<compile_context>
chip_gen: v5e
topology: v5e:2x2
jax: 0.10.0
libtpu: 0.0.40
codegen_flags: <defaults>
</compile_context>

<pallas_src>
import functools
import numpy as np
import jax
import jax.numpy as jnp
from jax.experimental import pallas as pl
from jax.experimental.pallas import tpu as pltpu

EPS = 1e-5          # nn.BatchNorm3d default eps
NEG_SLOPE = 0.1     # nn.LeakyReLU(0.1)


# ------------------------------ Pallas kernels -------------------------------

def _mm_bias_kernel(a_ref, w_ref, b_ref, o_ref, *, relu):
    # bf16 (TM,K)@(K,N) on the MXU with f32 accumulation; BN scale is already
    # folded into w, so the epilogue is just bias (+ optional LeakyReLU).
    acc = jnp.dot(a_ref[...], w_ref[...], preferred_element_type=jnp.float32)
    y = acc + b_ref[...]
    if relu:
        y = jnp.maximum(y, NEG_SLOPE * y)
    o_ref[...] = y.astype(o_ref.dtype)


def _mm_bias_res_kernel(a_ref, w_ref, b_ref, r_ref, o_ref):
    # conv3 + bn3 + residual add + LeakyReLU (bottleneck tail), fused.
    acc = jnp.dot(a_ref[...], w_ref[...], preferred_element_type=jnp.float32)
    y = acc + b_ref[...] + r_ref[...].astype(jnp.float32)
    y = jnp.maximum(y, NEG_SLOPE * y)
    o_ref[...] = y.astype(o_ref.dtype)


def _max_taps_kernel(x_ref, o_ref):
    # x_ref: (ntaps, M, C) valid pooling windows (bf16); elementwise VPU max.
    r = x_ref[0]
    for t in range(1, x_ref.shape[0]):
        r = jnp.maximum(r, x_ref[t])
    o_ref[...] = r


# ------------------------------ kernel wrappers -------------------------------

def _round_up(x, m):
    return ((x + m - 1) // m) * m


def _bn_fold(p):
    scale = p["gamma"] / jnp.sqrt(p["var"] + EPS)
    bias = p["beta"] - p["mean"] * scale
    return scale, bias


def _folded_conv_weight(p):
    """PyTorch (Cout,Cin,kd,kh,kw) conv weight with BN scale folded in,
    reshaped to (kvol*Cin, Cout) bf16 in tap-major (i,j,l) order."""
    scale, bias = _bn_fold(p)
    w = p["w"] * scale[:, None, None, None, None]
    cout = w.shape[0]
    wmat = jnp.transpose(w, (2, 3, 4, 1, 0)).reshape(-1, cout)
    return wmat.astype(jnp.bfloat16), bias


def matmul_bias_act(a, w, bias, residual=None, relu=True):
    """leaky_relu( a @ w + bias [+ residual] ); bf16 MXU, f32 epilogue, bf16 out."""
    M, K = a.shape
    N = w.shape[1]
    a = a.astype(jnp.bfloat16)
    w = w.astype(jnp.bfloat16)
    b2 = bias.astype(jnp.float32).reshape(1, N)

    # Row tile selection:
    #  * big matmuls (stem, layer1 3x3 conv): 2+ "parallel" row tiles so v7x's
    #    second TensorCore gets work;
    #  * tiny matmuls (layer2: M=16): single block -- an extra grid step
    #    (~0.35us) would cost more than it saves on v5e/v6e.
    flops = 2 * M * K * N
    if M > 256:
        tm = 256
    elif M >= 64 and M % 16 == 0 and flops >= (16 << 20):
        tm = M // 2
    else:
        tm = M
    Mp = _round_up(M, tm)
    if Mp != M:
        a = jnp.pad(a, ((0, Mp - M), (0, 0)))
        if residual is not None:
            residual = jnp.pad(residual, ((0, Mp - M), (0, 0)))

    grid = (Mp // tm,)
    a_spec = pl.BlockSpec((tm, K), lambda i: (i, 0))
    w_spec = pl.BlockSpec((K, N), lambda i: (0, 0))
    b_spec = pl.BlockSpec((1, N), lambda i: (0, 0))
    o_spec = pl.BlockSpec((tm, N), lambda i: (i, 0))
    cparams = pltpu.CompilerParams(dimension_semantics=("parallel",))
    out_shape = jax.ShapeDtypeStruct((Mp, N), jnp.bfloat16)

    if residual is None:
        out = pl.pallas_call(
            functools.partial(_mm_bias_kernel, relu=relu),
            out_shape=out_shape, grid=grid,
            in_specs=[a_spec, w_spec, b_spec],
            out_specs=o_spec, compiler_params=cparams,
        )(a, w, b2)
    else:
        out = pl.pallas_call(
            _mm_bias_res_kernel,
            out_shape=out_shape, grid=grid,
            in_specs=[a_spec, w_spec, b_spec, o_spec],
            out_specs=o_spec, compiler_params=cparams,
        )(a, w, b2, residual.astype(jnp.bfloat16))
    return out[:M] if Mp != M else out


def conv1x1_bn(x, p, stride=1, relu=True, residual=None):
    """1x1x1 Conv3d(bias=False) + folded BN (+ LeakyReLU / residual). No im2col."""
    if stride != 1:
        x = x[:, ::stride, ::stride, ::stride, :]
    Nb, D, H, W, C = x.shape
    wmat, bias = _folded_conv_weight(p)          # (Cin, Cout), BN scale folded
    cout = wmat.shape[1]
    r2 = None if residual is None else residual.reshape(-1, cout)
    out = matmul_bias_act(x.reshape(-1, C), wmat, bias, residual=r2, relu=relu)
    return out.reshape(Nb, D, H, W, cout)


def _im2col_3d(x, ksize, stride, padding):
    """Valid, stride-folded im2col: (M, kvol*Cin) bf16 columns (tap-major)."""
    kd, kh, kw = ksize
    sd, sh, sw = stride
    pd, ph, pw = padding
    xp = jnp.pad(x, ((0, 0), (pd, pd), (ph, ph), (pw, pw), (0, 0)))
    Nb, Dp, Hp, Wp, C = xp.shape
    Do = (Dp - kd) // sd + 1
    Ho = (Hp - kh) // sh + 1
    Wo = (Wp - kw) // sw + 1
    cols = []
    for i in range(kd):
        for j in range(kh):
            for l in range(kw):
                cols.append(
                    xp[:, i:i + (Do - 1) * sd + 1:sd,
                          j:j + (Ho - 1) * sh + 1:sh,
                          l:l + (Wo - 1) * sw + 1:sw, :])
    cols = jnp.stack(cols, axis=-2)              # (N, Do, Ho, Wo, kvol, C)
    return cols.reshape(Nb * Do * Ho * Wo, kd * kh * kw * C), (Nb, Do, Ho, Wo)


def conv_bn_im2col(x, p, ksize, stride, padding, relu=True, residual=None):
    """Conv3d(bias=False) + folded BN (+ LeakyReLU / residual) as ONE fused
    bf16 matmul over the valid output rows (K = kvol*Cin for max MXU depth)."""
    cols, (Nb, Do, Ho, Wo) = _im2col_3d(x.astype(jnp.bfloat16), ksize, stride,
                                        padding)
    wmat, bias = _folded_conv_weight(p)
    cout = wmat.shape[1]
    r2 = None if residual is None else residual.reshape(-1, cout)
    out = matmul_bias_act(cols, wmat, bias, residual=r2, relu=relu)
    return out.reshape(Nb, Do, Ho, Wo, cout)


def maxpool3d(x, ksize, stride, pad):
    """MaxPool3d(kernel=ksize, stride=stride, padding=pad) on NDHWC (bf16).

    Only the valid pooling windows are computed: the wrapper extracts the
    ksize^3 stride-folded windows (implicit -inf padding, as in PyTorch) and a
    single Pallas kernel reduces them with elementwise max."""
    Nb, D, H, W, C = x.shape
    sd, sh, sw = stride
    xp = jnp.pad(x, ((0, 0), (pad, pad), (pad, pad), (pad, pad), (0, 0)),
                 constant_values=float("-inf"))
    Dp, Hp, Wp = D + 2 * pad, H + 2 * pad, W + 2 * pad
    Do = (Dp - ksize) // sd + 1
    Ho = (Hp - ksize) // sh + 1
    Wo = (Wp - ksize) // sw + 1
    ntap = ksize ** 3
    taps = []
    for i in range(ksize):
        for j in range(ksize):
            for l in range(ksize):
                taps.append(xp[:, i:i + (Do - 1) * sd + 1:sd,
                                  j:j + (Ho - 1) * sh + 1:sh,
                                  l:l + (Wo - 1) * sw + 1:sw, :])
    M = Nb * Do * Ho * Wo
    taps = jnp.stack(taps, axis=0).reshape(ntap, M, C)

    out = pl.pallas_call(
        _max_taps_kernel,
        out_shape=jax.ShapeDtypeStruct((M, C), x.dtype),
        grid=(1,),
        in_specs=[pl.BlockSpec((ntap, M, C), lambda i: (0, 0, 0))],
        out_specs=pl.BlockSpec((M, C), lambda i: (0, 0)),
        compiler_params=pltpu.CompilerParams(dimension_semantics=("arbitrary",)),
    )(taps)
    return out.reshape(Nb, Do, Ho, Wo, C)


# ------------------------------- model structure ------------------------------

def bottleneck(x, bp, stride):
    if "down" in bp:
        identity = conv1x1_bn(x, bp["down"], stride=stride, relu=False)
    else:
        identity = x
    y = conv1x1_bn(x, bp["c1"], relu=True)
    # NOTE: the reference Bottleneck.forward applies NO activation after bn2.
    y = conv_bn_im2col(y, bp["c2"], (3, 3, 3), (stride,) * 3, (1, 1, 1),
                       relu=False)
    # conv3 + bn3 + residual add + LeakyReLU fused in one Pallas kernel.
    y = conv1x1_bn(y, bp["c3"], relu=True, residual=identity)
    return y


def resnet_forward(x_ncdhw, params):
    x = jnp.transpose(x_ncdhw, (0, 2, 3, 4, 1)).astype(jnp.bfloat16)  # ->NDHWC
    y = conv_bn_im2col(x, params["stem"], (3, 7, 7), (1, 2, 2), (1, 3, 3),
                       relu=True)
    y = maxpool3d(y, 3, (1, 2, 2), 1)
    for bp in params["layer1"]:
        y = bottleneck(y, bp, stride=1)
    for i, bp in enumerate(params["layer2"]):
        y = bottleneck(y, bp, stride=2 if i == 0 else 1)
    y = jnp.transpose(y, (0, 4, 1, 2, 3))                             # ->NCDHW
    return y.astype(jnp.float32)


# -------------------------------- parameter init ------------------------------

def _conv_bn_params(key, cin, cout, ksize):
    k1, k2, k3, k4, k5 = jax.random.split(key, 5)
    fan_in = cin * int(np.prod(ksize))
    return dict(
        w=jax.random.normal(k1, (cout, cin) + tuple(ksize), jnp.float32)
          / np.sqrt(fan_in),
        gamma=1.0 + 0.1 * jax.random.normal(k2, (cout,), jnp.float32),
        beta=0.1 * jax.random.normal(k3, (cout,), jnp.float32),
        mean=0.1 * jax.random.normal(k4, (cout,), jnp.float32),
        var=0.5 + jax.random.uniform(k5, (cout,), jnp.float32),
    )


def _make_layer_params(key, cin, cmid, num_blocks, stride):
    expansion = 4
    cexp = cmid * expansion
    blocks = []
    for i, k in enumerate(jax.random.split(key, num_blocks)):
        ks = jax.random.split(k, 4)
        in_ch = cin if i == 0 else cexp
        bp = {
            "c1": _conv_bn_params(ks[0], in_ch, cmid, (1, 1, 1)),
            "c2": _conv_bn_params(ks[1], cmid, cmid, (3, 3, 3)),
            "c3": _conv_bn_params(ks[2], cmid, cexp, (1, 1, 1)),
        }
        if i == 0 and (stride != 1 or cin != cexp):
            bp["down"] = _conv_bn_params(ks[3], cin, cexp, (1, 1, 1))
        blocks.append(bp)
    return blocks


def init_resnet_params(key):
    ks = jax.random.split(key, 3)
    return {
        "stem": _conv_bn_params(ks[0], 3, 64, (3, 7, 7)),
        "layer1": _make_layer_params(ks[1], 64, 64, num_blocks=3, stride=1),
        "layer2": _make_layer_params(ks[2], 256, 128, num_blocks=4, stride=2),
    }


# ------------------------------------ main ------------------------------------

if __name__ == "__main__":
    key = jax.random.PRNGKey(0)
    pkey, xkey = jax.random.split(key)
    params = init_resnet_params(pkey)
    x = jax.random.normal(xkey, (2, 3, 4, 16, 16), jnp.float32)  # NCDHW

    fwd = jax.jit(resnet_forward)
    out = fwd(x, params)
    jax.block_until_ready(out)
    assert out.shape == (2, 512, 2, 2, 2), out.shape
    assert bool(jnp.all(jnp.isfinite(out)))
    print("KERNEL_OK")
</pallas_src>

<mosaic_0001>
module attributes {stable_mosaic.version = 11 : i64} {
  func.func @_mm_bias_kernel(%arg0: i32, %arg1: memref<256x441xbf16, #tpu.memory_space<vmem>>, %arg2: memref<441x64xbf16, #tpu.memory_space<vmem>>, %arg3: memref<1x64xf32, #tpu.memory_space<vmem>>, %arg4: memref<256x64xbf16, #tpu.memory_space<vmem>>) attributes {dimension_semantics = [#tpu.dimension_semantics<parallel>], iteration_bounds = array<i64: 2>, scalar_prefetch = 0 : i64, scratch_operands = 0 : i64, tpu.core_type = #tpu.core_type<tc>, window_params = [{transform_indices = @transform_0, window_bounds = array<i64: 256, 441>}, {pipeline_mode = #tpu.pipeline_mode<synchronous>, transform_indices = @transform_1, window_bounds = array<i64: 441, 64>}, {pipeline_mode = #tpu.pipeline_mode<synchronous>, transform_indices = @transform_2, window_bounds = array<i64: 1, 64>}, {transform_indices = @transform_3, window_bounds = array<i64: 256, 64>}]} {
    %c0 = arith.constant 0 : index
    %c0_0 = arith.constant 0 : index
    %0 = vector.load %arg1[%c0, %c0_0] : memref<256x441xbf16, #tpu.memory_space<vmem>>, vector<256x441xbf16>
    %c0_1 = arith.constant 0 : index
    %c0_2 = arith.constant 0 : index
    %1 = vector.load %arg2[%c0_1, %c0_2] : memref<441x64xbf16, #tpu.memory_space<vmem>>, vector<441x64xbf16>
    %cst = arith.constant dense<0.000000e+00> : vector<256x64xf32>
    %2 = tpu.matmul %0, %1, %cst {dimension_numbers = #tpu.dot_dimension_numbers<[1], [0], [0], [1], [0, 0, 1, 1], [], []>} : vector<256x441xbf16>, vector<441x64xbf16>, vector<256x64xf32> -> vector<256x64xf32>
    %c0_3 = arith.constant 0 : index
    %c0_4 = arith.constant 0 : index
    %3 = vector.load %arg3[%c0_3, %c0_4] : memref<1x64xf32, #tpu.memory_space<vmem>>, vector<1x64xf32>
    %4 = vector.broadcast %3 : vector<1x64xf32> to vector<256x64xf32>
    %5 = arith.addf %2, %4 : vector<256x64xf32>
    %cst_5 = arith.constant 1.000000e-01 : f32
    %6 = vector.broadcast %cst_5 : f32 to vector<256x64xf32>
    %7 = arith.mulf %6, %5 : vector<256x64xf32>
    %8 = arith.maximumf %5, %7 : vector<256x64xf32>
    %9 = arith.truncf %8 : vector<256x64xf32> to vector<256x64xbf16>
    %c0_6 = arith.constant 0 : index
    %c0_7 = arith.constant 0 : index
    %10 = vector.load %arg4[%c0_6, %c0_7] : memref<256x64xbf16, #tpu.memory_space<vmem>>, vector<256x64xbf16>
    tpu.vector_store %arg4[%c0_6, %c0_7], %9 {strides = array<i32>} : memref<256x64xbf16, #tpu.memory_space<vmem>>, vector<256x64xbf16>,
    return
  }
  func.func @transform_0(%arg0: i32) -> (i32, i32) {
    %c0_i32 = arith.constant 0 : i32
    %c0_i32_0 = arith.constant 0 : i32
    return %arg0, %c0_i32 : i32, i32
  }
  func.func @transform_1(%arg0: i32) -> (i32, i32) {
    %c0_i32 = arith.constant 0 : i32
    %c0_i32_0 = arith.constant 0 : i32
    %c0_i32_1 = arith.constant 0 : i32
    return %c0_i32, %c0_i32_0 : i32, i32
  }
  func.func @transform_2(%arg0: i32) -> (i32, i32) {
    %c0_i32 = arith.constant 0 : i32
    %c0_i32_0 = arith.constant 0 : i32
    %c0_i32_1 = arith.constant 0 : i32
    return %c0_i32, %c0_i32_0 : i32, i32
  }
  func.func @transform_3(%arg0: i32) -> (i32, i32) {
    %c0_i32 = arith.constant 0 : i32
    %c0_i32_0 = arith.constant 0 : i32
    return %arg0, %c0_i32 : i32, i32
  }
}

module attributes {stable_mosaic.version = 11 : i64} {
  func.func @_max_taps_kernel(%arg0: i32, %arg1: memref<27x128x64xbf16, #tpu.memory_space<vmem>>, %arg2: memref<128x64xbf16, #tpu.memory_space<vmem>>) attributes {dimension_semantics = [#tpu.dimension_semantics<arbitrary>], iteration_bounds = array<i64: 1>, scalar_prefetch = 0 : i64, scratch_operands = 0 : i64, tpu.core_type = #tpu.core_type<tc>, window_params = [{pipeline_mode = #tpu.pipeline_mode<synchronous>, transform_indices = @transform_0, window_bounds = array<i64: 27, 128, 64>}, {pipeline_mode = #tpu.pipeline_mode<synchronous>, transform_indices = @transform_1, window_bounds = array<i64: 128, 64>}]} {
    %c0 = arith.constant 0 : index
    %c0_0 = arith.constant 0 : index
    %c0_1 = arith.constant 0 : index
    %0 = vector.load %arg1[%c0, %c0_0, %c0_1] : memref<27x128x64xbf16, #tpu.memory_space<vmem>>, vector<1x128x64xbf16>
    %1 = vector.shape_cast %0 : vector<1x128x64xbf16> to vector<128x64xbf16>
    %c1 = arith.constant 1 : index
    %c0_2 = arith.constant 0 : index
    %c0_3 = arith.constant 0 : index
    %2 = vector.load %arg1[%c1, %c0_2, %c0_3] : memref<27x128x64xbf16, #tpu.memory_space<vmem>>, vector<1x128x64xbf16>
    %3 = vector.shape_cast %2 : vector<1x128x64xbf16> to vector<128x64xbf16>
    %4 = arith.maximumf %1, %3 : vector<128x64xbf16>
    %c2 = arith.constant 2 : index
    %c0_4 = arith.constant 0 : index
    %c0_5 = arith.constant 0 : index
    %5 = vector.load %arg1[%c2, %c0_4, %c0_5] : memref<27x128x64xbf16, #tpu.memory_space<vmem>>, vector<1x128x64xbf16>
    %6 = vector.shape_cast %5 : vector<1x128x64xbf16> to vector<128x64xbf16>
    %7 = arith.maximumf %4, %6 : vector<128x64xbf16>
    %c3 = arith.constant 3 : index
    %c0_6 = arith.constant 0 : index
    %c0_7 = arith.constant 0 : index
    %8 = vector.load %arg1[%c3, %c0_6, %c0_7] : memref<27x128x64xbf16, #tpu.memory_space<vmem>>, vector<1x128x64xbf16>
    %9 = vector.shape_cast %8 : vector<1x128x64xbf16> to vector<128x64xbf16>
    %10 = arith.maximumf %7, %9 : vector<128x64xbf16>
    %c4 = arith.constant 4 : index
    %c0_8 = arith.constant 0 : index
    %c0_9 = arith.constant 0 : index
    %11 = vector.load %arg1[%c4, %c0_8, %c0_9] : memref<27x128x64xbf16, #tpu.memory_space<vmem>>, vector<1x128x64xbf16>
    %12 = vector.shape_cast %11 : vector<1x128x64xbf16> to vector<128x64xbf16>
    %13 = arith.maximumf %10, %12 : vector<128x64xbf16>
    %c5 = arith.constant 5 : index
    %c0_10 = arith.constant 0 : index
    %c0_11 = arith.constant 0 : index
    %14 = vector.load %arg1[%c5, %c0_10, %c0_11] : memref<27x128x64xbf16, #tpu.memory_space<vmem>>, vector<1x128x64xbf16>
    %15 = vector.shape_cast %14 : vector<1x128x64xbf16> to vector<128x64xbf16>
    %16 = arith.maximumf %13, %15 : vector<128x64xbf16>
    %c6 = arith.constant 6 : index
    %c0_12 = arith.constant 0 : index
    %c0_13 = arith.constant 0 : index
    %17 = vector.load %arg1[%c6, %c0_12, %c0_13] : memref<27x128x64xbf16, #tpu.memory_space<vmem>>, vector<1x128x64xbf16>
    %18 = vector.shape_cast %17 : vector<1x128x64xbf16> to vector<128x64xbf16>
    %19 = arith.maximumf %16, %18 : vector<128x64xbf16>
    %c7 = arith.constant 7 : index
    %c0_14 = arith.constant 0 : index
    %c0_15 = arith.constant 0 : index
    %20 = vector.load %arg1[%c7, %c0_14, %c0_15] : memref<27x128x64xbf16, #tpu.memory_space<vmem>>, vector<1x128x64xbf16>
    %21 = vector.shape_cast %20 : vector<1x128x64xbf16> to vector<128x64xbf16>
    %22 = arith.maximumf %19, %21 : vector<128x64xbf16>
    %c8 = arith.constant 8 : index
    %c0_16 = arith.constant 0 : index
    %c0_17 = arith.constant 0 : index
    %23 = vector.load %arg1[%c8, %c0_16, %c0_17] : memref<27x128x64xbf16, #tpu.memory_space<vmem>>, vector<1x128x64xbf16>
    %24 = vector.shape_cast %23 : vector<1x128x64xbf16> to vector<128x64xbf16>
    %25 = arith.maximumf %22, %24 : vector<128x64xbf16>
    %c9 = arith.constant 9 : index
    %c0_18 = arith.constant 0 : index
    %c0_19 = arith.constant 0 : index
    %26 = vector.load %arg1[%c9, %c0_18, %c0_19] : memref<27x128x64xbf16, #tpu.memory_space<vmem>>, vector<1x128x64xbf16>
    %27 = vector.shape_cast %26 : vector<1x128x64xbf16> to vector<128x64xbf16>
    %28 = arith.maximumf %25, %27 : vector<128x64xbf16>
    %c10 = arith.constant 10 : index
    %c0_20 = arith.constant 0 : index
    %c0_21 = arith.constant 0 : index
    %29 = vector.load %arg1[%c10, %c0_20, %c0_21] : memref<27x128x64xbf16, #tpu.memory_space<vmem>>, vector<1x128x64xbf16>
    %30 = vector.shape_cast %29 : vector<1x128x64xbf16> to vector<128x64xbf16>
    %31 = arith.maximumf %28, %30 : vector<128x64xbf16>
    %c11 = arith.constant 11 : index
    %c0_22 = arith.constant 0 : index
    %c0_23 = arith.constant 0 : index
    %32 = vector.load %arg1[%c11, %c0_22, %c0_23] : memref<27x128x64xbf16, #tpu.memory_space<vmem>>, vector<1x128x64xbf16>
    %33 = vector.shape_cast %32 : vector<1x128x64xbf16> to vector<128x64xbf16>
    %34 = arith.maximumf %31, %33 : vector<128x64xbf16>
    %c12 = arith.constant 12 : index
    %c0_24 = arith.constant 0 : index
    %c0_25 = arith.constant 0 : index
    %35 = vector.load %arg1[%c12, %c0_24, %c0_25] : memref<27x128x64xbf16, #tpu.memory_space<vmem>>, vector<1x128x64xbf16>
    %36 = vector.shape_cast %35 : vector<1x128x64xbf16> to vector<128x64xbf16>
    %37 = arith.maximumf %34, %36 : vector<128x64xbf16>
    %c13 = arith.constant 13 : index
    %c0_26 = arith.constant 0 : index
    %c0_27 = arith.constant 0 : index
    %38 = vector.load %arg1[%c13, %c0_26, %c0_27] : memref<27x128x64xbf16, #tpu.memory_space<vmem>>, vector<1x128x64xbf16>
    %39 = vector.shape_cast %38 : vector<1x128x64xbf16> to vector<128x64xbf16>
    %40 = arith.maximumf %37, %39 : vector<128x64xbf16>
    %c14 = arith.constant 14 : index
    %c0_28 = arith.constant 0 : index
    %c0_29 = arith.constant 0 : index
    %41 = vector.load %arg1[%c14, %c0_28, %c0_29] : memref<27x128x64xbf16, #tpu.memory_space<vmem>>, vector<1x128x64xbf16>
    %42 = vector.shape_cast %41 : vector<1x128x64xbf16> to vector<128x64xbf16>
    %43 = arith.maximumf %40, %42 : vector<128x64xbf16>
    %c15 = arith.constant 15 : index
    %c0_30 = arith.constant 0 : index
    %c0_31 = arith.constant 0 : index
    %44 = vector.load %arg1[%c15, %c0_30, %c0_31] : memref<27x128x64xbf16, #tpu.memory_space<vmem>>, vector<1x128x64xbf16>
    %45 = vector.shape_cast %44 : vector<1x128x64xbf16> to vector<128x64xbf16>
    %46 = arith.maximumf %43, %45 : vector<128x64xbf16>
    %c16 = arith.constant 16 : index
    %c0_32 = arith.constant 0 : index
    %c0_33 = arith.constant 0 : index
    %47 = vector.load %arg1[%c16, %c0_32, %c0_33] : memref<27x128x64xbf16, #tpu.memory_space<vmem>>, vector<1x128x64xbf16>
    %48 = vector.shape_cast %47 : vector<1x128x64xbf16> to vector<128x64xbf16>
    %49 = arith.maximumf %46, %48 : vector<128x64xbf16>
    %c17 = arith.constant 17 : index
    %c0_34 = arith.constant 0 : index
    %c0_35 = arith.constant 0 : index
    %50 = vector.load %arg1[%c17, %c0_34, %c0_35] : memref<27x128x64xbf16, #tpu.memory_space<vmem>>, vector<1x128x64xbf16>
    %51 = vector.shape_cast %50 : vector<1x128x64xbf16> to vector<128x64xbf16>
    %52 = arith.maximumf %49, %51 : vector<128x64xbf16>
    %c18 = arith.constant 18 : index
    %c0_36 = arith.constant 0 : index
    %c0_37 = arith.constant 0 : index
    %53 = vector.load %arg1[%c18, %c0_36, %c0_37] : memref<27x128x64xbf16, #tpu.memory_space<vmem>>, vector<1x128x64xbf16>
    %54 = vector.shape_cast %53 : vector<1x128x64xbf16> to vector<128x64xbf16>
    %55 = arith.maximumf %52, %54 : vector<128x64xbf16>
    %c19 = arith.constant 19 : index
    %c0_38 = arith.constant 0 : index
    %c0_39 = arith.constant 0 : index
    %56 = vector.load %arg1[%c19, %c0_38, %c0_39] : memref<27x128x64xbf16, #tpu.memory_space<vmem>>, vector<1x128x64xbf16>
    %57 = vector.shape_cast %56 : vector<1x128x64xbf16> to vector<128x64xbf16>
    %58 = arith.maximumf %55, %57 : vector<128x64xbf16>
    %c20 = arith.constant 20 : index
    %c0_40 = arith.constant 0 : index
    %c0_41 = arith.constant 0 : index
    %59 = vector.load %arg1[%c20, %c0_40, %c0_41] : memref<27x128x64xbf16, #tpu.memory_space<vmem>>, vector<1x128x64xbf16>
    %60 = vector.shape_cast %59 : vector<1x128x64xbf16> to vector<128x64xbf16>
    %61 = arith.maximumf %58, %60 : vector<128x64xbf16>
    %c21 = arith.constant 21 : index
    %c0_42 = arith.constant 0 : index
    %c0_43 = arith.constant 0 : index
    %62 = vector.load %arg1[%c21, %c0_42, %c0_43] : memref<27x128x64xbf16, #tpu.memory_space<vmem>>, vector<1x128x64xbf16>
    %63 = vector.shape_cast %62 : vector<1x128x64xbf16> to vector<128x64xbf16>
    %64 = arith.maximumf %61, %63 : vector<128x64xbf16>
    %c22 = arith.constant 22 : index
    %c0_44 = arith.constant 0 : index
    %c0_45 = arith.constant 0 : index
    %65 = vector.load %arg1[%c22, %c0_44, %c0_45] : memref<27x128x64xbf16, #tpu.memory_space<vmem>>, vector<1x128x64xbf16>
    %66 = vector.shape_cast %65 : vector<1x128x64xbf16> to vector<128x64xbf16>
    %67 = arith.maximumf %64, %66 : vector<128x64xbf16>
    %c23 = arith.constant 23 : index
    %c0_46 = arith.constant 0 : index
    %c0_47 = arith.constant 0 : index
    %68 = vector.load %arg1[%c23, %c0_46, %c0_47] : memref<27x128x64xbf16, #tpu.memory_space<vmem>>, vector<1x128x64xbf16>
    %69 = vector.shape_cast %68 : vector<1x128x64xbf16> to vector<128x64xbf16>
    %70 = arith.maximumf %67, %69 : vector<128x64xbf16>
    %c24 = arith.constant 24 : index
    %c0_48 = arith.constant 0 : index
    %c0_49 = arith.constant 0 : index
    %71 = vector.load %arg1[%c24, %c0_48, %c0_49] : memref<27x128x64xbf16, #tpu.memory_space<vmem>>, vector<1x128x64xbf16>
    %72 = vector.shape_cast %71 : vector<1x128x64xbf16> to vector<128x64xbf16>
    %73 = arith.maximumf %70, %72 : vector<128x64xbf16>
    %c25 = arith.constant 25 : index
    %c0_50 = arith.constant 0 : index
    %c0_51 = arith.constant 0 : index
    %74 = vector.load %arg1[%c25, %c0_50, %c0_51] : memref<27x128x64xbf16, #tpu.memory_space<vmem>>, vector<1x128x64xbf16>
    %75 = vector.shape_cast %74 : vector<1x128x64xbf16> to vector<128x64xbf16>
    %76 = arith.maximumf %73, %75 : vector<128x64xbf16>
    %c26 = arith.constant 26 : index
    %c0_52 = arith.constant 0 : index
    %c0_53 = arith.constant 0 : index
    %77 = vector.load %arg1[%c26, %c0_52, %c0_53] : memref<27x128x64xbf16, #tpu.memory_space<vmem>>, vector<1x128x64xbf16>
    %78 = vector.shape_cast %77 : vector<1x128x64xbf16> to vector<128x64xbf16>
    %79 = arith.maximumf %76, %78 : vector<128x64xbf16>
    %c0_54 = arith.constant 0 : index
    %c0_55 = arith.constant 0 : index
    %80 = vector.load %arg2[%c0_54, %c0_55] : memref<128x64xbf16, #tpu.memory_space<vmem>>, vector<128x64xbf16>
    tpu.vector_store %arg2[%c0_54, %c0_55], %79 {strides = array<i32>} : memref<128x64xbf16, #tpu.memory_space<vmem>>, vector<128x64xbf16>,
    return
  }
  func.func @transform_0(%arg0: i32) -> (i32, i32, i32) {
    %c0_i32 = arith.constant 0 : i32
    %c0_i32_0 = arith.constant 0 : i32
    %c0_i32_1 = arith.constant 0 : i32
    %c0_i32_2 = arith.constant 0 : i32
    return %c0_i32, %c0_i32_0, %c0_i32_1 : i32, i32, i32
  }
  func.func @transform_1(%arg0: i32) -> (i32, i32) {
    %c0_i32 = arith.constant 0 : i32
    %c0_i32_0 = arith.constant 0 : i32
    %c0_i32_1 = arith.constant 0 : i32
    return %c0_i32, %c0_i32_0 : i32, i32
  }
}

module attributes {stable_mosaic.version = 11 : i64} {
  func.func @_mm_bias_kernel(%arg0: i32, %arg1: memref<128x64xbf16, #tpu.memory_space<vmem>>, %arg2: memref<64x64xbf16, #tpu.memory_space<vmem>>, %arg3: memref<1x64xf32, #tpu.memory_space<vmem>>, %arg4: memref<128x64xbf16, #tpu.memory_space<vmem>>) attributes {dimension_semantics = [#tpu.dimension_semantics<parallel>], iteration_bounds = array<i64: 1>, scalar_prefetch = 0 : i64, scratch_operands = 0 : i64, tpu.core_type = #tpu.core_type<tc>, window_params = [{transform_indices = @transform_0, window_bounds = array<i64: 128, 64>}, {pipeline_mode = #tpu.pipeline_mode<synchronous>, transform_indices = @transform_1, window_bounds = array<i64: 64, 64>}, {pipeline_mode = #tpu.pipeline_mode<synchronous>, transform_indices = @transform_2, window_bounds = array<i64: 1, 64>}, {transform_indices = @transform_3, window_bounds = array<i64: 128, 64>}]} {
    %c0 = arith.constant 0 : index
    %c0_0 = arith.constant 0 : index
    %0 = vector.load %arg1[%c0, %c0_0] : memref<128x64xbf16, #tpu.memory_space<vmem>>, vector<128x64xbf16>
    %c0_1 = arith.constant 0 : index
    %c0_2 = arith.constant 0 : index
    %1 = vector.load %arg2[%c0_1, %c0_2] : memref<64x64xbf16, #tpu.memory_space<vmem>>, vector<64x64xbf16>
    %cst = arith.constant dense<0.000000e+00> : vector<128x64xf32>
    %2 = tpu.matmul %0, %1, %cst {dimension_numbers = #tpu.dot_dimension_numbers<[1], [0], [0], [1], [0, 0, 1, 1], [], []>} : vector<128x64xbf16>, vector<64x64xbf16>, vector<128x64xf32> -> vector<128x64xf32>
    %c0_3 = arith.constant 0 : index
    %c0_4 = arith.constant 0 : index
    %3 = vector.load %arg3[%c0_3, %c0_4] : memref<1x64xf32, #tpu.memory_space<vmem>>, vector<1x64xf32>
    %4 = vector.broadcast %3 : vector<1x64xf32> to vector<128x64xf32>
    %5 = arith.addf %2, %4 : vector<128x64xf32>
    %cst_5 = arith.constant 1.000000e-01 : f32
    %6 = vector.broadcast %cst_5 : f32 to vector<128x64xf32>
    %7 = arith.mulf %6, %5 : vector<128x64xf32>
    %8 = arith.maximumf %5, %7 : vector<128x64xf32>
    %9 = arith.truncf %8 : vector<128x64xf32> to vector<128x64xbf16>
    %c0_6 = arith.constant 0 : index
    %c0_7 = arith.constant 0 : index
    %10 = vector.load %arg4[%c0_6, %c0_7] : memref<128x64xbf16, #tpu.memory_space<vmem>>, vector<128x64xbf16>
    tpu.vector_store %arg4[%c0_6, %c0_7], %9 {strides = array<i32>} : memref<128x64xbf16, #tpu.memory_space<vmem>>, vector<128x64xbf16>,
    return
  }
  func.func @transform_0(%arg0: i32) -> (i32, i32) {
    %c0_i32 = arith.constant 0 : i32
    %c0_i32_0 = arith.constant 0 : i32
    return %arg0, %c0_i32 : i32, i32
  }
  func.func @transform_1(%arg0: i32) -> (i32, i32) {
    %c0_i32 = arith.constant 0 : i32
    %c0_i32_0 = arith.constant 0 : i32
    %c0_i32_1 = arith.constant 0 : i32
    return %c0_i32, %c0_i32_0 : i32, i32
  }
  func.func @transform_2(%arg0: i32) -> (i32, i32) {
    %c0_i32 = arith.constant 0 : i32
    %c0_i32_0 = arith.constant 0 : i32
    %c0_i32_1 = arith.constant 0 : i32
    return %c0_i32, %c0_i32_0 : i32, i32
  }
  func.func @transform_3(%arg0: i32) -> (i32, i32) {
    %c0_i32 = arith.constant 0 : i32
    %c0_i32_0 = arith.constant 0 : i32
    return %arg0, %c0_i32 : i32, i32
  }
}

module attributes {stable_mosaic.version = 11 : i64} {
  func.func @_mm_bias_kernel(%arg0: i32, %arg1: memref<64x1728xbf16, #tpu.memory_space<vmem>>, %arg2: memref<1728x64xbf16, #tpu.memory_space<vmem>>, %arg3: memref<1x64xf32, #tpu.memory_space<vmem>>, %arg4: memref<64x64xbf16, #tpu.memory_space<vmem>>) attributes {dimension_semantics = [#tpu.dimension_semantics<parallel>], iteration_bounds = array<i64: 2>, scalar_prefetch = 0 : i64, scratch_operands = 0 : i64, tpu.core_type = #tpu.core_type<tc>, window_params = [{transform_indices = @transform_0, window_bounds = array<i64: 64, 1728>}, {pipeline_mode = #tpu.pipeline_mode<synchronous>, transform_indices = @transform_1, window_bounds = array<i64: 1728, 64>}, {pipeline_mode = #tpu.pipeline_mode<synchronous>, transform_indices = @transform_2, window_bounds = array<i64: 1, 64>}, {transform_indices = @transform_3, window_bounds = array<i64: 64, 64>}]} {
    %c0 = arith.constant 0 : index
    %c0_0 = arith.constant 0 : index
    %0 = vector.load %arg1[%c0, %c0_0] : memref<64x1728xbf16, #tpu.memory_space<vmem>>, vector<64x1728xbf16>
    %c0_1 = arith.constant 0 : index
    %c0_2 = arith.constant 0 : index
    %1 = vector.load %arg2[%c0_1, %c0_2] : memref<1728x64xbf16, #tpu.memory_space<vmem>>, vector<1728x64xbf16>
    %cst = arith.constant dense<0.000000e+00> : vector<64x64xf32>
    %2 = tpu.matmul %0, %1, %cst {dimension_numbers = #tpu.dot_dimension_numbers<[1], [0], [0], [1], [0, 0, 1, 1], [], []>} : vector<64x1728xbf16>, vector<1728x64xbf16>, vector<64x64xf32> -> vector<64x64xf32>
    %c0_3 = arith.constant 0 : index
    %c0_4 = arith.constant 0 : index
    %3 = vector.load %arg3[%c0_3, %c0_4] : memref<1x64xf32, #tpu.memory_space<vmem>>, vector<1x64xf32>
    %4 = vector.broadcast %3 : vector<1x64xf32> to vector<64x64xf32>
    %5 = arith.addf %2, %4 : vector<64x64xf32>
    %6 = arith.truncf %5 : vector<64x64xf32> to vector<64x64xbf16>
    %c0_5 = arith.constant 0 : index
    %c0_6 = arith.constant 0 : index
    %7 = vector.load %arg4[%c0_5, %c0_6] : memref<64x64xbf16, #tpu.memory_space<vmem>>, vector<64x64xbf16>
    tpu.vector_store %arg4[%c0_5, %c0_6], %6 {strides = array<i32>} : memref<64x64xbf16, #tpu.memory_space<vmem>>, vector<64x64xbf16>,
    return
  }
  func.func @transform_0(%arg0: i32) -> (i32, i32) {
    %c0_i32 = arith.constant 0 : i32
    %c0_i32_0 = arith.constant 0 : i32
    return %arg0, %c0_i32 : i32, i32
  }
  func.func @transform_1(%arg0: i32) -> (i32, i32) {
    %c0_i32 = arith.constant 0 : i32
    %c0_i32_0 = arith.constant 0 : i32
    %c0_i32_1 = arith.constant 0 : i32
    return %c0_i32, %c0_i32_0 : i32, i32
  }
  func.func @transform_2(%arg0: i32) -> (i32, i32) {
    %c0_i32 = arith.constant 0 : i32
    %c0_i32_0 = arith.constant 0 : i32
    %c0_i32_1 = arith.constant 0 : i32
    return %c0_i32, %c0_i32_0 : i32, i32
  }
  func.func @transform_3(%arg0: i32) -> (i32, i32) {
    %c0_i32 = arith.constant 0 : i32
    %c0_i32_0 = arith.constant 0 : i32
    return %arg0, %c0_i32 : i32, i32
  }
}

module attributes {stable_mosaic.version = 11 : i64} {
  func.func @_mm_bias_kernel(%arg0: i32, %arg1: memref<128x64xbf16, #tpu.memory_space<vmem>>, %arg2: memref<64x256xbf16, #tpu.memory_space<vmem>>, %arg3: memref<1x256xf32, #tpu.memory_space<vmem>>, %arg4: memref<128x256xbf16, #tpu.memory_space<vmem>>) attributes {dimension_semantics = [#tpu.dimension_semantics<parallel>], iteration_bounds = array<i64: 1>, scalar_prefetch = 0 : i64, scratch_operands = 0 : i64, tpu.core_type = #tpu.core_type<tc>, window_params = [{transform_indices = @transform_0, window_bounds = array<i64: 128, 64>}, {pipeline_mode = #tpu.pipeline_mode<synchronous>, transform_indices = @transform_1, window_bounds = array<i64: 64, 256>}, {pipeline_mode = #tpu.pipeline_mode<synchronous>, transform_indices = @transform_2, window_bounds = array<i64: 1, 256>}, {transform_indices = @transform_3, window_bounds = array<i64: 128, 256>}]} {
    %c0 = arith.constant 0 : index
    %c0_0 = arith.constant 0 : index
    %0 = vector.load %arg1[%c0, %c0_0] : memref<128x64xbf16, #tpu.memory_space<vmem>>, vector<128x64xbf16>
    %c0_1 = arith.constant 0 : index
    %c0_2 = arith.constant 0 : index
    %1 = vector.load %arg2[%c0_1, %c0_2] : memref<64x256xbf16, #tpu.memory_space<vmem>>, vector<64x256xbf16>
    %cst = arith.constant dense<0.000000e+00> : vector<128x256xf32>
    %2 = tpu.matmul %0, %1, %cst {dimension_numbers = #tpu.dot_dimension_numbers<[1], [0], [0], [1], [0, 0, 1, 1], [], []>} : vector<128x64xbf16>, vector<64x256xbf16>, vector<128x256xf32> -> vector<128x256xf32>
    %c0_3 = arith.constant 0 : index
    %c0_4 = arith.constant 0 : index
    %3 = vector.load %arg3[%c0_3, %c0_4] : memref<1x256xf32, #tpu.memory_space<vmem>>, vector<1x256xf32>
    %4 = vector.broadcast %3 : vector<1x256xf32> to vector<128x256xf32>
    %5 = arith.addf %2, %4 : vector<128x256xf32>
    %6 = arith.truncf %5 : vector<128x256xf32> to vector<128x256xbf16>
    %c0_5 = arith.constant 0 : index
    %c0_6 = arith.constant 0 : index
    %7 = vector.load %arg4[%c0_5, %c0_6] : memref<128x256xbf16, #tpu.memory_space<vmem>>, vector<128x256xbf16>
    tpu.vector_store %arg4[%c0_5, %c0_6], %6 {strides = array<i32>} : memref<128x256xbf16, #tpu.memory_space<vmem>>, vector<128x256xbf16>,
    return
  }
  func.func @transform_0(%arg0: i32) -> (i32, i32) {
    %c0_i32 = arith.constant 0 : i32
    %c0_i32_0 = arith.constant 0 : i32
    return %arg0, %c0_i32 : i32, i32
  }
  func.func @transform_1(%arg0: i32) -> (i32, i32) {
    %c0_i32 = arith.constant 0 : i32
    %c0_i32_0 = arith.constant 0 : i32
    %c0_i32_1 = arith.constant 0 : i32
    return %c0_i32, %c0_i32_0 : i32, i32
  }
  func.func @transform_2(%arg0: i32) -> (i32, i32) {
    %c0_i32 = arith.constant 0 : i32
    %c0_i32_0 = arith.constant 0 : i32
    %c0_i32_1 = arith.constant 0 : i32
    return %c0_i32, %c0_i32_0 : i32, i32
  }
  func.func @transform_3(%arg0: i32) -> (i32, i32) {
    %c0_i32 = arith.constant 0 : i32
    %c0_i32_0 = arith.constant 0 : i32
    return %arg0, %c0_i32 : i32, i32
  }
}

module attributes {stable_mosaic.version = 11 : i64} {
  func.func @_mm_bias_res_kernel(%arg0: i32, %arg1: memref<128x64xbf16, #tpu.memory_space<vmem>>, %arg2: memref<64x256xbf16, #tpu.memory_space<vmem>>, %arg3: memref<1x256xf32, #tpu.memory_space<vmem>>, %arg4: memref<128x256xbf16, #tpu.memory_space<vmem>>, %arg5: memref<128x256xbf16, #tpu.memory_space<vmem>>) attributes {dimension_semantics = [#tpu.dimension_semantics<parallel>], iteration_bounds = array<i64: 1>, scalar_prefetch = 0 : i64, scratch_operands = 0 : i64, tpu.core_type = #tpu.core_type<tc>, window_params = [{transform_indices = @transform_0, window_bounds = array<i64: 128, 64>}, {pipeline_mode = #tpu.pipeline_mode<synchronous>, transform_indices = @transform_1, window_bounds = array<i64: 64, 256>}, {pipeline_mode = #tpu.pipeline_mode<synchronous>, transform_indices = @transform_2, window_bounds = array<i64: 1, 256>}, {transform_indices = @transform_3, window_bounds = array<i64: 128, 256>}, {transform_indices = @transform_4, window_bounds = array<i64: 128, 256>}]} {
    %c0 = arith.constant 0 : index
    %c0_0 = arith.constant 0 : index
    %0 = vector.load %arg1[%c0, %c0_0] : memref<128x64xbf16, #tpu.memory_space<vmem>>, vector<128x64xbf16>
    %c0_1 = arith.constant 0 : index
    %c0_2 = arith.constant 0 : index
    %1 = vector.load %arg2[%c0_1, %c0_2] : memref<64x256xbf16, #tpu.memory_space<vmem>>, vector<64x256xbf16>
    %cst = arith.constant dense<0.000000e+00> : vector<128x256xf32>
    %2 = tpu.matmul %0, %1, %cst {dimension_numbers = #tpu.dot_dimension_numbers<[1], [0], [0], [1], [0, 0, 1, 1], [], []>} : vector<128x64xbf16>, vector<64x256xbf16>, vector<128x256xf32> -> vector<128x256xf32>
    %c0_3 = arith.constant 0 : index
    %c0_4 = arith.constant 0 : index
    %3 = vector.load %arg3[%c0_3, %c0_4] : memref<1x256xf32, #tpu.memory_space<vmem>>, vector<1x256xf32>
    %4 = vector.broadcast %3 : vector<1x256xf32> to vector<128x256xf32>
    %5 = arith.addf %2, %4 : vector<128x256xf32>
    %c0_5 = arith.constant 0 : index
    %c0_6 = arith.constant 0 : index
    %6 = vector.load %arg4[%c0_5, %c0_6] : memref<128x256xbf16, #tpu.memory_space<vmem>>, vector<128x256xbf16>
    %7 = arith.extf %6 : vector<128x256xbf16> to vector<128x256xf32>
    %8 = arith.addf %5, %7 : vector<128x256xf32>
    %cst_7 = arith.constant 1.000000e-01 : f32
    %9 = vector.broadcast %cst_7 : f32 to vector<128x256xf32>
    %10 = arith.mulf %9, %8 : vector<128x256xf32>
    %11 = arith.maximumf %8, %10 : vector<128x256xf32>
    %12 = arith.truncf %11 : vector<128x256xf32> to vector<128x256xbf16>
    %c0_8 = arith.constant 0 : index
    %c0_9 = arith.constant 0 : index
    %13 = vector.load %arg5[%c0_8, %c0_9] : memref<128x256xbf16, #tpu.memory_space<vmem>>, vector<128x256xbf16>
    tpu.vector_store %arg5[%c0_8, %c0_9], %12 {strides = array<i32>} : memref<128x256xbf16, #tpu.memory_space<vmem>>, vector<128x256xbf16>,
    return
  }
  func.func @transform_0(%arg0: i32) -> (i32, i32) {
    %c0_i32 = arith.constant 0 : i32
    %c0_i32_0 = arith.constant 0 : i32
    return %arg0, %c0_i32 : i32, i32
  }
  func.func @transform_1(%arg0: i32) -> (i32, i32) {
    %c0_i32 = arith.constant 0 : i32
    %c0_i32_0 = arith.constant 0 : i32
    %c0_i32_1 = arith.constant 0 : i32
    return %c0_i32, %c0_i32_0 : i32, i32
  }
  func.func @transform_2(%arg0: i32) -> (i32, i32) {
    %c0_i32 = arith.constant 0 : i32
    %c0_i32_0 = arith.constant 0 : i32
    %c0_i32_1 = arith.constant 0 : i32
    return %c0_i32, %c0_i32_0 : i32, i32
  }
  func.func @transform_3(%arg0: i32) -> (i32, i32) {
    %c0_i32 = arith.constant 0 : i32
    %c0_i32_0 = arith.constant 0 : i32
    return %arg0, %c0_i32 : i32, i32
  }
  func.func @transform_4(%arg0: i32) -> (i32, i32) {
    %c0_i32 = arith.constant 0 : i32
    %c0_i32_0 = arith.constant 0 : i32
    return %arg0, %c0_i32 : i32, i32
  }
}

module attributes {stable_mosaic.version = 11 : i64} {
  func.func @_mm_bias_kernel(%arg0: i32, %arg1: memref<128x256xbf16, #tpu.memory_space<vmem>>, %arg2: memref<256x64xbf16, #tpu.memory_space<vmem>>, %arg3: memref<1x64xf32, #tpu.memory_space<vmem>>, %arg4: memref<128x64xbf16, #tpu.memory_space<vmem>>) attributes {dimension_semantics = [#tpu.dimension_semantics<parallel>], iteration_bounds = array<i64: 1>, scalar_prefetch = 0 : i64, scratch_operands = 0 : i64, tpu.core_type = #tpu.core_type<tc>, window_params = [{transform_indices = @transform_0, window_bounds = array<i64: 128, 256>}, {pipeline_mode = #tpu.pipeline_mode<synchronous>, transform_indices = @transform_1, window_bounds = array<i64: 256, 64>}, {pipeline_mode = #tpu.pipeline_mode<synchronous>, transform_indices = @transform_2, window_bounds = array<i64: 1, 64>}, {transform_indices = @transform_3, window_bounds = array<i64: 128, 64>}]} {
    %c0 = arith.constant 0 : index
    %c0_0 = arith.constant 0 : index
    %0 = vector.load %arg1[%c0, %c0_0] : memref<128x256xbf16, #tpu.memory_space<vmem>>, vector<128x256xbf16>
    %c0_1 = arith.constant 0 : index
    %c0_2 = arith.constant 0 : index
    %1 = vector.load %arg2[%c0_1, %c0_2] : memref<256x64xbf16, #tpu.memory_space<vmem>>, vector<256x64xbf16>
    %cst = arith.constant dense<0.000000e+00> : vector<128x64xf32>
    %2 = tpu.matmul %0, %1, %cst {dimension_numbers = #tpu.dot_dimension_numbers<[1], [0], [0], [1], [0, 0, 1, 1], [], []>} : vector<128x256xbf16>, vector<256x64xbf16>, vector<128x64xf32> -> vector<128x64xf32>
    %c0_3 = arith.constant 0 : index
    %c0_4 = arith.constant 0 : index
    %3 = vector.load %arg3[%c0_3, %c0_4] : memref<1x64xf32, #tpu.memory_space<vmem>>, vector<1x64xf32>
    %4 = vector.broadcast %3 : vector<1x64xf32> to vector<128x64xf32>
    %5 = arith.addf %2, %4 : vector<128x64xf32>
    %cst_5 = arith.constant 1.000000e-01 : f32
    %6 = vector.broadcast %cst_5 : f32 to vector<128x64xf32>
    %7 = arith.mulf %6, %5 : vector<128x64xf32>
    %8 = arith.maximumf %5, %7 : vector<128x64xf32>
    %9 = arith.truncf %8 : vector<128x64xf32> to vector<128x64xbf16>
    %c0_6 = arith.constant 0 : index
    %c0_7 = arith.constant 0 : index
    %10 = vector.load %arg4[%c0_6, %c0_7] : memref<128x64xbf16, #tpu.memory_space<vmem>>, vector<128x64xbf16>
    tpu.vector_store %arg4[%c0_6, %c0_7], %9 {strides = array<i32>} : memref<128x64xbf16, #tpu.memory_space<vmem>>, vector<128x64xbf16>,
    return
  }
  func.func @transform_0(%arg0: i32) -> (i32, i32) {
    %c0_i32 = arith.constant 0 : i32
    %c0_i32_0 = arith.constant 0 : i32
    return %arg0, %c0_i32 : i32, i32
  }
  func.func @transform_1(%arg0: i32) -> (i32, i32) {
    %c0_i32 = arith.constant 0 : i32
    %c0_i32_0 = arith.constant 0 : i32
    %c0_i32_1 = arith.constant 0 : i32
    return %c0_i32, %c0_i32_0 : i32, i32
  }
  func.func @transform_2(%arg0: i32) -> (i32, i32) {
    %c0_i32 = arith.constant 0 : i32
    %c0_i32_0 = arith.constant 0 : i32
    %c0_i32_1 = arith.constant 0 : i32
    return %c0_i32, %c0_i32_0 : i32, i32
  }
  func.func @transform_3(%arg0: i32) -> (i32, i32) {
    %c0_i32 = arith.constant 0 : i32
    %c0_i32_0 = arith.constant 0 : i32
    return %arg0, %c0_i32 : i32, i32
  }
}

module attributes {stable_mosaic.version = 11 : i64} {
  func.func @_mm_bias_kernel(%arg0: i32, %arg1: memref<128x256xbf16, #tpu.memory_space<vmem>>, %arg2: memref<256x128xbf16, #tpu.memory_space<vmem>>, %arg3: memref<1x128xf32, #tpu.memory_space<vmem>>, %arg4: memref<128x128xbf16, #tpu.memory_space<vmem>>) attributes {dimension_semantics = [#tpu.dimension_semantics<parallel>], iteration_bounds = array<i64: 1>, scalar_prefetch = 0 : i64, scratch_operands = 0 : i64, tpu.core_type = #tpu.core_type<tc>, window_params = [{transform_indices = @transform_0, window_bounds = array<i64: 128, 256>}, {pipeline_mode = #tpu.pipeline_mode<synchronous>, transform_indices = @transform_1, window_bounds = array<i64: 256, 128>}, {pipeline_mode = #tpu.pipeline_mode<synchronous>, transform_indices = @transform_2, window_bounds = array<i64: 1, 128>}, {transform_indices = @transform_3, window_bounds = array<i64: 128, 128>}]} {
    %c0 = arith.constant 0 : index
    %c0_0 = arith.constant 0 : index
    %0 = vector.load %arg1[%c0, %c0_0] : memref<128x256xbf16, #tpu.memory_space<vmem>>, vector<128x256xbf16>
    %c0_1 = arith.constant 0 : index
    %c0_2 = arith.constant 0 : index
    %1 = vector.load %arg2[%c0_1, %c0_2] : memref<256x128xbf16, #tpu.memory_space<vmem>>, vector<256x128xbf16>
    %cst = arith.constant dense<0.000000e+00> : vector<128x128xf32>
    %2 = tpu.matmul %0, %1, %cst {dimension_numbers = #tpu.dot_dimension_numbers<[1], [0], [0], [1], [0, 0, 1, 1], [], []>} : vector<128x256xbf16>, vector<256x128xbf16>, vector<128x128xf32> -> vector<128x128xf32>
    %c0_3 = arith.constant 0 : index
    %c0_4 = arith.constant 0 : index
    %3 = vector.load %arg3[%c0_3, %c0_4] : memref<1x128xf32, #tpu.memory_space<vmem>>, vector<1x128xf32>
    %4 = vector.broadcast %3 : vector<1x128xf32> to vector<128x128xf32>
    %5 = arith.addf %2, %4 : vector<128x128xf32>
    %cst_5 = arith.constant 1.000000e-01 : f32
    %6 = vector.broadcast %cst_5 : f32 to vector<128x128xf32>
    %7 = arith.mulf %6, %5 : vector<128x128xf32>
    %8 = arith.maximumf %5, %7 : vector<128x128xf32>
    %9 = arith.truncf %8 : vector<128x128xf32> to vector<128x128xbf16>
    %c0_6 = arith.constant 0 : index
    %c0_7 = arith.constant 0 : index
    %10 = vector.load %arg4[%c0_6, %c0_7] : memref<128x128xbf16, #tpu.memory_space<vmem>>, vector<128x128xbf16>
    tpu.vector_store %arg4[%c0_6, %c0_7], %9 {strides = array<i32>} : memref<128x128xbf16, #tpu.memory_space<vmem>>, vector<128x128xbf16>,
    return
  }
  func.func @transform_0(%arg0: i32) -> (i32, i32) {
    %c0_i32 = arith.constant 0 : i32
    %c0_i32_0 = arith.constant 0 : i32
    return %arg0, %c0_i32 : i32, i32
  }
  func.func @transform_1(%arg0: i32) -> (i32, i32) {
    %c0_i32 = arith.constant 0 : i32
    %c0_i32_0 = arith.constant 0 : i32
    %c0_i32_1 = arith.constant 0 : i32
    return %c0_i32, %c0_i32_0 : i32, i32
  }
  func.func @transform_2(%arg0: i32) -> (i32, i32) {
    %c0_i32 = arith.constant 0 : i32
    %c0_i32_0 = arith.constant 0 : i32
    %c0_i32_1 = arith.constant 0 : i32
    return %c0_i32, %c0_i32_0 : i32, i32
  }
  func.func @transform_3(%arg0: i32) -> (i32, i32) {
    %c0_i32 = arith.constant 0 : i32
    %c0_i32_0 = arith.constant 0 : i32
    return %arg0, %c0_i32 : i32, i32
  }
}

module attributes {stable_mosaic.version = 11 : i64} {
  func.func @_mm_bias_kernel(%arg0: i32, %arg1: memref<16x3456xbf16, #tpu.memory_space<vmem>>, %arg2: memref<3456x128xbf16, #tpu.memory_space<vmem>>, %arg3: memref<1x128xf32, #tpu.memory_space<vmem>>, %arg4: memref<16x128xbf16, #tpu.memory_space<vmem>>) attributes {dimension_semantics = [#tpu.dimension_semantics<parallel>], iteration_bounds = array<i64: 1>, scalar_prefetch = 0 : i64, scratch_operands = 0 : i64, tpu.core_type = #tpu.core_type<tc>, window_params = [{transform_indices = @transform_0, window_bounds = array<i64: 16, 3456>}, {pipeline_mode = #tpu.pipeline_mode<synchronous>, transform_indices = @transform_1, window_bounds = array<i64: 3456, 128>}, {pipeline_mode = #tpu.pipeline_mode<synchronous>, transform_indices = @transform_2, window_bounds = array<i64: 1, 128>}, {transform_indices = @transform_3, window_bounds = array<i64: 16, 128>}]} {
    %c0 = arith.constant 0 : index
    %c0_0 = arith.constant 0 : index
    %0 = vector.load %arg1[%c0, %c0_0] : memref<16x3456xbf16, #tpu.memory_space<vmem>>, vector<16x3456xbf16>
    %c0_1 = arith.constant 0 : index
    %c0_2 = arith.constant 0 : index
    %1 = vector.load %arg2[%c0_1, %c0_2] : memref<3456x128xbf16, #tpu.memory_space<vmem>>, vector<3456x128xbf16>
    %cst = arith.constant dense<0.000000e+00> : vector<16x128xf32>
    %2 = tpu.matmul %0, %1, %cst {dimension_numbers = #tpu.dot_dimension_numbers<[1], [0], [0], [1], [0, 0, 1, 1], [], []>} : vector<16x3456xbf16>, vector<3456x128xbf16>, vector<16x128xf32> -> vector<16x128xf32>
    %c0_3 = arith.constant 0 : index
    %c0_4 = arith.constant 0 : index
    %3 = vector.load %arg3[%c0_3, %c0_4] : memref<1x128xf32, #tpu.memory_space<vmem>>, vector<1x128xf32>
    %4 = vector.broadcast %3 : vector<1x128xf32> to vector<16x128xf32>
    %5 = arith.addf %2, %4 : vector<16x128xf32>
    %6 = arith.truncf %5 : vector<16x128xf32> to vector<16x128xbf16>
    %c0_5 = arith.constant 0 : index
    %c0_6 = arith.constant 0 : index
    %7 = vector.load %arg4[%c0_5, %c0_6] : memref<16x128xbf16, #tpu.memory_space<vmem>>, vector<16x128xbf16>
    tpu.vector_store %arg4[%c0_5, %c0_6], %6 {strides = array<i32>} : memref<16x128xbf16, #tpu.memory_space<vmem>>, vector<16x128xbf16>,
    return
  }
  func.func @transform_0(%arg0: i32) -> (i32, i32) {
    %c0_i32 = arith.constant 0 : i32
    %c0_i32_0 = arith.constant 0 : i32
    return %arg0, %c0_i32 : i32, i32
  }
  func.func @transform_1(%arg0: i32) -> (i32, i32) {
    %c0_i32 = arith.constant 0 : i32
    %c0_i32_0 = arith.constant 0 : i32
    %c0_i32_1 = arith.constant 0 : i32
    return %c0_i32, %c0_i32_0 : i32, i32
  }
  func.func @transform_2(%arg0: i32) -> (i32, i32) {
    %c0_i32 = arith.constant 0 : i32
    %c0_i32_0 = arith.constant 0 : i32
    %c0_i32_1 = arith.constant 0 : i32
    return %c0_i32, %c0_i32_0 : i32, i32
  }
  func.func @transform_3(%arg0: i32) -> (i32, i32) {
    %c0_i32 = arith.constant 0 : i32
    %c0_i32_0 = arith.constant 0 : i32
    return %arg0, %c0_i32 : i32, i32
  }
}

module attributes {stable_mosaic.version = 11 : i64} {
  func.func @_mm_bias_kernel(%arg0: i32, %arg1: memref<16x256xbf16, #tpu.memory_space<vmem>>, %arg2: memref<256x512xbf16, #tpu.memory_space<vmem>>, %arg3: memref<1x512xf32, #tpu.memory_space<vmem>>, %arg4: memref<16x512xbf16, #tpu.memory_space<vmem>>) attributes {dimension_semantics = [#tpu.dimension_semantics<parallel>], iteration_bounds = array<i64: 1>, scalar_prefetch = 0 : i64, scratch_operands = 0 : i64, tpu.core_type = #tpu.core_type<tc>, window_params = [{transform_indices = @transform_0, window_bounds = array<i64: 16, 256>}, {pipeline_mode = #tpu.pipeline_mode<synchronous>, transform_indices = @transform_1, window_bounds = array<i64: 256, 512>}, {pipeline_mode = #tpu.pipeline_mode<synchronous>, transform_indices = @transform_2, window_bounds = array<i64: 1, 512>}, {transform_indices = @transform_3, window_bounds = array<i64: 16, 512>}]} {
    %c0 = arith.constant 0 : index
    %c0_0 = arith.constant 0 : index
    %0 = vector.load %arg1[%c0, %c0_0] : memref<16x256xbf16, #tpu.memory_space<vmem>>, vector<16x256xbf16>
    %c0_1 = arith.constant 0 : index
    %c0_2 = arith.constant 0 : index
    %1 = vector.load %arg2[%c0_1, %c0_2] : memref<256x512xbf16, #tpu.memory_space<vmem>>, vector<256x512xbf16>
    %cst = arith.constant dense<0.000000e+00> : vector<16x512xf32>
    %2 = tpu.matmul %0, %1, %cst {dimension_numbers = #tpu.dot_dimension_numbers<[1], [0], [0], [1], [0, 0, 1, 1], [], []>} : vector<16x256xbf16>, vector<256x512xbf16>, vector<16x512xf32> -> vector<16x512xf32>
    %c0_3 = arith.constant 0 : index
    %c0_4 = arith.constant 0 : index
    %3 = vector.load %arg3[%c0_3, %c0_4] : memref<1x512xf32, #tpu.memory_space<vmem>>, vector<1x512xf32>
    %4 = vector.broadcast %3 : vector<1x512xf32> to vector<16x512xf32>
    %5 = arith.addf %2, %4 : vector<16x512xf32>
    %6 = arith.truncf %5 : vector<16x512xf32> to vector<16x512xbf16>
    %c0_5 = arith.constant 0 : index
    %c0_6 = arith.constant 0 : index
    %7 = vector.load %arg4[%c0_5, %c0_6] : memref<16x512xbf16, #tpu.memory_space<vmem>>, vector<16x512xbf16>
    tpu.vector_store %arg4[%c0_5, %c0_6], %6 {strides = array<i32>} : memref<16x512xbf16, #tpu.memory_space<vmem>>, vector<16x512xbf16>,
    return
  }
  func.func @transform_0(%arg0: i32) -> (i32, i32) {
    %c0_i32 = arith.constant 0 : i32
    %c0_i32_0 = arith.constant 0 : i32
    return %arg0, %c0_i32 : i32, i32
  }
  func.func @transform_1(%arg0: i32) -> (i32, i32) {
    %c0_i32 = arith.constant 0 : i32
    %c0_i32_0 = arith.constant 0 : i32
    %c0_i32_1 = arith.constant 0 : i32
    return %c0_i32, %c0_i32_0 : i32, i32
  }
  func.func @transform_2(%arg0: i32) -> (i32, i32) {
    %c0_i32 = arith.constant 0 : i32
    %c0_i32_0 = arith.constant 0 : i32
    %c0_i32_1 = arith.constant 0 : i32
    return %c0_i32, %c0_i32_0 : i32, i32
  }
  func.func @transform_3(%arg0: i32) -> (i32, i32) {
    %c0_i32 = arith.constant 0 : i32
    %c0_i32_0 = arith.constant 0 : i32
    return %arg0, %c0_i32 : i32, i32
  }
}

module attributes {stable_mosaic.version = 11 : i64} {
  func.func @_mm_bias_res_kernel(%arg0: i32, %arg1: memref<16x128xbf16, #tpu.memory_space<vmem>>, %arg2: memref<128x512xbf16, #tpu.memory_space<vmem>>, %arg3: memref<1x512xf32, #tpu.memory_space<vmem>>, %arg4: memref<16x512xbf16, #tpu.memory_space<vmem>>, %arg5: memref<16x512xbf16, #tpu.memory_space<vmem>>) attributes {dimension_semantics = [#tpu.dimension_semantics<parallel>], iteration_bounds = array<i64: 1>, scalar_prefetch = 0 : i64, scratch_operands = 0 : i64, tpu.core_type = #tpu.core_type<tc>, window_params = [{transform_indices = @transform_0, window_bounds = array<i64: 16, 128>}, {pipeline_mode = #tpu.pipeline_mode<synchronous>, transform_indices = @transform_1, window_bounds = array<i64: 128, 512>}, {pipeline_mode = #tpu.pipeline_mode<synchronous>, transform_indices = @transform_2, window_bounds = array<i64: 1, 512>}, {transform_indices = @transform_3, window_bounds = array<i64: 16, 512>}, {transform_indices = @transform_4, window_bounds = array<i64: 16, 512>}]} {
    %c0 = arith.constant 0 : index
    %c0_0 = arith.constant 0 : index
    %0 = vector.load %arg1[%c0, %c0_0] : memref<16x128xbf16, #tpu.memory_space<vmem>>, vector<16x128xbf16>
    %c0_1 = arith.constant 0 : index
    %c0_2 = arith.constant 0 : index
    %1 = vector.load %arg2[%c0_1, %c0_2] : memref<128x512xbf16, #tpu.memory_space<vmem>>, vector<128x512xbf16>
    %cst = arith.constant dense<0.000000e+00> : vector<16x512xf32>
    %2 = tpu.matmul %0, %1, %cst {dimension_numbers = #tpu.dot_dimension_numbers<[1], [0], [0], [1], [0, 0, 1, 1], [], []>} : vector<16x128xbf16>, vector<128x512xbf16>, vector<16x512xf32> -> vector<16x512xf32>
    %c0_3 = arith.constant 0 : index
    %c0_4 = arith.constant 0 : index
    %3 = vector.load %arg3[%c0_3, %c0_4] : memref<1x512xf32, #tpu.memory_space<vmem>>, vector<1x512xf32>
    %4 = vector.broadcast %3 : vector<1x512xf32> to vector<16x512xf32>
    %5 = arith.addf %2, %4 : vector<16x512xf32>
    %c0_5 = arith.constant 0 : index
    %c0_6 = arith.constant 0 : index
    %6 = vector.load %arg4[%c0_5, %c0_6] : memref<16x512xbf16, #tpu.memory_space<vmem>>, vector<16x512xbf16>
    %7 = arith.extf %6 : vector<16x512xbf16> to vector<16x512xf32>
    %8 = arith.addf %5, %7 : vector<16x512xf32>
    %cst_7 = arith.constant 1.000000e-01 : f32
    %9 = vector.broadcast %cst_7 : f32 to vector<16x512xf32>
    %10 = arith.mulf %9, %8 : vector<16x512xf32>
    %11 = arith.maximumf %8, %10 : vector<16x512xf32>
    %12 = arith.truncf %11 : vector<16x512xf32> to vector<16x512xbf16>
    %c0_8 = arith.constant 0 : index
    %c0_9 = arith.constant 0 : index
    %13 = vector.load %arg5[%c0_8, %c0_9] : memref<16x512xbf16, #tpu.memory_space<vmem>>, vector<16x512xbf16>
    tpu.vector_store %arg5[%c0_8, %c0_9], %12 {strides = array<i32>} : memref<16x512xbf16, #tpu.memory_space<vmem>>, vector<16x512xbf16>,
    return
  }
  func.func @transform_0(%arg0: i32) -> (i32, i32) {
    %c0_i32 = arith.constant 0 : i32
    %c0_i32_0 = arith.constant 0 : i32
    return %arg0, %c0_i32 : i32, i32
  }
  func.func @transform_1(%arg0: i32) -> (i32, i32) {
    %c0_i32 = arith.constant 0 : i32
    %c0_i32_0 = arith.constant 0 : i32
    %c0_i32_1 = arith.constant 0 : i32
    return %c0_i32, %c0_i32_0 : i32, i32
  }
  func.func @transform_2(%arg0: i32) -> (i32, i32) {
    %c0_i32 = arith.constant 0 : i32
    %c0_i32_0 = arith.constant 0 : i32
    %c0_i32_1 = arith.constant 0 : i32
    return %c0_i32, %c0_i32_0 : i32, i32
  }
  func.func @transform_3(%arg0: i32) -> (i32, i32) {
    %c0_i32 = arith.constant 0 : i32
    %c0_i32_0 = arith.constant 0 : i32
    return %arg0, %c0_i32 : i32, i32
  }
  func.func @transform_4(%arg0: i32) -> (i32, i32) {
    %c0_i32 = arith.constant 0 : i32
    %c0_i32_0 = arith.constant 0 : i32
    return %arg0, %c0_i32 : i32, i32
  }
}

module attributes {stable_mosaic.version = 11 : i64} {
  func.func @_mm_bias_kernel(%arg0: i32, %arg1: memref<16x512xbf16, #tpu.memory_space<vmem>>, %arg2: memref<512x128xbf16, #tpu.memory_space<vmem>>, %arg3: memref<1x128xf32, #tpu.memory_space<vmem>>, %arg4: memref<16x128xbf16, #tpu.memory_space<vmem>>) attributes {dimension_semantics = [#tpu.dimension_semantics<parallel>], iteration_bounds = array<i64: 1>, scalar_prefetch = 0 : i64, scratch_operands = 0 : i64, tpu.core_type = #tpu.core_type<tc>, window_params = [{transform_indices = @transform_0, window_bounds = array<i64: 16, 512>}, {pipeline_mode = #tpu.pipeline_mode<synchronous>, transform_indices = @transform_1, window_bounds = array<i64: 512, 128>}, {pipeline_mode = #tpu.pipeline_mode<synchronous>, transform_indices = @transform_2, window_bounds = array<i64: 1, 128>}, {transform_indices = @transform_3, window_bounds = array<i64: 16, 128>}]} {
    %c0 = arith.constant 0 : index
    %c0_0 = arith.constant 0 : index
    %0 = vector.load %arg1[%c0, %c0_0] : memref<16x512xbf16, #tpu.memory_space<vmem>>, vector<16x512xbf16>
    %c0_1 = arith.constant 0 : index
    %c0_2 = arith.constant 0 : index
    %1 = vector.load %arg2[%c0_1, %c0_2] : memref<512x128xbf16, #tpu.memory_space<vmem>>, vector<512x128xbf16>
    %cst = arith.constant dense<0.000000e+00> : vector<16x128xf32>
    %2 = tpu.matmul %0, %1, %cst {dimension_numbers = #tpu.dot_dimension_numbers<[1], [0], [0], [1], [0, 0, 1, 1], [], []>} : vector<16x512xbf16>, vector<512x128xbf16>, vector<16x128xf32> -> vector<16x128xf32>
    %c0_3 = arith.constant 0 : index
    %c0_4 = arith.constant 0 : index
    %3 = vector.load %arg3[%c0_3, %c0_4] : memref<1x128xf32, #tpu.memory_space<vmem>>, vector<1x128xf32>
    %4 = vector.broadcast %3 : vector<1x128xf32> to vector<16x128xf32>
    %5 = arith.addf %2, %4 : vector<16x128xf32>
    %cst_5 = arith.constant 1.000000e-01 : f32
    %6 = vector.broadcast %cst_5 : f32 to vector<16x128xf32>
    %7 = arith.mulf %6, %5 : vector<16x128xf32>
    %8 = arith.maximumf %5, %7 : vector<16x128xf32>
    %9 = arith.truncf %8 : vector<16x128xf32> to vector<16x128xbf16>
    %c0_6 = arith.constant 0 : index
    %c0_7 = arith.constant 0 : index
    %10 = vector.load %arg4[%c0_6, %c0_7] : memref<16x128xbf16, #tpu.memory_space<vmem>>, vector<16x128xbf16>
    tpu.vector_store %arg4[%c0_6, %c0_7], %9 {strides = array<i32>} : memref<16x128xbf16, #tpu.memory_space<vmem>>, vector<16x128xbf16>,
    return
  }
  func.func @transform_0(%arg0: i32) -> (i32, i32) {
    %c0_i32 = arith.constant 0 : i32
    %c0_i32_0 = arith.constant 0 : i32
    return %arg0, %c0_i32 : i32, i32
  }
  func.func @transform_1(%arg0: i32) -> (i32, i32) {
    %c0_i32 = arith.constant 0 : i32
    %c0_i32_0 = arith.constant 0 : i32
    %c0_i32_1 = arith.constant 0 : i32
    return %c0_i32, %c0_i32_0 : i32, i32
  }
  func.func @transform_2(%arg0: i32) -> (i32, i32) {
    %c0_i32 = arith.constant 0 : i32
    %c0_i32_0 = arith.constant 0 : i32
    %c0_i32_1 = arith.constant 0 : i32
    return %c0_i32, %c0_i32_0 : i32, i32
  }
  func.func @transform_3(%arg0: i32) -> (i32, i32) {
    %c0_i32 = arith.constant 0 : i32
    %c0_i32_0 = arith.constant 0 : i32
    return %arg0, %c0_i32 : i32, i32
  }
}

</mosaic_0001>

<bundles_post_ra>
// kernel: resnet_forward.25
= control target key start
LH: loop header
LB: loop body
LE: loop exit
PB: predicated region body
PF: predicated region fallthrough
CT: control target
= control target key end

     0   :  { %s1898_s12 = smov 0   ;;  %s2255_s0 = inlined_call_operand.vmem [shape: bf16[512,441], index: 0, kind: input, shape index: {}]   ;;  %s2256_s1 = inlined_call_operand.vmem [shape: bf16[441,64], index: 1, kind: input, shape index: {}]   ;;  %s2257_s2 = inlined_call_operand.vmem [shape: f32[1,64], index: 2, kind: input, shape index: {}]   ;;  %s2258_s3 = inlined_call_operand.vmem [shape: bf16[512,64], index: 3, kind: output, shape index: {}]  }
   0x1 LB: > { %s1370_s13 = sadd.s32 4294967295, %s1875_s12   ;;  %p1374_p0 = scmp.ge.s32.totalorder %s1875_s12, 1  ;;  %s1875_s12 = sphi %s1898_s12, %s13_s12  }
   0x2   : > { %p139_p1 = scmp.lt.s32.totalorder %s1875_s12, 3 }
   0x4   : > { %p140_p2 = pnand %p1374_p0, %p139_p1 }
   0x5   : > { %s1375_s20 = sshll.u32 (!%p140_p2), %s1370_s13, 5 }
   0x6   : > { %143 = sbr.rel (%p140_p2) target bundleno = 436 (0x1b4), region = 32  ;;  %p165_p3 = scmp.lt.s32.totalorder (!%p140_p2), %s1375_s20, 63 }
   0xb   : > { %v1838_v0 = vld [vmem:[%s2256_s1 + $0x38] sm:$0xff]  ;;  %vm822_vm0 = vcmask 1043456   ;;  %vm823_vm1 = vcmask 1044480   ;;  %v1877_v3 = vmov 65535   ;;  %v1837_v5 = vld [vmem:[%s2256_s1 + $0x30] sm:$0xff]  ;;  %v1836_v12 = vld [vmem:[%s2256_s1 + $0x28] sm:$0xff] }
   0xc   : > { %v1846_v1 = vld [vmem:[%s2256_s1 + $0x78] sm:$0xff]  ;;  %v824_v4 = vsel %vm822_vm0, 4294967295, %v1877_v3  ;;  %829 = vmatpush.bf16.msra.mxu0 %v1838_v0  ;;  %v1845_v6 = vld [vmem:[%s2256_s1 + $0x70] sm:$0xff]  ;;  %v1844_v13 = vld [vmem:[%s2256_s1 + $0x68] sm:$0xff]  ;;  %s2260_s20 = smov (!%p165_p3, %s1375_s20), 63  ;;  %vm773_vm2 = vcmask 465920  }
   0xd   : > { %v1854_v2 = vld [vmem:[%s2256_s1 + $0xb8] sm:$0xff]  ;;  %918 = vmatpush.bf16.msra.mxu1 %v1846_v1  ;;  %v1853_v7 = vld [vmem:[%s2256_s1 + $0xb0] sm:$0xff]  ;;  %v825_v10 = vsel %vm823_vm1, %v824_v4, 0  ;;  %v1852_v15 = vld [vmem:[%s2256_s1 + $0xa8] sm:$0xff]  ;;  %s1766_s17 = sshll.u32 %s2260_s20, 4  ;;  %s1379_s30 = sshll.u32 %s2260_s20, 2 }
   0xe   : > { %1007 = vmatpush.bf16.msra.mxu2 %v1854_v2  ;;  %v1746_v8 = vld [vmem:[%s2256_s1 + $0xd8] sm:$0xf]  ;;  %v1858_v9 = vld [vmem:[%s2256_s1 + $0xd8] sm:$0x10]  ;;  %v1857_v16 = vld [vmem:[%s2256_s1 + $0xd0] sm:$0xff]  ;;  %s1960_s25 = scalar_lea.vmem %s2255_s0, %s1766_s17  ;;  %s2102_s6 = scalar_lea.vmem %s2258_s3, %s1379_s30  ;;  %vm1281_vm3 = vcmask 519168  }
   0xf   : > { %v1747_v11 = vor.u32 %v1858_v9, %v1746_v8  ;;  %v1835_v17 = vld [vmem:[%s2256_s1 + $0x20] sm:$0xff]  ;;  %v1856_v20 = vld [vmem:[%s2256_s1 + $0xc8] sm:$0xff]  ;;  %v1834_v21 = vld [vmem:[%s2256_s1 + $0x18] sm:$0xff] }
  0x10   : > { %830 = vmatpush.bf16.msra.mxu0 %v1837_v5  ;;  %v1843_v18 = vld [vmem:[%s2256_s1 + $0x60] sm:$0xff]  ;;  %v1842_v22 = vld [vmem:[%s2256_s1 + $0x58] sm:$0xff]  ;;  %v1768_v25 = vld [vmem:[%s1960_s25 + $0xc] sm:$0xf] }
  0x11   : > { %919 = vmatpush.bf16.msra.mxu1 %v1845_v6  ;;  %v827_v14 = vand.u32 %v1747_v11, %v825_v10  ;;  %v1851_v19 = vld [vmem:[%s2256_s1 + $0xa0] sm:$0xff]  ;;  %v1850_v23 = vld [vmem:[%s2256_s1 + $0x98] sm:$0xff]  ;;  %v1833_v27 = vld [vmem:[%s2256_s1 + $0x10] sm:$0xff] }
  0x12   : > { %1008 = vmatpush.bf16.msra.mxu2 %v1853_v7  ;;  %v1855_v24 = vld [vmem:[%s2256_s1 + $0xc0] sm:$0xff]  ;;  %v1392_v26 = vld [vmem:[%s1960_s25 + $0x18] sm:$0xf0]  ;;  %v1841_v28 = vld [vmem:[%s2256_s1 + $0x50] sm:$0xff] }
  0x13   : > { %1100 = vmatpush.bf16.msra.mxu3 %v827_v14  ;;  %v1849_v29 = vld [vmem:[%s2256_s1 + $0x90] sm:$0xff]  ;;  %v1395_v30 = vor.u32 %v1768_v25, %v1392_v26  ;;  %v1832_v31 = vld [vmem:[%s2256_s1 + $0x8] sm:$0xff]  ;;  %v1831_v34 = vld [vmem:[%s2256_s1] sm:$0xff] }
  0x14   : > { %831 = vmatpush.bf16.msra.mxu0 %v1836_v12  ;;  %v1840_v32 = vld [vmem:[%s2256_s1 + $0x48] sm:$0xff]  ;;  %v1839_v35 = vld [vmem:[%s2256_s1 + $0x40] sm:$0xff]  ;;  %v1769_v37 = vld [vmem:[%s1960_s25 + $0xc] sm:$0xf0] }
  0x15   : > { %920 = vmatpush.bf16.msra.mxu1 %v1844_v13  ;;  %v1848_v33 = vld [vmem:[%s2256_s1 + $0x88] sm:$0xff]  ;;  %v1382_v36 = vld [vmem:[%s1960_s25] sm:$0xf]  ;;  %v1767_v38 = vld [vmem:[%s1960_s25 + $0x4] sm:$0xf] }
  0x16   : > { %1009 = vmatpush.bf16.msra.mxu2 %v1852_v15  ;;  %v1384_v39 = vld [vmem:[%s1960_s25 + $0x10] sm:$0xf0]  ;;  %v1847_v40 = vld [vmem:[%s2256_s1 + $0x80] sm:$0xff]  ;;  %v1390_v41 = vld [vmem:[%s1960_s25 + $0x8] sm:$0xf]  ;;  %v1383_v43 = vor.u32 %v1769_v37, %v1382_v36 }
  0x17   : > { %1101 = vmatpush.bf16.msra.mxu3 %v1857_v16  ;;  %v1770_v42 = vld [vmem:[%s1960_s25 + $0x14] sm:$0xf0]  ;;  %v1387_v44 = vor.u32 %v1767_v38, %v1384_v39  ;;  %v1772_v46 = vld [vmem:[%s1960_s25 + $0x2c] sm:$0xf]  ;;  %v1408_v47 = vld [vmem:[%s1960_s25 + $0x38] sm:$0xf0] }
  0x18   : > { %832 = vmatpush.bf16.msra.mxu0 %v1835_v17  ;;  %v1391_v45 = vor.u32 %v1770_v42, %v1390_v41  ;;  %v1411_v48 = vor.u32 %v1772_v46, %v1408_v47  ;;  %v1398_v49 = vld [vmem:[%s1960_s25 + $0x20] sm:$0xf]  ;;  %v1773_v50 = vld [vmem:[%s1960_s25 + $0x2c] sm:$0xf0]  ;;  %v1771_v51 = vld [vmem:[%s1960_s25 + $0x24] sm:$0xf] }
  0x19   : > { %921 = vmatpush.bf16.msra.mxu1 %v1843_v18  ;;  %v1400_v52 = vld [vmem:[%s1960_s25 + $0x30] sm:$0xf0]  ;;  %v1406_v53 = vld [vmem:[%s1960_s25 + $0x28] sm:$0xf]  ;;  %v1774_v54 = vld [vmem:[%s1960_s25 + $0x34] sm:$0xf0]  ;;  %v1399_v55 = vor.u32 %v1773_v50, %v1398_v49 }
  0x1a   : > { %1010 = vmatpush.bf16.msra.mxu2 %v1851_v19  ;;  %v1403_v56 = vor.u32 %v1771_v51, %v1400_v52  ;;  %v1407_v57 = vor.u32 %v1774_v54, %v1406_v53  ;;  %v1776_v58 = vld [vmem:[%s1960_s25 + $0x4c] sm:$0xf]  ;;  %v1424_v59 = vld [vmem:[%s1960_s25 + $0x58] sm:$0xf0]  ;;  %v1414_v61 = vld [vmem:[%s1960_s25 + $0x40] sm:$0xf] }
  0x1b   : > { %1102 = vmatpush.bf16.msra.mxu3 %v1856_v20  ;;  %v1427_v60 = vor.u32 %v1776_v58, %v1424_v59  ;;  %v1777_v62 = vld [vmem:[%s1960_s25 + $0x4c] sm:$0xf0]  ;;  %v1775_v63 = vld [vmem:[%s1960_s25 + $0x44] sm:$0xf]  ;;  %v1416_v0 = vld [vmem:[%s1960_s25 + $0x50] sm:$0xf0] }
  0x1c   : > { %833 = vmatpush.bf16.msra.mxu0 %v1834_v21  ;;  %v1422_v1 = vld [vmem:[%s1960_s25 + $0x48] sm:$0xf]  ;;  %v1778_v2 = vld [vmem:[%s1960_s25 + $0x54] sm:$0xf0]  ;;  %v1415_v3 = vor.u32 %v1777_v62, %v1414_v61  ;;  %v1419_v4 = vor.u32 %v1775_v63, %v1416_v0  ;;  %v1780_v6 = vld [vmem:[%s1960_s25 + $0x6c] sm:$0xf] }
  0x1d   : > { %922 = vmatpush.bf16.msra.mxu1 %v1842_v22  ;;  %v1423_v5 = vor.u32 %v1778_v2, %v1422_v1  ;;  %v1440_v7 = vld [vmem:[%s1960_s25 + $0x78] sm:$0xf0]  ;;  %v1430_v9 = vld [vmem:[%s1960_s25 + $0x60] sm:$0xf]  ;;  %v1781_v10 = vld [vmem:[%s1960_s25 + $0x6c] sm:$0xf0] }
  0x1e   : > { %1011 = vmatpush.bf16.msra.mxu2 %v1850_v23  ;;  %v1443_v8 = vor.u32 %v1780_v6, %v1440_v7  ;;  %v1779_v11 = vld [vmem:[%s1960_s25 + $0x64] sm:$0xf]  ;;  %v1432_v12 = vld [vmem:[%s1960_s25 + $0x70] sm:$0xf0]  ;;  %v1438_v13 = vld [vmem:[%s1960_s25 + $0x68] sm:$0xf]  ;;  %v1431_v15 = vor.u32 %v1781_v10, %v1430_v9 }
  0x1f   : > { %1103 = vmatpush.bf16.msra.mxu3 %v1855_v24  ;;  %v1782_v14 = vld [vmem:[%s1960_s25 + $0x74] sm:$0xf0]  ;;  %v1435_v16 = vor.u32 %v1779_v11, %v1432_v12  ;;  %v1784_v18 = vld [vmem:[%s1960_s25 + $0x8c] sm:$0xf]  ;;  %v1456_v19 = vld [vmem:[%s1960_s25 + $0x98] sm:$0xf0] }
  0x20   : > { %834 = vmatpush.bf16.msra.mxu0 %v1833_v27  ;;  %v1439_v17 = vor.u32 %v1782_v14, %v1438_v13  ;;  %v1459_v20 = vor.u32 %v1784_v18, %v1456_v19  ;;  %v1446_v21 = vld [vmem:[%s1960_s25 + $0x80] sm:$0xf]  ;;  %v1785_v22 = vld [vmem:[%s1960_s25 + $0x8c] sm:$0xf0]  ;;  %v1783_v23 = vld [vmem:[%s1960_s25 + $0x84] sm:$0xf] }
  0x21   : > { %923 = vmatpush.bf16.msra.mxu1 %v1841_v28  ;;  %v1448_v24 = vld [vmem:[%s1960_s25 + $0x90] sm:$0xf0]  ;;  %v1454_v25 = vld [vmem:[%s1960_s25 + $0x88] sm:$0xf]  ;;  %v1786_v26 = vld [vmem:[%s1960_s25 + $0x94] sm:$0xf0]  ;;  %v1447_v27 = vor.u32 %v1785_v22, %v1446_v21 }
  0x22   : > { %1012 = vmatpush.bf16.msra.mxu2 %v1849_v29  ;;  %1748 = vmatmul.msk.bf16.vlgmr.msra.gmra.mxu3 %vm773_vm2, %v1395_v30  ;;  %v1451_v28 = vor.u32 %v1783_v23, %v1448_v24  ;;  %v1455_v29 = vor.u32 %v1786_v26, %v1454_v25  ;;  %v1788_v30 = vld [vmem:[%s1960_s25 + $0xac] sm:$0xf]  ;;  %v1464_v36 = vld [vmem:[%s1960_s25 + $0xb0] sm:$0xf0]  ;;  %v1470_v37 = vld [vmem:[%s1960_s25 + $0xa8] sm:$0xf] }
  0x23   : > { %v1790_v38 = vld [vmem:[%s1960_s25 + $0xb4] sm:$0xf0]  ;;  %v1792_v42 = vld [vmem:[%s1960_s25 + $0xcc] sm:$0xf]  ;;  %v1793_v46 = vld [vmem:[%s1960_s25 + $0xcc] sm:$0xf0] }
  0x24   : > { %835 = vmatpush.bf16.msra.mxu0 %v1832_v31  ;;  %v1472_v31 = vld [vmem:[%s1960_s25 + $0xb8] sm:$0xf0]  ;;  %v1471_v41 = vor.u32 %v1790_v38, %v1470_v37  ;;  %v1791_v47 = vld [vmem:[%s1960_s25 + $0xc4] sm:$0xf]  ;;  %v1486_v49 = vld [vmem:[%s1960_s25 + $0xc8] sm:$0xf] }
  0x25   : > { %924 = vmatpush.bf16.msra.mxu1 %v1840_v32  ;;  %v1475_v32 = vor.u32 %v1788_v30, %v1472_v31  ;;  %v1794_v50 = vld [vmem:[%s1960_s25 + $0xd4] sm:$0xf0]  ;;  %v1796_v54 = vld [vmem:[%s1960_s25 + $0xec] sm:$0xf]  ;;  %v1797_v58 = vld [vmem:[%s1960_s25 + $0xec] sm:$0xf0] }
  0x26   : > { %1013 = vmatpush.bf16.msra.mxu2 %v1848_v33  ;;  %v1462_v33 = vld [vmem:[%s1960_s25 + $0xa0] sm:$0xf]  ;;  %v1487_v53 = vor.u32 %v1794_v50, %v1486_v49  ;;  %v1795_v59 = vld [vmem:[%s1960_s25 + $0xe4] sm:$0xf]  ;;  %v1502_v61 = vld [vmem:[%s1960_s25 + $0xe8] sm:$0xf] }
  0x27   : > { %v1798_v62 = vld [vmem:[%s1960_s25 + $0xf4] sm:$0xf0]  ;;  %v1800_v2 = vld [vmem:[%s1960_s25 + $0x10c] sm:$0xf]  ;;  %v1801_v7 = vld [vmem:[%s1960_s25 + $0x10c] sm:$0xf0] }
  0x28   : > { %836 = vmatpush.bf16.msra.mxu0 %v1831_v34  ;;  %v1789_v34 = vld [vmem:[%s1960_s25 + $0xac] sm:$0xf0]  ;;  %v1503_v1 = vor.u32 %v1798_v62, %v1502_v61  ;;  %v1512_v9 = vld [vmem:[%s1960_s25 + $0x110] sm:$0xf0]  ;;  %v2083_v10 = vld [vmem:[%s2257_s2] ss:$0 sm:$0xff] }
  0x29   : > { %925 = vmatpush.bf16.msra.mxu1 %v1839_v35  ;;  %v1787_v35 = vld [vmem:[%s1960_s25 + $0xa4] sm:$0xf]  ;;  %v1463_v39 = vor.u32 %v1789_v34, %v1462_v33  ;;  %v1518_v11 = vld [vmem:[%s1960_s25 + $0x108] sm:$0xf]  ;;  %v1802_v12 = vld [vmem:[%s1960_s25 + $0x114] sm:$0xf0] }
  0x2a   : > { %1014 = vmatpush.bf16.msra.mxu2 %v1847_v40  ;;  %v1467_v40 = vor.u32 %v1787_v35, %v1464_v36  ;;  %v1804_v19 = vld [vmem:[%s1960_s25 + $0x12c] sm:$0xf]  ;;  %v1526_v30 = vld [vmem:[%s1960_s25 + $0x120] sm:$0xf]  ;;  %v1805_v31 = vld [vmem:[%s1960_s25 + $0x12c] sm:$0xf0] }
  0x2b   : > { %837 = vmatmul.bf16.vlgmr.msra.gmra.mxu0 %v1383_v43  ;;  %v1488_v43 = vld [vmem:[%s1960_s25 + $0xd8] sm:$0xf0]  ;;  %v1803_v34 = vld [vmem:[%s1960_s25 + $0x124] sm:$0xf]  ;;  %v1528_v35 = vld [vmem:[%s1960_s25 + $0x130] sm:$0xf0] }
  0x2c   : > { %926 = vmatmul.bf16.vlgmr.msra.gmra.mxu1 %v1387_v44  ;;  %v1491_v44 = vor.u32 %v1792_v42, %v1488_v43  ;;  %v1534_v36 = vld [vmem:[%s1960_s25 + $0x128] sm:$0xf]  ;;  %v1806_v37 = vld [vmem:[%s1960_s25 + $0x134] sm:$0xf0]  ;;  %v1531_v42 = vor.u32 %v1803_v34, %v1528_v35  ;;  %v1808_v50 = vld [vmem:[%s1960_s25 + $0x14c] sm:$0xf] }
  0x2d   : > { %1015 = vmatmul.bf16.vlgmr.msra.gmra.mxu2 %v1391_v45  ;;  %v1478_v45 = vld [vmem:[%s1960_s25 + $0xc0] sm:$0xf] }
  0x2e   : > { %v1479_v51 = vor.u32 %v1793_v46, %v1478_v45  ;;  %v1558_v35 = vld [vmem:[%s1960_s25 + $0x160] sm:$0xf] }
  0x32   : > { %1749 = vmatmul.msk.bf16.gmra.mxu3 %vm773_vm2, %v1411_v48  ;;  %v1480_v48 = vld [vmem:[%s1960_s25 + $0xd0] sm:$0xf0] }
  0x33   : > { %v1483_v52 = vor.u32 %v1791_v47, %v1480_v48  ;;  %v1535_v47 = vor.u32 %v1806_v37, %v1534_v36  ;;  %v1813_v36 = vld [vmem:[%s1960_s25 + $0x16c] sm:$0xf0] }
  0x3b   : > { %842 = vmatmul.bf16.gmra.mxu0 %v1399_v55  ;;  %v1504_v55 = vld [vmem:[%s1960_s25 + $0xf8] sm:$0xf0] }
  0x3c   : > { %931 = vmatmul.bf16.gmra.mxu1 %v1403_v56  ;;  %v1507_v56 = vor.u32 %v1796_v54, %v1504_v55 }
  0x3d   : > { %1020 = vmatmul.bf16.gmra.mxu2 %v1407_v57  ;;  %v1494_v57 = vld [vmem:[%s1960_s25 + $0xe0] sm:$0xf] }
  0x3e   : > { %v1495_v63 = vor.u32 %v1797_v58, %v1494_v57 }
  0x42   : > { %1750 = vmatmul.msk.bf16.gmra.mxu3 %vm773_vm2, %v1427_v60  ;;  %v1496_v60 = vld [vmem:[%s1960_s25 + $0xf0] sm:$0xf0] }
  0x43   : > { %v1499_v0 = vor.u32 %v1795_v59, %v1496_v60 }
  0x4b   : > { %847 = vmatmul.bf16.gmra.mxu0 %v1415_v3  ;;  %v1520_v3 = vld [vmem:[%s1960_s25 + $0x118] sm:$0xf0] }
  0x4c   : > { %936 = vmatmul.bf16.gmra.mxu1 %v1419_v4  ;;  %v1523_v4 = vor.u32 %v1800_v2, %v1520_v3 }
  0x4d   : > { %1025 = vmatmul.bf16.gmra.mxu2 %v1423_v5  ;;  %v1510_v5 = vld [vmem:[%s1960_s25 + $0x100] sm:$0xf] }
  0x4e   : > { %v1511_v13 = vor.u32 %v1801_v7, %v1510_v5  ;;  %v1544_v5 = vld [vmem:[%s1960_s25 + $0x150] sm:$0xf0]  ;;  %v1810_v7 = vld [vmem:[%s1960_s25 + $0x154] sm:$0xf0] }
  0x52   : > { %1751 = vmatmul.msk.bf16.gmra.mxu3 %vm773_vm2, %v1443_v8  ;;  %v1799_v8 = vld [vmem:[%s1960_s25 + $0x104] sm:$0xf] }
  0x53   : > { %v1515_v14 = vor.u32 %v1799_v8, %v1512_v9 }
  0x5b   : > { %852 = vmatmul.bf16.gmra.mxu0 %v1431_v15 }
  0x5c   : > { %941 = vmatmul.bf16.gmra.mxu1 %v1435_v16 }
  0x5d   : > { %1030 = vmatmul.bf16.gmra.mxu2 %v1439_v17  ;;  %v1519_v17 = vor.u32 %v1802_v12, %v1518_v11 }
  0x62   : > { %1752 = vmatmul.msk.bf16.gmra.mxu3 %vm773_vm2, %v1459_v20  ;;  %v1536_v20 = vld [vmem:[%s1960_s25 + $0x138] sm:$0xf0] }
  0x63   : > { %v1539_v23 = vor.u32 %v1804_v19, %v1536_v20 }
  0x6b   : > { %857 = vmatmul.bf16.gmra.mxu0 %v1447_v27 }
  0x6c   : > { %946 = vmatmul.bf16.gmra.mxu1 %v1451_v28 }
  0x6d   : > { %1035 = vmatmul.bf16.gmra.mxu2 %v1455_v29 }
  0x72   : > { %1753 = vmatmul.msk.bf16.gmra.mxu3 %vm773_vm2, %v1475_v32 }
  0x7b   : > { %862 = vmatmul.bf16.gmra.mxu0 %v1463_v39 }
  0x7c   : > { %951 = vmatmul.bf16.gmra.mxu1 %v1467_v40 }
  0x7d   : > { %1040 = vmatmul.bf16.gmra.mxu2 %v1471_v41  ;;  %v1527_v41 = vor.u32 %v1805_v31, %v1526_v30 }
  0x82   : > { %1754 = vmatmul.msk.bf16.gmra.mxu3 %vm773_vm2, %v1491_v44 }
  0x8b   : > { %867 = vmatmul.bf16.gmra.mxu0 %v1479_v51  ;;  %v1552_v51 = vld [vmem:[%s1960_s25 + $0x158] sm:$0xf0] }
  0x8c   : > { %956 = vmatmul.bf16.gmra.mxu1 %v1483_v52  ;;  %v1555_v55 = vor.u32 %v1808_v50, %v1552_v51 }
  0x8d   : > { %1045 = vmatmul.bf16.gmra.mxu2 %v1487_v53 }
  0x92   : > { %1755 = vmatmul.msk.bf16.gmra.mxu3 %vm773_vm2, %v1507_v56 }
  0x9b   : > { %872 = vmatmul.bf16.gmra.mxu0 %v1495_v63 }
  0x9c   : > { %961 = vmatmul.bf16.gmra.mxu1 %v1499_v0  ;;  %v1542_v0 = vld [vmem:[%s1960_s25 + $0x140] sm:$0xf] }
  0x9d   : > { %1050 = vmatmul.bf16.gmra.mxu2 %v1503_v1  ;;  %v1809_v1 = vld [vmem:[%s1960_s25 + $0x14c] sm:$0xf0] }
  0x9e   : > { %v1543_v12 = vor.u32 %v1809_v1, %v1542_v0 }
  0xa2   : > { %1756 = vmatmul.msk.bf16.gmra.mxu3 %vm773_vm2, %v1523_v4  ;;  %v1807_v4 = vld [vmem:[%s1960_s25 + $0x144] sm:$0xf] }
  0xa5   : > { %v1105_v6 = vpop.f32.mrf.mxu3 }
  0xa8   : > { %v838_v15 = vpop.f32.mrf.mxu0 }
  0xa9   : > { %v927_v16 = vpop.f32.mrf.mxu1  ;;  %v839_v18 = vadd.f32 %v2083_v10, %v838_v15 }
  0xab   : > { %877 = vmatmul.bf16.gmra.mxu0 %v1511_v13  ;;  %v928_v21 = vadd.f32 %v927_v16, %v839_v18  ;;  %v1547_v13 = vor.u32 %v1807_v4, %v1544_v5  ;;  %v1574_v5 = vld [vmem:[%s1960_s25 + $0x180] sm:$0xf] }
  0xac   : > { %966 = vmatmul.bf16.gmra.mxu1 %v1515_v14 }
  0xad   : > { %1055 = vmatmul.bf16.gmra.mxu2 %v1519_v17  ;;  %v1107_v22 = vpop.f32.mrf.mxu3 }
  0xb0   : > { %v1016_v24 = vpop.f32.mrf.mxu2  ;;  %v840_v26 = vpop.f32.mrf.mxu0 }
  0xb1   : > { %v1017_v25 = vadd.f32 %v1016_v24, %v928_v21  ;;  %v929_v27 = vpop.f32.mrf.mxu1  ;;  %v841_v29 = vadd.f32 %v2083_v10, %v840_v26  ;;  %v1812_v21 = vld [vmem:[%s1960_s25 + $0x16c] sm:$0xf] }
  0xb2   : > { %1757 = vmatmul.msk.bf16.gmra.mxu3 %vm773_vm2, %v1539_v23 }
  0xb3   : > { %v1106_v28 = vadd.f32 %v1105_v6, %v1017_v25  ;;  %v930_v39 = vadd.f32 %v929_v27, %v841_v29  ;;  %v1550_v6 = vld [vmem:[%s1960_s25 + $0x148] sm:$0xf] }
  0xb4   : > { %v1551_v18 = vor.u32 %v1810_v7, %v1550_v6  ;;  %v1817_v6 = vld [vmem:[%s1960_s25 + $0x18c] sm:$0xf0] }
  0xb5   : > { %v1185_v32 = vmul.f32 0.1, %v1106_v28  ;;  %v1110_v33 = vpop.f32.mrf.mxu3 }
  0xb7   : > { %v1217_v38 = vmax.f32 %v1106_v28, %v1185_v32 }
  0xb8   : > { %v1018_v40 = vpop.f32.mrf.mxu2  ;;  %v843_v45 = vpop.f32.mrf.mxu0 }
  0xb9   : > { %v1249_v43 = vpack.c.bf16 %v1217_v38, %v1217_v38  ;;  %v1019_v44 = vadd.f32 %v1018_v40, %v930_v39  ;;  %v932_v46 = vpop.f32.mrf.mxu1  ;;  %v844_v48 = vadd.f32 %v2083_v10, %v843_v45  ;;  %v1811_v39 = vld [vmem:[%s1960_s25 + $0x164] sm:$0xf]  ;;  %v1560_v40 = vld [vmem:[%s1960_s25 + $0x170] sm:$0xf0] }
  0xbb   : > { %1282 = vst.msk [vmem:[%s2102_s6] sm:$0xf] %vm1281_vm3, %v1249_v43  ;;  %v1108_v49 = vadd.f32 %v1107_v22, %v1019_v44  ;;  %882 = vmatmul.bf16.gmra.mxu0 %v1527_v41  ;;  %v933_v53 = vadd.f32 %v932_v46, %v844_v48  ;;  %v1568_v22 = vld [vmem:[%s1960_s25 + $0x178] sm:$0xf0]  ;;  %v1566_v41 = vld [vmem:[%s1960_s25 + $0x168] sm:$0xf]  ;;  %v1559_v46 = vor.u32 %v1813_v36, %v1558_v35 }
  0xbc   : > { %971 = vmatmul.bf16.gmra.mxu1 %v1531_v42  ;;  %v1571_v26 = vor.u32 %v1812_v21, %v1568_v22  ;;  %v1814_v42 = vld [vmem:[%s1960_s25 + $0x174] sm:$0xf0] }
  0xbd   : > { %v1186_v52 = vmul.f32 0.1, %v1108_v49  ;;  %1060 = vmatmul.bf16.gmra.mxu2 %v1535_v47  ;;  %v1112_v54 = vpop.f32.mrf.mxu3  ;;  %v1563_v47 = vor.u32 %v1811_v39, %v1560_v40  ;;  %v1590_v40 = vld [vmem:[%s1960_s25 + $0x1a0] sm:$0xf] }
  0xbf   : > { %v1218_v56 = vmax.f32 %v1108_v49, %v1186_v52  ;;  %v1567_v52 = vor.u32 %v1814_v42, %v1566_v41  ;;  %v1821_v41 = vld [vmem:[%s1960_s25 + $0x1ac] sm:$0xf0] }
  0xc0   : > { %v1021_v57 = vpop.f32.mrf.mxu2  ;;  %v845_v60 = vpop.f32.mrf.mxu0 }
  0xc1   : > { %v1250_v58 = vpack.c.bf16 %v1218_v56, %v1218_v56  ;;  %v1022_v59 = vadd.f32 %v1021_v57, %v933_v53  ;;  %v934_v61 = vpop.f32.mrf.mxu1  ;;  %v846_v63 = vadd.f32 %v2083_v10, %v845_v60  ;;  %v1584_v56 = vld [vmem:[%s1960_s25 + $0x198] sm:$0xf0] }
  0xc2   : > { %1758 = vmatmul.msk.bf16.gmra.mxu3 %vm773_vm2, %v1555_v55  ;;  %v1816_v55 = vld [vmem:[%s1960_s25 + $0x18c] sm:$0xf] }
  0xc3   : > { %1283 = vst.msk [vmem:[%s2102_s6 + $0x4] sm:$0xf] %vm1281_vm3, %v1250_v58  ;;  %v1111_v62 = vadd.f32 %v1110_v33, %v1022_v59  ;;  %v935_v9 = vadd.f32 %v934_v61, %v846_v63  ;;  %v1587_v60 = vor.u32 %v1816_v55, %v1584_v56 }
  0xc5   : > { %v1187_v2 = vmul.f32 0.1, %v1111_v62  ;;  %v1115_v3 = vpop.f32.mrf.mxu3 }
  0xc7   : > { %v1219_v8 = vmax.f32 %v1111_v62, %v1187_v2 }
  0xc8   : > { %v1023_v11 = vpop.f32.mrf.mxu2  ;;  %v848_v16 = vpop.f32.mrf.mxu0 }
  0xc9   : > { %v1251_v14 = vpack.c.bf16 %v1219_v8, %v1219_v8  ;;  %v1024_v15 = vadd.f32 %v1023_v11, %v935_v9  ;;  %v937_v17 = vpop.f32.mrf.mxu1  ;;  %v849_v19 = vadd.f32 %v2083_v10, %v848_v16  ;;  %v1815_v9 = vld [vmem:[%s1960_s25 + $0x184] sm:$0xf]  ;;  %v1576_v11 = vld [vmem:[%s1960_s25 + $0x190] sm:$0xf0] }
  0xcb   : > { %1284 = vst.msk [vmem:[%s2102_s6 + $0x8] sm:$0xf] %vm1281_vm3, %v1251_v14  ;;  %v1113_v20 = vadd.f32 %v1112_v54, %v1024_v15  ;;  %887 = vmatmul.bf16.gmra.mxu0 %v1543_v12  ;;  %v938_v24 = vadd.f32 %v937_v17, %v849_v19  ;;  %v1582_v12 = vld [vmem:[%s1960_s25 + $0x188] sm:$0xf]  ;;  %v1575_v17 = vor.u32 %v1817_v6, %v1574_v5 }
  0xcc   : > { %976 = vmatmul.bf16.gmra.mxu1 %v1547_v13  ;;  %v1818_v13 = vld [vmem:[%s1960_s25 + $0x194] sm:$0xf0] }
  0xcd   : > { %v1188_v23 = vmul.f32 0.1, %v1113_v20  ;;  %1065 = vmatmul.bf16.gmra.mxu2 %v1551_v18  ;;  %v1117_v25 = vpop.f32.mrf.mxu3  ;;  %v1579_v18 = vor.u32 %v1815_v9, %v1576_v11  ;;  %v1606_v11 = vld [vmem:[%s1960_s25 + $0x1c0] sm:$0xf] }
  0xcf   : > { %v1220_v27 = vmax.f32 %v1113_v20, %v1188_v23  ;;  %v1583_v23 = vor.u32 %v1818_v13, %v1582_v12  ;;  %v1825_v12 = vld [vmem:[%s1960_s25 + $0x1cc] sm:$0xf0] }
  0xd0   : > { %v1026_v28 = vpop.f32.mrf.mxu2  ;;  %v850_v31 = vpop.f32.mrf.mxu0 }
  0xd1   : > { %v1252_v29 = vpack.c.bf16 %v1220_v27, %v1220_v27  ;;  %v1027_v30 = vadd.f32 %v1026_v28, %v938_v24  ;;  %v939_v32 = vpop.f32.mrf.mxu1  ;;  %v851_v34 = vadd.f32 %v2083_v10, %v850_v31  ;;  %v1600_v27 = vld [vmem:[%s1960_s25 + $0x1b8] sm:$0xf0] }
  0xd2   : > { %1759 = vmatmul.msk.bf16.gmra.mxu3 %vm773_vm2, %v1571_v26  ;;  %v1820_v26 = vld [vmem:[%s1960_s25 + $0x1ac] sm:$0xf] }
  0xd3   : > { %1285 = vst.msk [vmem:[%s2102_s6 + $0xc] sm:$0xf] %vm1281_vm3, %v1252_v29  ;;  %v1116_v33 = vadd.f32 %v1115_v3, %v1027_v30  ;;  %v940_v44 = vadd.f32 %v939_v32, %v851_v34  ;;  %v1603_v31 = vor.u32 %v1820_v26, %v1600_v27 }
  0xd5   : > { %v1189_v37 = vmul.f32 0.1, %v1116_v33  ;;  %v1120_v38 = vpop.f32.mrf.mxu3 }
  0xd7   : > { %v1221_v43 = vmax.f32 %v1116_v33, %v1189_v37 }
  0xd8   : > { %v1028_v45 = vpop.f32.mrf.mxu2  ;;  %v853_v50 = vpop.f32.mrf.mxu0 }
  0xd9   : > { %v1253_v48 = vpack.c.bf16 %v1221_v43, %v1221_v43  ;;  %v1029_v49 = vadd.f32 %v1028_v45, %v940_v44  ;;  %v942_v51 = vpop.f32.mrf.mxu1  ;;  %v854_v53 = vadd.f32 %v2083_v10, %v853_v50  ;;  %v1819_v44 = vld [vmem:[%s1960_s25 + $0x1a4] sm:$0xf]  ;;  %v1592_v45 = vld [vmem:[%s1960_s25 + $0x1b0] sm:$0xf0] }
  0xdb   : > { %1286 = vst.msk [vmem:[%s2102_s6 + $0x10] sm:$0xf] %vm1281_vm3, %v1253_v48  ;;  %v1118_v54 = vadd.f32 %v1117_v25, %v1029_v49  ;;  %892 = vmatmul.bf16.gmra.mxu0 %v1559_v46  ;;  %v943_v58 = vadd.f32 %v942_v51, %v854_v53  ;;  %v1598_v46 = vld [vmem:[%s1960_s25 + $0x1a8] sm:$0xf]  ;;  %v1591_v51 = vor.u32 %v1821_v41, %v1590_v40 }
  0xdc   : > { %981 = vmatmul.bf16.gmra.mxu1 %v1563_v47  ;;  %v1822_v47 = vld [vmem:[%s1960_s25 + $0x1b4] sm:$0xf0] }
  0xdd   : > { %v1190_v57 = vmul.f32 0.1, %v1118_v54  ;;  %1070 = vmatmul.bf16.gmra.mxu2 %v1567_v52  ;;  %v1122_v59 = vpop.f32.mrf.mxu3  ;;  %v1595_v52 = vor.u32 %v1819_v44, %v1592_v45  ;;  %v1622_v45 = vld [vmem:[%s1960_s25 + $0x1e0] sm:$0xf] }
  0xdf   : > { %v1222_v61 = vmax.f32 %v1118_v54, %v1190_v57  ;;  %v1599_v57 = vor.u32 %v1822_v47, %v1598_v46  ;;  %v1829_v46 = vld [vmem:[%s1960_s25 + $0x1ec] sm:$0xf0] }
  0xe0   : > { %v1031_v62 = vpop.f32.mrf.mxu2  ;;  %v855_v1 = vpop.f32.mrf.mxu0 }
  0xe1   : > { %v1254_v63 = vpack.c.bf16 %v1222_v61, %v1222_v61  ;;  %v1032_v0 = vadd.f32 %v1031_v62, %v943_v58  ;;  %v944_v2 = vpop.f32.mrf.mxu1  ;;  %v856_v4 = vadd.f32 %v2083_v10, %v855_v1  ;;  %v1616_v61 = vld [vmem:[%s1960_s25 + $0x1d8] sm:$0xf0] }
  0xe2   : > { %1760 = vmatmul.msk.bf16.gmra.mxu3 %vm773_vm2, %v1587_v60  ;;  %v1824_v60 = vld [vmem:[%s1960_s25 + $0x1cc] sm:$0xf] }
  0xe3   : > { %1287 = vst.msk [vmem:[%s2102_s6 + $0x14] sm:$0xf] %vm1281_vm3, %v1254_v63  ;;  %v1121_v3 = vadd.f32 %v1120_v38, %v1032_v0  ;;  %v945_v15 = vadd.f32 %v944_v2, %v856_v4  ;;  %v1619_v1 = vor.u32 %v1824_v60, %v1616_v61 }
  0xe5   : > { %v1191_v7 = vmul.f32 0.1, %v1121_v3  ;;  %v1125_v8 = vpop.f32.mrf.mxu3 }
  0xe7   : > { %v1223_v14 = vmax.f32 %v1121_v3, %v1191_v7 }
  0xe8   : > { %v1033_v16 = vpop.f32.mrf.mxu2  ;;  %v858_v21 = vpop.f32.mrf.mxu0 }
  0xe9   : > { %v1255_v19 = vpack.c.bf16 %v1223_v14, %v1223_v14  ;;  %v1034_v20 = vadd.f32 %v1033_v16, %v945_v15  ;;  %v947_v22 = vpop.f32.mrf.mxu1  ;;  %v859_v24 = vadd.f32 %v2083_v10, %v858_v21  ;;  %v1823_v15 = vld [vmem:[%s1960_s25 + $0x1c4] sm:$0xf]  ;;  %v1608_v16 = vld [vmem:[%s1960_s25 + $0x1d0] sm:$0xf0] }
  0xeb   : > { %1288 = vst.msk [vmem:[%s2102_s6 + $0x18] sm:$0xf] %vm1281_vm3, %v1255_v19  ;;  %v1123_v25 = vadd.f32 %v1122_v59, %v1034_v20  ;;  %897 = vmatmul.bf16.gmra.mxu0 %v1575_v17  ;;  %v948_v29 = vadd.f32 %v947_v22, %v859_v24  ;;  %v1614_v17 = vld [vmem:[%s1960_s25 + $0x1c8] sm:$0xf]  ;;  %v1607_v22 = vor.u32 %v1825_v12, %v1606_v11 }
  0xec   : > { %986 = vmatmul.bf16.gmra.mxu1 %v1579_v18  ;;  %v1826_v18 = vld [vmem:[%s1960_s25 + $0x1d4] sm:$0xf0] }
  0xed   : > { %v1192_v28 = vmul.f32 0.1, %v1123_v25  ;;  %1075 = vmatmul.bf16.gmra.mxu2 %v1583_v23  ;;  %v1127_v30 = vpop.f32.mrf.mxu3  ;;  %v1611_v23 = vor.u32 %v1823_v15, %v1608_v16 }
  0xef   : > { %v1224_v32 = vmax.f32 %v1123_v25, %v1192_v28  ;;  %v1615_v28 = vor.u32 %v1826_v18, %v1614_v17 }
  0xf0   : > { %v1036_v33 = vpop.f32.mrf.mxu2  ;;  %v860_v36 = vpop.f32.mrf.mxu0 }
  0xf1   : > { %v1256_v34 = vpack.c.bf16 %v1224_v32, %v1224_v32  ;;  %v1037_v35 = vadd.f32 %v1036_v33, %v948_v29  ;;  %v949_v37 = vpop.f32.mrf.mxu1  ;;  %v861_v39 = vadd.f32 %v2083_v10, %v860_v36  ;;  %v1632_v32 = vld [vmem:[%s1960_s25 + $0x1f8] sm:$0xf0] }
  0xf2   : > { %1761 = vmatmul.msk.bf16.gmra.mxu3 %vm773_vm2, %v1603_v31  ;;  %v1828_v31 = vld [vmem:[%s1960_s25 + $0x1ec] sm:$0xf] }
  0xf3   : > { %1289 = vst.msk [vmem:[%s2102_s6 + $0x1c] sm:$0xf] %vm1281_vm3, %v1256_v34  ;;  %v1126_v38 = vadd.f32 %v1125_v8, %v1037_v35  ;;  %v950_v49 = vadd.f32 %v949_v37, %v861_v39  ;;  %v1635_v36 = vor.u32 %v1828_v31, %v1632_v32 }
  0xf5   : > { %v1193_v42 = vmul.f32 0.1, %v1126_v38  ;;  %v1130_v43 = vpop.f32.mrf.mxu3 }
  0xf7   : > { %v1225_v48 = vmax.f32 %v1126_v38, %v1193_v42 }
  0xf8   : > { %v1038_v50 = vpop.f32.mrf.mxu2  ;;  %v863_v55 = vpop.f32.mrf.mxu0 }
  0xf9   : > { %v1257_v53 = vpack.c.bf16 %v1225_v48, %v1225_v48  ;;  %v1039_v54 = vadd.f32 %v1038_v50, %v950_v49  ;;  %v952_v56 = vpop.f32.mrf.mxu1  ;;  %v864_v58 = vadd.f32 %v2083_v10, %v863_v55  ;;  %v1827_v49 = vld [vmem:[%s1960_s25 + $0x1e4] sm:$0xf]  ;;  %v1624_v50 = vld [vmem:[%s1960_s25 + $0x1f0] sm:$0xf0] }
  0xfb   : > { %1290 = vst.msk [vmem:[%s2102_s6 + $0x20] sm:$0xf] %vm1281_vm3, %v1257_v53  ;;  %v1128_v59 = vadd.f32 %v1127_v30, %v1039_v54  ;;  %902 = vmatmul.bf16.gmra.mxu0 %v1591_v51  ;;  %v953_v63 = vadd.f32 %v952_v56, %v864_v58  ;;  %v1630_v51 = vld [vmem:[%s1960_s25 + $0x1e8] sm:$0xf]  ;;  %v1623_v56 = vor.u32 %v1829_v46, %v1622_v45 }
  0xfc   : > { %991 = vmatmul.bf16.gmra.mxu1 %v1595_v52  ;;  %v1830_v52 = vld [vmem:[%s1960_s25 + $0x1f4] sm:$0xf0] }
  0xfd   : > { %v1194_v62 = vmul.f32 0.1, %v1128_v59  ;;  %1080 = vmatmul.bf16.gmra.mxu2 %v1599_v57  ;;  %v1132_v0 = vpop.f32.mrf.mxu3  ;;  %v1627_v57 = vor.u32 %v1827_v49, %v1624_v50 }
  0xff   : > { %v1226_v2 = vmax.f32 %v1128_v59, %v1194_v62  ;;  %v1631_v62 = vor.u32 %v1830_v52, %v1630_v51 }
 0x100   : > { %v1041_v3 = vpop.f32.mrf.mxu2  ;;  %v865_v6 = vpop.f32.mrf.mxu0 }
 0x101   : > { %v1258_v4 = vpack.c.bf16 %v1226_v2, %v1226_v2  ;;  %v1042_v5 = vadd.f32 %v1041_v3, %v953_v63  ;;  %v954_v7 = vpop.f32.mrf.mxu1  ;;  %v866_v9 = vadd.f32 %v2083_v10, %v865_v6 }
 0x102   : > { %1762 = vmatmul.msk.bf16.gmra.mxu3 %vm773_vm2, %v1619_v1 }
 0x103   : > { %1291 = vst.msk [vmem:[%s2102_s6 + $0x24] sm:$0xf] %vm1281_vm3, %v1258_v4  ;;  %v1131_v8 = vadd.f32 %v1130_v43, %v1042_v5  ;;  %v955_v20 = vadd.f32 %v954_v7, %v866_v9 }
 0x105   : > { %v1195_v13 = vmul.f32 0.1, %v1131_v8  ;;  %v1135_v14 = vpop.f32.mrf.mxu3 }
 0x107   : > { %v1227_v19 = vmax.f32 %v1131_v8, %v1195_v13 }
 0x108   : > { %v1043_v21 = vpop.f32.mrf.mxu2  ;;  %v868_v26 = vpop.f32.mrf.mxu0 }
 0x109   : > { %v1259_v24 = vpack.c.bf16 %v1227_v19, %v1227_v19  ;;  %v1044_v25 = vadd.f32 %v1043_v21, %v955_v20  ;;  %v957_v27 = vpop.f32.mrf.mxu1  ;;  %v869_v29 = vadd.f32 %v2083_v10, %v868_v26 }
 0x10b   : > { %1292 = vst.msk [vmem:[%s2102_s6 + $0x28] sm:$0xf] %vm1281_vm3, %v1259_v24  ;;  %v1133_v30 = vadd.f32 %v1132_v0, %v1044_v25  ;;  %907 = vmatmul.bf16.gmra.mxu0 %v1607_v22  ;;  %v958_v34 = vadd.f32 %v957_v27, %v869_v29 }
 0x10c   : > { %996 = vmatmul.bf16.gmra.mxu1 %v1611_v23 }
 0x10d   : > { %v1196_v33 = vmul.f32 0.1, %v1133_v30  ;;  %1085 = vmatmul.bf16.gmra.mxu2 %v1615_v28  ;;  %v1137_v35 = vpop.f32.mrf.mxu3 }
 0x10f   : > { %v1228_v37 = vmax.f32 %v1133_v30, %v1196_v33 }
 0x110   : > { %v1046_v38 = vpop.f32.mrf.mxu2  ;;  %v870_v41 = vpop.f32.mrf.mxu0 }
 0x111   : > { %v1260_v39 = vpack.c.bf16 %v1228_v37, %v1228_v37  ;;  %v1047_v40 = vadd.f32 %v1046_v38, %v958_v34  ;;  %v959_v42 = vpop.f32.mrf.mxu1  ;;  %v871_v44 = vadd.f32 %v2083_v10, %v870_v41 }
 0x112   : > { %1763 = vmatmul.msk.bf16.gmra.mxu3 %vm773_vm2, %v1635_v36 }
 0x113   : > { %1293 = vst.msk [vmem:[%s2102_s6 + $0x2c] sm:$0xf] %vm1281_vm3, %v1260_v39  ;;  %v1136_v43 = vadd.f32 %v1135_v14, %v1047_v40  ;;  %v960_v54 = vadd.f32 %v959_v42, %v871_v44 }
 0x115   : > { %v1197_v47 = vmul.f32 0.1, %v1136_v43  ;;  %v1140_v48 = vpop.f32.mrf.mxu3 }
 0x117   : > { %v1229_v53 = vmax.f32 %v1136_v43, %v1197_v47 }
 0x118   : > { %v1048_v55 = vpop.f32.mrf.mxu2  ;;  %v873_v60 = vpop.f32.mrf.mxu0 }
 0x119   : > { %v1261_v58 = vpack.c.bf16 %v1229_v53, %v1229_v53  ;;  %v1049_v59 = vadd.f32 %v1048_v55, %v960_v54  ;;  %v962_v61 = vpop.f32.mrf.mxu1  ;;  %v874_v63 = vadd.f32 %v2083_v10, %v873_v60 }
 0x11b   : > { %1294 = vst.msk [vmem:[%s2102_s6 + $0x30] sm:$0xf] %vm1281_vm3, %v1261_v58  ;;  %v1138_v0 = vadd.f32 %v1137_v35, %v1049_v59  ;;  %912 = vmatmul.bf16.gmra.mxu0 %v1623_v56  ;;  %v963_v2 = vadd.f32 %v962_v61, %v874_v63 }
 0x11c   : > { %1001 = vmatmul.bf16.gmra.mxu1 %v1627_v57 }
 0x11d   : > { %v1198_v1 = vmul.f32 0.1, %v1138_v0  ;;  %1090 = vmatmul.bf16.gmra.mxu2 %v1631_v62  ;;  %v1142_v3 = vpop.f32.mrf.mxu3 }
 0x11f   : > { %v1230_v4 = vmax.f32 %v1138_v0, %v1198_v1 }
 0x120   : > { %v1051_v5 = vpop.f32.mrf.mxu2  ;;  %v875_v8 = vpop.f32.mrf.mxu0 }
 0x121   : > { %v1262_v6 = vpack.c.bf16 %v1230_v4, %v1230_v4  ;;  %v1052_v7 = vadd.f32 %v1051_v5, %v963_v2  ;;  %v964_v9 = vpop.f32.mrf.mxu1  ;;  %v876_v12 = vadd.f32 %v2083_v10, %v875_v8 }
 0x123   : > { %1295 = vst.msk [vmem:[%s2102_s6 + $0x34] sm:$0xf] %vm1281_vm3, %v1262_v6  ;;  %v1141_v11 = vadd.f32 %v1140_v48, %v1052_v7  ;;  %v965_v16 = vadd.f32 %v964_v9, %v876_v12 }
 0x125   : > { %v1199_v13 = vmul.f32 0.1, %v1141_v11  ;;  %v1145_v14 = vpop.f32.mrf.mxu3 }
 0x127   : > { %v1231_v15 = vmax.f32 %v1141_v11, %v1199_v13 }
 0x128   : > { %v1053_v17 = vpop.f32.mrf.mxu2  ;;  %v878_v20 = vpop.f32.mrf.mxu0 }
 0x129   : > { %v1263_v18 = vpack.c.bf16 %v1231_v15, %v1231_v15  ;;  %v1054_v19 = vadd.f32 %v1053_v17, %v965_v16  ;;  %v967_v21 = vpop.f32.mrf.mxu1  ;;  %v879_v22 = vadd.f32 %v2083_v10, %v878_v20 }
 0x12b   : > { %1296 = vst.msk [vmem:[%s2102_s6 + $0x38] sm:$0xf] %vm1281_vm3, %v1263_v18  ;;  %v1143_v23 = vadd.f32 %v1142_v3, %v1054_v19  ;;  %v968_v25 = vadd.f32 %v967_v21, %v879_v22 }
 0x12d   : > { %v1200_v24 = vmul.f32 0.1, %v1143_v23  ;;  %v1147_v26 = vpop.f32.mrf.mxu3 }
 0x12f   : > { %v1232_v27 = vmax.f32 %v1143_v23, %v1200_v24 }
 0x130   : > { %v1056_v28 = vpop.f32.mrf.mxu2  ;;  %v880_v31 = vpop.f32.mrf.mxu0 }
 0x131   : > { %v1264_v29 = vpack.c.bf16 %v1232_v27, %v1232_v27  ;;  %v1057_v30 = vadd.f32 %v1056_v28, %v968_v25  ;;  %v969_v32 = vpop.f32.mrf.mxu1  ;;  %v881_v34 = vadd.f32 %v2083_v10, %v880_v31 }
 0x133   : > { %1297 = vst.msk [vmem:[%s2102_s6 + $0x3c] sm:$0xf] %vm1281_vm3, %v1264_v29  ;;  %v1146_v33 = vadd.f32 %v1145_v14, %v1057_v30  ;;  %v970_v38 = vadd.f32 %v969_v32, %v881_v34 }
 0x135   : > { %v1201_v35 = vmul.f32 0.1, %v1146_v33  ;;  %v1150_v36 = vpop.f32.mrf.mxu3 }
 0x137   : > { %v1233_v37 = vmax.f32 %v1146_v33, %v1201_v35 }
 0x138   : > { %v1058_v39 = vpop.f32.mrf.mxu2  ;;  %v883_v42 = vpop.f32.mrf.mxu0 }
 0x139   : > { %v1265_v40 = vpack.c.bf16 %v1233_v37, %v1233_v37  ;;  %v1059_v41 = vadd.f32 %v1058_v39, %v970_v38  ;;  %v972_v43 = vpop.f32.mrf.mxu1  ;;  %v884_v44 = vadd.f32 %v2083_v10, %v883_v42 }
 0x13b   : > { %1298 = vst.msk [vmem:[%s2102_s6 + $0x40] sm:$0xf] %vm1281_vm3, %v1265_v40  ;;  %v1148_v45 = vadd.f32 %v1147_v26, %v1059_v41  ;;  %v973_v47 = vadd.f32 %v972_v43, %v884_v44 }
 0x13d   : > { %v1202_v46 = vmul.f32 0.1, %v1148_v45  ;;  %v1152_v48 = vpop.f32.mrf.mxu3 }
 0x13f   : > { %v1234_v49 = vmax.f32 %v1148_v45, %v1202_v46 }
 0x140   : > { %v1061_v50 = vpop.f32.mrf.mxu2  ;;  %v885_v53 = vpop.f32.mrf.mxu0 }
 0x141   : > { %v1266_v51 = vpack.c.bf16 %v1234_v49, %v1234_v49  ;;  %v1062_v52 = vadd.f32 %v1061_v50, %v973_v47  ;;  %v974_v54 = vpop.f32.mrf.mxu1  ;;  %v886_v56 = vadd.f32 %v2083_v10, %v885_v53 }
 0x143   : > { %1299 = vst.msk [vmem:[%s2102_s6 + $0x44] sm:$0xf] %vm1281_vm3, %v1266_v51  ;;  %v1151_v55 = vadd.f32 %v1150_v36, %v1062_v52  ;;  %v975_v60 = vadd.f32 %v974_v54, %v886_v56 }
 0x145   : > { %v1203_v57 = vmul.f32 0.1, %v1151_v55  ;;  %v1155_v58 = vpop.f32.mrf.mxu3 }
 0x147   : > { %v1235_v59 = vmax.f32 %v1151_v55, %v1203_v57 }
 0x148   : > { %v1063_v61 = vpop.f32.mrf.mxu2  ;;  %v888_v0 = vpop.f32.mrf.mxu0 }
 0x149   : > { %v1267_v62 = vpack.c.bf16 %v1235_v59, %v1235_v59  ;;  %v1064_v63 = vadd.f32 %v1063_v61, %v975_v60  ;;  %v977_v1 = vpop.f32.mrf.mxu1  ;;  %v889_v2 = vadd.f32 %v2083_v10, %v888_v0 }
 0x14b   : > { %1300 = vst.msk [vmem:[%s2102_s6 + $0x48] sm:$0xf] %vm1281_vm3, %v1267_v62  ;;  %v1153_v3 = vadd.f32 %v1152_v48, %v1064_v63  ;;  %v978_v5 = vadd.f32 %v977_v1, %v889_v2 }
 0x14d   : > { %v1204_v4 = vmul.f32 0.1, %v1153_v3  ;;  %v1157_v6 = vpop.f32.mrf.mxu3 }
 0x14f   : > { %v1236_v7 = vmax.f32 %v1153_v3, %v1204_v4 }
 0x150   : > { %v1066_v8 = vpop.f32.mrf.mxu2  ;;  %v890_v12 = vpop.f32.mrf.mxu0 }
 0x151   : > { %v1268_v9 = vpack.c.bf16 %v1236_v7, %v1236_v7  ;;  %v1067_v11 = vadd.f32 %v1066_v8, %v978_v5  ;;  %v979_v13 = vpop.f32.mrf.mxu1  ;;  %v891_v15 = vadd.f32 %v2083_v10, %v890_v12 }
 0x153   : > { %1301 = vst.msk [vmem:[%s2102_s6 + $0x4c] sm:$0xf] %vm1281_vm3, %v1268_v9  ;;  %v1156_v14 = vadd.f32 %v1155_v58, %v1067_v11  ;;  %v980_v19 = vadd.f32 %v979_v13, %v891_v15 }
 0x155   : > { %v1205_v16 = vmul.f32 0.1, %v1156_v14  ;;  %v1160_v17 = vpop.f32.mrf.mxu3 }
 0x157   : > { %v1237_v18 = vmax.f32 %v1156_v14, %v1205_v16 }
 0x158   : > { %v1068_v20 = vpop.f32.mrf.mxu2  ;;  %v893_v23 = vpop.f32.mrf.mxu0 }
 0x159   : > { %v1269_v21 = vpack.c.bf16 %v1237_v18, %v1237_v18  ;;  %v1069_v22 = vadd.f32 %v1068_v20, %v980_v19  ;;  %v982_v24 = vpop.f32.mrf.mxu1  ;;  %v894_v25 = vadd.f32 %v2083_v10, %v893_v23 }
 0x15b   : > { %1302 = vst.msk [vmem:[%s2102_s6 + $0x50] sm:$0xf] %vm1281_vm3, %v1269_v21  ;;  %v1158_v26 = vadd.f32 %v1157_v6, %v1069_v22  ;;  %v983_v28 = vadd.f32 %v982_v24, %v894_v25 }
 0x15d   : > { %v1206_v27 = vmul.f32 0.1, %v1158_v26  ;;  %v1162_v29 = vpop.f32.mrf.mxu3 }
 0x15f   : > { %v1238_v30 = vmax.f32 %v1158_v26, %v1206_v27 }
 0x160   : > { %v1071_v31 = vpop.f32.mrf.mxu2  ;;  %v895_v34 = vpop.f32.mrf.mxu0 }
 0x161   : > { %v1270_v32 = vpack.c.bf16 %v1238_v30, %v1238_v30  ;;  %v1072_v33 = vadd.f32 %v1071_v31, %v983_v28  ;;  %v984_v35 = vpop.f32.mrf.mxu1  ;;  %v896_v37 = vadd.f32 %v2083_v10, %v895_v34 }
 0x163   : > { %1303 = vst.msk [vmem:[%s2102_s6 + $0x54] sm:$0xf] %vm1281_vm3, %v1270_v32  ;;  %v1161_v36 = vadd.f32 %v1160_v17, %v1072_v33  ;;  %v985_v41 = vadd.f32 %v984_v35, %v896_v37 }
 0x165   : > { %v1207_v38 = vmul.f32 0.1, %v1161_v36  ;;  %v1165_v39 = vpop.f32.mrf.mxu3 }
 0x167   : > { %v1239_v40 = vmax.f32 %v1161_v36, %v1207_v38 }
 0x168   : > { %v1073_v42 = vpop.f32.mrf.mxu2  ;;  %v898_v45 = vpop.f32.mrf.mxu0 }
 0x169   : > { %v1271_v43 = vpack.c.bf16 %v1239_v40, %v1239_v40  ;;  %v1074_v44 = vadd.f32 %v1073_v42, %v985_v41  ;;  %v987_v46 = vpop.f32.mrf.mxu1  ;;  %v899_v47 = vadd.f32 %v2083_v10, %v898_v45 }
 0x16b   : > { %1304 = vst.msk [vmem:[%s2102_s6 + $0x58] sm:$0xf] %vm1281_vm3, %v1271_v43  ;;  %v1163_v48 = vadd.f32 %v1162_v29, %v1074_v44  ;;  %v988_v50 = vadd.f32 %v987_v46, %v899_v47 }
 0x16d   : > { %v1208_v49 = vmul.f32 0.1, %v1163_v48  ;;  %v1167_v51 = vpop.f32.mrf.mxu3 }
 0x16f   : > { %v1240_v52 = vmax.f32 %v1163_v48, %v1208_v49 }
 0x170   : > { %v1076_v53 = vpop.f32.mrf.mxu2  ;;  %v900_v56 = vpop.f32.mrf.mxu0 }
 0x171   : > { %v1272_v54 = vpack.c.bf16 %v1240_v52, %v1240_v52  ;;  %v1077_v55 = vadd.f32 %v1076_v53, %v988_v50  ;;  %v989_v57 = vpop.f32.mrf.mxu1  ;;  %v901_v59 = vadd.f32 %v2083_v10, %v900_v56 }
 0x173   : > { %1305 = vst.msk [vmem:[%s2102_s6 + $0x5c] sm:$0xf] %vm1281_vm3, %v1272_v54  ;;  %v1166_v58 = vadd.f32 %v1165_v39, %v1077_v55  ;;  %v990_v62 = vadd.f32 %v989_v57, %v901_v59 }
 0x175   : > { %v1209_v60 = vmul.f32 0.1, %v1166_v58  ;;  %v1170_v0 = vpop.f32.mrf.mxu3 }
 0x177   : > { %v1241_v61 = vmax.f32 %v1166_v58, %v1209_v60 }
 0x178   : > { %v1078_v63 = vpop.f32.mrf.mxu2  ;;  %v903_v3 = vpop.f32.mrf.mxu0 }
 0x179   : > { %v1273_v1 = vpack.c.bf16 %v1241_v61, %v1241_v61  ;;  %v1079_v2 = vadd.f32 %v1078_v63, %v990_v62  ;;  %v992_v4 = vpop.f32.mrf.mxu1  ;;  %v904_v5 = vadd.f32 %v2083_v10, %v903_v3 }
 0x17b   : > { %1306 = vst.msk [vmem:[%s2102_s6 + $0x60] sm:$0xf] %vm1281_vm3, %v1273_v1  ;;  %v1168_v6 = vadd.f32 %v1167_v51, %v1079_v2  ;;  %v993_v8 = vadd.f32 %v992_v4, %v904_v5 }
 0x17d   : > { %v1210_v7 = vmul.f32 0.1, %v1168_v6  ;;  %v1172_v16 = vpop.f32.mrf.mxu3 }
 0x17f   : > { %v1242_v9 = vmax.f32 %v1168_v6, %v1210_v7 }
 0x180   : > { %v1081_v11 = vpop.f32.mrf.mxu2  ;;  %v905_v14 = vpop.f32.mrf.mxu0 }
 0x181   : > { %v1274_v12 = vpack.c.bf16 %v1242_v9, %v1242_v9  ;;  %v1082_v13 = vadd.f32 %v1081_v11, %v993_v8  ;;  %v994_v15 = vpop.f32.mrf.mxu1  ;;  %v906_v18 = vadd.f32 %v2083_v10, %v905_v14 }
 0x183   : > { %1307 = vst.msk [vmem:[%s2102_s6 + $0x64] sm:$0xf] %vm1281_vm3, %v1274_v12  ;;  %v1171_v17 = vadd.f32 %v1170_v0, %v1082_v13  ;;  %v995_v21 = vadd.f32 %v994_v15, %v906_v18 }
 0x185   : > { %v1211_v19 = vmul.f32 0.1, %v1171_v17  ;;  %v1175_v29 = vpop.f32.mrf.mxu3 }
 0x187   : > { %v1243_v20 = vmax.f32 %v1171_v17, %v1211_v19 }
 0x188   : > { %v1083_v22 = vpop.f32.mrf.mxu2  ;;  %v908_v25 = vpop.f32.mrf.mxu0 }
 0x189   : > { %v1275_v23 = vpack.c.bf16 %v1243_v20, %v1243_v20  ;;  %v1084_v24 = vadd.f32 %v1083_v22, %v995_v21  ;;  %v997_v26 = vpop.f32.mrf.mxu1  ;;  %v909_v27 = vadd.f32 %v2083_v10, %v908_v25 }
 0x18b   : > { %1308 = vst.msk [vmem:[%s2102_s6 + $0x68] sm:$0xf] %vm1281_vm3, %v1275_v23  ;;  %v1173_v28 = vadd.f32 %v1172_v16, %v1084_v24  ;;  %v998_v31 = vadd.f32 %v997_v26, %v909_v27 }
 0x18d   : > { %v1212_v30 = vmul.f32 0.1, %v1173_v28  ;;  %v1177_v41 = vpop.f32.mrf.mxu3 }
 0x18f   : > { %v1244_v32 = vmax.f32 %v1173_v28, %v1212_v30 }
 0x190   : > { %v1086_v33 = vpop.f32.mrf.mxu2  ;;  %v910_v36 = vpop.f32.mrf.mxu0 }
 0x191   : > { %v1276_v34 = vpack.c.bf16 %v1244_v32, %v1244_v32  ;;  %v1087_v35 = vadd.f32 %v1086_v33, %v998_v31  ;;  %v999_v37 = vpop.f32.mrf.mxu1  ;;  %v911_v39 = vadd.f32 %v2083_v10, %v910_v36 }
 0x193   : > { %1309 = vst.msk [vmem:[%s2102_s6 + $0x6c] sm:$0xf] %vm1281_vm3, %v1276_v34  ;;  %v1176_v38 = vadd.f32 %v1175_v29, %v1087_v35  ;;  %v1000_v43 = vadd.f32 %v999_v37, %v911_v39 }
 0x195   : > { %v1213_v40 = vmul.f32 0.1, %v1176_v38  ;;  %v1180_v54 = vpop.f32.mrf.mxu3 }
 0x197   : > { %v1245_v42 = vmax.f32 %v1176_v38, %v1213_v40 }
 0x198   : > { %v1088_v44 = vpop.f32.mrf.mxu2  ;;  %v913_v47 = vpop.f32.mrf.mxu0 }
 0x199   : > { %v1277_v45 = vpack.c.bf16 %v1245_v42, %v1245_v42  ;;  %v1089_v46 = vadd.f32 %v1088_v44, %v1000_v43  ;;  %v914_v48 = vadd.f32 %v2083_v10, %v913_v47  ;;  %v1002_v50 = vpop.f32.mrf.mxu1 }
 0x19b   : > { %1310 = vst.msk [vmem:[%s2102_s6 + $0x70] sm:$0xf] %vm1281_vm3, %v1277_v45  ;;  %v1178_v49 = vadd.f32 %v1177_v41, %v1089_v46  ;;  %v1003_v52 = vadd.f32 %v1002_v50, %v914_v48 }
 0x19d   : > { %v1214_v51 = vmul.f32 0.1, %v1178_v49  ;;  %v1182_v4 = vpop.f32.mrf.mxu3 }
 0x19f   : > { %v1246_v53 = vmax.f32 %v1178_v49, %v1214_v51 }
 0x1a0   : > { %v1091_v55 = vpop.f32.mrf.mxu2  ;;  %v915_v58 = vpop.f32.mrf.mxu0 }
 0x1a1   : > { %v1278_v56 = vpack.c.bf16 %v1246_v53, %v1246_v53  ;;  %v1092_v57 = vadd.f32 %v1091_v55, %v1003_v52  ;;  %v916_v60 = vadd.f32 %v2083_v10, %v915_v58  ;;  %v1004_v62 = vpop.f32.mrf.mxu1 }
 0x1a3   : > { %1311 = vst.msk [vmem:[%s2102_s6 + $0x74] sm:$0xf] %vm1281_vm3, %v1278_v56  ;;  %v1181_v59 = vadd.f32 %v1180_v54, %v1092_v57  ;;  %v1005_v0 = vadd.f32 %v1004_v62, %v916_v60 }
 0x1a5   : > { %v1215_v61 = vmul.f32 0.1, %v1181_v59 }
 0x1a7   : > { %v1247_v63 = vmax.f32 %v1181_v59, %v1215_v61 }
 0x1a8   : > { %v1093_v1 = vpop.f32.mrf.mxu2 }
 0x1a9   : > { %v1279_v2 = vpack.c.bf16 %v1247_v63, %v1247_v63  ;;  %v1094_v3 = vadd.f32 %v1093_v1, %v1005_v0 }
 0x1ab   : > { %1312 = vst.msk [vmem:[%s2102_s6 + $0x78] sm:$0xf] %vm1281_vm3, %v1279_v2  ;;  %v1183_v5 = vadd.f32 %v1182_v4, %v1094_v3 }
 0x1ad   : > { %v1216_v6 = vmul.f32 0.1, %v1183_v5 }
 0x1af   : > { %v1248_v7 = vmax.f32 %v1183_v5, %v1216_v6 }
 0x1b1   : > { %v1280_v8 = vpack.c.bf16 %v1248_v7, %v1248_v7 }
 0x1b3   : > { %1313 = vst.msk [vmem:[%s2102_s6 + $0x7c] sm:$0xf] %vm1281_vm3, %v1280_v8 }
 0x1b4 PF: > { %s13_s12 = sadd.s32 1, %s1875_s12  }
 0x1b5   : > { %p10_p4 = scmp.ge.s32.totalorder %s13_s12, 4  }
 0x1b7   :  { %12 = sbr.rel (!%p10_p4) target bundleno = 1 (0x1), region = 62 }

// kernel: resnet_forward.28
= control target key start
LH: loop header
LB: loop body
LE: loop exit
PB: predicated region body
PF: predicated region fallthrough
CT: control target
= control target key end

     0   :  { %vm107_vm0 = vcmask 523264   ;;  %vm229_vm1 = vcmask 519168   ;;  %s480_s1 = inlined_call_operand.vmem [shape: bf16[64,64], index: 1, kind: input, shape index: {}]   ;;  %s481_s2 = inlined_call_operand.vmem [shape: f32[1,64], index: 2, kind: input, shape index: {}]   ;;  %s482_s0 = inlined_call_operand.vmem [shape: bf16[128,64], index: 0, kind: input, shape index: {}]   ;;  %s483_s3 = inlined_call_operand.vmem [shape: bf16[128,64], index: 3, kind: output, shape index: {}]  }
   0x1   :  { %v317_v0 = vld [vmem:[%s480_s1 + $0x18] sm:$0xff]  ;;  %v316_v1 = vld [vmem:[%s480_s1 + $0x10] sm:$0xff]  ;;  %v315_v2 = vld [vmem:[%s480_s1 + $0x8] sm:$0xff] }
   0x2   :  { %136 = vmatpush.bf16.msra.mxu0 %v317_v0  ;;  %318 = vmatpush.bf16.msra.mxu1 %v317_v0  ;;  %v314_v3 = vld [vmem:[%s480_s1] sm:$0xff]  ;;  %v308_v5 = vld [vmem:[%s482_s0 + $0x10] sm:$0xff]  ;;  %v307_v8 = vld [vmem:[%s482_s0 + $0x8] sm:$0xff] }
   0x3   :  { %319 = vmatpush.bf16.msra.mxu2 %v317_v0  ;;  %320 = vmatpush.bf16.msra.mxu3 %v317_v0  ;;  %v306_v4 = vld [vmem:[%s482_s0] sm:$0xff]  ;;  %v312_v7 = vld [vmem:[%s482_s0 + $0x30] sm:$0xff]  ;;  %v309_v9 = vld [vmem:[%s482_s0 + $0x18] sm:$0xff] }
   0x4   :  { %v310_v6 = vld [vmem:[%s482_s0 + $0x20] sm:$0xff]  ;;  %v311_v10 = vld [vmem:[%s482_s0 + $0x28] sm:$0xff]  ;;  %v313_v11 = vld [vmem:[%s482_s0 + $0x38] sm:$0xff] }
   0x5   :  { %v398_v12 = vld [vmem:[%s481_s2] ss:$0 sm:$0xff] }
   0x6   :  { %137 = vmatpush.bf16.msra.mxu0 %v316_v1  ;;  %321 = vmatpush.bf16.msra.mxu1 %v316_v1 }
   0x7   :  { %322 = vmatpush.bf16.msra.mxu2 %v316_v1  ;;  %323 = vmatpush.bf16.msra.mxu3 %v316_v1 }
   0xa   :  { %138 = vmatpush.bf16.msra.mxu0 %v315_v2  ;;  %324 = vmatpush.bf16.msra.mxu1 %v315_v2 }
   0xb   :  { %325 = vmatpush.bf16.msra.mxu2 %v315_v2  ;;  %326 = vmatpush.bf16.msra.mxu3 %v315_v2 }
   0xe   :  { %139 = vmatpush.bf16.msra.mxu0 %v314_v3  ;;  %327 = vmatpush.bf16.msra.mxu1 %v314_v3 }
   0xf   :  { %328 = vmatpush.bf16.msra.mxu2 %v314_v3  ;;  %329 = vmatpush.bf16.msra.mxu3 %v314_v3 }
  0x11   :  { %298 = vmatmul.msk.bf16.vlgmr.msra.gmra.mxu0 %vm107_vm0, %v306_v4  ;;  %300 = vmatmul.msk.bf16.vlgmr.msra.gmra.mxu1 %vm107_vm0, %v308_v5 }
  0x12   :  { %302 = vmatmul.msk.bf16.vlgmr.msra.gmra.mxu2 %vm107_vm0, %v310_v6  ;;  %304 = vmatmul.msk.bf16.vlgmr.msra.gmra.mxu3 %vm107_vm0, %v312_v7 }
  0x21   :  { %299 = vmatmul.msk.bf16.gmra.mxu0 %vm107_vm0, %v307_v8  ;;  %301 = vmatmul.msk.bf16.gmra.mxu1 %vm107_vm0, %v309_v9 }
  0x22   :  { %303 = vmatmul.msk.bf16.gmra.mxu2 %vm107_vm0, %v311_v10  ;;  %305 = vmatmul.msk.bf16.gmra.mxu3 %vm107_vm0, %v313_v11 }
  0x8e   :  { %v141_v13 = vpop.f32.mrf.mxu0  ;;  %v151_v14 = vpop.f32.mrf.mxu1 }
  0x8f   :  { %v142_v15 = vadd.f32 %v398_v12, %v141_v13  ;;  %v152_v16 = vadd.f32 %v398_v12, %v151_v14 }
  0x91   :  { %v181_v17 = vmul.f32 0.1, %v142_v15  ;;  %v185_v18 = vmul.f32 0.1, %v152_v16 }
  0x93   :  { %v197_v19 = vmax.f32 %v142_v15, %v181_v17  ;;  %v201_v20 = vmax.f32 %v152_v16, %v185_v18 }
  0x95   :  { %v213_v21 = vpack.c.bf16 %v197_v19, %v197_v19  ;;  %v217_v22 = vpack.c.bf16 %v201_v20, %v201_v20  ;;  %v161_v23 = vpop.f32.mrf.mxu2  ;;  %v171_v24 = vpop.f32.mrf.mxu3 }
  0x96   :  { %v162_v25 = vadd.f32 %v398_v12, %v161_v23  ;;  %v172_v26 = vadd.f32 %v398_v12, %v171_v24  ;;  %v143_v27 = vpop.f32.mrf.mxu0  ;;  %v153_v28 = vpop.f32.mrf.mxu1 }
  0x97   :  { %230 = vst.msk [vmem:[%s483_s3] sm:$0xf] %vm229_vm1, %v213_v21  ;;  %v144_v29 = vadd.f32 %v398_v12, %v143_v27  ;;  %v154_v30 = vadd.f32 %v398_v12, %v153_v28 }
  0x98   :  { %234 = vst.msk [vmem:[%s483_s3 + $0x10] sm:$0xf] %vm229_vm1, %v217_v22  ;;  %v189_v31 = vmul.f32 0.1, %v162_v25  ;;  %v193_v32 = vmul.f32 0.1, %v172_v26 }
  0x99   :  { %v182_v33 = vmul.f32 0.1, %v144_v29  ;;  %v186_v34 = vmul.f32 0.1, %v154_v30 }
  0x9a   :  { %v205_v35 = vmax.f32 %v162_v25, %v189_v31  ;;  %v209_v36 = vmax.f32 %v172_v26, %v193_v32 }
  0x9b   :  { %v198_v37 = vmax.f32 %v144_v29, %v182_v33  ;;  %v202_v38 = vmax.f32 %v154_v30, %v186_v34 }
  0x9c   :  { %v221_v39 = vpack.c.bf16 %v205_v35, %v205_v35  ;;  %v225_v40 = vpack.c.bf16 %v209_v36, %v209_v36 }
  0x9d   :  { %v214_v41 = vpack.c.bf16 %v198_v37, %v198_v37  ;;  %v218_v42 = vpack.c.bf16 %v202_v38, %v202_v38  ;;  %v163_v43 = vpop.f32.mrf.mxu2  ;;  %v173_v44 = vpop.f32.mrf.mxu3 }
  0x9e   :  { %238 = vst.msk [vmem:[%s483_s3 + $0x20] sm:$0xf] %vm229_vm1, %v221_v39  ;;  %v164_v45 = vadd.f32 %v398_v12, %v163_v43  ;;  %v174_v46 = vadd.f32 %v398_v12, %v173_v44  ;;  %v146_v47 = vpop.f32.mrf.mxu0  ;;  %v156_v48 = vpop.f32.mrf.mxu1 }
  0x9f   :  { %242 = vst.msk [vmem:[%s483_s3 + $0x30] sm:$0xf] %vm229_vm1, %v225_v40  ;;  %v147_v49 = vadd.f32 %v398_v12, %v146_v47  ;;  %v157_v50 = vadd.f32 %v398_v12, %v156_v48 }
  0xa0   :  { %231 = vst.msk [vmem:[%s483_s3 + $0x4] sm:$0xf] %vm229_vm1, %v214_v41  ;;  %v190_v51 = vmul.f32 0.1, %v164_v45  ;;  %v194_v52 = vmul.f32 0.1, %v174_v46 }
  0xa1   :  { %235 = vst.msk [vmem:[%s483_s3 + $0x14] sm:$0xf] %vm229_vm1, %v218_v42  ;;  %v183_v53 = vmul.f32 0.1, %v147_v49  ;;  %v187_v54 = vmul.f32 0.1, %v157_v50 }
  0xa2   :  { %v206_v55 = vmax.f32 %v164_v45, %v190_v51  ;;  %v210_v56 = vmax.f32 %v174_v46, %v194_v52 }
  0xa3   :  { %v199_v57 = vmax.f32 %v147_v49, %v183_v53  ;;  %v203_v58 = vmax.f32 %v157_v50, %v187_v54 }
  0xa4   :  { %v222_v59 = vpack.c.bf16 %v206_v55, %v206_v55  ;;  %v226_v60 = vpack.c.bf16 %v210_v56, %v210_v56 }
  0xa5   :  { %v215_v61 = vpack.c.bf16 %v199_v57, %v199_v57  ;;  %v219_v62 = vpack.c.bf16 %v203_v58, %v203_v58  ;;  %v166_v63 = vpop.f32.mrf.mxu2  ;;  %v176_v0 = vpop.f32.mrf.mxu3 }
  0xa6   :  { %239 = vst.msk [vmem:[%s483_s3 + $0x24] sm:$0xf] %vm229_vm1, %v222_v59  ;;  %v167_v1 = vadd.f32 %v398_v12, %v166_v63  ;;  %v177_v2 = vadd.f32 %v398_v12, %v176_v0  ;;  %v148_v3 = vpop.f32.mrf.mxu0  ;;  %v158_v4 = vpop.f32.mrf.mxu1 }
  0xa7   :  { %243 = vst.msk [vmem:[%s483_s3 + $0x34] sm:$0xf] %vm229_vm1, %v226_v60  ;;  %v149_v5 = vadd.f32 %v398_v12, %v148_v3  ;;  %v159_v6 = vadd.f32 %v398_v12, %v158_v4 }
  0xa8   :  { %232 = vst.msk [vmem:[%s483_s3 + $0x8] sm:$0xf] %vm229_vm1, %v215_v61  ;;  %v191_v7 = vmul.f32 0.1, %v167_v1  ;;  %v195_v8 = vmul.f32 0.1, %v177_v2 }
  0xa9   :  { %236 = vst.msk [vmem:[%s483_s3 + $0x18] sm:$0xf] %vm229_vm1, %v219_v62  ;;  %v184_v9 = vmul.f32 0.1, %v149_v5  ;;  %v188_v10 = vmul.f32 0.1, %v159_v6 }
  0xaa   :  { %v207_v11 = vmax.f32 %v167_v1, %v191_v7  ;;  %v211_v13 = vmax.f32 %v177_v2, %v195_v8 }
  0xab   :  { %v200_v14 = vmax.f32 %v149_v5, %v184_v9  ;;  %v204_v15 = vmax.f32 %v159_v6, %v188_v10 }
  0xac   :  { %v223_v16 = vpack.c.bf16 %v207_v11, %v207_v11  ;;  %v227_v17 = vpack.c.bf16 %v211_v13, %v211_v13 }
  0xad   :  { %v216_v18 = vpack.c.bf16 %v200_v14, %v200_v14  ;;  %v220_v19 = vpack.c.bf16 %v204_v15, %v204_v15  ;;  %v168_v20 = vpop.f32.mrf.mxu2  ;;  %v178_v21 = vpop.f32.mrf.mxu3 }
  0xae   :  { %240 = vst.msk [vmem:[%s483_s3 + $0x28] sm:$0xf] %vm229_vm1, %v223_v16  ;;  %v169_v22 = vadd.f32 %v398_v12, %v168_v20  ;;  %v179_v23 = vadd.f32 %v398_v12, %v178_v21 }
  0xaf   :  { %244 = vst.msk [vmem:[%s483_s3 + $0x38] sm:$0xf] %vm229_vm1, %v227_v17 }
  0xb0   :  { %233 = vst.msk [vmem:[%s483_s3 + $0xc] sm:$0xf] %vm229_vm1, %v216_v18  ;;  %v192_v24 = vmul.f32 0.1, %v169_v22  ;;  %v196_v25 = vmul.f32 0.1, %v179_v23 }
  0xb1   :  { %237 = vst.msk [vmem:[%s483_s3 + $0x1c] sm:$0xf] %vm229_vm1, %v220_v19 }
  0xb2   :  { %v208_v26 = vmax.f32 %v169_v22, %v192_v24  ;;  %v212_v27 = vmax.f32 %v179_v23, %v196_v25 }
  0xb4   :  { %v224_v12 = vpack.c.bf16 %v208_v26, %v208_v26  ;;  %v228_v28 = vpack.c.bf16 %v212_v27, %v212_v27 }
  0xb6   :  { %241 = vst.msk [vmem:[%s483_s3 + $0x2c] sm:$0xf] %vm229_vm1, %v224_v12 }
  0xb7   :  { %245 = vst.msk [vmem:[%s483_s3 + $0x3c] sm:$0xf] %vm229_vm1, %v228_v28 }

// kernel: resnet_forward.26
= control target key start
LH: loop header
LB: loop body
LE: loop exit
PB: predicated region body
PF: predicated region fallthrough
CT: control target
= control target key end

     0   :  { %vm2130_vm0 = vcmask 519168   ;;  %s4380_s0 = inlined_call_operand.vmem [shape: bf16[27,128,64], index: 0, kind: input, shape index: {}]   ;;  %s4381_s1 = inlined_call_operand.vmem [shape: bf16[128,64], index: 1, kind: output, shape index: {}]  }
   0x1   :  { %v2568_v0 = vld [vmem:[%s4380_s0] sm:$0xff]   ;;  %v3431_v1 = vld [vmem:[%s4380_s0 + $0x8] sm:$0xff]   ;;  %v3432_v2 = vld [vmem:[%s4380_s0 + $0x10] sm:$0xff]  }
   0x2   :  { %v3433_v3 = vld [vmem:[%s4380_s0 + $0x18] sm:$0xff]   ;;  %v3434_v4 = vld [vmem:[%s4380_s0 + $0x20] sm:$0xff]   ;;  %v2569_v5 = vunpack.c.l.bf16 %v2568_v0  ;;  %v3435_v6 = vld [vmem:[%s4380_s0 + $0x28] sm:$0xff]   ;;  %v2570_v8 = vunpack.c.h.bf16 %v2568_v0  ;;  %v2573_v9 = vunpack.c.l.bf16 %v3431_v1  ;;  %v2574_v10 = vunpack.c.h.bf16 %v3431_v1 }
   0x3   :  { %v3436_v7 = vld [vmem:[%s4380_s0 + $0x30] sm:$0xff]   ;;  %v2577_v11 = vunpack.c.l.bf16 %v3432_v2  ;;  %v3437_v12 = vld [vmem:[%s4380_s0 + $0x38] sm:$0xff]   ;;  %v3438_v13 = vld [vmem:[%s4380_s0 + $0x40] sm:$0xff]   ;;  %v2578_v14 = vunpack.c.h.bf16 %v3432_v2  ;;  %v2581_v15 = vunpack.c.l.bf16 %v3433_v3  ;;  %v2582_v16 = vunpack.c.h.bf16 %v3433_v3 }
   0x4   :  { %v2585_v17 = vunpack.c.l.bf16 %v3434_v4  ;;  %v3439_v18 = vld [vmem:[%s4380_s0 + $0x48] sm:$0xff]   ;;  %v3440_v19 = vld [vmem:[%s4380_s0 + $0x50] sm:$0xff]   ;;  %v2586_v20 = vunpack.c.h.bf16 %v3434_v4  ;;  %v2589_v21 = vunpack.c.l.bf16 %v3435_v6  ;;  %v2590_v22 = vunpack.c.h.bf16 %v3435_v6  ;;  %v3441_v24 = vld [vmem:[%s4380_s0 + $0x58] sm:$0xff]  }
   0x5   :  { %v2593_v23 = vunpack.c.l.bf16 %v3436_v7  ;;  %v3442_v25 = vld [vmem:[%s4380_s0 + $0x60] sm:$0xff]   ;;  %v2594_v26 = vunpack.c.h.bf16 %v3436_v7  ;;  %v2597_v27 = vunpack.c.l.bf16 %v3437_v12  ;;  %v2598_v28 = vunpack.c.h.bf16 %v3437_v12  ;;  %v3443_v30 = vld [vmem:[%s4380_s0 + $0x68] sm:$0xff]   ;;  %v3444_v31 = vld [vmem:[%s4380_s0 + $0x70] sm:$0xff]  }
   0x6   :  { %v2601_v29 = vunpack.c.l.bf16 %v3438_v13  ;;  %v2602_v32 = vunpack.c.h.bf16 %v3438_v13  ;;  %v2605_v33 = vunpack.c.l.bf16 %v3439_v18  ;;  %v2606_v34 = vunpack.c.h.bf16 %v3439_v18  ;;  %v3445_v36 = vld [vmem:[%s4380_s0 + $0x78] sm:$0xff]   ;;  %v3446_v53 = vld [vmem:[%s4380_s0 + $0x80] sm:$0xff]   ;;  %v3447_v58 = vld [vmem:[%s4380_s0 + $0x88] sm:$0xff]  }
   0x7   :  { %v2609_v35 = vunpack.c.l.bf16 %v3440_v19  ;;  %v2610_v37 = vunpack.c.h.bf16 %v3440_v19  ;;  %v2613_v38 = vunpack.c.l.bf16 %v3441_v24  ;;  %v2614_v39 = vunpack.c.h.bf16 %v3441_v24  ;;  %v3448_v59 = vld [vmem:[%s4380_s0 + $0x90] sm:$0xff]   ;;  %v3449_v0 = vld [vmem:[%s4380_s0 + $0x98] sm:$0xff]   ;;  %v3450_v1 = vld [vmem:[%s4380_s0 + $0xa0] sm:$0xff]  }
   0x8   :  { %v2617_v40 = vunpack.c.l.bf16 %v3442_v25  ;;  %v2618_v41 = vunpack.c.h.bf16 %v3442_v25  ;;  %v2621_v42 = vunpack.c.l.bf16 %v3443_v30  ;;  %v2622_v43 = vunpack.c.h.bf16 %v3443_v30  ;;  %v3451_v6 = vld [vmem:[%s4380_s0 + $0xa8] sm:$0xff]   ;;  %v3452_v7 = vld [vmem:[%s4380_s0 + $0xb0] sm:$0xff]   ;;  %v3453_v12 = vld [vmem:[%s4380_s0 + $0xb8] sm:$0xff]  }
   0x9   :  { %v2625_v44 = vunpack.c.l.bf16 %v3444_v31  ;;  %v2626_v45 = vunpack.c.h.bf16 %v3444_v31  ;;  %v2629_v46 = vunpack.c.l.bf16 %v3445_v36  ;;  %v2630_v47 = vunpack.c.h.bf16 %v3445_v36 }
   0xa   :  { %v73_v48 = vmax.f32 %v2569_v5, %v2601_v29  ;;  %v74_v49 = vmax.f32 %v2570_v8, %v2602_v32  ;;  %v75_v50 = vmax.f32 %v2573_v9, %v2605_v33  ;;  %v76_v51 = vmax.f32 %v2574_v10, %v2606_v34  ;;  %v3454_v29 = vld [vmem:[%s4380_s0 + $0xc0] sm:$0xff]   ;;  %v3455_v34 = vld [vmem:[%s4380_s0 + $0xc8] sm:$0xff]  }
   0xb   :  { %v77_v52 = vmax.f32 %v2577_v11, %v2609_v35  ;;  %v78_v54 = vmax.f32 %v2578_v14, %v2610_v37  ;;  %v79_v55 = vmax.f32 %v2581_v15, %v2613_v38  ;;  %v80_v56 = vmax.f32 %v2582_v16, %v2614_v39  ;;  %v3456_v35 = vld [vmem:[%s4380_s0 + $0xd0] sm:$0xff]  }
   0xc   :  { %v81_v57 = vmax.f32 %v2585_v17, %v2617_v40  ;;  %v82_v60 = vmax.f32 %v2586_v20, %v2618_v41  ;;  %v83_v61 = vmax.f32 %v2589_v21, %v2621_v42  ;;  %v84_v62 = vmax.f32 %v2590_v22, %v2622_v43  ;;  %v3457_v40 = vld [vmem:[%s4380_s0 + $0xd8] sm:$0xff]   ;;  %v3458_v41 = vld [vmem:[%s4380_s0 + $0xe0] sm:$0xff]  }
   0xd   :  { %v85_v63 = vmax.f32 %v2593_v23, %v2625_v44  ;;  %v86_v2 = vmax.f32 %v2594_v26, %v2626_v45  ;;  %v87_v3 = vmax.f32 %v2597_v27, %v2629_v46  ;;  %v88_v4 = vmax.f32 %v2598_v28, %v2630_v47  ;;  %v3459_v46 = vld [vmem:[%s4380_s0 + $0xe8] sm:$0xff]   ;;  %v3460_v47 = vld [vmem:[%s4380_s0 + $0xf0] sm:$0xff]  }
   0xe   :  { %v2633_v5 = vunpack.c.l.bf16 %v3446_v53  ;;  %v2634_v8 = vunpack.c.h.bf16 %v3446_v53  ;;  %v2637_v9 = vunpack.c.l.bf16 %v3447_v58  ;;  %v2638_v10 = vunpack.c.h.bf16 %v3447_v58 }
   0xf   :  { %v2641_v11 = vunpack.c.l.bf16 %v3448_v59  ;;  %v2642_v13 = vunpack.c.h.bf16 %v3448_v59  ;;  %v2645_v14 = vunpack.c.l.bf16 %v3449_v0  ;;  %v2646_v15 = vunpack.c.h.bf16 %v3449_v0 }
  0x10   :  { %v2649_v16 = vunpack.c.l.bf16 %v3450_v1  ;;  %v2650_v17 = vunpack.c.h.bf16 %v3450_v1  ;;  %v2653_v18 = vunpack.c.l.bf16 %v3451_v6  ;;  %v2654_v19 = vunpack.c.h.bf16 %v3451_v6 }
  0x11   :  { %v2657_v20 = vunpack.c.l.bf16 %v3452_v7  ;;  %v2658_v21 = vunpack.c.h.bf16 %v3452_v7  ;;  %v2661_v22 = vunpack.c.l.bf16 %v3453_v12  ;;  %v2662_v23 = vunpack.c.h.bf16 %v3453_v12 }
  0x12   :  { %v154_v24 = vmax.f32 %v73_v48, %v2633_v5  ;;  %v155_v25 = vmax.f32 %v74_v49, %v2634_v8  ;;  %v156_v26 = vmax.f32 %v75_v50, %v2637_v9  ;;  %v157_v27 = vmax.f32 %v76_v51, %v2638_v10  ;;  %v3462_v5 = vld [vmem:[%s4380_s0 + $0x100] sm:$0xff]   ;;  %v3463_v10 = vld [vmem:[%s4380_s0 + $0x108] sm:$0xff]  }
  0x13   :  { %v158_v28 = vmax.f32 %v77_v52, %v2641_v11  ;;  %v159_v30 = vmax.f32 %v78_v54, %v2642_v13  ;;  %v160_v31 = vmax.f32 %v79_v55, %v2645_v14  ;;  %v161_v32 = vmax.f32 %v80_v56, %v2646_v15  ;;  %v3461_v52 = vld [vmem:[%s4380_s0 + $0xf8] sm:$0xff]   ;;  %v3464_v11 = vld [vmem:[%s4380_s0 + $0x110] sm:$0xff]  }
  0x14   :  { %v162_v33 = vmax.f32 %v81_v57, %v2649_v16  ;;  %v163_v36 = vmax.f32 %v82_v60, %v2650_v17  ;;  %v164_v37 = vmax.f32 %v83_v61, %v2653_v18  ;;  %v165_v38 = vmax.f32 %v84_v62, %v2654_v19  ;;  %v3465_v16 = vld [vmem:[%s4380_s0 + $0x118] sm:$0xff]   ;;  %v3466_v17 = vld [vmem:[%s4380_s0 + $0x120] sm:$0xff]  }
  0x15   :  { %v166_v39 = vmax.f32 %v85_v63, %v2657_v20  ;;  %v167_v42 = vmax.f32 %v86_v2, %v2658_v21  ;;  %v168_v43 = vmax.f32 %v87_v3, %v2661_v22  ;;  %v169_v44 = vmax.f32 %v88_v4, %v2662_v23  ;;  %v3467_v22 = vld [vmem:[%s4380_s0 + $0x128] sm:$0xff]   ;;  %v3468_v23 = vld [vmem:[%s4380_s0 + $0x130] sm:$0xff]  }
  0x16   :  { %v2665_v45 = vunpack.c.l.bf16 %v3454_v29  ;;  %v2666_v48 = vunpack.c.h.bf16 %v3454_v29  ;;  %v2669_v49 = vunpack.c.l.bf16 %v3455_v34  ;;  %v2670_v50 = vunpack.c.h.bf16 %v3455_v34 }
  0x17   :  { %v2673_v51 = vunpack.c.l.bf16 %v3456_v35  ;;  %v2674_v53 = vunpack.c.h.bf16 %v3456_v35  ;;  %v2677_v54 = vunpack.c.l.bf16 %v3457_v40  ;;  %v2678_v55 = vunpack.c.h.bf16 %v3457_v40 }
  0x18   :  { %v2681_v56 = vunpack.c.l.bf16 %v3458_v41  ;;  %v2682_v57 = vunpack.c.h.bf16 %v3458_v41  ;;  %v2685_v58 = vunpack.c.l.bf16 %v3459_v46  ;;  %v2686_v59 = vunpack.c.h.bf16 %v3459_v46 }
  0x19   :  { %v2689_v60 = vunpack.c.l.bf16 %v3460_v47  ;;  %v2690_v61 = vunpack.c.h.bf16 %v3460_v47  ;;  %v2693_v62 = vunpack.c.l.bf16 %v3461_v52  ;;  %v2694_v63 = vunpack.c.h.bf16 %v3461_v52 }
  0x1a   :  { %v235_v0 = vmax.f32 %v154_v24, %v2665_v45  ;;  %v236_v1 = vmax.f32 %v155_v25, %v2666_v48  ;;  %v237_v2 = vmax.f32 %v156_v26, %v2669_v49  ;;  %v238_v3 = vmax.f32 %v157_v27, %v2670_v50  ;;  %v3470_v45 = vld [vmem:[%s4380_s0 + $0x140] sm:$0xff]   ;;  %v3471_v50 = vld [vmem:[%s4380_s0 + $0x148] sm:$0xff]  }
  0x1b   :  { %v239_v4 = vmax.f32 %v158_v28, %v2673_v51  ;;  %v240_v6 = vmax.f32 %v159_v30, %v2674_v53  ;;  %v241_v7 = vmax.f32 %v160_v31, %v2677_v54  ;;  %v242_v8 = vmax.f32 %v161_v32, %v2678_v55  ;;  %v3469_v28 = vld [vmem:[%s4380_s0 + $0x138] sm:$0xff]   ;;  %v3472_v51 = vld [vmem:[%s4380_s0 + $0x150] sm:$0xff]  }
  0x1c   :  { %v243_v9 = vmax.f32 %v162_v33, %v2681_v56  ;;  %v244_v12 = vmax.f32 %v163_v36, %v2682_v57  ;;  %v245_v13 = vmax.f32 %v164_v37, %v2685_v58  ;;  %v246_v14 = vmax.f32 %v165_v38, %v2686_v59  ;;  %v3473_v56 = vld [vmem:[%s4380_s0 + $0x158] sm:$0xff]   ;;  %v3474_v57 = vld [vmem:[%s4380_s0 + $0x160] sm:$0xff]  }
  0x1d   :  { %v247_v15 = vmax.f32 %v166_v39, %v2689_v60  ;;  %v248_v18 = vmax.f32 %v167_v42, %v2690_v61  ;;  %v249_v19 = vmax.f32 %v168_v43, %v2693_v62  ;;  %v250_v20 = vmax.f32 %v169_v44, %v2694_v63  ;;  %v3475_v62 = vld [vmem:[%s4380_s0 + $0x168] sm:$0xff]   ;;  %v3476_v63 = vld [vmem:[%s4380_s0 + $0x170] sm:$0xff]  }
  0x1e   :  { %v2697_v21 = vunpack.c.l.bf16 %v3462_v5  ;;  %v2698_v24 = vunpack.c.h.bf16 %v3462_v5  ;;  %v2701_v25 = vunpack.c.l.bf16 %v3463_v10  ;;  %v2702_v26 = vunpack.c.h.bf16 %v3463_v10 }
  0x1f   :  { %v2705_v27 = vunpack.c.l.bf16 %v3464_v11  ;;  %v2706_v29 = vunpack.c.h.bf16 %v3464_v11  ;;  %v2709_v30 = vunpack.c.l.bf16 %v3465_v16  ;;  %v2710_v31 = vunpack.c.h.bf16 %v3465_v16 }
  0x20   :  { %v2713_v32 = vunpack.c.l.bf16 %v3466_v17  ;;  %v2714_v33 = vunpack.c.h.bf16 %v3466_v17  ;;  %v2717_v34 = vunpack.c.l.bf16 %v3467_v22  ;;  %v2718_v35 = vunpack.c.h.bf16 %v3467_v22 }
  0x21   :  { %v2721_v36 = vunpack.c.l.bf16 %v3468_v23  ;;  %v2722_v37 = vunpack.c.h.bf16 %v3468_v23  ;;  %v2725_v38 = vunpack.c.l.bf16 %v3469_v28  ;;  %v2726_v39 = vunpack.c.h.bf16 %v3469_v28 }
  0x22   :  { %v316_v40 = vmax.f32 %v235_v0, %v2697_v21  ;;  %v317_v41 = vmax.f32 %v236_v1, %v2698_v24  ;;  %v318_v42 = vmax.f32 %v237_v2, %v2701_v25  ;;  %v319_v43 = vmax.f32 %v238_v3, %v2702_v26  ;;  %v3478_v21 = vld [vmem:[%s4380_s0 + $0x180] sm:$0xff]   ;;  %v3479_v26 = vld [vmem:[%s4380_s0 + $0x188] sm:$0xff]  }
  0x23   :  { %v320_v44 = vmax.f32 %v239_v4, %v2705_v27  ;;  %v321_v46 = vmax.f32 %v240_v6, %v2706_v29  ;;  %v322_v47 = vmax.f32 %v241_v7, %v2709_v30  ;;  %v323_v48 = vmax.f32 %v242_v8, %v2710_v31  ;;  %v3477_v4 = vld [vmem:[%s4380_s0 + $0x178] sm:$0xff]   ;;  %v3480_v27 = vld [vmem:[%s4380_s0 + $0x190] sm:$0xff]  }
  0x24   :  { %v324_v49 = vmax.f32 %v243_v9, %v2713_v32  ;;  %v325_v52 = vmax.f32 %v244_v12, %v2714_v33  ;;  %v326_v53 = vmax.f32 %v245_v13, %v2717_v34  ;;  %v327_v54 = vmax.f32 %v246_v14, %v2718_v35  ;;  %v3481_v32 = vld [vmem:[%s4380_s0 + $0x198] sm:$0xff]   ;;  %v3482_v33 = vld [vmem:[%s4380_s0 + $0x1a0] sm:$0xff]  }
  0x25   :  { %v328_v55 = vmax.f32 %v247_v15, %v2721_v36  ;;  %v329_v58 = vmax.f32 %v248_v18, %v2722_v37  ;;  %v330_v59 = vmax.f32 %v249_v19, %v2725_v38  ;;  %v331_v60 = vmax.f32 %v250_v20, %v2726_v39  ;;  %v3483_v38 = vld [vmem:[%s4380_s0 + $0x1a8] sm:$0xff]   ;;  %v3484_v39 = vld [vmem:[%s4380_s0 + $0x1b0] sm:$0xff]  }
  0x26   :  { %v2729_v61 = vunpack.c.l.bf16 %v3470_v45  ;;  %v2730_v0 = vunpack.c.h.bf16 %v3470_v45  ;;  %v2733_v1 = vunpack.c.l.bf16 %v3471_v50  ;;  %v2734_v2 = vunpack.c.h.bf16 %v3471_v50 }
  0x27   :  { %v2737_v3 = vunpack.c.l.bf16 %v3472_v51  ;;  %v2738_v5 = vunpack.c.h.bf16 %v3472_v51  ;;  %v2741_v6 = vunpack.c.l.bf16 %v3473_v56  ;;  %v2742_v7 = vunpack.c.h.bf16 %v3473_v56 }
  0x28   :  { %v2745_v8 = vunpack.c.l.bf16 %v3474_v57  ;;  %v2746_v9 = vunpack.c.h.bf16 %v3474_v57  ;;  %v2749_v10 = vunpack.c.l.bf16 %v3475_v62  ;;  %v2750_v11 = vunpack.c.h.bf16 %v3475_v62 }
  0x29   :  { %v2753_v12 = vunpack.c.l.bf16 %v3476_v63  ;;  %v2754_v13 = vunpack.c.h.bf16 %v3476_v63  ;;  %v2757_v14 = vunpack.c.l.bf16 %v3477_v4  ;;  %v2758_v15 = vunpack.c.h.bf16 %v3477_v4 }
  0x2a   :  { %v397_v16 = vmax.f32 %v316_v40, %v2729_v61  ;;  %v398_v17 = vmax.f32 %v317_v41, %v2730_v0  ;;  %v399_v18 = vmax.f32 %v318_v42, %v2733_v1  ;;  %v400_v19 = vmax.f32 %v319_v43, %v2734_v2  ;;  %v3486_v61 = vld [vmem:[%s4380_s0 + $0x1c0] sm:$0xff]   ;;  %v3487_v2 = vld [vmem:[%s4380_s0 + $0x1c8] sm:$0xff]  }
  0x2b   :  { %v401_v20 = vmax.f32 %v320_v44, %v2737_v3  ;;  %v402_v22 = vmax.f32 %v321_v46, %v2738_v5  ;;  %v403_v23 = vmax.f32 %v322_v47, %v2741_v6  ;;  %v404_v24 = vmax.f32 %v323_v48, %v2742_v7  ;;  %v3485_v44 = vld [vmem:[%s4380_s0 + $0x1b8] sm:$0xff]   ;;  %v3488_v3 = vld [vmem:[%s4380_s0 + $0x1d0] sm:$0xff]  }
  0x2c   :  { %v405_v25 = vmax.f32 %v324_v49, %v2745_v8  ;;  %v406_v28 = vmax.f32 %v325_v52, %v2746_v9  ;;  %v407_v29 = vmax.f32 %v326_v53, %v2749_v10  ;;  %v408_v30 = vmax.f32 %v327_v54, %v2750_v11  ;;  %v3489_v8 = vld [vmem:[%s4380_s0 + $0x1d8] sm:$0xff]   ;;  %v3490_v9 = vld [vmem:[%s4380_s0 + $0x1e0] sm:$0xff]  }
  0x2d   :  { %v409_v31 = vmax.f32 %v328_v55, %v2753_v12  ;;  %v410_v34 = vmax.f32 %v329_v58, %v2754_v13  ;;  %v411_v35 = vmax.f32 %v330_v59, %v2757_v14  ;;  %v412_v36 = vmax.f32 %v331_v60, %v2758_v15  ;;  %v3491_v14 = vld [vmem:[%s4380_s0 + $0x1e8] sm:$0xff]   ;;  %v3492_v15 = vld [vmem:[%s4380_s0 + $0x1f0] sm:$0xff]  }
  0x2e   :  { %v2761_v37 = vunpack.c.l.bf16 %v3478_v21  ;;  %v2762_v40 = vunpack.c.h.bf16 %v3478_v21  ;;  %v2765_v41 = vunpack.c.l.bf16 %v3479_v26  ;;  %v2766_v42 = vunpack.c.h.bf16 %v3479_v26 }
  0x2f   :  { %v2769_v43 = vunpack.c.l.bf16 %v3480_v27  ;;  %v2770_v45 = vunpack.c.h.bf16 %v3480_v27  ;;  %v2773_v46 = vunpack.c.l.bf16 %v3481_v32  ;;  %v2774_v47 = vunpack.c.h.bf16 %v3481_v32 }
  0x30   :  { %v2777_v48 = vunpack.c.l.bf16 %v3482_v33  ;;  %v2778_v49 = vunpack.c.h.bf16 %v3482_v33  ;;  %v2781_v50 = vunpack.c.l.bf16 %v3483_v38  ;;  %v2782_v51 = vunpack.c.h.bf16 %v3483_v38 }
  0x31   :  { %v2785_v52 = vunpack.c.l.bf16 %v3484_v39  ;;  %v2786_v53 = vunpack.c.h.bf16 %v3484_v39  ;;  %v2789_v54 = vunpack.c.l.bf16 %v3485_v44  ;;  %v2790_v55 = vunpack.c.h.bf16 %v3485_v44 }
  0x32   :  { %v478_v56 = vmax.f32 %v397_v16, %v2761_v37  ;;  %v479_v57 = vmax.f32 %v398_v17, %v2762_v40  ;;  %v480_v58 = vmax.f32 %v399_v18, %v2765_v41  ;;  %v481_v59 = vmax.f32 %v400_v19, %v2766_v42  ;;  %v3494_v37 = vld [vmem:[%s4380_s0 + $0x200] sm:$0xff]   ;;  %v3495_v42 = vld [vmem:[%s4380_s0 + $0x208] sm:$0xff]  }
  0x33   :  { %v482_v60 = vmax.f32 %v401_v20, %v2769_v43  ;;  %v483_v62 = vmax.f32 %v402_v22, %v2770_v45  ;;  %v484_v63 = vmax.f32 %v403_v23, %v2773_v46  ;;  %v485_v0 = vmax.f32 %v404_v24, %v2774_v47  ;;  %v3493_v20 = vld [vmem:[%s4380_s0 + $0x1f8] sm:$0xff]   ;;  %v3496_v43 = vld [vmem:[%s4380_s0 + $0x210] sm:$0xff]  }
  0x34   :  { %v486_v1 = vmax.f32 %v405_v25, %v2777_v48  ;;  %v487_v4 = vmax.f32 %v406_v28, %v2778_v49  ;;  %v488_v5 = vmax.f32 %v407_v29, %v2781_v50  ;;  %v489_v6 = vmax.f32 %v408_v30, %v2782_v51  ;;  %v3497_v48 = vld [vmem:[%s4380_s0 + $0x218] sm:$0xff]   ;;  %v3498_v49 = vld [vmem:[%s4380_s0 + $0x220] sm:$0xff]  }
  0x35   :  { %v490_v7 = vmax.f32 %v409_v31, %v2785_v52  ;;  %v491_v10 = vmax.f32 %v410_v34, %v2786_v53  ;;  %v492_v11 = vmax.f32 %v411_v35, %v2789_v54  ;;  %v493_v12 = vmax.f32 %v412_v36, %v2790_v55  ;;  %v3499_v54 = vld [vmem:[%s4380_s0 + $0x228] sm:$0xff]   ;;  %v3500_v55 = vld [vmem:[%s4380_s0 + $0x230] sm:$0xff]  }
  0x36   :  { %v2793_v13 = vunpack.c.l.bf16 %v3486_v61  ;;  %v2794_v16 = vunpack.c.h.bf16 %v3486_v61  ;;  %v2797_v17 = vunpack.c.l.bf16 %v3487_v2  ;;  %v2798_v18 = vunpack.c.h.bf16 %v3487_v2 }
  0x37   :  { %v2801_v19 = vunpack.c.l.bf16 %v3488_v3  ;;  %v2802_v21 = vunpack.c.h.bf16 %v3488_v3  ;;  %v2805_v22 = vunpack.c.l.bf16 %v3489_v8  ;;  %v2806_v23 = vunpack.c.h.bf16 %v3489_v8 }
  0x38   :  { %v2809_v24 = vunpack.c.l.bf16 %v3490_v9  ;;  %v2810_v25 = vunpack.c.h.bf16 %v3490_v9  ;;  %v2813_v26 = vunpack.c.l.bf16 %v3491_v14  ;;  %v2814_v27 = vunpack.c.h.bf16 %v3491_v14 }
  0x39   :  { %v2817_v28 = vunpack.c.l.bf16 %v3492_v15  ;;  %v2818_v29 = vunpack.c.h.bf16 %v3492_v15  ;;  %v2821_v30 = vunpack.c.l.bf16 %v3493_v20  ;;  %v2822_v31 = vunpack.c.h.bf16 %v3493_v20 }
  0x3a   :  { %v559_v32 = vmax.f32 %v478_v56, %v2793_v13  ;;  %v560_v33 = vmax.f32 %v479_v57, %v2794_v16  ;;  %v561_v34 = vmax.f32 %v480_v58, %v2797_v17  ;;  %v562_v35 = vmax.f32 %v481_v59, %v2798_v18  ;;  %v3502_v13 = vld [vmem:[%s4380_s0 + $0x240] sm:$0xff]   ;;  %v3503_v18 = vld [vmem:[%s4380_s0 + $0x248] sm:$0xff]  }
  0x3b   :  { %v563_v36 = vmax.f32 %v482_v60, %v2801_v19  ;;  %v564_v38 = vmax.f32 %v483_v62, %v2802_v21  ;;  %v565_v39 = vmax.f32 %v484_v63, %v2805_v22  ;;  %v566_v40 = vmax.f32 %v485_v0, %v2806_v23  ;;  %v3501_v60 = vld [vmem:[%s4380_s0 + $0x238] sm:$0xff]   ;;  %v3504_v19 = vld [vmem:[%s4380_s0 + $0x250] sm:$0xff]  }
  0x3c   :  { %v567_v41 = vmax.f32 %v486_v1, %v2809_v24  ;;  %v568_v44 = vmax.f32 %v487_v4, %v2810_v25  ;;  %v569_v45 = vmax.f32 %v488_v5, %v2813_v26  ;;  %v570_v46 = vmax.f32 %v489_v6, %v2814_v27  ;;  %v3505_v24 = vld [vmem:[%s4380_s0 + $0x258] sm:$0xff]   ;;  %v3506_v25 = vld [vmem:[%s4380_s0 + $0x260] sm:$0xff]  }
  0x3d   :  { %v571_v47 = vmax.f32 %v490_v7, %v2817_v28  ;;  %v572_v50 = vmax.f32 %v491_v10, %v2818_v29  ;;  %v573_v51 = vmax.f32 %v492_v11, %v2821_v30  ;;  %v574_v52 = vmax.f32 %v493_v12, %v2822_v31  ;;  %v3507_v30 = vld [vmem:[%s4380_s0 + $0x268] sm:$0xff]   ;;  %v3508_v31 = vld [vmem:[%s4380_s0 + $0x270] sm:$0xff]  }
  0x3e   :  { %v2825_v53 = vunpack.c.l.bf16 %v3494_v37  ;;  %v2826_v56 = vunpack.c.h.bf16 %v3494_v37  ;;  %v2829_v57 = vunpack.c.l.bf16 %v3495_v42  ;;  %v2830_v58 = vunpack.c.h.bf16 %v3495_v42 }
  0x3f   :  { %v2833_v59 = vunpack.c.l.bf16 %v3496_v43  ;;  %v2834_v61 = vunpack.c.h.bf16 %v3496_v43  ;;  %v2837_v62 = vunpack.c.l.bf16 %v3497_v48  ;;  %v2838_v63 = vunpack.c.h.bf16 %v3497_v48 }
  0x40   :  { %v2841_v0 = vunpack.c.l.bf16 %v3498_v49  ;;  %v2842_v1 = vunpack.c.h.bf16 %v3498_v49  ;;  %v2845_v2 = vunpack.c.l.bf16 %v3499_v54  ;;  %v2846_v3 = vunpack.c.h.bf16 %v3499_v54 }
  0x41   :  { %v2849_v4 = vunpack.c.l.bf16 %v3500_v55  ;;  %v2850_v5 = vunpack.c.h.bf16 %v3500_v55  ;;  %v2853_v6 = vunpack.c.l.bf16 %v3501_v60  ;;  %v2854_v7 = vunpack.c.h.bf16 %v3501_v60 }
  0x42   :  { %v640_v8 = vmax.f32 %v559_v32, %v2825_v53  ;;  %v641_v9 = vmax.f32 %v560_v33, %v2826_v56  ;;  %v642_v10 = vmax.f32 %v561_v34, %v2829_v57  ;;  %v643_v11 = vmax.f32 %v562_v35, %v2830_v58  ;;  %v3510_v53 = vld [vmem:[%s4380_s0 + $0x280] sm:$0xff]   ;;  %v3511_v58 = vld [vmem:[%s4380_s0 + $0x288] sm:$0xff]  }
  0x43   :  { %v644_v12 = vmax.f32 %v563_v36, %v2833_v59  ;;  %v645_v14 = vmax.f32 %v564_v38, %v2834_v61  ;;  %v646_v15 = vmax.f32 %v565_v39, %v2837_v62  ;;  %v647_v16 = vmax.f32 %v566_v40, %v2838_v63  ;;  %v3509_v36 = vld [vmem:[%s4380_s0 + $0x278] sm:$0xff]   ;;  %v3512_v59 = vld [vmem:[%s4380_s0 + $0x290] sm:$0xff]  }
  0x44   :  { %v648_v17 = vmax.f32 %v567_v41, %v2841_v0  ;;  %v649_v20 = vmax.f32 %v568_v44, %v2842_v1  ;;  %v650_v21 = vmax.f32 %v569_v45, %v2845_v2  ;;  %v651_v22 = vmax.f32 %v570_v46, %v2846_v3  ;;  %v3513_v0 = vld [vmem:[%s4380_s0 + $0x298] sm:$0xff]   ;;  %v3514_v1 = vld [vmem:[%s4380_s0 + $0x2a0] sm:$0xff]  }
  0x45   :  { %v652_v23 = vmax.f32 %v571_v47, %v2849_v4  ;;  %v653_v26 = vmax.f32 %v572_v50, %v2850_v5  ;;  %v654_v27 = vmax.f32 %v573_v51, %v2853_v6  ;;  %v655_v28 = vmax.f32 %v574_v52, %v2854_v7  ;;  %v3515_v6 = vld [vmem:[%s4380_s0 + $0x2a8] sm:$0xff]   ;;  %v3516_v7 = vld [vmem:[%s4380_s0 + $0x2b0] sm:$0xff]  }
  0x46   :  { %v2857_v29 = vunpack.c.l.bf16 %v3502_v13  ;;  %v2858_v32 = vunpack.c.h.bf16 %v3502_v13  ;;  %v2861_v33 = vunpack.c.l.bf16 %v3503_v18  ;;  %v2862_v34 = vunpack.c.h.bf16 %v3503_v18 }
  0x47   :  { %v2865_v35 = vunpack.c.l.bf16 %v3504_v19  ;;  %v2866_v37 = vunpack.c.h.bf16 %v3504_v19  ;;  %v2869_v38 = vunpack.c.l.bf16 %v3505_v24  ;;  %v2870_v39 = vunpack.c.h.bf16 %v3505_v24 }
  0x48   :  { %v2873_v40 = vunpack.c.l.bf16 %v3506_v25  ;;  %v2874_v41 = vunpack.c.h.bf16 %v3506_v25  ;;  %v2877_v42 = vunpack.c.l.bf16 %v3507_v30  ;;  %v2878_v43 = vunpack.c.h.bf16 %v3507_v30 }
  0x49   :  { %v2881_v44 = vunpack.c.l.bf16 %v3508_v31  ;;  %v2882_v45 = vunpack.c.h.bf16 %v3508_v31  ;;  %v2885_v46 = vunpack.c.l.bf16 %v3509_v36  ;;  %v2886_v47 = vunpack.c.h.bf16 %v3509_v36 }
  0x4a   :  { %v721_v48 = vmax.f32 %v640_v8, %v2857_v29  ;;  %v722_v49 = vmax.f32 %v641_v9, %v2858_v32  ;;  %v723_v50 = vmax.f32 %v642_v10, %v2861_v33  ;;  %v724_v51 = vmax.f32 %v643_v11, %v2862_v34  ;;  %v3518_v29 = vld [vmem:[%s4380_s0 + $0x2c0] sm:$0xff]   ;;  %v3519_v34 = vld [vmem:[%s4380_s0 + $0x2c8] sm:$0xff]  }
  0x4b   :  { %v725_v52 = vmax.f32 %v644_v12, %v2865_v35  ;;  %v726_v54 = vmax.f32 %v645_v14, %v2866_v37  ;;  %v727_v55 = vmax.f32 %v646_v15, %v2869_v38  ;;  %v728_v56 = vmax.f32 %v647_v16, %v2870_v39  ;;  %v3517_v12 = vld [vmem:[%s4380_s0 + $0x2b8] sm:$0xff]   ;;  %v3520_v35 = vld [vmem:[%s4380_s0 + $0x2d0] sm:$0xff]  }
  0x4c   :  { %v729_v57 = vmax.f32 %v648_v17, %v2873_v40  ;;  %v730_v60 = vmax.f32 %v649_v20, %v2874_v41  ;;  %v731_v61 = vmax.f32 %v650_v21, %v2877_v42  ;;  %v732_v62 = vmax.f32 %v651_v22, %v2878_v43  ;;  %v3521_v40 = vld [vmem:[%s4380_s0 + $0x2d8] sm:$0xff]   ;;  %v3522_v41 = vld [vmem:[%s4380_s0 + $0x2e0] sm:$0xff]  }
  0x4d   :  { %v733_v63 = vmax.f32 %v652_v23, %v2881_v44  ;;  %v734_v2 = vmax.f32 %v653_v26, %v2882_v45  ;;  %v735_v3 = vmax.f32 %v654_v27, %v2885_v46  ;;  %v736_v4 = vmax.f32 %v655_v28, %v2886_v47  ;;  %v3523_v46 = vld [vmem:[%s4380_s0 + $0x2e8] sm:$0xff]   ;;  %v3524_v47 = vld [vmem:[%s4380_s0 + $0x2f0] sm:$0xff]  }
  0x4e   :  { %v2889_v5 = vunpack.c.l.bf16 %v3510_v53  ;;  %v2890_v8 = vunpack.c.h.bf16 %v3510_v53  ;;  %v2893_v9 = vunpack.c.l.bf16 %v3511_v58  ;;  %v2894_v10 = vunpack.c.h.bf16 %v3511_v58 }
  0x4f   :  { %v2897_v11 = vunpack.c.l.bf16 %v3512_v59  ;;  %v2898_v13 = vunpack.c.h.bf16 %v3512_v59  ;;  %v2901_v14 = vunpack.c.l.bf16 %v3513_v0  ;;  %v2902_v15 = vunpack.c.h.bf16 %v3513_v0 }
  0x50   :  { %v2905_v16 = vunpack.c.l.bf16 %v3514_v1  ;;  %v2906_v17 = vunpack.c.h.bf16 %v3514_v1  ;;  %v2909_v18 = vunpack.c.l.bf16 %v3515_v6  ;;  %v2910_v19 = vunpack.c.h.bf16 %v3515_v6 }
  0x51   :  { %v2913_v20 = vunpack.c.l.bf16 %v3516_v7  ;;  %v2914_v21 = vunpack.c.h.bf16 %v3516_v7  ;;  %v2917_v22 = vunpack.c.l.bf16 %v3517_v12  ;;  %v2918_v23 = vunpack.c.h.bf16 %v3517_v12 }
  0x52   :  { %v802_v24 = vmax.f32 %v721_v48, %v2889_v5  ;;  %v803_v25 = vmax.f32 %v722_v49, %v2890_v8  ;;  %v804_v26 = vmax.f32 %v723_v50, %v2893_v9  ;;  %v805_v27 = vmax.f32 %v724_v51, %v2894_v10  ;;  %v3526_v5 = vld [vmem:[%s4380_s0 + $0x300] sm:$0xff]   ;;  %v3527_v10 = vld [vmem:[%s4380_s0 + $0x308] sm:$0xff]  }
  0x53   :  { %v806_v28 = vmax.f32 %v725_v52, %v2897_v11  ;;  %v807_v30 = vmax.f32 %v726_v54, %v2898_v13  ;;  %v808_v31 = vmax.f32 %v727_v55, %v2901_v14  ;;  %v809_v32 = vmax.f32 %v728_v56, %v2902_v15  ;;  %v3525_v52 = vld [vmem:[%s4380_s0 + $0x2f8] sm:$0xff]   ;;  %v3528_v11 = vld [vmem:[%s4380_s0 + $0x310] sm:$0xff]  }
  0x54   :  { %v810_v33 = vmax.f32 %v729_v57, %v2905_v16  ;;  %v811_v36 = vmax.f32 %v730_v60, %v2906_v17  ;;  %v812_v37 = vmax.f32 %v731_v61, %v2909_v18  ;;  %v813_v38 = vmax.f32 %v732_v62, %v2910_v19  ;;  %v3529_v16 = vld [vmem:[%s4380_s0 + $0x318] sm:$0xff]   ;;  %v3530_v17 = vld [vmem:[%s4380_s0 + $0x320] sm:$0xff]  }
  0x55   :  { %v814_v39 = vmax.f32 %v733_v63, %v2913_v20  ;;  %v815_v42 = vmax.f32 %v734_v2, %v2914_v21  ;;  %v816_v43 = vmax.f32 %v735_v3, %v2917_v22  ;;  %v817_v44 = vmax.f32 %v736_v4, %v2918_v23  ;;  %v3531_v22 = vld [vmem:[%s4380_s0 + $0x328] sm:$0xff]   ;;  %v3532_v23 = vld [vmem:[%s4380_s0 + $0x330] sm:$0xff]  }
  0x56   :  { %v2921_v45 = vunpack.c.l.bf16 %v3518_v29  ;;  %v2922_v48 = vunpack.c.h.bf16 %v3518_v29  ;;  %v2925_v49 = vunpack.c.l.bf16 %v3519_v34  ;;  %v2926_v50 = vunpack.c.h.bf16 %v3519_v34 }
  0x57   :  { %v2929_v51 = vunpack.c.l.bf16 %v3520_v35  ;;  %v2930_v53 = vunpack.c.h.bf16 %v3520_v35  ;;  %v2933_v54 = vunpack.c.l.bf16 %v3521_v40  ;;  %v2934_v55 = vunpack.c.h.bf16 %v3521_v40 }
  0x58   :  { %v2937_v56 = vunpack.c.l.bf16 %v3522_v41  ;;  %v2938_v57 = vunpack.c.h.bf16 %v3522_v41  ;;  %v2941_v58 = vunpack.c.l.bf16 %v3523_v46  ;;  %v2942_v59 = vunpack.c.h.bf16 %v3523_v46 }
  0x59   :  { %v2945_v60 = vunpack.c.l.bf16 %v3524_v47  ;;  %v2946_v61 = vunpack.c.h.bf16 %v3524_v47  ;;  %v2949_v62 = vunpack.c.l.bf16 %v3525_v52  ;;  %v2950_v63 = vunpack.c.h.bf16 %v3525_v52 }
  0x5a   :  { %v883_v0 = vmax.f32 %v802_v24, %v2921_v45  ;;  %v884_v1 = vmax.f32 %v803_v25, %v2922_v48  ;;  %v885_v2 = vmax.f32 %v804_v26, %v2925_v49  ;;  %v886_v3 = vmax.f32 %v805_v27, %v2926_v50  ;;  %v3534_v45 = vld [vmem:[%s4380_s0 + $0x340] sm:$0xff]   ;;  %v3535_v50 = vld [vmem:[%s4380_s0 + $0x348] sm:$0xff]  }
  0x5b   :  { %v887_v4 = vmax.f32 %v806_v28, %v2929_v51  ;;  %v888_v6 = vmax.f32 %v807_v30, %v2930_v53  ;;  %v889_v7 = vmax.f32 %v808_v31, %v2933_v54  ;;  %v890_v8 = vmax.f32 %v809_v32, %v2934_v55  ;;  %v3533_v28 = vld [vmem:[%s4380_s0 + $0x338] sm:$0xff]   ;;  %v3536_v51 = vld [vmem:[%s4380_s0 + $0x350] sm:$0xff]  }
  0x5c   :  { %v891_v9 = vmax.f32 %v810_v33, %v2937_v56  ;;  %v892_v12 = vmax.f32 %v811_v36, %v2938_v57  ;;  %v893_v13 = vmax.f32 %v812_v37, %v2941_v58  ;;  %v894_v14 = vmax.f32 %v813_v38, %v2942_v59  ;;  %v3537_v56 = vld [vmem:[%s4380_s0 + $0x358] sm:$0xff]   ;;  %v3538_v57 = vld [vmem:[%s4380_s0 + $0x360] sm:$0xff]  }
  0x5d   :  { %v895_v15 = vmax.f32 %v814_v39, %v2945_v60  ;;  %v896_v18 = vmax.f32 %v815_v42, %v2946_v61  ;;  %v897_v19 = vmax.f32 %v816_v43, %v2949_v62  ;;  %v898_v20 = vmax.f32 %v817_v44, %v2950_v63  ;;  %v3539_v62 = vld [vmem:[%s4380_s0 + $0x368] sm:$0xff]   ;;  %v3540_v63 = vld [vmem:[%s4380_s0 + $0x370] sm:$0xff]  }
  0x5e   :  { %v2953_v21 = vunpack.c.l.bf16 %v3526_v5  ;;  %v2954_v24 = vunpack.c.h.bf16 %v3526_v5  ;;  %v2957_v25 = vunpack.c.l.bf16 %v3527_v10  ;;  %v2958_v26 = vunpack.c.h.bf16 %v3527_v10 }
  0x5f   :  { %v2961_v27 = vunpack.c.l.bf16 %v3528_v11  ;;  %v2962_v29 = vunpack.c.h.bf16 %v3528_v11  ;;  %v2965_v30 = vunpack.c.l.bf16 %v3529_v16  ;;  %v2966_v31 = vunpack.c.h.bf16 %v3529_v16 }
  0x60   :  { %v2969_v32 = vunpack.c.l.bf16 %v3530_v17  ;;  %v2970_v33 = vunpack.c.h.bf16 %v3530_v17  ;;  %v2973_v34 = vunpack.c.l.bf16 %v3531_v22  ;;  %v2974_v35 = vunpack.c.h.bf16 %v3531_v22 }
  0x61   :  { %v2977_v36 = vunpack.c.l.bf16 %v3532_v23  ;;  %v2978_v37 = vunpack.c.h.bf16 %v3532_v23  ;;  %v2981_v38 = vunpack.c.l.bf16 %v3533_v28  ;;  %v2982_v39 = vunpack.c.h.bf16 %v3533_v28 }
  0x62   :  { %v964_v40 = vmax.f32 %v883_v0, %v2953_v21  ;;  %v965_v41 = vmax.f32 %v884_v1, %v2954_v24  ;;  %v966_v42 = vmax.f32 %v885_v2, %v2957_v25  ;;  %v967_v43 = vmax.f32 %v886_v3, %v2958_v26  ;;  %v3542_v21 = vld [vmem:[%s4380_s0 + $0x380] sm:$0xff]   ;;  %v3543_v26 = vld [vmem:[%s4380_s0 + $0x388] sm:$0xff]  }
  0x63   :  { %v968_v44 = vmax.f32 %v887_v4, %v2961_v27  ;;  %v969_v46 = vmax.f32 %v888_v6, %v2962_v29  ;;  %v970_v47 = vmax.f32 %v889_v7, %v2965_v30  ;;  %v971_v48 = vmax.f32 %v890_v8, %v2966_v31  ;;  %v3541_v4 = vld [vmem:[%s4380_s0 + $0x378] sm:$0xff]   ;;  %v3544_v27 = vld [vmem:[%s4380_s0 + $0x390] sm:$0xff]  }
  0x64   :  { %v972_v49 = vmax.f32 %v891_v9, %v2969_v32  ;;  %v973_v52 = vmax.f32 %v892_v12, %v2970_v33  ;;  %v974_v53 = vmax.f32 %v893_v13, %v2973_v34  ;;  %v975_v54 = vmax.f32 %v894_v14, %v2974_v35  ;;  %v3545_v32 = vld [vmem:[%s4380_s0 + $0x398] sm:$0xff]   ;;  %v3546_v33 = vld [vmem:[%s4380_s0 + $0x3a0] sm:$0xff]  }
  0x65   :  { %v976_v55 = vmax.f32 %v895_v15, %v2977_v36  ;;  %v977_v58 = vmax.f32 %v896_v18, %v2978_v37  ;;  %v978_v59 = vmax.f32 %v897_v19, %v2981_v38  ;;  %v979_v60 = vmax.f32 %v898_v20, %v2982_v39  ;;  %v3547_v38 = vld [vmem:[%s4380_s0 + $0x3a8] sm:$0xff]   ;;  %v3548_v39 = vld [vmem:[%s4380_s0 + $0x3b0] sm:$0xff]  }
  0x66   :  { %v2985_v61 = vunpack.c.l.bf16 %v3534_v45  ;;  %v2986_v0 = vunpack.c.h.bf16 %v3534_v45  ;;  %v2989_v1 = vunpack.c.l.bf16 %v3535_v50  ;;  %v2990_v2 = vunpack.c.h.bf16 %v3535_v50 }
  0x67   :  { %v2993_v3 = vunpack.c.l.bf16 %v3536_v51  ;;  %v2994_v5 = vunpack.c.h.bf16 %v3536_v51  ;;  %v2997_v6 = vunpack.c.l.bf16 %v3537_v56  ;;  %v2998_v7 = vunpack.c.h.bf16 %v3537_v56 }
  0x68   :  { %v3001_v8 = vunpack.c.l.bf16 %v3538_v57  ;;  %v3002_v9 = vunpack.c.h.bf16 %v3538_v57  ;;  %v3005_v10 = vunpack.c.l.bf16 %v3539_v62  ;;  %v3006_v11 = vunpack.c.h.bf16 %v3539_v62 }
  0x69   :  { %v3009_v12 = vunpack.c.l.bf16 %v3540_v63  ;;  %v3010_v13 = vunpack.c.h.bf16 %v3540_v63  ;;  %v3013_v14 = vunpack.c.l.bf16 %v3541_v4  ;;  %v3014_v15 = vunpack.c.h.bf16 %v3541_v4 }
  0x6a   :  { %v1045_v16 = vmax.f32 %v964_v40, %v2985_v61  ;;  %v1046_v17 = vmax.f32 %v965_v41, %v2986_v0  ;;  %v1047_v18 = vmax.f32 %v966_v42, %v2989_v1  ;;  %v1048_v19 = vmax.f32 %v967_v43, %v2990_v2  ;;  %v3550_v61 = vld [vmem:[%s4380_s0 + $0x3c0] sm:$0xff]   ;;  %v3551_v2 = vld [vmem:[%s4380_s0 + $0x3c8] sm:$0xff]  }
  0x6b   :  { %v1049_v20 = vmax.f32 %v968_v44, %v2993_v3  ;;  %v1050_v22 = vmax.f32 %v969_v46, %v2994_v5  ;;  %v1051_v23 = vmax.f32 %v970_v47, %v2997_v6  ;;  %v1052_v24 = vmax.f32 %v971_v48, %v2998_v7  ;;  %v3549_v44 = vld [vmem:[%s4380_s0 + $0x3b8] sm:$0xff]   ;;  %v3552_v3 = vld [vmem:[%s4380_s0 + $0x3d0] sm:$0xff]  }
  0x6c   :  { %v1053_v25 = vmax.f32 %v972_v49, %v3001_v8  ;;  %v1054_v28 = vmax.f32 %v973_v52, %v3002_v9  ;;  %v1055_v29 = vmax.f32 %v974_v53, %v3005_v10  ;;  %v1056_v30 = vmax.f32 %v975_v54, %v3006_v11  ;;  %v3553_v8 = vld [vmem:[%s4380_s0 + $0x3d8] sm:$0xff]   ;;  %v3554_v9 = vld [vmem:[%s4380_s0 + $0x3e0] sm:$0xff]  }
  0x6d   :  { %v1057_v31 = vmax.f32 %v976_v55, %v3009_v12  ;;  %v1058_v34 = vmax.f32 %v977_v58, %v3010_v13  ;;  %v1059_v35 = vmax.f32 %v978_v59, %v3013_v14  ;;  %v1060_v36 = vmax.f32 %v979_v60, %v3014_v15  ;;  %v3555_v14 = vld [vmem:[%s4380_s0 + $0x3e8] sm:$0xff]   ;;  %v3556_v15 = vld [vmem:[%s4380_s0 + $0x3f0] sm:$0xff]  }
  0x6e   :  { %v3017_v37 = vunpack.c.l.bf16 %v3542_v21  ;;  %v3018_v40 = vunpack.c.h.bf16 %v3542_v21  ;;  %v3021_v41 = vunpack.c.l.bf16 %v3543_v26  ;;  %v3022_v42 = vunpack.c.h.bf16 %v3543_v26 }
  0x6f   :  { %v3025_v43 = vunpack.c.l.bf16 %v3544_v27  ;;  %v3026_v45 = vunpack.c.h.bf16 %v3544_v27  ;;  %v3029_v46 = vunpack.c.l.bf16 %v3545_v32  ;;  %v3030_v47 = vunpack.c.h.bf16 %v3545_v32 }
  0x70   :  { %v3033_v48 = vunpack.c.l.bf16 %v3546_v33  ;;  %v3034_v49 = vunpack.c.h.bf16 %v3546_v33  ;;  %v3037_v50 = vunpack.c.l.bf16 %v3547_v38  ;;  %v3038_v51 = vunpack.c.h.bf16 %v3547_v38 }
  0x71   :  { %v3041_v52 = vunpack.c.l.bf16 %v3548_v39  ;;  %v3042_v53 = vunpack.c.h.bf16 %v3548_v39  ;;  %v3045_v54 = vunpack.c.l.bf16 %v3549_v44  ;;  %v3046_v55 = vunpack.c.h.bf16 %v3549_v44 }
  0x72   :  { %v1126_v56 = vmax.f32 %v1045_v16, %v3017_v37  ;;  %v1127_v57 = vmax.f32 %v1046_v17, %v3018_v40  ;;  %v1128_v58 = vmax.f32 %v1047_v18, %v3021_v41  ;;  %v1129_v59 = vmax.f32 %v1048_v19, %v3022_v42  ;;  %v3558_v37 = vld [vmem:[%s4380_s0 + $0x400] sm:$0xff]   ;;  %v3559_v42 = vld [vmem:[%s4380_s0 + $0x408] sm:$0xff]  }
  0x73   :  { %v1130_v60 = vmax.f32 %v1049_v20, %v3025_v43  ;;  %v1131_v62 = vmax.f32 %v1050_v22, %v3026_v45  ;;  %v1132_v63 = vmax.f32 %v1051_v23, %v3029_v46  ;;  %v1133_v0 = vmax.f32 %v1052_v24, %v3030_v47  ;;  %v3557_v20 = vld [vmem:[%s4380_s0 + $0x3f8] sm:$0xff]   ;;  %v3560_v43 = vld [vmem:[%s4380_s0 + $0x410] sm:$0xff]  }
  0x74   :  { %v1134_v1 = vmax.f32 %v1053_v25, %v3033_v48  ;;  %v1135_v4 = vmax.f32 %v1054_v28, %v3034_v49  ;;  %v1136_v5 = vmax.f32 %v1055_v29, %v3037_v50  ;;  %v1137_v6 = vmax.f32 %v1056_v30, %v3038_v51  ;;  %v3561_v48 = vld [vmem:[%s4380_s0 + $0x418] sm:$0xff]   ;;  %v3562_v49 = vld [vmem:[%s4380_s0 + $0x420] sm:$0xff]  }
  0x75   :  { %v1138_v7 = vmax.f32 %v1057_v31, %v3041_v52  ;;  %v1139_v10 = vmax.f32 %v1058_v34, %v3042_v53  ;;  %v1140_v11 = vmax.f32 %v1059_v35, %v3045_v54  ;;  %v1141_v12 = vmax.f32 %v1060_v36, %v3046_v55  ;;  %v3563_v54 = vld [vmem:[%s4380_s0 + $0x428] sm:$0xff]   ;;  %v3564_v55 = vld [vmem:[%s4380_s0 + $0x430] sm:$0xff]  }
  0x76   :  { %v3049_v13 = vunpack.c.l.bf16 %v3550_v61  ;;  %v3050_v16 = vunpack.c.h.bf16 %v3550_v61  ;;  %v3053_v17 = vunpack.c.l.bf16 %v3551_v2  ;;  %v3054_v18 = vunpack.c.h.bf16 %v3551_v2 }
  0x77   :  { %v3057_v19 = vunpack.c.l.bf16 %v3552_v3  ;;  %v3058_v21 = vunpack.c.h.bf16 %v3552_v3  ;;  %v3061_v22 = vunpack.c.l.bf16 %v3553_v8  ;;  %v3062_v23 = vunpack.c.h.bf16 %v3553_v8 }
  0x78   :  { %v3065_v24 = vunpack.c.l.bf16 %v3554_v9  ;;  %v3066_v25 = vunpack.c.h.bf16 %v3554_v9  ;;  %v3069_v26 = vunpack.c.l.bf16 %v3555_v14  ;;  %v3070_v27 = vunpack.c.h.bf16 %v3555_v14 }
  0x79   :  { %v3073_v28 = vunpack.c.l.bf16 %v3556_v15  ;;  %v3074_v29 = vunpack.c.h.bf16 %v3556_v15  ;;  %v3077_v30 = vunpack.c.l.bf16 %v3557_v20  ;;  %v3078_v31 = vunpack.c.h.bf16 %v3557_v20 }
  0x7a   :  { %v1207_v32 = vmax.f32 %v1126_v56, %v3049_v13  ;;  %v1208_v33 = vmax.f32 %v1127_v57, %v3050_v16  ;;  %v1209_v34 = vmax.f32 %v1128_v58, %v3053_v17  ;;  %v1210_v35 = vmax.f32 %v1129_v59, %v3054_v18  ;;  %v3566_v13 = vld [vmem:[%s4380_s0 + $0x440] sm:$0xff]   ;;  %v3567_v18 = vld [vmem:[%s4380_s0 + $0x448] sm:$0xff]  }
  0x7b   :  { %v1211_v36 = vmax.f32 %v1130_v60, %v3057_v19  ;;  %v1212_v38 = vmax.f32 %v1131_v62, %v3058_v21  ;;  %v1213_v39 = vmax.f32 %v1132_v63, %v3061_v22  ;;  %v1214_v40 = vmax.f32 %v1133_v0, %v3062_v23  ;;  %v3565_v60 = vld [vmem:[%s4380_s0 + $0x438] sm:$0xff]   ;;  %v3568_v19 = vld [vmem:[%s4380_s0 + $0x450] sm:$0xff]  }
  0x7c   :  { %v1215_v41 = vmax.f32 %v1134_v1, %v3065_v24  ;;  %v1216_v44 = vmax.f32 %v1135_v4, %v3066_v25  ;;  %v1217_v45 = vmax.f32 %v1136_v5, %v3069_v26  ;;  %v1218_v46 = vmax.f32 %v1137_v6, %v3070_v27  ;;  %v3569_v24 = vld [vmem:[%s4380_s0 + $0x458] sm:$0xff]   ;;  %v3570_v25 = vld [vmem:[%s4380_s0 + $0x460] sm:$0xff]  }
  0x7d   :  { %v1219_v47 = vmax.f32 %v1138_v7, %v3073_v28  ;;  %v1220_v50 = vmax.f32 %v1139_v10, %v3074_v29  ;;  %v1221_v51 = vmax.f32 %v1140_v11, %v3077_v30  ;;  %v1222_v52 = vmax.f32 %v1141_v12, %v3078_v31  ;;  %v3571_v30 = vld [vmem:[%s4380_s0 + $0x468] sm:$0xff]   ;;  %v3572_v31 = vld [vmem:[%s4380_s0 + $0x470] sm:$0xff]  }
  0x7e   :  { %v3081_v53 = vunpack.c.l.bf16 %v3558_v37  ;;  %v3082_v56 = vunpack.c.h.bf16 %v3558_v37  ;;  %v3085_v57 = vunpack.c.l.bf16 %v3559_v42  ;;  %v3086_v58 = vunpack.c.h.bf16 %v3559_v42 }
  0x7f   :  { %v3089_v59 = vunpack.c.l.bf16 %v3560_v43  ;;  %v3090_v61 = vunpack.c.h.bf16 %v3560_v43  ;;  %v3093_v62 = vunpack.c.l.bf16 %v3561_v48  ;;  %v3094_v63 = vunpack.c.h.bf16 %v3561_v48 }
  0x80   :  { %v3097_v0 = vunpack.c.l.bf16 %v3562_v49  ;;  %v3098_v1 = vunpack.c.h.bf16 %v3562_v49  ;;  %v3101_v2 = vunpack.c.l.bf16 %v3563_v54  ;;  %v3102_v3 = vunpack.c.h.bf16 %v3563_v54 }
  0x81   :  { %v3105_v4 = vunpack.c.l.bf16 %v3564_v55  ;;  %v3106_v5 = vunpack.c.h.bf16 %v3564_v55  ;;  %v3109_v6 = vunpack.c.l.bf16 %v3565_v60  ;;  %v3110_v7 = vunpack.c.h.bf16 %v3565_v60 }
  0x82   :  { %v1288_v8 = vmax.f32 %v1207_v32, %v3081_v53  ;;  %v1289_v9 = vmax.f32 %v1208_v33, %v3082_v56  ;;  %v1290_v10 = vmax.f32 %v1209_v34, %v3085_v57  ;;  %v1291_v11 = vmax.f32 %v1210_v35, %v3086_v58  ;;  %v3574_v53 = vld [vmem:[%s4380_s0 + $0x480] sm:$0xff]   ;;  %v3575_v58 = vld [vmem:[%s4380_s0 + $0x488] sm:$0xff]  }
  0x83   :  { %v1292_v12 = vmax.f32 %v1211_v36, %v3089_v59  ;;  %v1293_v14 = vmax.f32 %v1212_v38, %v3090_v61  ;;  %v1294_v15 = vmax.f32 %v1213_v39, %v3093_v62  ;;  %v1295_v16 = vmax.f32 %v1214_v40, %v3094_v63  ;;  %v3573_v36 = vld [vmem:[%s4380_s0 + $0x478] sm:$0xff]   ;;  %v3576_v59 = vld [vmem:[%s4380_s0 + $0x490] sm:$0xff]  }
  0x84   :  { %v1296_v17 = vmax.f32 %v1215_v41, %v3097_v0  ;;  %v1297_v20 = vmax.f32 %v1216_v44, %v3098_v1  ;;  %v1298_v21 = vmax.f32 %v1217_v45, %v3101_v2  ;;  %v1299_v22 = vmax.f32 %v1218_v46, %v3102_v3  ;;  %v3577_v0 = vld [vmem:[%s4380_s0 + $0x498] sm:$0xff]   ;;  %v3578_v1 = vld [vmem:[%s4380_s0 + $0x4a0] sm:$0xff]  }
  0x85   :  { %v1300_v23 = vmax.f32 %v1219_v47, %v3105_v4  ;;  %v1301_v26 = vmax.f32 %v1220_v50, %v3106_v5  ;;  %v1302_v27 = vmax.f32 %v1221_v51, %v3109_v6  ;;  %v1303_v28 = vmax.f32 %v1222_v52, %v3110_v7  ;;  %v3579_v6 = vld [vmem:[%s4380_s0 + $0x4a8] sm:$0xff]   ;;  %v3580_v7 = vld [vmem:[%s4380_s0 + $0x4b0] sm:$0xff]  }
  0x86   :  { %v3113_v29 = vunpack.c.l.bf16 %v3566_v13  ;;  %v3114_v32 = vunpack.c.h.bf16 %v3566_v13  ;;  %v3117_v33 = vunpack.c.l.bf16 %v3567_v18  ;;  %v3118_v34 = vunpack.c.h.bf16 %v3567_v18 }
  0x87   :  { %v3121_v35 = vunpack.c.l.bf16 %v3568_v19  ;;  %v3122_v37 = vunpack.c.h.bf16 %v3568_v19  ;;  %v3125_v38 = vunpack.c.l.bf16 %v3569_v24  ;;  %v3126_v39 = vunpack.c.h.bf16 %v3569_v24 }
  0x88   :  { %v3129_v40 = vunpack.c.l.bf16 %v3570_v25  ;;  %v3130_v41 = vunpack.c.h.bf16 %v3570_v25  ;;  %v3133_v42 = vunpack.c.l.bf16 %v3571_v30  ;;  %v3134_v43 = vunpack.c.h.bf16 %v3571_v30 }
  0x89   :  { %v3137_v44 = vunpack.c.l.bf16 %v3572_v31  ;;  %v3138_v45 = vunpack.c.h.bf16 %v3572_v31  ;;  %v3141_v46 = vunpack.c.l.bf16 %v3573_v36  ;;  %v3142_v47 = vunpack.c.h.bf16 %v3573_v36 }
  0x8a   :  { %v1369_v48 = vmax.f32 %v1288_v8, %v3113_v29  ;;  %v1370_v49 = vmax.f32 %v1289_v9, %v3114_v32  ;;  %v1371_v50 = vmax.f32 %v1290_v10, %v3117_v33  ;;  %v1372_v51 = vmax.f32 %v1291_v11, %v3118_v34  ;;  %v3582_v29 = vld [vmem:[%s4380_s0 + $0x4c0] sm:$0xff]   ;;  %v3583_v34 = vld [vmem:[%s4380_s0 + $0x4c8] sm:$0xff]  }
  0x8b   :  { %v1373_v52 = vmax.f32 %v1292_v12, %v3121_v35  ;;  %v1374_v54 = vmax.f32 %v1293_v14, %v3122_v37  ;;  %v1375_v55 = vmax.f32 %v1294_v15, %v3125_v38  ;;  %v1376_v56 = vmax.f32 %v1295_v16, %v3126_v39  ;;  %v3581_v12 = vld [vmem:[%s4380_s0 + $0x4b8] sm:$0xff]   ;;  %v3584_v35 = vld [vmem:[%s4380_s0 + $0x4d0] sm:$0xff]  }
  0x8c   :  { %v1377_v57 = vmax.f32 %v1296_v17, %v3129_v40  ;;  %v1378_v60 = vmax.f32 %v1297_v20, %v3130_v41  ;;  %v1379_v61 = vmax.f32 %v1298_v21, %v3133_v42  ;;  %v1380_v62 = vmax.f32 %v1299_v22, %v3134_v43  ;;  %v3585_v40 = vld [vmem:[%s4380_s0 + $0x4d8] sm:$0xff]   ;;  %v3586_v41 = vld [vmem:[%s4380_s0 + $0x4e0] sm:$0xff]  }
  0x8d   :  { %v1381_v63 = vmax.f32 %v1300_v23, %v3137_v44  ;;  %v1382_v2 = vmax.f32 %v1301_v26, %v3138_v45  ;;  %v1383_v3 = vmax.f32 %v1302_v27, %v3141_v46  ;;  %v1384_v4 = vmax.f32 %v1303_v28, %v3142_v47  ;;  %v3587_v46 = vld [vmem:[%s4380_s0 + $0x4e8] sm:$0xff]   ;;  %v3588_v47 = vld [vmem:[%s4380_s0 + $0x4f0] sm:$0xff]  }
  0x8e   :  { %v3145_v5 = vunpack.c.l.bf16 %v3574_v53  ;;  %v3146_v8 = vunpack.c.h.bf16 %v3574_v53  ;;  %v3149_v9 = vunpack.c.l.bf16 %v3575_v58  ;;  %v3150_v10 = vunpack.c.h.bf16 %v3575_v58 }
  0x8f   :  { %v3153_v11 = vunpack.c.l.bf16 %v3576_v59  ;;  %v3154_v13 = vunpack.c.h.bf16 %v3576_v59  ;;  %v3157_v14 = vunpack.c.l.bf16 %v3577_v0  ;;  %v3158_v15 = vunpack.c.h.bf16 %v3577_v0 }
  0x90   :  { %v3161_v16 = vunpack.c.l.bf16 %v3578_v1  ;;  %v3162_v17 = vunpack.c.h.bf16 %v3578_v1  ;;  %v3165_v18 = vunpack.c.l.bf16 %v3579_v6  ;;  %v3166_v19 = vunpack.c.h.bf16 %v3579_v6 }
  0x91   :  { %v3169_v20 = vunpack.c.l.bf16 %v3580_v7  ;;  %v3170_v21 = vunpack.c.h.bf16 %v3580_v7  ;;  %v3173_v22 = vunpack.c.l.bf16 %v3581_v12  ;;  %v3174_v23 = vunpack.c.h.bf16 %v3581_v12 }
  0x92   :  { %v1450_v24 = vmax.f32 %v1369_v48, %v3145_v5  ;;  %v1451_v25 = vmax.f32 %v1370_v49, %v3146_v8  ;;  %v1452_v26 = vmax.f32 %v1371_v50, %v3149_v9  ;;  %v1453_v27 = vmax.f32 %v1372_v51, %v3150_v10  ;;  %v3590_v5 = vld [vmem:[%s4380_s0 + $0x500] sm:$0xff]   ;;  %v3591_v10 = vld [vmem:[%s4380_s0 + $0x508] sm:$0xff]  }
  0x93   :  { %v1454_v28 = vmax.f32 %v1373_v52, %v3153_v11  ;;  %v1455_v30 = vmax.f32 %v1374_v54, %v3154_v13  ;;  %v1456_v31 = vmax.f32 %v1375_v55, %v3157_v14  ;;  %v1457_v32 = vmax.f32 %v1376_v56, %v3158_v15  ;;  %v3589_v52 = vld [vmem:[%s4380_s0 + $0x4f8] sm:$0xff]   ;;  %v3592_v11 = vld [vmem:[%s4380_s0 + $0x510] sm:$0xff]  }
  0x94   :  { %v1458_v33 = vmax.f32 %v1377_v57, %v3161_v16  ;;  %v1459_v36 = vmax.f32 %v1378_v60, %v3162_v17  ;;  %v1460_v37 = vmax.f32 %v1379_v61, %v3165_v18  ;;  %v1461_v38 = vmax.f32 %v1380_v62, %v3166_v19  ;;  %v3593_v16 = vld [vmem:[%s4380_s0 + $0x518] sm:$0xff]   ;;  %v3594_v17 = vld [vmem:[%s4380_s0 + $0x520] sm:$0xff]  }
  0x95   :  { %v1462_v39 = vmax.f32 %v1381_v63, %v3169_v20  ;;  %v1463_v42 = vmax.f32 %v1382_v2, %v3170_v21  ;;  %v1464_v43 = vmax.f32 %v1383_v3, %v3173_v22  ;;  %v1465_v44 = vmax.f32 %v1384_v4, %v3174_v23  ;;  %v3595_v22 = vld [vmem:[%s4380_s0 + $0x528] sm:$0xff]   ;;  %v3596_v23 = vld [vmem:[%s4380_s0 + $0x530] sm:$0xff]  }
  0x96   :  { %v3177_v45 = vunpack.c.l.bf16 %v3582_v29  ;;  %v3178_v48 = vunpack.c.h.bf16 %v3582_v29  ;;  %v3181_v49 = vunpack.c.l.bf16 %v3583_v34  ;;  %v3182_v50 = vunpack.c.h.bf16 %v3583_v34 }
  0x97   :  { %v3185_v51 = vunpack.c.l.bf16 %v3584_v35  ;;  %v3186_v53 = vunpack.c.h.bf16 %v3584_v35  ;;  %v3189_v54 = vunpack.c.l.bf16 %v3585_v40  ;;  %v3190_v55 = vunpack.c.h.bf16 %v3585_v40 }
  0x98   :  { %v3193_v56 = vunpack.c.l.bf16 %v3586_v41  ;;  %v3194_v57 = vunpack.c.h.bf16 %v3586_v41  ;;  %v3197_v58 = vunpack.c.l.bf16 %v3587_v46  ;;  %v3198_v59 = vunpack.c.h.bf16 %v3587_v46 }
  0x99   :  { %v3201_v60 = vunpack.c.l.bf16 %v3588_v47  ;;  %v3202_v61 = vunpack.c.h.bf16 %v3588_v47  ;;  %v3205_v62 = vunpack.c.l.bf16 %v3589_v52  ;;  %v3206_v63 = vunpack.c.h.bf16 %v3589_v52 }
  0x9a   :  { %v1531_v0 = vmax.f32 %v1450_v24, %v3177_v45  ;;  %v1532_v1 = vmax.f32 %v1451_v25, %v3178_v48  ;;  %v1533_v2 = vmax.f32 %v1452_v26, %v3181_v49  ;;  %v1534_v3 = vmax.f32 %v1453_v27, %v3182_v50  ;;  %v3598_v45 = vld [vmem:[%s4380_s0 + $0x540] sm:$0xff]   ;;  %v3599_v50 = vld [vmem:[%s4380_s0 + $0x548] sm:$0xff]  }
  0x9b   :  { %v1535_v4 = vmax.f32 %v1454_v28, %v3185_v51  ;;  %v1536_v6 = vmax.f32 %v1455_v30, %v3186_v53  ;;  %v1537_v7 = vmax.f32 %v1456_v31, %v3189_v54  ;;  %v1538_v8 = vmax.f32 %v1457_v32, %v3190_v55  ;;  %v3597_v28 = vld [vmem:[%s4380_s0 + $0x538] sm:$0xff]   ;;  %v3600_v51 = vld [vmem:[%s4380_s0 + $0x550] sm:$0xff]  }
  0x9c   :  { %v1539_v9 = vmax.f32 %v1458_v33, %v3193_v56  ;;  %v1540_v12 = vmax.f32 %v1459_v36, %v3194_v57  ;;  %v1541_v13 = vmax.f32 %v1460_v37, %v3197_v58  ;;  %v1542_v14 = vmax.f32 %v1461_v38, %v3198_v59  ;;  %v3601_v56 = vld [vmem:[%s4380_s0 + $0x558] sm:$0xff]   ;;  %v3602_v57 = vld [vmem:[%s4380_s0 + $0x560] sm:$0xff]  }
  0x9d   :  { %v1543_v15 = vmax.f32 %v1462_v39, %v3201_v60  ;;  %v1544_v18 = vmax.f32 %v1463_v42, %v3202_v61  ;;  %v1545_v19 = vmax.f32 %v1464_v43, %v3205_v62  ;;  %v1546_v20 = vmax.f32 %v1465_v44, %v3206_v63  ;;  %v3603_v62 = vld [vmem:[%s4380_s0 + $0x568] sm:$0xff]   ;;  %v3604_v63 = vld [vmem:[%s4380_s0 + $0x570] sm:$0xff]  }
  0x9e   :  { %v3209_v21 = vunpack.c.l.bf16 %v3590_v5  ;;  %v3210_v24 = vunpack.c.h.bf16 %v3590_v5  ;;  %v3213_v25 = vunpack.c.l.bf16 %v3591_v10  ;;  %v3214_v26 = vunpack.c.h.bf16 %v3591_v10 }
  0x9f   :  { %v3217_v27 = vunpack.c.l.bf16 %v3592_v11  ;;  %v3218_v29 = vunpack.c.h.bf16 %v3592_v11  ;;  %v3221_v30 = vunpack.c.l.bf16 %v3593_v16  ;;  %v3222_v31 = vunpack.c.h.bf16 %v3593_v16 }
  0xa0   :  { %v3225_v32 = vunpack.c.l.bf16 %v3594_v17  ;;  %v3226_v33 = vunpack.c.h.bf16 %v3594_v17  ;;  %v3229_v34 = vunpack.c.l.bf16 %v3595_v22  ;;  %v3230_v35 = vunpack.c.h.bf16 %v3595_v22 }
  0xa1   :  { %v3233_v36 = vunpack.c.l.bf16 %v3596_v23  ;;  %v3234_v37 = vunpack.c.h.bf16 %v3596_v23  ;;  %v3237_v38 = vunpack.c.l.bf16 %v3597_v28  ;;  %v3238_v39 = vunpack.c.h.bf16 %v3597_v28 }
  0xa2   :  { %v1612_v40 = vmax.f32 %v1531_v0, %v3209_v21  ;;  %v1613_v41 = vmax.f32 %v1532_v1, %v3210_v24  ;;  %v1614_v42 = vmax.f32 %v1533_v2, %v3213_v25  ;;  %v1615_v43 = vmax.f32 %v1534_v3, %v3214_v26  ;;  %v3606_v21 = vld [vmem:[%s4380_s0 + $0x580] sm:$0xff]   ;;  %v3607_v26 = vld [vmem:[%s4380_s0 + $0x588] sm:$0xff]  }
  0xa3   :  { %v1616_v44 = vmax.f32 %v1535_v4, %v3217_v27  ;;  %v1617_v46 = vmax.f32 %v1536_v6, %v3218_v29  ;;  %v1618_v47 = vmax.f32 %v1537_v7, %v3221_v30  ;;  %v1619_v48 = vmax.f32 %v1538_v8, %v3222_v31  ;;  %v3605_v4 = vld [vmem:[%s4380_s0 + $0x578] sm:$0xff]   ;;  %v3608_v27 = vld [vmem:[%s4380_s0 + $0x590] sm:$0xff]  }
  0xa4   :  { %v1620_v49 = vmax.f32 %v1539_v9, %v3225_v32  ;;  %v1621_v52 = vmax.f32 %v1540_v12, %v3226_v33  ;;  %v1622_v53 = vmax.f32 %v1541_v13, %v3229_v34  ;;  %v1623_v54 = vmax.f32 %v1542_v14, %v3230_v35  ;;  %v3609_v32 = vld [vmem:[%s4380_s0 + $0x598] sm:$0xff]   ;;  %v3610_v33 = vld [vmem:[%s4380_s0 + $0x5a0] sm:$0xff]  }
  0xa5   :  { %v1624_v55 = vmax.f32 %v1543_v15, %v3233_v36  ;;  %v1625_v58 = vmax.f32 %v1544_v18, %v3234_v37  ;;  %v1626_v59 = vmax.f32 %v1545_v19, %v3237_v38  ;;  %v1627_v60 = vmax.f32 %v1546_v20, %v3238_v39  ;;  %v3611_v38 = vld [vmem:[%s4380_s0 + $0x5a8] sm:$0xff]   ;;  %v3612_v39 = vld [vmem:[%s4380_s0 + $0x5b0] sm:$0xff]  }
  0xa6   :  { %v3241_v61 = vunpack.c.l.bf16 %v3598_v45  ;;  %v3242_v0 = vunpack.c.h.bf16 %v3598_v45  ;;  %v3245_v1 = vunpack.c.l.bf16 %v3599_v50  ;;  %v3246_v2 = vunpack.c.h.bf16 %v3599_v50 }
  0xa7   :  { %v3249_v3 = vunpack.c.l.bf16 %v3600_v51  ;;  %v3250_v5 = vunpack.c.h.bf16 %v3600_v51  ;;  %v3253_v6 = vunpack.c.l.bf16 %v3601_v56  ;;  %v3254_v7 = vunpack.c.h.bf16 %v3601_v56 }
  0xa8   :  { %v3257_v8 = vunpack.c.l.bf16 %v3602_v57  ;;  %v3258_v9 = vunpack.c.h.bf16 %v3602_v57  ;;  %v3261_v10 = vunpack.c.l.bf16 %v3603_v62  ;;  %v3262_v11 = vunpack.c.h.bf16 %v3603_v62 }
  0xa9   :  { %v3265_v12 = vunpack.c.l.bf16 %v3604_v63  ;;  %v3266_v13 = vunpack.c.h.bf16 %v3604_v63  ;;  %v3269_v14 = vunpack.c.l.bf16 %v3605_v4  ;;  %v3270_v15 = vunpack.c.h.bf16 %v3605_v4 }
  0xaa   :  { %v1693_v16 = vmax.f32 %v1612_v40, %v3241_v61  ;;  %v1694_v17 = vmax.f32 %v1613_v41, %v3242_v0  ;;  %v1695_v18 = vmax.f32 %v1614_v42, %v3245_v1  ;;  %v1696_v19 = vmax.f32 %v1615_v43, %v3246_v2  ;;  %v3614_v61 = vld [vmem:[%s4380_s0 + $0x5c0] sm:$0xff]   ;;  %v3615_v2 = vld [vmem:[%s4380_s0 + $0x5c8] sm:$0xff]  }
  0xab   :  { %v1697_v20 = vmax.f32 %v1616_v44, %v3249_v3  ;;  %v1698_v22 = vmax.f32 %v1617_v46, %v3250_v5  ;;  %v1699_v23 = vmax.f32 %v1618_v47, %v3253_v6  ;;  %v1700_v24 = vmax.f32 %v1619_v48, %v3254_v7  ;;  %v3613_v44 = vld [vmem:[%s4380_s0 + $0x5b8] sm:$0xff]   ;;  %v3616_v3 = vld [vmem:[%s4380_s0 + $0x5d0] sm:$0xff]  }
  0xac   :  { %v1701_v25 = vmax.f32 %v1620_v49, %v3257_v8  ;;  %v1702_v28 = vmax.f32 %v1621_v52, %v3258_v9  ;;  %v1703_v29 = vmax.f32 %v1622_v53, %v3261_v10  ;;  %v1704_v30 = vmax.f32 %v1623_v54, %v3262_v11  ;;  %v3617_v8 = vld [vmem:[%s4380_s0 + $0x5d8] sm:$0xff]   ;;  %v3618_v9 = vld [vmem:[%s4380_s0 + $0x5e0] sm:$0xff]  }
  0xad   :  { %v1705_v31 = vmax.f32 %v1624_v55, %v3265_v12  ;;  %v1706_v34 = vmax.f32 %v1625_v58, %v3266_v13  ;;  %v1707_v35 = vmax.f32 %v1626_v59, %v3269_v14  ;;  %v1708_v36 = vmax.f32 %v1627_v60, %v3270_v15  ;;  %v3619_v14 = vld [vmem:[%s4380_s0 + $0x5e8] sm:$0xff]   ;;  %v3620_v15 = vld [vmem:[%s4380_s0 + $0x5f0] sm:$0xff]  }
  0xae   :  { %v3273_v37 = vunpack.c.l.bf16 %v3606_v21  ;;  %v3274_v40 = vunpack.c.h.bf16 %v3606_v21  ;;  %v3277_v41 = vunpack.c.l.bf16 %v3607_v26  ;;  %v3278_v42 = vunpack.c.h.bf16 %v3607_v26 }
  0xaf   :  { %v3281_v43 = vunpack.c.l.bf16 %v3608_v27  ;;  %v3282_v45 = vunpack.c.h.bf16 %v3608_v27  ;;  %v3285_v46 = vunpack.c.l.bf16 %v3609_v32  ;;  %v3286_v47 = vunpack.c.h.bf16 %v3609_v32 }
  0xb0   :  { %v3289_v48 = vunpack.c.l.bf16 %v3610_v33  ;;  %v3290_v49 = vunpack.c.h.bf16 %v3610_v33  ;;  %v3293_v50 = vunpack.c.l.bf16 %v3611_v38  ;;  %v3294_v51 = vunpack.c.h.bf16 %v3611_v38 }
  0xb1   :  { %v3297_v52 = vunpack.c.l.bf16 %v3612_v39  ;;  %v3298_v53 = vunpack.c.h.bf16 %v3612_v39  ;;  %v3301_v54 = vunpack.c.l.bf16 %v3613_v44  ;;  %v3302_v55 = vunpack.c.h.bf16 %v3613_v44 }
  0xb2   :  { %v1774_v56 = vmax.f32 %v1693_v16, %v3273_v37  ;;  %v1775_v57 = vmax.f32 %v1694_v17, %v3274_v40  ;;  %v1776_v58 = vmax.f32 %v1695_v18, %v3277_v41  ;;  %v1777_v59 = vmax.f32 %v1696_v19, %v3278_v42  ;;  %v3622_v37 = vld [vmem:[%s4380_s0 + $0x600] sm:$0xff]   ;;  %v3623_v42 = vld [vmem:[%s4380_s0 + $0x608] sm:$0xff]  }
  0xb3   :  { %v1778_v60 = vmax.f32 %v1697_v20, %v3281_v43  ;;  %v1779_v62 = vmax.f32 %v1698_v22, %v3282_v45  ;;  %v1780_v63 = vmax.f32 %v1699_v23, %v3285_v46  ;;  %v1781_v0 = vmax.f32 %v1700_v24, %v3286_v47  ;;  %v3621_v20 = vld [vmem:[%s4380_s0 + $0x5f8] sm:$0xff]   ;;  %v3624_v43 = vld [vmem:[%s4380_s0 + $0x610] sm:$0xff]  }
  0xb4   :  { %v1782_v1 = vmax.f32 %v1701_v25, %v3289_v48  ;;  %v1783_v4 = vmax.f32 %v1702_v28, %v3290_v49  ;;  %v1784_v5 = vmax.f32 %v1703_v29, %v3293_v50  ;;  %v1785_v6 = vmax.f32 %v1704_v30, %v3294_v51  ;;  %v3625_v48 = vld [vmem:[%s4380_s0 + $0x618] sm:$0xff]   ;;  %v3626_v49 = vld [vmem:[%s4380_s0 + $0x620] sm:$0xff]  }
  0xb5   :  { %v1786_v7 = vmax.f32 %v1705_v31, %v3297_v52  ;;  %v1787_v10 = vmax.f32 %v1706_v34, %v3298_v53  ;;  %v1788_v11 = vmax.f32 %v1707_v35, %v3301_v54  ;;  %v1789_v12 = vmax.f32 %v1708_v36, %v3302_v55  ;;  %v3627_v54 = vld [vmem:[%s4380_s0 + $0x628] sm:$0xff]   ;;  %v3628_v55 = vld [vmem:[%s4380_s0 + $0x630] sm:$0xff]  }
  0xb6   :  { %v3305_v13 = vunpack.c.l.bf16 %v3614_v61  ;;  %v3306_v16 = vunpack.c.h.bf16 %v3614_v61  ;;  %v3309_v17 = vunpack.c.l.bf16 %v3615_v2  ;;  %v3310_v18 = vunpack.c.h.bf16 %v3615_v2 }
  0xb7   :  { %v3313_v19 = vunpack.c.l.bf16 %v3616_v3  ;;  %v3314_v21 = vunpack.c.h.bf16 %v3616_v3  ;;  %v3317_v22 = vunpack.c.l.bf16 %v3617_v8  ;;  %v3318_v23 = vunpack.c.h.bf16 %v3617_v8 }
  0xb8   :  { %v3321_v24 = vunpack.c.l.bf16 %v3618_v9  ;;  %v3322_v25 = vunpack.c.h.bf16 %v3618_v9  ;;  %v3325_v26 = vunpack.c.l.bf16 %v3619_v14  ;;  %v3326_v27 = vunpack.c.h.bf16 %v3619_v14  ;;  %v3631_v14 = vld [vmem:[%s4380_s0 + $0x648] sm:$0xff]  }
  0xb9   :  { %v3329_v28 = vunpack.c.l.bf16 %v3620_v15  ;;  %v3330_v29 = vunpack.c.h.bf16 %v3620_v15  ;;  %v3333_v30 = vunpack.c.l.bf16 %v3621_v20  ;;  %v3334_v31 = vunpack.c.h.bf16 %v3621_v20 }
  0xba   :  { %v1855_v32 = vmax.f32 %v1774_v56, %v3305_v13  ;;  %v1856_v33 = vmax.f32 %v1775_v57, %v3306_v16  ;;  %v1857_v34 = vmax.f32 %v1776_v58, %v3309_v17  ;;  %v1858_v35 = vmax.f32 %v1777_v59, %v3310_v18 }
  0xbb   :  { %v1859_v36 = vmax.f32 %v1778_v60, %v3313_v19  ;;  %v1860_v38 = vmax.f32 %v1779_v62, %v3314_v21  ;;  %v1861_v39 = vmax.f32 %v1780_v63, %v3317_v22  ;;  %v1862_v40 = vmax.f32 %v1781_v0, %v3318_v23  ;;  %v3629_v60 = vld [vmem:[%s4380_s0 + $0x638] sm:$0xff]   ;;  %v3632_v19 = vld [vmem:[%s4380_s0 + $0x650] sm:$0xff]  }
  0xbc   :  { %v1863_v41 = vmax.f32 %v1782_v1, %v3321_v24  ;;  %v1864_v44 = vmax.f32 %v1783_v4, %v3322_v25  ;;  %v1865_v45 = vmax.f32 %v1784_v5, %v3325_v26  ;;  %v1866_v46 = vmax.f32 %v1785_v6, %v3326_v27  ;;  %v3630_v5 = vld [vmem:[%s4380_s0 + $0x640] sm:$0xff]   ;;  %v3633_v24 = vld [vmem:[%s4380_s0 + $0x658] sm:$0xff]  }
  0xbd   :  { %v1867_v47 = vmax.f32 %v1786_v7, %v3329_v28  ;;  %v1868_v50 = vmax.f32 %v1787_v10, %v3330_v29  ;;  %v1869_v51 = vmax.f32 %v1788_v11, %v3333_v30  ;;  %v1870_v52 = vmax.f32 %v1789_v12, %v3334_v31  ;;  %v3638_v25 = vld [vmem:[%s4380_s0 + $0x680] sm:$0xff]  }
  0xbe   :  { %v3337_v53 = vunpack.c.l.bf16 %v3622_v37  ;;  %v3338_v56 = vunpack.c.h.bf16 %v3622_v37  ;;  %v3341_v57 = vunpack.c.l.bf16 %v3623_v42  ;;  %v3342_v58 = vunpack.c.h.bf16 %v3623_v42  ;;  %v3634_v30 = vld [vmem:[%s4380_s0 + $0x660] sm:$0xff]  }
  0xbf   :  { %v3345_v59 = vunpack.c.l.bf16 %v3624_v43  ;;  %v3346_v61 = vunpack.c.h.bf16 %v3624_v43  ;;  %v3349_v62 = vunpack.c.l.bf16 %v3625_v48  ;;  %v3350_v63 = vunpack.c.h.bf16 %v3625_v48 }
  0xc0   :  { %v3353_v0 = vunpack.c.l.bf16 %v3626_v49  ;;  %v3354_v1 = vunpack.c.h.bf16 %v3626_v49  ;;  %v3357_v2 = vunpack.c.l.bf16 %v3627_v54  ;;  %v3358_v3 = vunpack.c.h.bf16 %v3627_v54  ;;  %v3637_v49 = vld [vmem:[%s4380_s0 + $0x678] sm:$0xff]  }
  0xc1   :  { %v3361_v4 = vunpack.c.l.bf16 %v3628_v55  ;;  %v3362_v6 = vunpack.c.h.bf16 %v3628_v55  ;;  %v3365_v7 = vunpack.c.l.bf16 %v3629_v60  ;;  %v3366_v8 = vunpack.c.h.bf16 %v3629_v60 }
  0xc2   :  { %v1936_v9 = vmax.f32 %v1855_v32, %v3337_v53  ;;  %v1937_v10 = vmax.f32 %v1856_v33, %v3338_v56  ;;  %v1938_v11 = vmax.f32 %v1857_v34, %v3341_v57  ;;  %v1939_v12 = vmax.f32 %v1858_v35, %v3342_v58  ;;  %v3635_v35 = vld [vmem:[%s4380_s0 + $0x668] sm:$0xff]   ;;  %v3641_v56 = vld [vmem:[%s4380_s0 + $0x698] sm:$0xff]  }
  0xc3   :  { %v1940_v13 = vmax.f32 %v1859_v36, %v3345_v59  ;;  %v1941_v15 = vmax.f32 %v1860_v38, %v3346_v61  ;;  %v1942_v16 = vmax.f32 %v1861_v39, %v3349_v62  ;;  %v1943_v17 = vmax.f32 %v1862_v40, %v3350_v63  ;;  %v3639_v36 = vld [vmem:[%s4380_s0 + $0x688] sm:$0xff]   ;;  %v3636_v39 = vld [vmem:[%s4380_s0 + $0x670] sm:$0xff]  }
  0xc4   :  { %v3369_v18 = vunpack.c.l.bf16 %v3630_v5  ;;  %v1944_v20 = vmax.f32 %v1863_v41, %v3353_v0  ;;  %v1945_v21 = vmax.f32 %v1864_v44, %v3354_v1  ;;  %v1946_v22 = vmax.f32 %v1865_v45, %v3357_v2  ;;  %v3642_v0 = vld [vmem:[%s4380_s0 + $0x6a0] sm:$0xff]  }
  0xc5   :  { %v3370_v23 = vunpack.c.h.bf16 %v3630_v5  ;;  %v1947_v26 = vmax.f32 %v1866_v46, %v3358_v3  ;;  %v4271_v27 = vmax.f32 %v1867_v47, %v3361_v4  ;;  %v4273_v28 = vmax.f32 %v1868_v50, %v3362_v6  ;;  %v3640_v46 = vld [vmem:[%s4380_s0 + $0x690] sm:$0xff]  }
  0xc6   :  { %v3373_v29 = vunpack.c.l.bf16 %v3631_v14  ;;  %v4278_v31 = vmax.f32 %v1869_v51, %v3365_v7  ;;  %v4280_v32 = vmax.f32 %v1870_v52, %v3366_v8  ;;  %v3374_v33 = vunpack.c.h.bf16 %v3631_v14 }
  0xc7   :  { %v3377_v34 = vunpack.c.l.bf16 %v3632_v19  ;;  %v3378_v37 = vunpack.c.h.bf16 %v3632_v19  ;;  %v3381_v38 = vunpack.c.l.bf16 %v3633_v24  ;;  %v2017_v40 = vmax.f32 %v1936_v9, %v3369_v18  ;;  %v3643_v9 = vld [vmem:[%s4380_s0 + $0x6a8] sm:$0xff]  }
  0xc8   :  { %v3401_v41 = vunpack.c.l.bf16 %v3638_v25  ;;  %v3382_v42 = vunpack.c.h.bf16 %v3633_v24  ;;  %v3385_v43 = vunpack.c.l.bf16 %v3634_v30  ;;  %v2018_v44 = vmax.f32 %v1937_v10, %v3370_v23 }
  0xc9   :  { %v3402_v45 = vunpack.c.h.bf16 %v3638_v25  ;;  %v3386_v47 = vunpack.c.h.bf16 %v3634_v30  ;;  %v3389_v48 = vunpack.c.l.bf16 %v3635_v35  ;;  %v2019_v50 = vmax.f32 %v1938_v11, %v3373_v29 }
  0xca   :  { %v3405_v51 = vunpack.c.l.bf16 %v3639_v36  ;;  %v3390_v52 = vunpack.c.h.bf16 %v3635_v35  ;;  %v3393_v53 = vunpack.c.l.bf16 %v3636_v39  ;;  %v2020_v54 = vmax.f32 %v1939_v12, %v3374_v33 }
  0xcb   :  { %v3406_v55 = vunpack.c.h.bf16 %v3639_v36  ;;  %v3394_v57 = vunpack.c.h.bf16 %v3636_v39  ;;  %v2021_v58 = vmax.f32 %v1940_v13, %v3377_v34  ;;  %v3409_v59 = vunpack.c.l.bf16 %v3640_v46 }
  0xcc   :  { %v2098_v60 = vmax.f32 %v2017_v40, %v3401_v41  ;;  %v3397_v61 = vunpack.c.l.bf16 %v3637_v49  ;;  %v2022_v62 = vmax.f32 %v1941_v15, %v3378_v37  ;;  %v3410_v63 = vunpack.c.h.bf16 %v3640_v46 }
  0xcd   :  { %v2099_v1 = vmax.f32 %v2018_v44, %v3402_v45  ;;  %v3398_v2 = vunpack.c.h.bf16 %v3637_v49  ;;  %v2023_v3 = vmax.f32 %v1942_v16, %v3381_v38  ;;  %v3413_v4 = vunpack.c.l.bf16 %v3641_v56  ;;  %v3644_v16 = vld [vmem:[%s4380_s0 + $0x6b0] sm:$0xff]  }
  0xce   :  { %v2100_v5 = vmax.f32 %v2019_v50, %v3405_v51  ;;  %v2024_v6 = vmax.f32 %v1943_v17, %v3382_v42  ;;  %v2025_v7 = vmax.f32 %v1944_v20, %v3385_v43  ;;  %v3414_v8 = vunpack.c.h.bf16 %v3641_v56 }
  0xcf   :  { %v2101_v10 = vmax.f32 %v2020_v54, %v3406_v55  ;;  %v2026_v11 = vmax.f32 %v1945_v21, %v3386_v47  ;;  %v3417_v12 = vunpack.c.l.bf16 %v3642_v0  ;;  %v2102_v13 = vmax.f32 %v2021_v58, %v3409_v59  ;;  %v3645_v21 = vld [vmem:[%s4380_s0 + $0x6b8] sm:$0xff]  }
  0xd0   :  { %v2114_v14 = vpack.c.bf16 %v2098_v60, %v2098_v60  ;;  %v2027_v15 = vmax.f32 %v1946_v22, %v3389_v48  ;;  %v3418_v18 = vunpack.c.h.bf16 %v3642_v0  ;;  %v2103_v19 = vmax.f32 %v2022_v62, %v3410_v63 }
  0xd1   :  { %v2115_v23 = vpack.c.bf16 %v2099_v1, %v2099_v1  ;;  %v2028_v17 = vmax.f32 %v1947_v26, %v3390_v52  ;;  %v3421_v20 = vunpack.c.l.bf16 %v3643_v9  ;;  %v2104_v24 = vmax.f32 %v2023_v3, %v3413_v4 }
  0xd2   :  { %v2116_v25 = vpack.c.bf16 %v2100_v5, %v2100_v5  ;;  %v3422_v29 = vunpack.c.h.bf16 %v3643_v9  ;;  %v2105_v30 = vmax.f32 %v2024_v6, %v3414_v8  ;;  %v2117_v33 = vpack.c.bf16 %v2101_v10, %v2101_v10  ;;  %2131 = vst.msk [vmem:[%s4381_s1] sm:$0xf] %vm2130_vm0, %v2114_v14 }
  0xd3   :  { %v2029_v22 = vmax.f32 %v4271_v27, %v3393_v53  ;;  %v3425_v34 = vunpack.c.l.bf16 %v3644_v16  ;;  %v2106_v35 = vmax.f32 %v2025_v7, %v3417_v12  ;;  %v2118_v36 = vpack.c.bf16 %v2102_v13, %v2102_v13  ;;  %2132 = vst.msk [vmem:[%s4381_s1 + $0x4] sm:$0xf] %vm2130_vm0, %v2115_v23 }
  0xd4   :  { %v2030_v26 = vmax.f32 %v4273_v28, %v3394_v57  ;;  %v3426_v37 = vunpack.c.h.bf16 %v3644_v16  ;;  %v2107_v38 = vmax.f32 %v2026_v11, %v3418_v18  ;;  %v2119_v39 = vpack.c.bf16 %v2103_v19, %v2103_v19  ;;  %2133 = vst.msk [vmem:[%s4381_s1 + $0x8] sm:$0xf] %vm2130_vm0, %v2116_v25 }
  0xd5   :  { %v2031_v27 = vmax.f32 %v4278_v31, %v3397_v61  ;;  %v3429_v40 = vunpack.c.l.bf16 %v3645_v21  ;;  %v2108_v41 = vmax.f32 %v2027_v15, %v3421_v20  ;;  %v2120_v42 = vpack.c.bf16 %v2104_v24, %v2104_v24  ;;  %2134 = vst.msk [vmem:[%s4381_s1 + $0xc] sm:$0xf] %vm2130_vm0, %v2117_v33 }
  0xd6   :  { %v2032_v28 = vmax.f32 %v4280_v32, %v3398_v2  ;;  %v3430_v43 = vunpack.c.h.bf16 %v3645_v21  ;;  %v2109_v44 = vmax.f32 %v2028_v17, %v3422_v29  ;;  %v2121_v45 = vpack.c.bf16 %v2105_v30, %v2105_v30  ;;  %2135 = vst.msk [vmem:[%s4381_s1 + $0x10] sm:$0xf] %vm2130_vm0, %v2118_v36 }
  0xd7   :  { %v2110_v46 = vmax.f32 %v2029_v22, %v3425_v34  ;;  %v2122_v31 = vpack.c.bf16 %v2106_v35, %v2106_v35  ;;  %v2111_v47 = vmax.f32 %v2030_v26, %v3426_v37  ;;  %v2123_v48 = vpack.c.bf16 %v2107_v38, %v2107_v38  ;;  %2136 = vst.msk [vmem:[%s4381_s1 + $0x14] sm:$0xf] %vm2130_vm0, %v2119_v39 }
  0xd8   :  { %v2112_v32 = vmax.f32 %v2031_v27, %v3429_v40  ;;  %v2124_v49 = vpack.c.bf16 %v2108_v41, %v2108_v41  ;;  %2137 = vst.msk [vmem:[%s4381_s1 + $0x18] sm:$0xf] %vm2130_vm0, %v2120_v42  ;;  %v2113_v50 = vmax.f32 %v2032_v28, %v3430_v43  ;;  %v2125_v51 = vpack.c.bf16 %v2109_v44, %v2109_v44 }
  0xd9   :  { %2138 = vst.msk [vmem:[%s4381_s1 + $0x1c] sm:$0xf] %vm2130_vm0, %v2121_v45  ;;  %v2126_v52 = vpack.c.bf16 %v2110_v46, %v2110_v46  ;;  %v2127_v53 = vpack.c.bf16 %v2111_v47, %v2111_v47 }
  0xda   :  { %2139 = vst.msk [vmem:[%s4381_s1 + $0x20] sm:$0xf] %vm2130_vm0, %v2122_v31  ;;  %v2128_v54 = vpack.c.bf16 %v2112_v32, %v2112_v32  ;;  %v2129_v55 = vpack.c.bf16 %v2113_v50, %v2113_v50 }
  0xdb   :  { %2140 = vst.msk [vmem:[%s4381_s1 + $0x24] sm:$0xf] %vm2130_vm0, %v2123_v48 }
  0xdc   :  { %2141 = vst.msk [vmem:[%s4381_s1 + $0x28] sm:$0xf] %vm2130_vm0, %v2124_v49 }
  0xdd   :  { %2142 = vst.msk [vmem:[%s4381_s1 + $0x2c] sm:$0xf] %vm2130_vm0, %v2125_v51 }
  0xde   :  { %2143 = vst.msk [vmem:[%s4381_s1 + $0x30] sm:$0xf] %vm2130_vm0, %v2126_v52 }
  0xdf   :  { %2144 = vst.msk [vmem:[%s4381_s1 + $0x34] sm:$0xf] %vm2130_vm0, %v2127_v53 }
  0xe0   :  { %2145 = vst.msk [vmem:[%s4381_s1 + $0x38] sm:$0xf] %vm2130_vm0, %v2128_v54 }
  0xe1   :  { %2146 = vst.msk [vmem:[%s4381_s1 + $0x3c] sm:$0xf] %vm2130_vm0, %v2129_v55 }

// kernel: resnet_forward.29
= control target key start
LH: loop header
LB: loop body
LE: loop exit
PB: predicated region body
PF: predicated region fallthrough
CT: control target
= control target key end

     0   :  { %s2759_s12 = smov 0   ;;  %s3346_s0 = inlined_call_operand.vmem [shape: bf16[128,1728], index: 0, kind: input, shape index: {}]   ;;  %s3347_s1 = inlined_call_operand.vmem [shape: bf16[1728,64], index: 1, kind: input, shape index: {}]   ;;  %s3348_s2 = inlined_call_operand.vmem [shape: f32[1,64], index: 2, kind: input, shape index: {}]   ;;  %s3349_s3 = inlined_call_operand.vmem [shape: bf16[128,64], index: 3, kind: output, shape index: {}]  }
   0x1 LB: > { %s1870_s13 = sadd.s32 4294967295, %s2737_s12   ;;  %p1874_p0 = scmp.ge.s32.totalorder %s2737_s12, 1  ;;  %s2737_s12 = sphi %s2759_s12, %s13_s12  }
   0x2   : > { %p139_p1 = scmp.lt.s32.totalorder %s2737_s12, 3 }
   0x4   : > { %p140_p2 = pnand %p1874_p0, %p139_p1 }
   0x5   : > { %s1875_s26 = sshll.u32 (!%p140_p2), %s1870_s13, 3 }
   0x6   : > { %143 = sbr.rel (%p140_p2) target bundleno = 402 (0x192), region = 32  ;;  %p165_p3 = scmp.lt.s32.totalorder (!%p140_p2), %s1875_s26, 15 }
   0xb   : > { %v2604_v0 = vld [vmem:[%s3347_s1 + $0x38] sm:$0xff]  ;;  %v2603_v2 = vld [vmem:[%s3347_s1 + $0x30] sm:$0xff]  ;;  %v2602_v4 = vld [vmem:[%s3347_s1 + $0x28] sm:$0xff]  ;;  %s3351_s26 = smov (!%p165_p3, %s1875_s26), 15  ;;  %vm1378_vm0 = vcmask 523264   ;;  %vm1805_vm1 = vcmask 519168  }
   0xc   : > { %v2612_v1 = vld [vmem:[%s3347_s1 + $0x78] sm:$0xff]  ;;  %2705 = vmatpush.bf16.msra.mxu2 %v2604_v0  ;;  %v2611_v3 = vld [vmem:[%s3347_s1 + $0x70] sm:$0xff]  ;;  %1391 = vmatpush.bf16.msra.mxu0 %v2604_v0  ;;  %v2610_v5 = vld [vmem:[%s3347_s1 + $0x68] sm:$0xff]  ;;  %s2721_s13 = smul.u32 56, %s3351_s26 }
   0xd   : > { %2713 = vmatpush.bf16.msra.mxu3 %v2612_v1  ;;  %1420 = vmatpush.bf16.msra.mxu1 %v2612_v1  ;;  %v2601_v6 = vld [vmem:[%s3347_s1 + $0x20] sm:$0xff]  ;;  %v2600_v8 = vld [vmem:[%s3347_s1 + $0x18] sm:$0xff]  ;;  %v2599_v10 = vld [vmem:[%s3347_s1 + $0x10] sm:$0xff] }
   0xe   : > { %v2609_v7 = vld [vmem:[%s3347_s1 + $0x60] sm:$0xff]  ;;  %v2608_v9 = vld [vmem:[%s3347_s1 + $0x58] sm:$0xff]  ;;  %v2607_v11 = vld [vmem:[%s3347_s1 + $0x50] sm:$0xff]  ;;  %s2815_s20 = scalar_lea.vmem %s3346_s0, %s2721_s13 }
   0xf   : > { %v2598_v12 = vld [vmem:[%s3347_s1 + $0x8] sm:$0xff]  ;;  %v2597_v14 = vld [vmem:[%s3347_s1] sm:$0xff]  ;;  %v2576_v17 = vld [vmem:[%s2815_s20 + $0x114] sm:$0xf0] }
  0x10   : > { %2706 = vmatpush.bf16.msra.mxu2 %v2603_v2  ;;  %1392 = vmatpush.bf16.msra.mxu0 %v2603_v2  ;;  %v2606_v13 = vld [vmem:[%s3347_s1 + $0x48] sm:$0xff]  ;;  %v2605_v15 = vld [vmem:[%s3347_s1 + $0x40] sm:$0xff]  ;;  %v1995_v19 = vld [vmem:[%s2815_s20 + $0x118] sm:$0xf0] }
  0x11   : > { %2714 = vmatpush.bf16.msra.mxu3 %v2611_v3  ;;  %1421 = vmatpush.bf16.msra.mxu1 %v2611_v3  ;;  %v1993_v16 = vld [vmem:[%s2815_s20 + $0xe0] sm:$0xf]  ;;  %v2569_v18 = vld [vmem:[%s2815_s20 + $0xe4] sm:$0xf]  ;;  %v2620_v20 = vld [vmem:[%s3347_s1 + $0xb8] sm:$0xff] }
  0x12   : > { %v1881_v21 = vld [vmem:[%s2815_s20] sm:$0xf]  ;;  %v2548_v22 = vld [vmem:[%s2815_s20 + $0x34] sm:$0xf0]  ;;  %v2541_v24 = vld [vmem:[%s2815_s20 + $0x4] sm:$0xf]  ;;  %v1994_v26 = vor.u32 %v2576_v17, %v1993_v16  ;;  %v1998_v27 = vor.u32 %v2569_v18, %v1995_v19 }
  0x13   : > { %v2628_v23 = vld [vmem:[%s3347_s1 + $0xf8] sm:$0xff]  ;;  %v1882_v28 = vor.u32 %v2548_v22, %v1881_v21  ;;  %v2619_v32 = vld [vmem:[%s3347_s1 + $0xb0] sm:$0xff]  ;;  %v2618_v36 = vld [vmem:[%s3347_s1 + $0xa8] sm:$0xff] }
  0x14   : > { %2707 = vmatpush.bf16.msra.mxu2 %v2602_v4  ;;  %1393 = vmatpush.bf16.msra.mxu0 %v2602_v4  ;;  %v1883_v25 = vld [vmem:[%s2815_s20 + $0x38] sm:$0xf0]  ;;  %v2627_v33 = vld [vmem:[%s3347_s1 + $0xf0] sm:$0xff]  ;;  %v2626_v37 = vld [vmem:[%s3347_s1 + $0xe8] sm:$0xff] }
  0x15   : > { %2715 = vmatpush.bf16.msra.mxu3 %v2610_v5  ;;  %1422 = vmatpush.bf16.msra.mxu1 %v2610_v5  ;;  %v2644_v29 = vld [vmem:[%s3347_s1 + $0x178] sm:$0xff]  ;;  %v1886_v31 = vor.u32 %v2541_v24, %v1883_v25  ;;  %v2643_v34 = vld [vmem:[%s3347_s1 + $0x170] sm:$0xff]  ;;  %v2642_v38 = vld [vmem:[%s3347_s1 + $0x168] sm:$0xff] }
  0x16   : > { %v2636_v30 = vld [vmem:[%s3347_s1 + $0x138] sm:$0xff]  ;;  %v2635_v35 = vld [vmem:[%s3347_s1 + $0x130] sm:$0xff]  ;;  %v2634_v39 = vld [vmem:[%s3347_s1 + $0x128] sm:$0xff] }
  0x17   : > { %v2617_v40 = vld [vmem:[%s3347_s1 + $0xa0] sm:$0xff]  ;;  %v2049_v43 = vld [vmem:[%s2815_s20 + $0x150] sm:$0xf]  ;;  %v2590_v44 = vld [vmem:[%s2815_s20 + $0x184] sm:$0xf0] }
  0x18   : > { %2708 = vmatpush.bf16.msra.mxu2 %v2601_v6  ;;  %1394 = vmatpush.bf16.msra.mxu0 %v2601_v6  ;;  %v2625_v41 = vld [vmem:[%s3347_s1 + $0xe0] sm:$0xff]  ;;  %v2583_v45 = vld [vmem:[%s2815_s20 + $0x154] sm:$0xf]  ;;  %v2051_v46 = vld [vmem:[%s2815_s20 + $0x188] sm:$0xf0]  ;;  %v2050_v54 = vor.u32 %v2590_v44, %v2049_v43 }
  0x19   : > { %2716 = vmatpush.bf16.msra.mxu3 %v2609_v7  ;;  %1423 = vmatpush.bf16.msra.mxu1 %v2609_v7  ;;  %v2633_v42 = vld [vmem:[%s3347_s1 + $0x120] sm:$0xff]  ;;  %v2616_v48 = vld [vmem:[%s3347_s1 + $0x98] sm:$0xff]  ;;  %v1937_v49 = vld [vmem:[%s2815_s20 + $0x70] sm:$0xf]  ;;  %v2054_v55 = vor.u32 %v2583_v45, %v2051_v46 }
  0x1a   : > { %v2641_v47 = vld [vmem:[%s3347_s1 + $0x160] sm:$0xff]  ;;  %v2562_v50 = vld [vmem:[%s2815_s20 + $0xa4] sm:$0xf0]  ;;  %v2624_v51 = vld [vmem:[%s3347_s1 + $0xd8] sm:$0xff] }
  0x1b   : > { %v2555_v52 = vld [vmem:[%s2815_s20 + $0x74] sm:$0xf]  ;;  %v1939_v53 = vld [vmem:[%s2815_s20 + $0xa8] sm:$0xf0]  ;;  %v1938_v56 = vor.u32 %v2562_v50, %v1937_v49  ;;  %v2640_v57 = vld [vmem:[%s3347_s1 + $0x158] sm:$0xff] }
  0x1c   : > { %2709 = vmatpush.bf16.msra.mxu2 %v2600_v8  ;;  %1395 = vmatpush.bf16.msra.mxu0 %v2600_v8  ;;  %v2632_v58 = vld [vmem:[%s3347_s1 + $0x118] sm:$0xff]  ;;  %v1942_v59 = vor.u32 %v2555_v52, %v1939_v53  ;;  %v2615_v60 = vld [vmem:[%s3347_s1 + $0x90] sm:$0xff]  ;;  %v2614_v0 = vld [vmem:[%s3347_s1 + $0x88] sm:$0xff] }
  0x1d   : > { %2717 = vmatpush.bf16.msra.mxu3 %v2608_v9  ;;  %1424 = vmatpush.bf16.msra.mxu1 %v2608_v9  ;;  %v2623_v61 = vld [vmem:[%s3347_s1 + $0xd0] sm:$0xff]  ;;  %v2622_v1 = vld [vmem:[%s3347_s1 + $0xc8] sm:$0xff]  ;;  %v2613_v4 = vld [vmem:[%s3347_s1 + $0x80] sm:$0xff] }
  0x1e   : > { %v2639_v62 = vld [vmem:[%s3347_s1 + $0x150] sm:$0xff]  ;;  %v2638_v2 = vld [vmem:[%s3347_s1 + $0x148] sm:$0xff]  ;;  %v2621_v5 = vld [vmem:[%s3347_s1 + $0xc0] sm:$0xff] }
  0x1f   : > { %v2631_v63 = vld [vmem:[%s3347_s1 + $0x110] sm:$0xff]  ;;  %v2630_v3 = vld [vmem:[%s3347_s1 + $0x108] sm:$0xff]  ;;  %v2629_v7 = vld [vmem:[%s3347_s1 + $0x100] sm:$0xff] }
  0x20   : > { %2710 = vmatpush.bf16.msra.mxu2 %v2599_v10  ;;  %1396 = vmatpush.bf16.msra.mxu0 %v2599_v10  ;;  %v1889_v6 = vld [vmem:[%s2815_s20 + $0x8] sm:$0xf]  ;;  %v2549_v8 = vld [vmem:[%s2815_s20 + $0x3c] sm:$0xf0]  ;;  %v2652_v9 = vld [vmem:[%s3347_s1 + $0x1b8] sm:$0xff] }
  0x21   : > { %2718 = vmatpush.bf16.msra.mxu3 %v2607_v11  ;;  %1425 = vmatpush.bf16.msra.mxu1 %v2607_v11  ;;  %v2660_v10 = vld [vmem:[%s3347_s1 + $0x1f8] sm:$0xff]  ;;  %v2542_v11 = vld [vmem:[%s2815_s20 + $0xc] sm:$0xf]  ;;  %v2543_v17 = vld [vmem:[%s2815_s20 + $0x14] sm:$0xf] }
  0x22   : > { %v2676_v16 = vld [vmem:[%s3347_s1 + $0x278] sm:$0xff]  ;;  %v1899_v18 = vld [vmem:[%s2815_s20 + $0x48] sm:$0xf0]  ;;  %v2659_v25 = vld [vmem:[%s3347_s1 + $0x1f0] sm:$0xff] }
  0x23   : > { %v2668_v19 = vld [vmem:[%s3347_s1 + $0x238] sm:$0xff]  ;;  %v1902_v24 = vor.u32 %v2543_v17, %v1899_v18  ;;  %v2557_v43 = vld [vmem:[%s2815_s20 + $0x84] sm:$0xf]  ;;  %v2655_v53 = vld [vmem:[%s3347_s1 + $0x1d0] sm:$0xff] }
  0x24   : > { %2711 = vmatpush.bf16.msra.mxu2 %v2598_v12  ;;  %1397 = vmatpush.bf16.msra.mxu0 %v2598_v12  ;;  %v1891_v12 = vld [vmem:[%s2815_s20 + $0x40] sm:$0xf0]  ;;  %v2656_v44 = vld [vmem:[%s3347_s1 + $0x1d8] sm:$0xff] }
  0x25   : > { %2719 = vmatpush.bf16.msra.mxu3 %v2606_v13  ;;  %1426 = vmatpush.bf16.msra.mxu1 %v2606_v13  ;;  %v2637_v13 = vld [vmem:[%s3347_s1 + $0x140] sm:$0xff]  ;;  %v1894_v21 = vor.u32 %v2542_v11, %v1891_v12  ;;  %v1955_v45 = vld [vmem:[%s2815_s20 + $0xb8] sm:$0xf0]  ;;  %v2057_v18 = vld [vmem:[%s2815_s20 + $0x158] sm:$0xf] }
  0x26   : > { %v2664_v46 = vld [vmem:[%s3347_s1 + $0x218] sm:$0xff]  ;;  %v1958_v52 = vor.u32 %v2557_v43, %v1955_v45  ;;  %v2669_v11 = vld [vmem:[%s3347_s1 + $0x240] sm:$0xff] }
  0x27   : > { %v2684_v12 = vld [vmem:[%s3347_s1 + $0x2b8] sm:$0xff]  ;;  %v2545_v43 = vld [vmem:[%s2815_s20 + $0x24] sm:$0xf] }
  0x28   : > { %2712 = vmatpush.bf16.msra.mxu2 %v2597_v14  ;;  %1398 = vmatpush.bf16.msra.mxu0 %v2597_v14  ;;  %v1897_v14 = vld [vmem:[%s2815_s20 + $0x10] sm:$0xf]  ;;  %v2704_v17 = vld [vmem:[%s3347_s1 + $0x358] sm:$0xff] }
  0x29   : > { %2720 = vmatpush.bf16.msra.mxu3 %v2605_v15  ;;  %1427 = vmatpush.bf16.msra.mxu1 %v2605_v15  ;;  %v2550_v15 = vld [vmem:[%s2815_s20 + $0x44] sm:$0xf0] }
  0x2a   : > { %v1898_v22 = vor.u32 %v2550_v15, %v1897_v14  ;;  %v2683_v14 = vld [vmem:[%s3347_s1 + $0x2b0] sm:$0xff]  ;;  %v2700_v15 = vld [vmem:[%s3347_s1 + $0x338] sm:$0xff] }
  0x2b   : > { %1409 = vmatmul.bf16.vlgmr.msra.gmra.mxu2 %v1994_v26  ;;  %1399 = vmatmul.bf16.vlgmr.msra.gmra.mxu0 %v1882_v28  ;;  %v2667_v26 = vld [vmem:[%s3347_s1 + $0x230] sm:$0xff]  ;;  %v2650_v28 = vld [vmem:[%s3347_s1 + $0x1a8] sm:$0xff] }
  0x2c   : > { %1449 = vmatpush.bf16.msrb.mxu2 %v2620_v20  ;;  %1438 = vmatmul.bf16.vlgmr.msra.gmra.mxu3 %v1998_v27  ;;  %v1890_v20 = vor.u32 %v2549_v8, %v1889_v6  ;;  %v2675_v27 = vld [vmem:[%s3347_s1 + $0x270] sm:$0xff]  ;;  %v2011_v6 = vld [vmem:[%s2815_s20 + $0x128] sm:$0xf0] }
  0x2d   : > { %1478 = vmatpush.bf16.msrb.mxu3 %v2628_v23  ;;  %1536 = vmatpush.bf16.msrb.mxu1 %v2644_v29  ;;  %v2651_v23 = vld [vmem:[%s3347_s1 + $0x1b0] sm:$0xff]  ;;  %v2658_v29 = vld [vmem:[%s3347_s1 + $0x1e8] sm:$0xff] }
  0x2e   : > { %1507 = vmatpush.bf16.msrb.mxu0 %v2636_v30  ;;  %1428 = vmatmul.bf16.vlgmr.msra.gmra.mxu1 %v1886_v31  ;;  %v2666_v30 = vld [vmem:[%s3347_s1 + $0x228] sm:$0xff] }
  0x2f   : > { %v2674_v31 = vld [vmem:[%s3347_s1 + $0x268] sm:$0xff] }
  0x30   : > { %1450 = vmatpush.bf16.msrb.mxu2 %v2619_v32  ;;  %v2649_v32 = vld [vmem:[%s3347_s1 + $0x1a0] sm:$0xff] }
  0x31   : > { %1479 = vmatpush.bf16.msrb.mxu3 %v2627_v33  ;;  %1537 = vmatpush.bf16.msrb.mxu1 %v2643_v34  ;;  %v2657_v33 = vld [vmem:[%s3347_s1 + $0x1e0] sm:$0xff] }
  0x32   : > { %1508 = vmatpush.bf16.msrb.mxu0 %v2635_v35  ;;  %v2665_v34 = vld [vmem:[%s3347_s1 + $0x220] sm:$0xff] }
  0x33   : > { %v2673_v35 = vld [vmem:[%s3347_s1 + $0x260] sm:$0xff] }
  0x34   : > { %1451 = vmatpush.bf16.msrb.mxu2 %v2618_v36  ;;  %v1945_v36 = vld [vmem:[%s2815_s20 + $0x78] sm:$0xf] }
  0x35   : > { %1480 = vmatpush.bf16.msrb.mxu3 %v2626_v37  ;;  %1538 = vmatpush.bf16.msrb.mxu1 %v2642_v38  ;;  %v2563_v37 = vld [vmem:[%s2815_s20 + $0xac] sm:$0xf0]  ;;  %v2556_v38 = vld [vmem:[%s2815_s20 + $0x7c] sm:$0xf] }
  0x36   : > { %1509 = vmatpush.bf16.msrb.mxu0 %v2634_v39  ;;  %v1947_v39 = vld [vmem:[%s2815_s20 + $0xb0] sm:$0xf0] }
  0x37   : > { %v1950_v49 = vor.u32 %v2556_v38, %v1947_v39  ;;  %v2551_v38 = vld [vmem:[%s2815_s20 + $0x4c] sm:$0xf0]  ;;  %v2544_v39 = vld [vmem:[%s2815_s20 + $0x1c] sm:$0xf] }
  0x38   : > { %1452 = vmatpush.bf16.msrb.mxu2 %v2617_v40  ;;  %v1953_v40 = vld [vmem:[%s2815_s20 + $0x80] sm:$0xf] }
  0x39   : > { %1481 = vmatpush.bf16.msrb.mxu3 %v2625_v41  ;;  %1539 = vmatpush.bf16.msrb.mxu1 %v2641_v47  ;;  %v2648_v41 = vld [vmem:[%s3347_s1 + $0x198] sm:$0xff] }
  0x3a   : > { %1510 = vmatpush.bf16.msrb.mxu0 %v2633_v42  ;;  %v2564_v42 = vld [vmem:[%s2815_s20 + $0xb4] sm:$0xf0] }
  0x3b   : > { %1414 = vmatmul.bf16.gmra.mxu2 %v2050_v54  ;;  %1404 = vmatmul.bf16.gmra.mxu0 %v1938_v56  ;;  %v2672_v47 = vld [vmem:[%s3347_s1 + $0x258] sm:$0xff]  ;;  %v1954_v50 = vor.u32 %v2564_v42, %v1953_v40  ;;  %v2646_v54 = vld [vmem:[%s3347_s1 + $0x188] sm:$0xff]  ;;  %v1907_v40 = vld [vmem:[%s2815_s20 + $0x50] sm:$0xf0] }
  0x3c   : > { %1453 = vmatpush.bf16.msrb.mxu2 %v2616_v48  ;;  %1443 = vmatmul.bf16.gmra.mxu3 %v2054_v55  ;;  %v1946_v48 = vor.u32 %v2563_v37, %v1945_v36  ;;  %v2663_v55 = vld [vmem:[%s3347_s1 + $0x210] sm:$0xff]  ;;  %v2654_v56 = vld [vmem:[%s3347_s1 + $0x1c8] sm:$0xff]  ;;  %v1905_v37 = vld [vmem:[%s2815_s20 + $0x18] sm:$0xf] }
  0x3d   : > { %1482 = vmatpush.bf16.msrb.mxu3 %v2624_v51  ;;  %1540 = vmatpush.bf16.msrb.mxu1 %v2640_v57  ;;  %v2647_v51 = vld [vmem:[%s3347_s1 + $0x190] sm:$0xff]  ;;  %v2552_v42 = vld [vmem:[%s2815_s20 + $0x54] sm:$0xf0]  ;;  %v1906_v45 = vor.u32 %v2551_v38, %v1905_v37  ;;  %v2593_v38 = vld [vmem:[%s2815_s20 + $0x19c] sm:$0xf0] }
  0x3e   : > { %1511 = vmatpush.bf16.msrb.mxu0 %v2632_v58  ;;  %1433 = vmatmul.bf16.gmra.mxu1 %v1942_v59  ;;  %v2671_v57 = vld [vmem:[%s3347_s1 + $0x250] sm:$0xff]  ;;  %v2662_v58 = vld [vmem:[%s3347_s1 + $0x208] sm:$0xff] }
  0x3f   : > { %v2670_v59 = vld [vmem:[%s3347_s1 + $0x248] sm:$0xff]  ;;  %v2703_v36 = vld [vmem:[%s3347_s1 + $0x350] sm:$0xff] }
  0x40   : > { %1454 = vmatpush.bf16.msrb.mxu2 %v2615_v60  ;;  %v2645_v60 = vld [vmem:[%s3347_s1 + $0x180] sm:$0xff] }
  0x41   : > { %1483 = vmatpush.bf16.msrb.mxu3 %v2623_v61  ;;  %1541 = vmatpush.bf16.msrb.mxu1 %v2639_v62  ;;  %v2653_v61 = vld [vmem:[%s3347_s1 + $0x1c0] sm:$0xff] }
  0x42   : > { %1512 = vmatpush.bf16.msrb.mxu0 %v2631_v63  ;;  %v2661_v62 = vld [vmem:[%s3347_s1 + $0x200] sm:$0xff]  ;;  %v2001_v63 = vld [vmem:[%s2815_s20 + $0xe8] sm:$0xf] }
  0x44   : > { %1455 = vmatpush.bf16.msrb.mxu2 %v2614_v0  ;;  %v2577_v0 = vld [vmem:[%s2815_s20 + $0x11c] sm:$0xf0] }
  0x45   : > { %1484 = vmatpush.bf16.msrb.mxu3 %v2622_v1  ;;  %1542 = vmatpush.bf16.msrb.mxu1 %v2638_v2  ;;  %v2570_v1 = vld [vmem:[%s2815_s20 + $0xec] sm:$0xf]  ;;  %v2003_v2 = vld [vmem:[%s2815_s20 + $0x120] sm:$0xf0] }
  0x46   : > { %1513 = vmatpush.bf16.msrb.mxu0 %v2630_v3  ;;  %v2009_v3 = vld [vmem:[%s2815_s20 + $0xf0] sm:$0xf]  ;;  %v2006_v8 = vor.u32 %v2570_v1, %v2003_v2 }
  0x48   : > { %1456 = vmatpush.bf16.msrb.mxu2 %v2613_v4  ;;  %v2578_v4 = vld [vmem:[%s2815_s20 + $0x124] sm:$0xf0] }
  0x49   : > { %1485 = vmatpush.bf16.msrb.mxu3 %v2621_v5  ;;  %1543 = vmatpush.bf16.msrb.mxu1 %v2637_v13  ;;  %v2571_v5 = vld [vmem:[%s2815_s20 + $0xf4] sm:$0xf]  ;;  %v2692_v13 = vld [vmem:[%s3347_s1 + $0x2f8] sm:$0xff] }
  0x4a   : > { %1514 = vmatpush.bf16.msrb.mxu0 %v2629_v7  ;;  %v2002_v7 = vor.u32 %v2577_v0, %v2001_v63 }
  0x4b   : > { %1457 = vmatmul.bf16.vlgmr.msrb.gmra.mxu2 %v1890_v20  ;;  %v2584_v20 = vld [vmem:[%s2815_s20 + $0x15c] sm:$0xf] }
  0x4c   : > { %1565 = vmatpush.bf16.msra.mxu2 %v2652_v9  ;;  %1486 = vmatmul.bf16.vlgmr.msrb.gmra.mxu3 %v1894_v21  ;;  %v2010_v9 = vor.u32 %v2578_v4, %v2009_v3  ;;  %v2059_v21 = vld [vmem:[%s2815_s20 + $0x190] sm:$0xf0]  ;;  %v2702_v3 = vld [vmem:[%s3347_s1 + $0x348] sm:$0xff] }
  0x4d   : > { %1594 = vmatpush.bf16.msra.mxu3 %v2660_v10  ;;  %1652 = vmatpush.bf16.msra.mxu1 %v2676_v16  ;;  %v2014_v10 = vor.u32 %v2571_v5, %v2011_v6  ;;  %v2691_v16 = vld [vmem:[%s3347_s1 + $0x2f0] sm:$0xff]  ;;  %v2678_v4 = vld [vmem:[%s3347_s1 + $0x288] sm:$0xff] }
  0x4e   : > { %1623 = vmatpush.bf16.msra.mxu0 %v2668_v19  ;;  %1544 = vmatmul.bf16.vlgmr.msrb.gmra.mxu1 %v1902_v24  ;;  %v2591_v19 = vld [vmem:[%s2815_s20 + $0x18c] sm:$0xf0]  ;;  %v2585_v24 = vld [vmem:[%s2815_s20 + $0x164] sm:$0xf]  ;;  %v2686_v5 = vld [vmem:[%s3347_s1 + $0x2c8] sm:$0xff] }
  0x4f   : > { %1515 = vmatmul.bf16.vlgmr.msrb.gmra.mxu0 %v1898_v22  ;;  %v2065_v22 = vld [vmem:[%s2815_s20 + $0x160] sm:$0xf]  ;;  %v2695_v6 = vld [vmem:[%s3347_s1 + $0x310] sm:$0xff] }
  0x50   : > { %1566 = vmatpush.bf16.msra.mxu2 %v2651_v23  ;;  %v2592_v23 = vld [vmem:[%s2815_s20 + $0x194] sm:$0xf0] }
  0x51   : > { %1595 = vmatpush.bf16.msra.mxu3 %v2659_v25  ;;  %1653 = vmatpush.bf16.msra.mxu1 %v2675_v27  ;;  %v2067_v25 = vld [vmem:[%s2815_s20 + $0x198] sm:$0xf0]  ;;  %v2062_v27 = vor.u32 %v2584_v20, %v2059_v21  ;;  %v3168_v20 = vld [vmem:[%s3348_s2] ss:$0 sm:$0xff] }
  0x52   : > { %1624 = vmatpush.bf16.msra.mxu0 %v2667_v26  ;;  %v2058_v26 = vor.u32 %v2591_v19, %v2057_v18 }
  0x54   : > { %1567 = vmatpush.bf16.msra.mxu2 %v2650_v28  ;;  %v2066_v28 = vor.u32 %v2592_v23, %v2065_v22  ;;  %v2693_v22 = vld [vmem:[%s3347_s1 + $0x300] sm:$0xff] }
  0x55   : > { %1596 = vmatpush.bf16.msra.mxu3 %v2658_v29  ;;  %1654 = vmatpush.bf16.msra.mxu1 %v2674_v31  ;;  %v2070_v29 = vor.u32 %v2585_v24, %v2067_v25  ;;  %v2690_v31 = vld [vmem:[%s3347_s1 + $0x2e8] sm:$0xff]  ;;  %v2701_v25 = vld [vmem:[%s3347_s1 + $0x340] sm:$0xff] }
  0x56   : > { %1625 = vmatpush.bf16.msra.mxu0 %v2666_v30  ;;  %v2682_v30 = vld [vmem:[%s3347_s1 + $0x2a8] sm:$0xff] }
  0x58   : > { %1568 = vmatpush.bf16.msra.mxu2 %v2649_v32  ;;  %v2699_v32 = vld [vmem:[%s3347_s1 + $0x330] sm:$0xff] }
  0x59   : > { %1597 = vmatpush.bf16.msra.mxu3 %v2657_v33  ;;  %1655 = vmatpush.bf16.msra.mxu1 %v2673_v35  ;;  %v2681_v33 = vld [vmem:[%s3347_s1 + $0x2a0] sm:$0xff]  ;;  %v2698_v35 = vld [vmem:[%s3347_s1 + $0x328] sm:$0xff] }
  0x5a   : > { %1626 = vmatpush.bf16.msra.mxu0 %v2665_v34  ;;  %v2689_v34 = vld [vmem:[%s3347_s1 + $0x2e0] sm:$0xff] }
  0x5b   : > { %1462 = vmatmul.bf16.gmra.mxu2 %v1946_v48 }
  0x5c   : > { %1569 = vmatpush.bf16.msra.mxu2 %v2648_v41  ;;  %1491 = vmatmul.bf16.gmra.mxu3 %v1950_v49  ;;  %v1913_v41 = vld [vmem:[%s2815_s20 + $0x20] sm:$0xf]  ;;  %v2680_v49 = vld [vmem:[%s3347_s1 + $0x298] sm:$0xff] }
  0x5d   : > { %1598 = vmatpush.bf16.msra.mxu3 %v2656_v44  ;;  %1656 = vmatpush.bf16.msra.mxu1 %v2672_v47  ;;  %v1915_v44 = vld [vmem:[%s2815_s20 + $0x58] sm:$0xf0]  ;;  %v1914_v47 = vor.u32 %v2552_v42, %v1913_v41  ;;  %v2081_v41 = vld [vmem:[%s2815_s20 + $0x170] sm:$0xf]  ;;  %v2594_v42 = vld [vmem:[%s2815_s20 + $0x1a4] sm:$0xf0] }
  0x5e   : > { %1627 = vmatpush.bf16.msra.mxu0 %v2664_v46  ;;  %1549 = vmatmul.bf16.gmra.mxu1 %v1958_v52  ;;  %v1910_v46 = vor.u32 %v2544_v39, %v1907_v40  ;;  %v1918_v48 = vor.u32 %v2545_v43, %v1915_v44  ;;  %v2679_v52 = vld [vmem:[%s3347_s1 + $0x290] sm:$0xff]  ;;  %v2586_v39 = vld [vmem:[%s2815_s20 + $0x16c] sm:$0xf]  ;;  %v2075_v40 = vld [vmem:[%s2815_s20 + $0x1a0] sm:$0xf0] }
  0x5f   : > { %1520 = vmatmul.bf16.gmra.mxu0 %v1954_v50  ;;  %v2688_v50 = vld [vmem:[%s3347_s1 + $0x2d8] sm:$0xff] }
  0x60   : > { %1570 = vmatpush.bf16.msra.mxu2 %v2647_v51  ;;  %v2697_v51 = vld [vmem:[%s3347_s1 + $0x320] sm:$0xff] }
  0x61   : > { %1599 = vmatpush.bf16.msra.mxu3 %v2655_v53  ;;  %1657 = vmatpush.bf16.msra.mxu1 %v2671_v57  ;;  %v1961_v53 = vld [vmem:[%s2815_s20 + $0x88] sm:$0xf]  ;;  %v2687_v57 = vld [vmem:[%s3347_s1 + $0x2d0] sm:$0xff] }
  0x62   : > { %1628 = vmatpush.bf16.msra.mxu0 %v2663_v55  ;;  %v2558_v55 = vld [vmem:[%s2815_s20 + $0x8c] sm:$0xf] }
  0x64   : > { %1571 = vmatpush.bf16.msra.mxu2 %v2646_v54  ;;  %v2565_v54 = vld [vmem:[%s2815_s20 + $0xbc] sm:$0xf0] }
  0x65   : > { %1600 = vmatpush.bf16.msra.mxu3 %v2654_v56  ;;  %1658 = vmatpush.bf16.msra.mxu1 %v2670_v59  ;;  %v1963_v56 = vld [vmem:[%s2815_s20 + $0xc0] sm:$0xf0]  ;;  %v1969_v59 = vld [vmem:[%s2815_s20 + $0x90] sm:$0xf]  ;;  %v1962_v63 = vor.u32 %v2565_v54, %v1961_v53 }
  0x66   : > { %1629 = vmatpush.bf16.msra.mxu0 %v2662_v58  ;;  %v2696_v58 = vld [vmem:[%s3347_s1 + $0x318] sm:$0xff]  ;;  %v1966_v0 = vor.u32 %v2558_v55, %v1963_v56 }
  0x68   : > { %1572 = vmatpush.bf16.msra.mxu2 %v2645_v60  ;;  %v2566_v60 = vld [vmem:[%s2815_s20 + $0xc4] sm:$0xf0] }
  0x69   : > { %1601 = vmatpush.bf16.msra.mxu3 %v2653_v61  ;;  %1659 = vmatpush.bf16.msra.mxu1 %v2669_v11  ;;  %v2559_v61 = vld [vmem:[%s2815_s20 + $0x94] sm:$0xf]  ;;  %v1970_v1 = vor.u32 %v2566_v60, %v1969_v59 }
  0x6a   : > { %1630 = vmatpush.bf16.msra.mxu0 %v2661_v62  ;;  %v1971_v62 = vld [vmem:[%s2815_s20 + $0xc8] sm:$0xf0]  ;;  %v2019_v11 = vld [vmem:[%s2815_s20 + $0x130] sm:$0xf0] }
  0x6b   : > { %1467 = vmatmul.bf16.gmra.mxu2 %v2002_v7  ;;  %v1974_v2 = vor.u32 %v2559_v61, %v1971_v62  ;;  %v2677_v7 = vld [vmem:[%s3347_s1 + $0x280] sm:$0xff] }
  0x6c   : > { %1496 = vmatmul.bf16.gmra.mxu3 %v2006_v8  ;;  %1681 = vmatpush.bf16.msrb.mxu2 %v2684_v12  ;;  %v2017_v8 = vld [vmem:[%s2815_s20 + $0xf8] sm:$0xf]  ;;  %v2685_v12 = vld [vmem:[%s3347_s1 + $0x2c0] sm:$0xff] }
  0x6d   : > { %1710 = vmatpush.bf16.msrb.mxu3 %v2692_v13  ;;  %1772 = vmatpush.bf16.msrb.mxu1 %v2704_v17  ;;  %v2694_v13 = vld [vmem:[%s3347_s1 + $0x308] sm:$0xff]  ;;  %v2027_v17 = vld [vmem:[%s2815_s20 + $0x138] sm:$0xf0] }
  0x6e   : > { %1554 = vmatmul.bf16.gmra.mxu1 %v2014_v10  ;;  %1739 = vmatpush.bf16.msrb.mxu0 %v2700_v15  ;;  %v2572_v10 = vld [vmem:[%s2815_s20 + $0xfc] sm:$0xf]  ;;  %v2580_v15 = vld [vmem:[%s2815_s20 + $0x134] sm:$0xf0] }
  0x6f   : > { %1525 = vmatmul.bf16.gmra.mxu0 %v2010_v9  ;;  %v2579_v9 = vld [vmem:[%s2815_s20 + $0x12c] sm:$0xf0]  ;;  %v2022_v19 = vor.u32 %v2572_v10, %v2019_v11  ;;  %v1931_v10 = vld [vmem:[%s2815_s20 + $0x68] sm:$0xf0] }
  0x70   : > { %1682 = vmatpush.bf16.msrb.mxu2 %v2683_v14  ;;  %v2025_v14 = vld [vmem:[%s2815_s20 + $0x100] sm:$0xf]  ;;  %v2018_v18 = vor.u32 %v2579_v9, %v2017_v8  ;;  %v2547_v9 = vld [vmem:[%s2815_s20 + $0x34] sm:$0xf] }
  0x71   : > { %1711 = vmatpush.bf16.msrb.mxu3 %v2691_v16  ;;  %1773 = vmatpush.bf16.msrb.mxu1 %v2703_v36  ;;  %v2573_v16 = vld [vmem:[%s2815_s20 + $0x104] sm:$0xf]  ;;  %v2026_v21 = vor.u32 %v2580_v15, %v2025_v14  ;;  %v2073_v36 = vld [vmem:[%s2815_s20 + $0x168] sm:$0xf] }
  0x72   : > { %1740 = vmatpush.bf16.msrb.mxu0 %v2699_v32  ;;  %v2030_v24 = vor.u32 %v2573_v16, %v2027_v17  ;;  %v1934_v17 = vor.u32 %v2547_v9, %v1931_v10 }
  0x74   : > { %1683 = vmatpush.bf16.msrb.mxu2 %v2682_v30 }
  0x75   : > { %1712 = vmatpush.bf16.msrb.mxu3 %v2690_v31  ;;  %1774 = vmatpush.bf16.msrb.mxu1 %v2702_v3  ;;  %v2546_v3 = vld [vmem:[%s2815_s20 + $0x2c] sm:$0xf] }
  0x76   : > { %1741 = vmatpush.bf16.msrb.mxu0 %v2698_v35 }
  0x78   : > { %1684 = vmatpush.bf16.msrb.mxu2 %v2681_v33 }
  0x79   : > { %1713 = vmatpush.bf16.msrb.mxu3 %v2689_v34  ;;  %1775 = vmatpush.bf16.msrb.mxu1 %v2701_v25 }
  0x7a   : > { %1742 = vmatpush.bf16.msrb.mxu0 %v2697_v51 }
  0x7b   : > { %1472 = vmatmul.bf16.gmra.mxu2 %v2058_v26 }
  0x7c   : > { %1501 = vmatmul.bf16.gmra.mxu3 %v2062_v27  ;;  %1685 = vmatpush.bf16.msrb.mxu2 %v2680_v49  ;;  %v2078_v49 = vor.u32 %v2586_v39, %v2075_v40  ;;  %v1987_v39 = vld [vmem:[%s2815_s20 + $0xd8] sm:$0xf0] }
  0x7d   : > { %1714 = vmatpush.bf16.msrb.mxu3 %v2688_v50  ;;  %v2082_v50 = vor.u32 %v2594_v42, %v2081_v41 }
  0x7e   : > { %1559 = vmatmul.bf16.gmra.mxu1 %v2070_v29  ;;  %1743 = vmatpush.bf16.msrb.mxu0 %v2696_v58 }
  0x7f   : > { %1530 = vmatmul.bf16.gmra.mxu0 %v2066_v28 }
  0x80   : > { %1686 = vmatpush.bf16.msrb.mxu2 %v2679_v52 }
  0x81   : > { %1715 = vmatpush.bf16.msrb.mxu3 %v2687_v57 }
  0x82   : > { %1744 = vmatpush.bf16.msrb.mxu0 %v2695_v6  ;;  %v2554_v6 = vld [vmem:[%s2815_s20 + $0x64] sm:$0xf0] }
  0x84   : > { %1687 = vmatpush.bf16.msrb.mxu2 %v2678_v4  ;;  %v1923_v4 = vld [vmem:[%s2815_s20 + $0x60] sm:$0xf0] }
  0x85   : > { %1716 = vmatpush.bf16.msrb.mxu3 %v2686_v5  ;;  %v1929_v5 = vld [vmem:[%s2815_s20 + $0x30] sm:$0xf] }
  0x86   : > { %1745 = vmatpush.bf16.msrb.mxu0 %v2694_v13  ;;  %v1926_v13 = vor.u32 %v2546_v3, %v1923_v4  ;;  %v1930_v14 = vor.u32 %v2554_v6, %v1929_v5  ;;  %v2575_v4 = vld [vmem:[%s2815_s20 + $0x114] sm:$0xf]  ;;  %v2043_v5 = vld [vmem:[%s2815_s20 + $0x148] sm:$0xf0] }
  0x88   : > { %1688 = vmatpush.bf16.msrb.mxu2 %v2677_v7 }
  0x89   : > { %1717 = vmatpush.bf16.msrb.mxu3 %v2685_v12 }
  0x8a   : > { %1746 = vmatpush.bf16.msrb.mxu0 %v2693_v22 }
  0x8b   : > { %1573 = vmatmul.bf16.vlgmr.msra.gmra.mxu2 %v1906_v45  ;;  %v2587_v45 = vld [vmem:[%s2815_s20 + $0x174] sm:$0xf] }
  0x8c   : > { %1602 = vmatmul.bf16.vlgmr.msra.gmra.mxu3 %v1910_v46  ;;  %v2083_v46 = vld [vmem:[%s2815_s20 + $0x1a8] sm:$0xf0] }
  0x8d   : > { %v2086_v53 = vor.u32 %v2587_v45, %v2083_v46 }
  0x8e   : > { %1660 = vmatmul.bf16.vlgmr.msra.gmra.mxu1 %v1918_v48  ;;  %v2074_v48 = vor.u32 %v2593_v38, %v2073_v36  ;;  %v2561_v38 = vld [vmem:[%s2815_s20 + $0xa4] sm:$0xf] }
  0x8f   : > { %1631 = vmatmul.bf16.vlgmr.msra.gmra.mxu0 %v1914_v47  ;;  %v1990_v45 = vor.u32 %v2561_v38, %v1987_v39 }
  0x9b   : > { %1578 = vmatmul.bf16.gmra.mxu2 %v1962_v63 }
  0x9c   : > { %1607 = vmatmul.bf16.gmra.mxu3 %v1966_v0  ;;  %v1921_v0 = vld [vmem:[%s2815_s20 + $0x28] sm:$0xf] }
  0x9e   : > { %1665 = vmatmul.bf16.gmra.mxu1 %v1974_v2  ;;  %v2553_v2 = vld [vmem:[%s2815_s20 + $0x5c] sm:$0xf0] }
  0x9f   : > { %1636 = vmatmul.bf16.gmra.mxu0 %v1970_v1  ;;  %v1922_v12 = vor.u32 %v2553_v2, %v1921_v0 }
  0xa8   : > { %v1400_v23 = vpop.f32.mrf.mxu0 }
  0xa9   : > { %v1401_v26 = vadd.f32 %v3168_v20, %v1400_v23 }
  0xab   : > { %v1429_v27 = vpop.f32.mrf.mxu1  ;;  %1583 = vmatmul.bf16.gmra.mxu2 %v2018_v18 }
  0xac   : > { %1612 = vmatmul.bf16.gmra.mxu3 %v2022_v19  ;;  %v3177_v28 = vadd.f32 %v1429_v27, %v1401_v26  ;;  %v1977_v26 = vld [vmem:[%s2815_s20 + $0x98] sm:$0xf]  ;;  %v2567_v27 = vld [vmem:[%s2815_s20 + $0xcc] sm:$0xf0] }
  0xad   : > { %v1978_v41 = vor.u32 %v2567_v27, %v1977_v26  ;;  %v2097_v26 = vld [vmem:[%s2815_s20 + $0x180] sm:$0xf]  ;;  %v2596_v27 = vld [vmem:[%s2815_s20 + $0x1b4] sm:$0xf0] }
  0xae   : > { %1670 = vmatmul.bf16.gmra.mxu1 %v2030_v24  ;;  %v1410_v29 = vpop.f32.mrf.mxu2  ;;  %v2098_v39 = vor.u32 %v2596_v27, %v2097_v26 }
  0xaf   : > { %1641 = vmatmul.bf16.gmra.mxu0 %v2026_v21  ;;  %v1439_v30 = vpop.f32.mrf.mxu3  ;;  %v1411_v31 = vadd.f32 %v3168_v20, %v1410_v29  ;;  %v2560_v29 = vld [vmem:[%s2815_s20 + $0x9c] sm:$0xf] }
  0xb0   : > { %v1402_v33 = vpop.f32.mrf.mxu0 }
  0xb1   : > { %v3180_v32 = vadd.f32 %v1439_v30, %v1411_v31  ;;  %v1403_v34 = vadd.f32 %v3168_v20, %v1402_v33  ;;  %v1979_v30 = vld [vmem:[%s2815_s20 + $0xd0] sm:$0xf0]  ;;  %v1985_v31 = vld [vmem:[%s2815_s20 + $0xa0] sm:$0xf]  ;;  %v2568_v33 = vld [vmem:[%s2815_s20 + $0xd4] sm:$0xf0] }
  0xb2   : > { %v1986_v42 = vor.u32 %v2568_v33, %v1985_v31  ;;  %v2589_v33 = vld [vmem:[%s2815_s20 + $0x184] sm:$0xf] }
  0xb3   : > { %v1431_v35 = vpop.f32.mrf.mxu1 }
  0xb4   : > { %v3184_v37 = vadd.f32 %v1431_v35, %v1403_v34 }
  0xb6   : > { %v1412_v43 = vpop.f32.mrf.mxu2 }
  0xb7   : > { %v1441_v44 = vpop.f32.mrf.mxu3  ;;  %v1413_v47 = vadd.f32 %v3168_v20, %v1412_v43 }
  0xb8   : > { %v1405_v52 = vpop.f32.mrf.mxu0 }
  0xb9   : > { %v3194_v51 = vadd.f32 %v1441_v44, %v1413_v47  ;;  %v1406_v54 = vadd.f32 %v3168_v20, %v1405_v52 }
  0xbb   : > { %v1434_v55 = vpop.f32.mrf.mxu1  ;;  %1588 = vmatmul.bf16.gmra.mxu2 %v2074_v48 }
  0xbc   : > { %1617 = vmatmul.bf16.gmra.mxu3 %v2078_v49  ;;  %v3197_v56 = vadd.f32 %v1434_v55, %v1406_v54 }
  0xbe   : > { %1675 = vmatmul.bf16.gmra.mxu1 %v2086_v53  ;;  %v1415_v57 = vpop.f32.mrf.mxu2 }
  0xbf   : > { %1646 = vmatmul.bf16.gmra.mxu0 %v2082_v50  ;;  %v1444_v58 = vpop.f32.mrf.mxu3  ;;  %v1416_v59 = vadd.f32 %v3168_v20, %v1415_v57  ;;  %v2033_v57 = vld [vmem:[%s2815_s20 + $0x108] sm:$0xf] }
  0xc0   : > { %v1407_v61 = vpop.f32.mrf.mxu0 }
  0xc1   : > { %v3200_v60 = vadd.f32 %v1444_v58, %v1416_v59  ;;  %v1408_v62 = vadd.f32 %v3168_v20, %v1407_v61  ;;  %v2581_v58 = vld [vmem:[%s2815_s20 + $0x13c] sm:$0xf0]  ;;  %v2574_v59 = vld [vmem:[%s2815_s20 + $0x10c] sm:$0xf]  ;;  %v2035_v61 = vld [vmem:[%s2815_s20 + $0x140] sm:$0xf0] }
  0xc3   : > { %v1436_v63 = vpop.f32.mrf.mxu1 }
  0xc4   : > { %v3204_v1 = vadd.f32 %v1436_v63, %v1408_v62  ;;  %v2041_v62 = vld [vmem:[%s2815_s20 + $0x110] sm:$0xf]  ;;  %v2582_v63 = vld [vmem:[%s2815_s20 + $0x144] sm:$0xf0] }
  0xc6   : > { %v1417_v7 = vpop.f32.mrf.mxu2 }
  0xc7   : > { %v1446_v8 = vpop.f32.mrf.mxu3  ;;  %v1418_v11 = vadd.f32 %v3168_v20, %v1417_v7  ;;  %v2034_v7 = vor.u32 %v2581_v58, %v2033_v57 }
  0xc9   : > { %v3214_v15 = vadd.f32 %v1446_v8, %v1418_v11  ;;  %v2042_v8 = vor.u32 %v2582_v63, %v2041_v62  ;;  %v2046_v11 = vor.u32 %v2575_v4, %v2043_v5 }
  0xcb   : > { %v1545_v18 = vpop.f32.mrf.mxu1  ;;  %1689 = vmatmul.bf16.vlgmr.msrb.gmra.mxu2 %v1922_v12 }
  0xcc   : > { %v1516_v16 = vpop.f32.mrf.mxu0  ;;  %1718 = vmatmul.bf16.vlgmr.msrb.gmra.mxu3 %v1926_v13 }
  0xce   : > { %2535 = vmatmul.msk.bf16.vlgmr.msrb.gmra.mxu1 %vm1378_vm0, %v1934_v17  ;;  %v1458_v19 = vpop.f32.mrf.mxu2 }
  0xcf   : > { %1747 = vmatmul.bf16.vlgmr.msrb.gmra.mxu0 %v1930_v14  ;;  %v1487_v20 = vpop.f32.mrf.mxu3  ;;  %v1459_v21 = vadd.f32 %v1458_v19, %v3177_v28  ;;  %v1982_v28 = vor.u32 %v2560_v29, %v1979_v30 }
  0xd1   : > { %v1488_v22 = vadd.f32 %v1487_v20, %v1459_v21 }
  0xd3   : > { %v1547_v24 = vpop.f32.mrf.mxu1  ;;  %v1517_v25 = vadd.f32 %v1516_v16, %v1488_v22  ;;  %v2089_v22 = vld [vmem:[%s2815_s20 + $0x178] sm:$0xf] }
  0xd4   : > { %v1518_v23 = vpop.f32.mrf.mxu0 }
  0xd5   : > { %v3224_v34 = vadd.f32 %v1545_v18, %v1517_v25  ;;  %v2091_v25 = vld [vmem:[%s2815_s20 + $0x1b0] sm:$0xf0] }
  0xd6   : > { %v1460_v35 = vpop.f32.mrf.mxu2 }
  0xd7   : > { %v1489_v36 = vpop.f32.mrf.mxu3  ;;  %v1461_v40 = vadd.f32 %v1460_v35, %v3184_v37  ;;  %v2099_v35 = vld [vmem:[%s2815_s20 + $0x1b8] sm:$0xf0] }
  0xd9   : > { %v1490_v43 = vadd.f32 %v1489_v36, %v1461_v40 }
  0xdb   : > { %v1550_v46 = vpop.f32.mrf.mxu1  ;;  %v1519_v47 = vadd.f32 %v1518_v23, %v1490_v43  ;;  %1694 = vmatmul.bf16.gmra.mxu2 %v1978_v41  ;;  %v2595_v23 = vld [vmem:[%s2815_s20 + $0x1ac] sm:$0xf0] }
  0xdc   : > { %v1521_v44 = vpop.f32.mrf.mxu0  ;;  %1723 = vmatmul.bf16.gmra.mxu3 %v1982_v28  ;;  %v2090_v38 = vor.u32 %v2595_v23, %v2089_v22  ;;  %v2102_v28 = vor.u32 %v2589_v33, %v2099_v35 }
  0xdd   : > { %v3230_v37 = vadd.f32 %v1547_v24, %v1519_v47  ;;  %v2588_v24 = vld [vmem:[%s2815_s20 + $0x17c] sm:$0xf]  ;;  %s1878_s20 = sshll.u32 %s3351_s26, 2 }
  0xde   : > { %2536 = vmatmul.msk.bf16.gmra.mxu1 %vm1378_vm0, %v1990_v45  ;;  %v1463_v48 = vpop.f32.mrf.mxu2  ;;  %s3305_s21 = scalar_lea.vmem %s3349_s3, %s1878_s20 }
  0xdf   : > { %1752 = vmatmul.bf16.gmra.mxu0 %v1986_v42  ;;  %v1492_v49 = vpop.f32.mrf.mxu3  ;;  %v1464_v50 = vadd.f32 %v1463_v48, %v3197_v56  ;;  %v2038_v56 = vor.u32 %v2574_v59, %v2035_v61 }
  0xe1   : > { %v1493_v52 = vadd.f32 %v1492_v49, %v1464_v50 }
  0xe3   : > { %v1552_v54 = vpop.f32.mrf.mxu1  ;;  %v1522_v55 = vadd.f32 %v1521_v44, %v1493_v52 }
  0xe4   : > { %v1523_v53 = vpop.f32.mrf.mxu0 }
  0xe5   : > { %v3239_v0 = vadd.f32 %v1550_v46, %v1522_v55 }
  0xe6   : > { %v1465_v2 = vpop.f32.mrf.mxu2 }
  0xe7   : > { %v1494_v3 = vpop.f32.mrf.mxu3  ;;  %v1466_v6 = vadd.f32 %v1465_v2, %v3204_v1 }
  0xe9   : > { %v1495_v9 = vadd.f32 %v1494_v3, %v1466_v6 }
  0xeb   : > { %v1555_v12 = vpop.f32.mrf.mxu1  ;;  %v1524_v13 = vadd.f32 %v1523_v53, %v1495_v9  ;;  %1699 = vmatmul.bf16.gmra.mxu2 %v2034_v7 }
  0xec   : > { %v1526_v10 = vpop.f32.mrf.mxu0  ;;  %1728 = vmatmul.bf16.gmra.mxu3 %v2038_v56 }
  0xed   : > { %v3245_v1 = vadd.f32 %v1552_v54, %v1524_v13 }
  0xee   : > { %2537 = vmatmul.msk.bf16.gmra.mxu1 %vm1378_vm0, %v2046_v11  ;;  %v1468_v14 = vpop.f32.mrf.mxu2 }
  0xef   : > { %1757 = vmatmul.bf16.gmra.mxu0 %v2042_v8  ;;  %v1497_v16 = vpop.f32.mrf.mxu3  ;;  %v1469_v17 = vadd.f32 %v1468_v14, %v3180_v32  ;;  %v2094_v32 = vor.u32 %v2588_v24, %v2091_v25 }
  0xf1   : > { %v1498_v18 = vadd.f32 %v1497_v16, %v1469_v17 }
  0xf3   : > { %v1557_v20 = vpop.f32.mrf.mxu1  ;;  %v1527_v21 = vadd.f32 %v1526_v10, %v1498_v18 }
  0xf4   : > { %v1528_v19 = vpop.f32.mrf.mxu0 }
  0xf5   : > { %v3254_v29 = vadd.f32 %v1555_v12, %v1527_v21 }
  0xf6   : > { %v1470_v30 = vpop.f32.mrf.mxu2 }
  0xf7   : > { %v1499_v31 = vpop.f32.mrf.mxu3  ;;  %v1471_v36 = vadd.f32 %v1470_v30, %v3194_v51 }
  0xf9   : > { %v1500_v40 = vadd.f32 %v1499_v31, %v1471_v36 }
  0xfb   : > { %v1560_v42 = vpop.f32.mrf.mxu1  ;;  %v1529_v43 = vadd.f32 %v1528_v19, %v1500_v40  ;;  %1704 = vmatmul.bf16.gmra.mxu2 %v2090_v38 }
  0xfc   : > { %v1531_v41 = vpop.f32.mrf.mxu0  ;;  %1733 = vmatmul.bf16.gmra.mxu3 %v2094_v32 }
  0xfd   : > { %v3260_v44 = vadd.f32 %v1557_v20, %v1529_v43 }
  0xfe   : > { %2538 = vmatmul.msk.bf16.gmra.mxu1 %vm1378_vm0, %v2102_v28  ;;  %v1473_v45 = vpop.f32.mrf.mxu2 }
  0xff   : > { %1762 = vmatmul.bf16.gmra.mxu0 %v2098_v39  ;;  %v1502_v46 = vpop.f32.mrf.mxu3  ;;  %v1474_v47 = vadd.f32 %v1473_v45, %v3200_v60 }
 0x101   : > { %v1503_v51 = vadd.f32 %v1502_v46, %v1474_v47 }
 0x103   : > { %v1562_v49 = vpop.f32.mrf.mxu1  ;;  %v1532_v50 = vadd.f32 %v1531_v41, %v1503_v51 }
 0x104   : > { %v1533_v48 = vpop.f32.mrf.mxu0 }
 0x105   : > { %v3263_v52 = vadd.f32 %v1560_v42, %v1532_v50 }
 0x106   : > { %v1475_v53 = vpop.f32.mrf.mxu2 }
 0x107   : > { %v1504_v54 = vpop.f32.mrf.mxu3  ;;  %v1476_v55 = vadd.f32 %v1475_v53, %v3214_v15 }
 0x109   : > { %v1505_v57 = vadd.f32 %v1504_v54, %v1476_v55 }
 0x10b   : > { %v1661_v59 = vpop.f32.mrf.mxu1  ;;  %v1534_v61 = vadd.f32 %v1533_v48, %v1505_v57 }
 0x10c   : > { %v1632_v58 = vpop.f32.mrf.mxu0 }
 0x10d   : > { %v3266_v62 = vadd.f32 %v1562_v49, %v1534_v61 }
 0x10e   : > { %v1574_v63 = vpop.f32.mrf.mxu2 }
 0x10f   : > { %v1603_v2 = vpop.f32.mrf.mxu3  ;;  %v1575_v25 = vadd.f32 %v1574_v63, %v3224_v34 }
 0x111   : > { %v1604_v30 = vadd.f32 %v1603_v2, %v1575_v25 }
 0x113   : > { %v1663_v60 = vpop.f32.mrf.mxu1  ;;  %v1633_v35 = vadd.f32 %v1632_v58, %v1604_v30 }
 0x114   : > { %v1634_v3 = vpop.f32.mrf.mxu0 }
 0x115   : > { %v1662_v40 = vadd.f32 %v1661_v59, %v1633_v35 }
 0x116   : > { %v1576_v4 = vpop.f32.mrf.mxu2 }
 0x117   : > { %v1605_v5 = vpop.f32.mrf.mxu3  ;;  %v1577_v36 = vadd.f32 %v1576_v4, %v3230_v37 }
 0x119   : > { %v1606_v39 = vadd.f32 %v1605_v5, %v1577_v36 }
 0x11b   : > { %v1666_v7 = vpop.f32.mrf.mxu1  ;;  %v1635_v42 = vadd.f32 %v1634_v3, %v1606_v39 }
 0x11c   : > { %v1637_v6 = vpop.f32.mrf.mxu0 }
 0x11d   : > { %v1664_v50 = vadd.f32 %v1663_v60, %v1635_v42 }
 0x11e   : > { %v1579_v56 = vpop.f32.mrf.mxu2 }
 0x11f   : > { %v1608_v8 = vpop.f32.mrf.mxu3  ;;  %v1580_v43 = vadd.f32 %v1579_v56, %v3239_v0 }
 0x121   : > { %v1609_v48 = vadd.f32 %v1608_v8, %v1580_v43 }
 0x123   : > { %v3268_v10 = vpop.f32.mrf.mxu1  ;;  %v1638_v0 = vadd.f32 %v1637_v6, %v1609_v48 }
 0x124   : > { %v1639_v9 = vpop.f32.mrf.mxu0 }
 0x125   : > { %v1667_v60 = vadd.f32 %v1666_v7, %v1638_v0 }
 0x126   : > { %v1581_v15 = vpop.f32.mrf.mxu2 }
 0x127   : > { %v1610_v11 = vpop.f32.mrf.mxu3  ;;  %v1582_v57 = vadd.f32 %v1581_v15, %v3245_v1 }
 0x129   : > { %v1611_v2 = vadd.f32 %v1610_v11, %v1582_v57 }
 0x12b   : > { %v3272_v13 = vpop.f32.mrf.mxu1  ;;  %v1640_v25 = vadd.f32 %v1639_v9, %v1611_v2 }
 0x12c   : > { %v3270_v12 = vpop.f32.mrf.mxu0 }
 0x12d   : > { %v1669_v11 = vadd.f32 %v3268_v10, %v1640_v25 }
 0x12e   : > { %v1584_v14 = vpop.f32.mrf.mxu2 }
 0x12f   : > { %v1613_v16 = vpop.f32.mrf.mxu3  ;;  %v1585_v6 = vadd.f32 %v1584_v14, %v3254_v29 }
 0x131   : > { %v1614_v36 = vadd.f32 %v1613_v16, %v1585_v6 }
 0x133   : > { %v3276_v18 = vpop.f32.mrf.mxu1 }
 0x134   : > { %v3274_v17 = vpop.f32.mrf.mxu0 }
 0x136   : > { %v3278_v19 = vpop.f32.mrf.mxu2 }
 0x137   : > { %v3280_v20 = vpop.f32.mrf.mxu3  ;;  %v1587_v29 = vadd.f32 %v3278_v19, %v3260_v44 }
 0x139   : > { %v1616_v16 = vadd.f32 %v3280_v20, %v1587_v29 }
 0x13b   : > { %v3284_v22 = vpop.f32.mrf.mxu1 }
 0x13c   : > { %v3282_v21 = vpop.f32.mrf.mxu0 }
 0x13e   : > { %v3286_v23 = vpop.f32.mrf.mxu2 }
 0x13f   : > { %v3288_v24 = vpop.f32.mrf.mxu3  ;;  %v1590_v44 = vadd.f32 %v3286_v23, %v3263_v52 }
 0x141   : > { %v1619_v20 = vadd.f32 %v3288_v24, %v1590_v44 }
 0x143   : > { %v3293_v27 = vpop.f32.mrf.mxu1 }
 0x144   : > { %v3291_v26 = vpop.f32.mrf.mxu0 }
 0x146   : > { %v3295_v31 = vpop.f32.mrf.mxu2 }
 0x147   : > { %v3297_v33 = vpop.f32.mrf.mxu3  ;;  %v1592_v52 = vadd.f32 %v3295_v31, %v3266_v62 }
 0x149   : > { %v1621_v24 = vadd.f32 %v3297_v33, %v1592_v52 }
 0x14b   : > { %v1777_v32 = vpop.f32.mrf.mxu1 }
 0x14c   : > { %v1748_v38 = vpop.f32.mrf.mxu0 }
 0x14e   : > { %v1690_v41 = vpop.f32.mrf.mxu2 }
 0x14f   : > { %v1719_v28 = vpop.f32.mrf.mxu3  ;;  %v1691_v34 = vadd.f32 %v1690_v41, %v1662_v40  ;;  %v1643_v41 = vadd.f32 %v3270_v12, %v1614_v36  ;;  %v1645_v12 = vadd.f32 %v3274_v17, %v1616_v16 }
 0x151   : > { %v1720_v45 = vadd.f32 %v1719_v28, %v1691_v34  ;;  %v1672_v10 = vadd.f32 %v3272_v13, %v1643_v41  ;;  %v1674_v13 = vadd.f32 %v3276_v18, %v1645_v12 }
 0x153   : > { %v1779_v47 = vpop.f32.mrf.mxu1  ;;  %v1749_v51 = vadd.f32 %v1748_v38, %v1720_v45 }
 0x154   : > { %v1750_v46 = vpop.f32.mrf.mxu0 }
 0x155   : > { %v1778_v49 = vadd.f32 %v1777_v32, %v1749_v51 }
 0x156   : > { %v1692_v37 = vpop.f32.mrf.mxu2 }
 0x157   : > { %v1721_v53 = vpop.f32.mrf.mxu3  ;;  %v1797_v54 = vpack.c.bf16 %v1778_v49, %v1778_v49  ;;  %v1693_v55 = vadd.f32 %v1692_v37, %v1664_v50 }
 0x159   : > { %1806 = vst.msk [vmem:[%s3305_s21] sm:$0xf] %vm1805_vm1, %v1797_v54  ;;  %v1722_v58 = vadd.f32 %v1721_v53, %v1693_v55  ;;  %v1648_v55 = vadd.f32 %v3282_v21, %v1619_v20  ;;  %v1650_v21 = vadd.f32 %v3291_v26, %v1621_v24 }
 0x15b   : > { %v1782_v61 = vpop.f32.mrf.mxu1  ;;  %v1751_v63 = vadd.f32 %v1750_v46, %v1722_v58  ;;  %v1677_v18 = vadd.f32 %v3284_v22, %v1648_v55  ;;  %v1679_v33 = vadd.f32 %v3293_v27, %v1650_v21 }
 0x15c   : > { %v1753_v59 = vpop.f32.mrf.mxu0 }
 0x15d   : > { %v1780_v3 = vadd.f32 %v1779_v47, %v1751_v63 }
 0x15e   : > { %v1695_v4 = vpop.f32.mrf.mxu2 }
 0x15f   : > { %v1724_v5 = vpop.f32.mrf.mxu3  ;;  %v1798_v56 = vpack.c.bf16 %v1780_v3, %v1780_v3  ;;  %v1696_v8 = vadd.f32 %v1695_v4, %v1667_v60 }
 0x161   : > { %1807 = vst.msk [vmem:[%s3305_s21 + $0x4] sm:$0xf] %vm1805_vm1, %v1798_v56  ;;  %v1725_v1 = vadd.f32 %v1724_v5, %v1696_v8 }
 0x163   : > { %v1754_v30 = vadd.f32 %v1753_v59, %v1725_v1  ;;  %v1784_v35 = vpop.f32.mrf.mxu1 }
 0x164   : > { %v1755_v15 = vpop.f32.mrf.mxu0 }
 0x165   : > { %v1783_v38 = vadd.f32 %v1782_v61, %v1754_v30 }
 0x166   : > { %v1697_v32 = vpop.f32.mrf.mxu2 }
 0x167   : > { %v1726_v7 = vpop.f32.mrf.mxu3  ;;  %v1799_v39 = vpack.c.bf16 %v1783_v38, %v1783_v38  ;;  %v1698_v40 = vadd.f32 %v1697_v32, %v1669_v11 }
 0x169   : > { %1808 = vst.msk [vmem:[%s3305_s21 + $0x8] sm:$0xf] %vm1805_vm1, %v1799_v39  ;;  %v1727_v9 = vadd.f32 %v1726_v7, %v1698_v40 }
 0x16b   : > { %v1756_v14 = vadd.f32 %v1755_v15, %v1727_v9  ;;  %v1787_v42 = vpop.f32.mrf.mxu1 }
 0x16c   : > { %v1758_v28 = vpop.f32.mrf.mxu0 }
 0x16d   : > { %v1785_v34 = vadd.f32 %v1784_v35, %v1756_v14 }
 0x16e   : > { %v1700_v43 = vpop.f32.mrf.mxu2 }
 0x16f   : > { %v1729_v45 = vpop.f32.mrf.mxu3  ;;  %v1800_v46 = vpack.c.bf16 %v1785_v34, %v1785_v34  ;;  %v1701_v47 = vadd.f32 %v1700_v43, %v1672_v10 }
 0x171   : > { %1809 = vst.msk [vmem:[%s3305_s21 + $0xc] sm:$0xf] %vm1805_vm1, %v1800_v46  ;;  %v1730_v19 = vadd.f32 %v1729_v45, %v1701_v47 }
 0x173   : > { %v1759_v51 = vadd.f32 %v1758_v28, %v1730_v19  ;;  %v1789_v17 = vpop.f32.mrf.mxu1 }
 0x174   : > { %v1760_v49 = vpop.f32.mrf.mxu0 }
 0x175   : > { %v1788_v48 = vadd.f32 %v1787_v42, %v1759_v51 }
 0x176   : > { %v1702_v50 = vpop.f32.mrf.mxu2 }
 0x177   : > { %v1731_v37 = vpop.f32.mrf.mxu3  ;;  %v1801_v53 = vpack.c.bf16 %v1788_v48, %v1788_v48  ;;  %v1703_v54 = vadd.f32 %v1702_v50, %v1674_v13 }
 0x179   : > { %1810 = vst.msk [vmem:[%s3305_s21 + $0x10] sm:$0xf] %vm1805_vm1, %v1801_v53  ;;  %v1732_v23 = vadd.f32 %v1731_v37, %v1703_v54 }
 0x17b   : > { %v1761_v0 = vadd.f32 %v1760_v49, %v1732_v23  ;;  %v1792_v31 = vpop.f32.mrf.mxu1 }
 0x17c   : > { %v1763_v2 = vpop.f32.mrf.mxu0 }
 0x17d   : > { %v1790_v57 = vadd.f32 %v1789_v17, %v1761_v0 }
 0x17e   : > { %v1705_v58 = vpop.f32.mrf.mxu2 }
 0x17f   : > { %v1734_v59 = vpop.f32.mrf.mxu3  ;;  %v1802_v61 = vpack.c.bf16 %v1790_v57, %v1790_v57  ;;  %v1706_v63 = vadd.f32 %v1705_v58, %v1677_v18 }
 0x181   : > { %1811 = vst.msk [vmem:[%s3305_s21 + $0x14] sm:$0xf] %vm1805_vm1, %v1802_v61  ;;  %v1735_v62 = vadd.f32 %v1734_v59, %v1706_v63 }
 0x183   : > { %v1764_v3 = vadd.f32 %v1763_v2, %v1735_v62  ;;  %v1794_v1 = vpop.f32.mrf.mxu1 }
 0x184   : > { %v1765_v25 = vpop.f32.mrf.mxu0 }
 0x185   : > { %v1793_v60 = vadd.f32 %v1792_v31, %v1764_v3 }
 0x186   : > { %v1707_v4 = vpop.f32.mrf.mxu2 }
 0x187   : > { %v1803_v5 = vpack.c.bf16 %v1793_v60, %v1793_v60  ;;  %v1708_v22 = vadd.f32 %v1707_v4, %v1679_v33  ;;  %v1736_v56 = vpop.f32.mrf.mxu3 }
 0x189   : > { %1812 = vst.msk [vmem:[%s3305_s21 + $0x18] sm:$0xf] %vm1805_vm1, %v1803_v5  ;;  %v1737_v8 = vadd.f32 %v1736_v56, %v1708_v22 }
 0x18b   : > { %v1766_v6 = vadd.f32 %v1765_v25, %v1737_v8 }
 0x18d   : > { %v1795_v26 = vadd.f32 %v1794_v1, %v1766_v6 }
 0x18f   : > { %v1804_v15 = vpack.c.bf16 %v1795_v26, %v1795_v26 }
 0x191   : > { %1813 = vst.msk [vmem:[%s3305_s21 + $0x1c] sm:$0xf] %vm1805_vm1, %v1804_v15 }
 0x192 PF: > { %s13_s12 = sadd.s32 1, %s2737_s12  }
 0x193   : > { %p10_p4 = scmp.ge.s32.totalorder %s13_s12, 4  }
 0x195   :  { %12 = sbr.rel (!%p10_p4) target bundleno = 1 (0x1), region = 62 }

// kernel: resnet_forward.27
= control target key start
LH: loop header
LB: loop body
LE: loop exit
PB: predicated region body
PF: predicated region fallthrough
CT: control target
= control target key end

     0   :  { %vm125_vm0 = vcmask 523264   ;;  %s583_s1 = inlined_call_operand.vmem [shape: bf16[64,256], index: 1, kind: input, shape index: {}]   ;;  %s584_s0 = inlined_call_operand.vmem [shape: bf16[128,64], index: 0, kind: input, shape index: {}]   ;;  %s585_s2 = inlined_call_operand.vmem [shape: f32[1,256], index: 2, kind: input, shape index: {}]   ;;  %s586_s3 = inlined_call_operand.vmem [shape: bf16[128,256], index: 3, kind: output, shape index: {}]  }
   0x1   :  { %v342_v0 = vld [vmem:[%s583_s1 + $0x30] sm:$0xf]  ;;  %v379_v1 = vld [vmem:[%s583_s1 + $0x34] sm:$0xf0]  ;;  %v378_v2 = vld [vmem:[%s583_s1 + $0x34] sm:$0xf] }
   0x2   :  { %v343_v3 = vor.u32 %v379_v1, %v342_v0  ;;  %v344_v4 = vld [vmem:[%s583_s1 + $0x38] sm:$0xf0]  ;;  %v334_v5 = vld [vmem:[%s583_s1 + $0x20] sm:$0xf]  ;;  %v377_v6 = vld [vmem:[%s583_s1 + $0x24] sm:$0xf0] }
   0x3   :  { %v347_v7 = vor.u32 %v378_v2, %v344_v4  ;;  %v376_v8 = vld [vmem:[%s583_s1 + $0x24] sm:$0xf]  ;;  %v336_v9 = vld [vmem:[%s583_s1 + $0x28] sm:$0xf0]  ;;  %v335_v10 = vor.u32 %v377_v6, %v334_v5  ;;  %v326_v12 = vld [vmem:[%s583_s1 + $0x10] sm:$0xf] }
   0x4   :  { %154 = vmatpush.bf16.msra.mxu0 %v343_v3  ;;  %380 = vmatpush.bf16.msra.mxu2 %v343_v3  ;;  %v339_v11 = vor.u32 %v376_v8, %v336_v9  ;;  %v375_v13 = vld [vmem:[%s583_s1 + $0x14] sm:$0xf0]  ;;  %v374_v14 = vld [vmem:[%s583_s1 + $0x14] sm:$0xf]  ;;  %v328_v15 = vld [vmem:[%s583_s1 + $0x18] sm:$0xf0] }
   0x5   :  { %203 = vmatpush.bf16.msra.mxu1 %v347_v7  ;;  %384 = vmatpush.bf16.msra.mxu3 %v347_v7  ;;  %v327_v16 = vor.u32 %v375_v13, %v326_v12  ;;  %v331_v17 = vor.u32 %v374_v14, %v328_v15  ;;  %v318_v18 = vld [vmem:[%s583_s1] sm:$0xf]  ;;  %v373_v19 = vld [vmem:[%s583_s1 + $0x4] sm:$0xf0]  ;;  %v372_v20 = vld [vmem:[%s583_s1 + $0x4] sm:$0xf] }
   0x6   :  { %v320_v21 = vld [vmem:[%s583_s1 + $0x8] sm:$0xf0]  ;;  %v319_v22 = vor.u32 %v373_v19, %v318_v18  ;;  %v364_v24 = vld [vmem:[%s584_s0] sm:$0xff]  ;;  %v366_v28 = vld [vmem:[%s584_s0 + $0x10] sm:$0xff] }
   0x7   :  { %v323_v23 = vor.u32 %v372_v20, %v320_v21  ;;  %v368_v25 = vld [vmem:[%s584_s0 + $0x20] sm:$0xff]  ;;  %v365_v26 = vld [vmem:[%s584_s0 + $0x8] sm:$0xff]  ;;  %v370_v29 = vld [vmem:[%s584_s0 + $0x30] sm:$0xff] }
   0x8   :  { %155 = vmatpush.bf16.msra.mxu0 %v335_v10  ;;  %381 = vmatpush.bf16.msra.mxu2 %v335_v10  ;;  %v369_v27 = vld [vmem:[%s584_s0 + $0x28] sm:$0xff]  ;;  %v367_v30 = vld [vmem:[%s584_s0 + $0x18] sm:$0xff]  ;;  %v39_v32 = vld [vmem:[%s585_s2] sm:$0x3] }
   0x9   :  { %204 = vmatpush.bf16.msra.mxu1 %v339_v11  ;;  %385 = vmatpush.bf16.msra.mxu3 %v339_v11  ;;  %v371_v31 = vld [vmem:[%s584_s0 + $0x38] sm:$0xff]  ;;  %v499_v33 = vperm.slane %v39_v32, 0  ;;  %v501_v34 = vperm.slane %v39_v32, 1 }
   0xc   :  { %156 = vmatpush.bf16.msra.mxu0 %v327_v16  ;;  %382 = vmatpush.bf16.msra.mxu2 %v327_v16 }
   0xd   :  { %205 = vmatpush.bf16.msra.mxu1 %v331_v17  ;;  %386 = vmatpush.bf16.msra.mxu3 %v331_v17 }
  0x10   :  { %157 = vmatpush.bf16.msra.mxu0 %v319_v22  ;;  %383 = vmatpush.bf16.msra.mxu2 %v319_v22 }
  0x11   :  { %206 = vmatpush.bf16.msra.mxu1 %v323_v23  ;;  %387 = vmatpush.bf16.msra.mxu3 %v323_v23 }
  0x13   :  { %348 = vmatmul.msk.bf16.vlgmr.msra.gmra.mxu0 %vm125_vm0, %v364_v24  ;;  %352 = vmatmul.msk.bf16.vlgmr.msra.gmra.mxu2 %vm125_vm0, %v368_v25 }
  0x14   :  { %356 = vmatmul.msk.bf16.vlgmr.msra.gmra.mxu1 %vm125_vm0, %v364_v24  ;;  %360 = vmatmul.msk.bf16.vlgmr.msra.gmra.mxu3 %vm125_vm0, %v368_v25 }
  0x23   :  { %349 = vmatmul.msk.bf16.gmra.mxu0 %vm125_vm0, %v365_v26  ;;  %353 = vmatmul.msk.bf16.gmra.mxu2 %vm125_vm0, %v369_v27 }
  0x24   :  { %357 = vmatmul.msk.bf16.gmra.mxu1 %vm125_vm0, %v365_v26  ;;  %361 = vmatmul.msk.bf16.gmra.mxu3 %vm125_vm0, %v369_v27 }
  0x33   :  { %350 = vmatmul.msk.bf16.gmra.mxu0 %vm125_vm0, %v366_v28  ;;  %354 = vmatmul.msk.bf16.gmra.mxu2 %vm125_vm0, %v370_v29 }
  0x34   :  { %358 = vmatmul.msk.bf16.gmra.mxu1 %vm125_vm0, %v366_v28  ;;  %362 = vmatmul.msk.bf16.gmra.mxu3 %vm125_vm0, %v370_v29 }
  0x43   :  { %351 = vmatmul.msk.bf16.gmra.mxu0 %vm125_vm0, %v367_v30  ;;  %355 = vmatmul.msk.bf16.gmra.mxu2 %vm125_vm0, %v371_v31 }
  0x44   :  { %359 = vmatmul.msk.bf16.gmra.mxu1 %vm125_vm0, %v367_v30  ;;  %363 = vmatmul.msk.bf16.gmra.mxu3 %vm125_vm0, %v371_v31 }
  0x90   :  { %v159_v35 = vpop.f32.mrf.mxu0 }
  0x91   :  { %v160_v36 = vadd.f32 %v159_v35, %v499_v33  ;;  %v208_v37 = vpop.f32.mrf.mxu1 }
  0x92   :  { %v209_v38 = vadd.f32 %v208_v37, %v501_v34 }
  0x94   :  { %v248_v39 = vpack.c.bf16 %v209_v38, %v160_v36 }
  0x96   :  { %264 = vst [vmem:[%s586_s3] sm:$0xff] %v248_v39  ;;  %v179_v40 = vpop.f32.mrf.mxu2 }
  0x97   :  { %v180_v41 = vadd.f32 %v179_v40, %v499_v33  ;;  %v228_v42 = vpop.f32.mrf.mxu3 }
  0x98   :  { %v229_v43 = vadd.f32 %v228_v42, %v501_v34  ;;  %v161_v44 = vpop.f32.mrf.mxu0 }
  0x99   :  { %v162_v45 = vadd.f32 %v161_v44, %v499_v33  ;;  %v210_v46 = vpop.f32.mrf.mxu1 }
  0x9a   :  { %v256_v47 = vpack.c.bf16 %v229_v43, %v180_v41  ;;  %v211_v48 = vadd.f32 %v210_v46, %v501_v34 }
  0x9c   :  { %272 = vst [vmem:[%s586_s3 + $0x40] sm:$0xff] %v256_v47  ;;  %v249_v49 = vpack.c.bf16 %v211_v48, %v162_v45 }
  0x9e   :  { %265 = vst [vmem:[%s586_s3 + $0x8] sm:$0xff] %v249_v49  ;;  %v181_v50 = vpop.f32.mrf.mxu2 }
  0x9f   :  { %v182_v51 = vadd.f32 %v181_v50, %v499_v33  ;;  %v230_v52 = vpop.f32.mrf.mxu3 }
  0xa0   :  { %v231_v53 = vadd.f32 %v230_v52, %v501_v34  ;;  %v164_v54 = vpop.f32.mrf.mxu0 }
  0xa1   :  { %v165_v55 = vadd.f32 %v164_v54, %v499_v33  ;;  %v213_v56 = vpop.f32.mrf.mxu1 }
  0xa2   :  { %v257_v57 = vpack.c.bf16 %v231_v53, %v182_v51  ;;  %v214_v58 = vadd.f32 %v213_v56, %v501_v34 }
  0xa4   :  { %273 = vst [vmem:[%s586_s3 + $0x48] sm:$0xff] %v257_v57  ;;  %v250_v59 = vpack.c.bf16 %v214_v58, %v165_v55 }
  0xa6   :  { %266 = vst [vmem:[%s586_s3 + $0x10] sm:$0xff] %v250_v59  ;;  %v184_v60 = vpop.f32.mrf.mxu2 }
  0xa7   :  { %v185_v61 = vadd.f32 %v184_v60, %v499_v33  ;;  %v233_v62 = vpop.f32.mrf.mxu3 }
  0xa8   :  { %v234_v63 = vadd.f32 %v233_v62, %v501_v34  ;;  %v166_v0 = vpop.f32.mrf.mxu0 }
  0xa9   :  { %v167_v1 = vadd.f32 %v166_v0, %v499_v33  ;;  %v215_v2 = vpop.f32.mrf.mxu1 }
  0xaa   :  { %v258_v3 = vpack.c.bf16 %v234_v63, %v185_v61  ;;  %v216_v4 = vadd.f32 %v215_v2, %v501_v34 }
  0xac   :  { %274 = vst [vmem:[%s586_s3 + $0x50] sm:$0xff] %v258_v3  ;;  %v251_v5 = vpack.c.bf16 %v216_v4, %v167_v1 }
  0xae   :  { %267 = vst [vmem:[%s586_s3 + $0x18] sm:$0xff] %v251_v5  ;;  %v186_v6 = vpop.f32.mrf.mxu2 }
  0xaf   :  { %v187_v7 = vadd.f32 %v186_v6, %v499_v33  ;;  %v235_v8 = vpop.f32.mrf.mxu3 }
  0xb0   :  { %v236_v9 = vadd.f32 %v235_v8, %v501_v34  ;;  %v169_v10 = vpop.f32.mrf.mxu0 }
  0xb1   :  { %v170_v11 = vadd.f32 %v169_v10, %v499_v33  ;;  %v218_v12 = vpop.f32.mrf.mxu1 }
  0xb2   :  { %v259_v13 = vpack.c.bf16 %v236_v9, %v187_v7  ;;  %v219_v14 = vadd.f32 %v218_v12, %v501_v34 }
  0xb4   :  { %275 = vst [vmem:[%s586_s3 + $0x58] sm:$0xff] %v259_v13  ;;  %v252_v15 = vpack.c.bf16 %v219_v14, %v170_v11 }
  0xb6   :  { %268 = vst [vmem:[%s586_s3 + $0x20] sm:$0xff] %v252_v15  ;;  %v189_v16 = vpop.f32.mrf.mxu2 }
  0xb7   :  { %v190_v17 = vadd.f32 %v189_v16, %v499_v33  ;;  %v238_v18 = vpop.f32.mrf.mxu3 }
  0xb8   :  { %v239_v19 = vadd.f32 %v238_v18, %v501_v34  ;;  %v171_v20 = vpop.f32.mrf.mxu0 }
  0xb9   :  { %v172_v21 = vadd.f32 %v171_v20, %v499_v33  ;;  %v220_v22 = vpop.f32.mrf.mxu1 }
  0xba   :  { %v260_v23 = vpack.c.bf16 %v239_v19, %v190_v17  ;;  %v221_v24 = vadd.f32 %v220_v22, %v501_v34 }
  0xbc   :  { %276 = vst [vmem:[%s586_s3 + $0x60] sm:$0xff] %v260_v23  ;;  %v253_v25 = vpack.c.bf16 %v221_v24, %v172_v21 }
  0xbe   :  { %269 = vst [vmem:[%s586_s3 + $0x28] sm:$0xff] %v253_v25  ;;  %v191_v26 = vpop.f32.mrf.mxu2 }
  0xbf   :  { %v192_v27 = vadd.f32 %v191_v26, %v499_v33  ;;  %v240_v28 = vpop.f32.mrf.mxu3 }
  0xc0   :  { %v241_v29 = vadd.f32 %v240_v28, %v501_v34  ;;  %v174_v30 = vpop.f32.mrf.mxu0 }
  0xc1   :  { %v175_v31 = vadd.f32 %v174_v30, %v499_v33  ;;  %v223_v32 = vpop.f32.mrf.mxu1 }
  0xc2   :  { %v261_v35 = vpack.c.bf16 %v241_v29, %v192_v27  ;;  %v224_v36 = vadd.f32 %v223_v32, %v501_v34 }
  0xc4   :  { %277 = vst [vmem:[%s586_s3 + $0x68] sm:$0xff] %v261_v35  ;;  %v254_v37 = vpack.c.bf16 %v224_v36, %v175_v31 }
  0xc6   :  { %270 = vst [vmem:[%s586_s3 + $0x30] sm:$0xff] %v254_v37  ;;  %v194_v38 = vpop.f32.mrf.mxu2 }
  0xc7   :  { %v195_v39 = vadd.f32 %v194_v38, %v499_v33  ;;  %v243_v40 = vpop.f32.mrf.mxu3 }
  0xc8   :  { %v244_v41 = vadd.f32 %v243_v40, %v501_v34  ;;  %v176_v42 = vpop.f32.mrf.mxu0 }
  0xc9   :  { %v177_v43 = vadd.f32 %v176_v42, %v499_v33  ;;  %v225_v44 = vpop.f32.mrf.mxu1 }
  0xca   :  { %v262_v45 = vpack.c.bf16 %v244_v41, %v195_v39  ;;  %v226_v46 = vadd.f32 %v225_v44, %v501_v34 }
  0xcc   :  { %278 = vst [vmem:[%s586_s3 + $0x70] sm:$0xff] %v262_v45  ;;  %v255_v47 = vpack.c.bf16 %v226_v46, %v177_v43 }
  0xce   :  { %271 = vst [vmem:[%s586_s3 + $0x38] sm:$0xff] %v255_v47  ;;  %v196_v48 = vpop.f32.mrf.mxu2 }
  0xcf   :  { %v197_v49 = vadd.f32 %v196_v48, %v499_v33  ;;  %v245_v50 = vpop.f32.mrf.mxu3 }
  0xd0   :  { %v246_v51 = vadd.f32 %v245_v50, %v501_v34 }
  0xd2   :  { %v263_v52 = vpack.c.bf16 %v246_v51, %v197_v49 }
  0xd4   :  { %279 = vst [vmem:[%s586_s3 + $0x78] sm:$0xff] %v263_v52 }

// kernel: resnet_forward.30
= control target key start
LH: loop header
LB: loop body
LE: loop exit
PB: predicated region body
PF: predicated region fallthrough
CT: control target
= control target key end

     0   :  { %vm128_vm0 = vcmask 523264   ;;  %s783_s1 = inlined_call_operand.vmem [shape: bf16[64,256], index: 1, kind: input, shape index: {}]   ;;  %s784_s0 = inlined_call_operand.vmem [shape: bf16[128,64], index: 0, kind: input, shape index: {}]   ;;  %s785_s2 = inlined_call_operand.vmem [shape: f32[1,256], index: 2, kind: input, shape index: {}]   ;;  %s786_s3 = inlined_call_operand.vmem [shape: bf16[128,256], index: 3, kind: input, shape index: {}]   ;;  %s787_s4 = inlined_call_operand.vmem [shape: bf16[128,256], index: 4, kind: output, shape index: {}]  }
   0x1   :  { %v489_v0 = vld [vmem:[%s783_s1 + $0x30] sm:$0xf]  ;;  %v526_v1 = vld [vmem:[%s783_s1 + $0x34] sm:$0xf0]  ;;  %v525_v2 = vld [vmem:[%s783_s1 + $0x34] sm:$0xf] }
   0x2   :  { %v490_v3 = vor.u32 %v526_v1, %v489_v0  ;;  %v491_v4 = vld [vmem:[%s783_s1 + $0x38] sm:$0xf0]  ;;  %v481_v5 = vld [vmem:[%s783_s1 + $0x20] sm:$0xf]  ;;  %v524_v6 = vld [vmem:[%s783_s1 + $0x24] sm:$0xf0] }
   0x3   :  { %v494_v7 = vor.u32 %v525_v2, %v491_v4  ;;  %v523_v8 = vld [vmem:[%s783_s1 + $0x24] sm:$0xf]  ;;  %v483_v9 = vld [vmem:[%s783_s1 + $0x28] sm:$0xf0]  ;;  %v482_v10 = vor.u32 %v524_v6, %v481_v5  ;;  %v473_v12 = vld [vmem:[%s783_s1 + $0x10] sm:$0xf] }
   0x4   :  { %157 = vmatpush.bf16.msra.mxu0 %v490_v3  ;;  %527 = vmatpush.bf16.msra.mxu2 %v490_v3  ;;  %v486_v11 = vor.u32 %v523_v8, %v483_v9  ;;  %v522_v13 = vld [vmem:[%s783_s1 + $0x14] sm:$0xf0]  ;;  %v521_v14 = vld [vmem:[%s783_s1 + $0x14] sm:$0xf]  ;;  %v475_v15 = vld [vmem:[%s783_s1 + $0x18] sm:$0xf0] }
   0x5   :  { %206 = vmatpush.bf16.msra.mxu1 %v494_v7  ;;  %531 = vmatpush.bf16.msra.mxu3 %v494_v7  ;;  %v474_v16 = vor.u32 %v522_v13, %v473_v12  ;;  %v478_v17 = vor.u32 %v521_v14, %v475_v15  ;;  %v465_v18 = vld [vmem:[%s783_s1] sm:$0xf]  ;;  %v520_v19 = vld [vmem:[%s783_s1 + $0x4] sm:$0xf0]  ;;  %v519_v20 = vld [vmem:[%s783_s1 + $0x4] sm:$0xf] }
   0x6   :  { %v467_v21 = vld [vmem:[%s783_s1 + $0x8] sm:$0xf0]  ;;  %v466_v22 = vor.u32 %v520_v19, %v465_v18  ;;  %v511_v24 = vld [vmem:[%s784_s0] sm:$0xff]  ;;  %v513_v28 = vld [vmem:[%s784_s0 + $0x10] sm:$0xff] }
   0x7   :  { %v470_v23 = vor.u32 %v519_v20, %v467_v21  ;;  %v515_v25 = vld [vmem:[%s784_s0 + $0x20] sm:$0xff]  ;;  %v512_v26 = vld [vmem:[%s784_s0 + $0x8] sm:$0xff]  ;;  %v517_v29 = vld [vmem:[%s784_s0 + $0x30] sm:$0xff] }
   0x8   :  { %158 = vmatpush.bf16.msra.mxu0 %v482_v10  ;;  %528 = vmatpush.bf16.msra.mxu2 %v482_v10  ;;  %v516_v27 = vld [vmem:[%s784_s0 + $0x28] sm:$0xff]  ;;  %v514_v30 = vld [vmem:[%s784_s0 + $0x18] sm:$0xff]  ;;  %v42_v32 = vld [vmem:[%s785_s2] sm:$0x3] }
   0x9   :  { %207 = vmatpush.bf16.msra.mxu1 %v486_v11  ;;  %532 = vmatpush.bf16.msra.mxu3 %v486_v11  ;;  %v518_v31 = vld [vmem:[%s784_s0 + $0x38] sm:$0xff]  ;;  %v251_v33 = vld [vmem:[%s786_s3] sm:$0xff]  ;;  %v654_v34 = vperm.slane %v42_v32, 0  ;;  %v656_v35 = vperm.slane %v42_v32, 1  ;;  %v252_v45 = vld [vmem:[%s786_s3 + $0x8] sm:$0xff] }
   0xa   :  { %v267_v36 = vunpack.c.l.bf16 %v251_v33  ;;  %v268_v38 = vunpack.c.h.bf16 %v251_v33  ;;  %v259_v42 = vld [vmem:[%s786_s3 + $0x40] sm:$0xff]  ;;  %v269_v54 = vunpack.c.l.bf16 %v252_v45  ;;  %v270_v58 = vunpack.c.h.bf16 %v252_v45  ;;  %v260_v1 = vld [vmem:[%s786_s3 + $0x48] sm:$0xff]  ;;  %v253_v6 = vld [vmem:[%s786_s3 + $0x10] sm:$0xff] }
   0xb   :  { %v283_v47 = vunpack.c.l.bf16 %v259_v42  ;;  %v284_v50 = vunpack.c.h.bf16 %v259_v42  ;;  %v285_v9 = vunpack.c.l.bf16 %v260_v1  ;;  %v286_v13 = vunpack.c.h.bf16 %v260_v1 }
   0xc   :  { %159 = vmatpush.bf16.msra.mxu0 %v474_v16  ;;  %529 = vmatpush.bf16.msra.mxu2 %v474_v16 }
   0xd   :  { %208 = vmatpush.bf16.msra.mxu1 %v478_v17  ;;  %533 = vmatpush.bf16.msra.mxu3 %v478_v17  ;;  %v271_v17 = vunpack.c.l.bf16 %v253_v6 }
  0x10   :  { %160 = vmatpush.bf16.msra.mxu0 %v466_v22  ;;  %530 = vmatpush.bf16.msra.mxu2 %v466_v22  ;;  %v272_v22 = vunpack.c.h.bf16 %v253_v6 }
  0x11   :  { %209 = vmatpush.bf16.msra.mxu1 %v470_v23  ;;  %534 = vmatpush.bf16.msra.mxu3 %v470_v23 }
  0x13   :  { %495 = vmatmul.msk.bf16.vlgmr.msra.gmra.mxu0 %vm128_vm0, %v511_v24  ;;  %499 = vmatmul.msk.bf16.vlgmr.msra.gmra.mxu2 %vm128_vm0, %v515_v25 }
  0x14   :  { %503 = vmatmul.msk.bf16.vlgmr.msra.gmra.mxu1 %vm128_vm0, %v511_v24  ;;  %507 = vmatmul.msk.bf16.vlgmr.msra.gmra.mxu3 %vm128_vm0, %v515_v25 }
  0x23   :  { %496 = vmatmul.msk.bf16.gmra.mxu0 %vm128_vm0, %v512_v26  ;;  %500 = vmatmul.msk.bf16.gmra.mxu2 %vm128_vm0, %v516_v27 }
  0x24   :  { %504 = vmatmul.msk.bf16.gmra.mxu1 %vm128_vm0, %v512_v26  ;;  %508 = vmatmul.msk.bf16.gmra.mxu3 %vm128_vm0, %v516_v27 }
  0x33   :  { %497 = vmatmul.msk.bf16.gmra.mxu0 %vm128_vm0, %v513_v28  ;;  %501 = vmatmul.msk.bf16.gmra.mxu2 %vm128_vm0, %v517_v29 }
  0x34   :  { %505 = vmatmul.msk.bf16.gmra.mxu1 %vm128_vm0, %v513_v28  ;;  %509 = vmatmul.msk.bf16.gmra.mxu3 %vm128_vm0, %v517_v29  ;;  %v261_v29 = vld [vmem:[%s786_s3 + $0x50] sm:$0xff] }
  0x43   :  { %498 = vmatmul.msk.bf16.gmra.mxu0 %vm128_vm0, %v514_v30  ;;  %502 = vmatmul.msk.bf16.gmra.mxu2 %vm128_vm0, %v518_v31 }
  0x44   :  { %506 = vmatmul.msk.bf16.gmra.mxu1 %vm128_vm0, %v514_v30  ;;  %510 = vmatmul.msk.bf16.gmra.mxu3 %vm128_vm0, %v518_v31 }
  0x90   :  { %v162_v37 = vpop.f32.mrf.mxu0 }
  0x91   :  { %v163_v39 = vadd.f32 %v162_v37, %v654_v34  ;;  %v211_v40 = vpop.f32.mrf.mxu1 }
  0x92   :  { %v212_v41 = vadd.f32 %v211_v40, %v656_v35 }
  0x93   :  { %v299_v43 = vadd.f32 %v267_v36, %v163_v39  ;;  %v254_v36 = vld [vmem:[%s786_s3 + $0x18] sm:$0xff]  ;;  %v287_v39 = vunpack.c.l.bf16 %v261_v29 }
  0x94   :  { %v300_v44 = vadd.f32 %v268_v38, %v212_v41 }
  0x95   :  { %v331_v46 = vmul.f32 0.1, %v299_v43 }
  0x96   :  { %v332_v48 = vmul.f32 0.1, %v300_v44  ;;  %v182_v49 = vpop.f32.mrf.mxu2 }
  0x97   :  { %v363_v51 = vmax.f32 %v299_v43, %v331_v46  ;;  %v183_v52 = vadd.f32 %v182_v49, %v654_v34  ;;  %v231_v53 = vpop.f32.mrf.mxu3  ;;  %v288_v43 = vunpack.c.h.bf16 %v261_v29 }
  0x98   :  { %v364_v55 = vmax.f32 %v300_v44, %v332_v48  ;;  %v232_v56 = vadd.f32 %v231_v53, %v656_v35  ;;  %v164_v57 = vpop.f32.mrf.mxu0 }
  0x99   :  { %v315_v59 = vadd.f32 %v283_v47, %v183_v52  ;;  %v165_v60 = vadd.f32 %v164_v57, %v654_v34  ;;  %v213_v61 = vpop.f32.mrf.mxu1  ;;  %v273_v47 = vunpack.c.l.bf16 %v254_v36  ;;  %v274_v52 = vunpack.c.h.bf16 %v254_v36 }
  0x9a   :  { %v395_v62 = vpack.c.bf16 %v364_v55, %v363_v51  ;;  %v316_v63 = vadd.f32 %v284_v50, %v232_v56  ;;  %v214_v0 = vadd.f32 %v213_v61, %v656_v35 }
  0x9b   :  { %v347_v2 = vmul.f32 0.1, %v315_v59  ;;  %v301_v3 = vadd.f32 %v269_v54, %v165_v60 }
  0x9c   :  { %411 = vst [vmem:[%s787_s4] sm:$0xff] %v395_v62  ;;  %v348_v4 = vmul.f32 0.1, %v316_v63  ;;  %v302_v5 = vadd.f32 %v270_v58, %v214_v0  ;;  %v255_v0 = vld [vmem:[%s786_s3 + $0x20] sm:$0xff] }
  0x9d   :  { %v379_v7 = vmax.f32 %v315_v59, %v347_v2  ;;  %v333_v8 = vmul.f32 0.1, %v301_v3  ;;  %v262_v59 = vld [vmem:[%s786_s3 + $0x58] sm:$0xff] }
  0x9e   :  { %v380_v10 = vmax.f32 %v316_v63, %v348_v4  ;;  %v334_v11 = vmul.f32 0.1, %v302_v5  ;;  %v184_v12 = vpop.f32.mrf.mxu2 }
  0x9f   :  { %v365_v14 = vmax.f32 %v301_v3, %v333_v8  ;;  %v185_v15 = vadd.f32 %v184_v12, %v654_v34  ;;  %v233_v16 = vpop.f32.mrf.mxu3  ;;  %v289_v3 = vunpack.c.l.bf16 %v262_v59 }
  0xa0   :  { %v403_v18 = vpack.c.bf16 %v380_v10, %v379_v7  ;;  %v366_v19 = vmax.f32 %v302_v5, %v334_v11  ;;  %v234_v20 = vadd.f32 %v233_v16, %v656_v35  ;;  %v167_v21 = vpop.f32.mrf.mxu0  ;;  %v290_v7 = vunpack.c.h.bf16 %v262_v59 }
  0xa1   :  { %v317_v23 = vadd.f32 %v285_v9, %v185_v15  ;;  %v168_v24 = vadd.f32 %v167_v21, %v654_v34  ;;  %v216_v25 = vpop.f32.mrf.mxu1  ;;  %v275_v11 = vunpack.c.l.bf16 %v255_v0  ;;  %v276_v16 = vunpack.c.h.bf16 %v255_v0 }
  0xa2   :  { %419 = vst [vmem:[%s787_s4 + $0x40] sm:$0xff] %v403_v18  ;;  %v396_v26 = vpack.c.bf16 %v366_v19, %v365_v14  ;;  %v318_v27 = vadd.f32 %v286_v13, %v234_v20  ;;  %v217_v28 = vadd.f32 %v216_v25, %v656_v35 }
  0xa3   :  { %v349_v30 = vmul.f32 0.1, %v317_v23  ;;  %v303_v31 = vadd.f32 %v271_v17, %v168_v24 }
  0xa4   :  { %412 = vst [vmem:[%s787_s4 + $0x8] sm:$0xff] %v396_v26  ;;  %v350_v32 = vmul.f32 0.1, %v318_v27  ;;  %v304_v33 = vadd.f32 %v272_v22, %v217_v28  ;;  %v256_v28 = vld [vmem:[%s786_s3 + $0x28] sm:$0xff] }
  0xa5   :  { %v381_v37 = vmax.f32 %v317_v23, %v349_v30  ;;  %v335_v38 = vmul.f32 0.1, %v303_v31  ;;  %v263_v23 = vld [vmem:[%s786_s3 + $0x60] sm:$0xff] }
  0xa6   :  { %v382_v40 = vmax.f32 %v318_v27, %v350_v32  ;;  %v336_v41 = vmul.f32 0.1, %v304_v33  ;;  %v187_v42 = vpop.f32.mrf.mxu2 }
  0xa7   :  { %v367_v44 = vmax.f32 %v303_v31, %v335_v38  ;;  %v188_v45 = vadd.f32 %v187_v42, %v654_v34  ;;  %v236_v46 = vpop.f32.mrf.mxu3  ;;  %v291_v31 = vunpack.c.l.bf16 %v263_v23 }
  0xa8   :  { %v404_v48 = vpack.c.bf16 %v382_v40, %v381_v37  ;;  %v368_v49 = vmax.f32 %v304_v33, %v336_v41  ;;  %v237_v50 = vadd.f32 %v236_v46, %v656_v35  ;;  %v169_v51 = vpop.f32.mrf.mxu0  ;;  %v292_v37 = vunpack.c.h.bf16 %v263_v23 }
  0xa9   :  { %v319_v53 = vadd.f32 %v287_v39, %v188_v45  ;;  %v170_v54 = vadd.f32 %v169_v51, %v654_v34  ;;  %v218_v55 = vpop.f32.mrf.mxu1  ;;  %v277_v41 = vunpack.c.l.bf16 %v256_v28  ;;  %v278_v46 = vunpack.c.h.bf16 %v256_v28 }
  0xaa   :  { %420 = vst [vmem:[%s787_s4 + $0x48] sm:$0xff] %v404_v48  ;;  %v397_v56 = vpack.c.bf16 %v368_v49, %v367_v44  ;;  %v320_v57 = vadd.f32 %v288_v43, %v237_v50  ;;  %v219_v58 = vadd.f32 %v218_v55, %v656_v35 }
  0xab   :  { %v351_v60 = vmul.f32 0.1, %v319_v53  ;;  %v305_v61 = vadd.f32 %v273_v47, %v170_v54 }
  0xac   :  { %413 = vst [vmem:[%s787_s4 + $0x10] sm:$0xff] %v397_v56  ;;  %v352_v62 = vmul.f32 0.1, %v320_v57  ;;  %v306_v63 = vadd.f32 %v274_v52, %v219_v58  ;;  %v257_v58 = vld [vmem:[%s786_s3 + $0x30] sm:$0xff] }
  0xad   :  { %v383_v1 = vmax.f32 %v319_v53, %v351_v60  ;;  %v337_v2 = vmul.f32 0.1, %v305_v61  ;;  %v264_v53 = vld [vmem:[%s786_s3 + $0x68] sm:$0xff] }
  0xae   :  { %v384_v4 = vmax.f32 %v320_v57, %v352_v62  ;;  %v338_v5 = vmul.f32 0.1, %v306_v63  ;;  %v189_v6 = vpop.f32.mrf.mxu2 }
  0xaf   :  { %v369_v8 = vmax.f32 %v305_v61, %v337_v2  ;;  %v190_v9 = vadd.f32 %v189_v6, %v654_v34  ;;  %v238_v10 = vpop.f32.mrf.mxu3  ;;  %v293_v61 = vunpack.c.l.bf16 %v264_v53 }
  0xb0   :  { %v405_v12 = vpack.c.bf16 %v384_v4, %v383_v1  ;;  %v370_v13 = vmax.f32 %v306_v63, %v338_v5  ;;  %v239_v14 = vadd.f32 %v238_v10, %v656_v35  ;;  %v172_v15 = vpop.f32.mrf.mxu0  ;;  %v294_v1 = vunpack.c.h.bf16 %v264_v53 }
  0xb1   :  { %v321_v17 = vadd.f32 %v289_v3, %v190_v9  ;;  %v173_v18 = vadd.f32 %v172_v15, %v654_v34  ;;  %v221_v19 = vpop.f32.mrf.mxu1  ;;  %v279_v5 = vunpack.c.l.bf16 %v257_v58  ;;  %v280_v10 = vunpack.c.h.bf16 %v257_v58 }
  0xb2   :  { %421 = vst [vmem:[%s787_s4 + $0x50] sm:$0xff] %v405_v12  ;;  %v398_v20 = vpack.c.bf16 %v370_v13, %v369_v8  ;;  %v322_v21 = vadd.f32 %v290_v7, %v239_v14  ;;  %v222_v22 = vadd.f32 %v221_v19, %v656_v35 }
  0xb3   :  { %v353_v24 = vmul.f32 0.1, %v321_v17  ;;  %v307_v25 = vadd.f32 %v275_v11, %v173_v18 }
  0xb4   :  { %414 = vst [vmem:[%s787_s4 + $0x18] sm:$0xff] %v398_v20  ;;  %v354_v26 = vmul.f32 0.1, %v322_v21  ;;  %v308_v27 = vadd.f32 %v276_v16, %v222_v22  ;;  %v258_v22 = vld [vmem:[%s786_s3 + $0x38] sm:$0xff] }
  0xb5   :  { %v385_v29 = vmax.f32 %v321_v17, %v353_v24  ;;  %v339_v30 = vmul.f32 0.1, %v307_v25  ;;  %v265_v17 = vld [vmem:[%s786_s3 + $0x70] sm:$0xff] }
  0xb6   :  { %v386_v32 = vmax.f32 %v322_v21, %v354_v26  ;;  %v340_v33 = vmul.f32 0.1, %v308_v27  ;;  %v192_v36 = vpop.f32.mrf.mxu2 }
  0xb7   :  { %v371_v38 = vmax.f32 %v307_v25, %v339_v30  ;;  %v193_v39 = vadd.f32 %v192_v36, %v654_v34  ;;  %v241_v40 = vpop.f32.mrf.mxu3  ;;  %v295_v25 = vunpack.c.l.bf16 %v265_v17 }
  0xb8   :  { %v406_v42 = vpack.c.bf16 %v386_v32, %v385_v29  ;;  %v372_v43 = vmax.f32 %v308_v27, %v340_v33  ;;  %v242_v44 = vadd.f32 %v241_v40, %v656_v35  ;;  %v174_v45 = vpop.f32.mrf.mxu0  ;;  %v296_v29 = vunpack.c.h.bf16 %v265_v17 }
  0xb9   :  { %v323_v47 = vadd.f32 %v291_v31, %v193_v39  ;;  %v175_v48 = vadd.f32 %v174_v45, %v654_v34  ;;  %v223_v49 = vpop.f32.mrf.mxu1  ;;  %v281_v33 = vunpack.c.l.bf16 %v258_v22  ;;  %v282_v40 = vunpack.c.h.bf16 %v258_v22 }
  0xba   :  { %422 = vst [vmem:[%s787_s4 + $0x58] sm:$0xff] %v406_v42  ;;  %v399_v50 = vpack.c.bf16 %v372_v43, %v371_v38  ;;  %v324_v51 = vadd.f32 %v292_v37, %v242_v44  ;;  %v224_v52 = vadd.f32 %v223_v49, %v656_v35 }
  0xbb   :  { %v355_v54 = vmul.f32 0.1, %v323_v47  ;;  %v309_v55 = vadd.f32 %v277_v41, %v175_v48 }
  0xbc   :  { %415 = vst [vmem:[%s787_s4 + $0x20] sm:$0xff] %v399_v50  ;;  %v356_v56 = vmul.f32 0.1, %v324_v51  ;;  %v310_v57 = vadd.f32 %v278_v46, %v224_v52 }
  0xbd   :  { %v387_v59 = vmax.f32 %v323_v47, %v355_v54  ;;  %v341_v60 = vmul.f32 0.1, %v309_v55  ;;  %v266_v47 = vld [vmem:[%s786_s3 + $0x78] sm:$0xff] }
  0xbe   :  { %v388_v62 = vmax.f32 %v324_v51, %v356_v56  ;;  %v342_v63 = vmul.f32 0.1, %v310_v57  ;;  %v194_v0 = vpop.f32.mrf.mxu2  ;;  %v297_v54 = vunpack.c.l.bf16 %v266_v47  ;;  %v298_v58 = vunpack.c.h.bf16 %v266_v47 }
  0xbf   :  { %v373_v2 = vmax.f32 %v309_v55, %v341_v60  ;;  %v195_v3 = vadd.f32 %v194_v0, %v654_v34  ;;  %v243_v4 = vpop.f32.mrf.mxu3 }
  0xc0   :  { %v407_v6 = vpack.c.bf16 %v388_v62, %v387_v59  ;;  %v374_v7 = vmax.f32 %v310_v57, %v342_v63  ;;  %v244_v8 = vadd.f32 %v243_v4, %v656_v35  ;;  %v177_v9 = vpop.f32.mrf.mxu0 }
  0xc1   :  { %v325_v11 = vadd.f32 %v293_v61, %v195_v3  ;;  %v178_v12 = vadd.f32 %v177_v9, %v654_v34  ;;  %v226_v13 = vpop.f32.mrf.mxu1 }
  0xc2   :  { %423 = vst [vmem:[%s787_s4 + $0x60] sm:$0xff] %v407_v6  ;;  %v400_v14 = vpack.c.bf16 %v374_v7, %v373_v2  ;;  %v326_v15 = vadd.f32 %v294_v1, %v244_v8  ;;  %v227_v16 = vadd.f32 %v226_v13, %v656_v35 }
  0xc3   :  { %v357_v18 = vmul.f32 0.1, %v325_v11  ;;  %v311_v19 = vadd.f32 %v279_v5, %v178_v12 }
  0xc4   :  { %416 = vst [vmem:[%s787_s4 + $0x28] sm:$0xff] %v400_v14  ;;  %v358_v20 = vmul.f32 0.1, %v326_v15  ;;  %v312_v21 = vadd.f32 %v280_v10, %v227_v16 }
  0xc5   :  { %v389_v23 = vmax.f32 %v325_v11, %v357_v18  ;;  %v343_v24 = vmul.f32 0.1, %v311_v19 }
  0xc6   :  { %v390_v26 = vmax.f32 %v326_v15, %v358_v20  ;;  %v344_v27 = vmul.f32 0.1, %v312_v21  ;;  %v197_v28 = vpop.f32.mrf.mxu2 }
  0xc7   :  { %v375_v30 = vmax.f32 %v311_v19, %v343_v24  ;;  %v198_v31 = vadd.f32 %v197_v28, %v654_v34  ;;  %v246_v32 = vpop.f32.mrf.mxu3 }
  0xc8   :  { %v408_v36 = vpack.c.bf16 %v390_v26, %v389_v23  ;;  %v376_v37 = vmax.f32 %v312_v21, %v344_v27  ;;  %v247_v38 = vadd.f32 %v246_v32, %v656_v35  ;;  %v179_v39 = vpop.f32.mrf.mxu0 }
  0xc9   :  { %v327_v41 = vadd.f32 %v295_v25, %v198_v31  ;;  %v180_v42 = vadd.f32 %v179_v39, %v654_v34  ;;  %v228_v43 = vpop.f32.mrf.mxu1 }
  0xca   :  { %424 = vst [vmem:[%s787_s4 + $0x68] sm:$0xff] %v408_v36  ;;  %v401_v44 = vpack.c.bf16 %v376_v37, %v375_v30  ;;  %v328_v45 = vadd.f32 %v296_v29, %v247_v38  ;;  %v229_v46 = vadd.f32 %v228_v43, %v656_v35 }
  0xcb   :  { %v359_v48 = vmul.f32 0.1, %v327_v41  ;;  %v313_v49 = vadd.f32 %v281_v33, %v180_v42 }
  0xcc   :  { %417 = vst [vmem:[%s787_s4 + $0x30] sm:$0xff] %v401_v44  ;;  %v360_v50 = vmul.f32 0.1, %v328_v45  ;;  %v314_v51 = vadd.f32 %v282_v40, %v229_v46 }
  0xcd   :  { %v391_v52 = vmax.f32 %v327_v41, %v359_v48  ;;  %v345_v53 = vmul.f32 0.1, %v313_v49 }
  0xce   :  { %v392_v55 = vmax.f32 %v328_v45, %v360_v50  ;;  %v346_v56 = vmul.f32 0.1, %v314_v51  ;;  %v199_v57 = vpop.f32.mrf.mxu2 }
  0xcf   :  { %v377_v59 = vmax.f32 %v313_v49, %v345_v53  ;;  %v200_v60 = vadd.f32 %v199_v57, %v654_v34  ;;  %v248_v61 = vpop.f32.mrf.mxu3 }
  0xd0   :  { %v409_v62 = vpack.c.bf16 %v392_v55, %v391_v52  ;;  %v378_v63 = vmax.f32 %v314_v51, %v346_v56  ;;  %v249_v0 = vadd.f32 %v248_v61, %v656_v35 }
  0xd1   :  { %v329_v1 = vadd.f32 %v297_v54, %v200_v60 }
  0xd2   :  { %425 = vst [vmem:[%s787_s4 + $0x70] sm:$0xff] %v409_v62  ;;  %v402_v2 = vpack.c.bf16 %v378_v63, %v377_v59  ;;  %v330_v3 = vadd.f32 %v298_v58, %v249_v0 }
  0xd3   :  { %v361_v4 = vmul.f32 0.1, %v329_v1 }
  0xd4   :  { %418 = vst [vmem:[%s787_s4 + $0x38] sm:$0xff] %v402_v2  ;;  %v362_v5 = vmul.f32 0.1, %v330_v3 }
  0xd5   :  { %v393_v6 = vmax.f32 %v329_v1, %v361_v4 }
  0xd6   :  { %v394_v34 = vmax.f32 %v330_v3, %v362_v5 }
  0xd8   :  { %v410_v7 = vpack.c.bf16 %v394_v34, %v393_v6 }
  0xda   :  { %426 = vst [vmem:[%s787_s4 + $0x78] sm:$0xff] %v410_v7 }

// kernel: resnet_forward.31
= control target key start
LH: loop header
LB: loop body
LE: loop exit
PB: predicated region body
PF: predicated region fallthrough
CT: control target
= control target key end

     0   :  { %vm388_vm0 = vcmask 519168   ;;  %s835_s1 = inlined_call_operand.vmem [shape: bf16[256,64], index: 1, kind: input, shape index: {}]   ;;  %s836_s2 = inlined_call_operand.vmem [shape: f32[1,64], index: 2, kind: input, shape index: {}]   ;;  %s837_s0 = inlined_call_operand.vmem [shape: bf16[128,256], index: 0, kind: input, shape index: {}]   ;;  %s838_s3 = inlined_call_operand.vmem [shape: bf16[128,64], index: 3, kind: output, shape index: {}]  }
   0x1   :  { %v560_v0 = vld [vmem:[%s835_s1 + $0x38] sm:$0xff]  ;;  %v559_v2 = vld [vmem:[%s835_s1 + $0x30] sm:$0xff]  ;;  %v558_v4 = vld [vmem:[%s835_s1 + $0x28] sm:$0xff] }
   0x2   :  { %v568_v1 = vld [vmem:[%s835_s1 + $0x78] sm:$0xff]  ;;  %242 = vmatpush.bf16.msra.mxu0 %v560_v0  ;;  %569 = vmatpush.bf16.msra.mxu2 %v560_v0  ;;  %v567_v3 = vld [vmem:[%s835_s1 + $0x70] sm:$0xff]  ;;  %v566_v5 = vld [vmem:[%s835_s1 + $0x68] sm:$0xff] }
   0x3   :  { %291 = vmatpush.bf16.msra.mxu1 %v568_v1  ;;  %577 = vmatpush.bf16.msra.mxu3 %v568_v1  ;;  %v557_v6 = vld [vmem:[%s835_s1 + $0x20] sm:$0xff]  ;;  %v556_v8 = vld [vmem:[%s835_s1 + $0x18] sm:$0xff]  ;;  %v555_v10 = vld [vmem:[%s835_s1 + $0x10] sm:$0xff] }
   0x4   :  { %v565_v7 = vld [vmem:[%s835_s1 + $0x60] sm:$0xff]  ;;  %v564_v9 = vld [vmem:[%s835_s1 + $0x58] sm:$0xff]  ;;  %v563_v11 = vld [vmem:[%s835_s1 + $0x50] sm:$0xff] }
   0x5   :  { %v554_v12 = vld [vmem:[%s835_s1 + $0x8] sm:$0xff]  ;;  %v553_v14 = vld [vmem:[%s835_s1] sm:$0xff]  ;;  %v419_v28 = vld [vmem:[%s837_s0 + $0x10] sm:$0xf] }
   0x6   :  { %243 = vmatpush.bf16.msra.mxu0 %v559_v2  ;;  %570 = vmatpush.bf16.msra.mxu2 %v559_v2  ;;  %v562_v13 = vld [vmem:[%s835_s1 + $0x48] sm:$0xff]  ;;  %v561_v15 = vld [vmem:[%s835_s1 + $0x40] sm:$0xff]  ;;  %v540_v29 = vld [vmem:[%s837_s0 + $0x14] sm:$0xf0] }
   0x7   :  { %292 = vmatpush.bf16.msra.mxu1 %v567_v3  ;;  %578 = vmatpush.bf16.msra.mxu3 %v567_v3  ;;  %v411_v16 = vld [vmem:[%s837_s0] sm:$0xf]  ;;  %v538_v17 = vld [vmem:[%s837_s0 + $0x4] sm:$0xf0]  ;;  %v537_v20 = vld [vmem:[%s837_s0 + $0x4] sm:$0xf]  ;;  %v420_v36 = vor.u32 %v540_v29, %v419_v28 }
   0x8   :  { %v443_v18 = vld [vmem:[%s837_s0 + $0x40] sm:$0xf]  ;;  %v546_v19 = vld [vmem:[%s837_s0 + $0x44] sm:$0xf0]  ;;  %v413_v21 = vld [vmem:[%s837_s0 + $0x8] sm:$0xf0]  ;;  %v412_v24 = vor.u32 %v538_v17, %v411_v16 }
   0x9   :  { %v545_v22 = vld [vmem:[%s837_s0 + $0x44] sm:$0xf]  ;;  %v445_v23 = vld [vmem:[%s837_s0 + $0x48] sm:$0xf0]  ;;  %v444_v25 = vor.u32 %v546_v19, %v443_v18  ;;  %v416_v26 = vor.u32 %v537_v20, %v413_v21  ;;  %v451_v30 = vld [vmem:[%s837_s0 + $0x50] sm:$0xf] }
   0xa   :  { %244 = vmatpush.bf16.msra.mxu0 %v558_v4  ;;  %571 = vmatpush.bf16.msra.mxu2 %v558_v4  ;;  %v448_v27 = vor.u32 %v545_v22, %v445_v23  ;;  %v548_v31 = vld [vmem:[%s837_s0 + $0x54] sm:$0xf0]  ;;  %v539_v32 = vld [vmem:[%s837_s0 + $0x14] sm:$0xf]  ;;  %v421_v33 = vld [vmem:[%s837_s0 + $0x18] sm:$0xf0] }
   0xb   :  { %293 = vmatpush.bf16.msra.mxu1 %v566_v5  ;;  %579 = vmatpush.bf16.msra.mxu3 %v566_v5  ;;  %v547_v34 = vld [vmem:[%s837_s0 + $0x54] sm:$0xf]  ;;  %v453_v35 = vld [vmem:[%s837_s0 + $0x58] sm:$0xf0]  ;;  %v452_v37 = vor.u32 %v548_v31, %v451_v30  ;;  %v424_v38 = vor.u32 %v539_v32, %v421_v33  ;;  %v427_v40 = vld [vmem:[%s837_s0 + $0x20] sm:$0xf] }
   0xc   :  { %v456_v39 = vor.u32 %v547_v34, %v453_v35  ;;  %v542_v41 = vld [vmem:[%s837_s0 + $0x24] sm:$0xf0]  ;;  %v459_v42 = vld [vmem:[%s837_s0 + $0x60] sm:$0xf]  ;;  %v541_v44 = vld [vmem:[%s837_s0 + $0x24] sm:$0xf] }
   0xd   :  { %v550_v43 = vld [vmem:[%s837_s0 + $0x64] sm:$0xf0]  ;;  %v429_v45 = vld [vmem:[%s837_s0 + $0x28] sm:$0xf0]  ;;  %v549_v46 = vld [vmem:[%s837_s0 + $0x64] sm:$0xf]  ;;  %v428_v48 = vor.u32 %v542_v41, %v427_v40 }
   0xe   :  { %245 = vmatpush.bf16.msra.mxu0 %v557_v6  ;;  %572 = vmatpush.bf16.msra.mxu2 %v557_v6  ;;  %v461_v47 = vld [vmem:[%s837_s0 + $0x68] sm:$0xf0]  ;;  %v460_v49 = vor.u32 %v550_v43, %v459_v42  ;;  %v432_v50 = vor.u32 %v541_v44, %v429_v45  ;;  %v435_v52 = vld [vmem:[%s837_s0 + $0x30] sm:$0xf]  ;;  %v544_v53 = vld [vmem:[%s837_s0 + $0x34] sm:$0xf0] }
   0xf   :  { %294 = vmatpush.bf16.msra.mxu1 %v565_v7  ;;  %580 = vmatpush.bf16.msra.mxu3 %v565_v7  ;;  %v464_v51 = vor.u32 %v549_v46, %v461_v47  ;;  %v467_v54 = vld [vmem:[%s837_s0 + $0x70] sm:$0xf]  ;;  %v552_v55 = vld [vmem:[%s837_s0 + $0x74] sm:$0xf0]  ;;  %v543_v56 = vld [vmem:[%s837_s0 + $0x34] sm:$0xf]  ;;  %v436_v60 = vor.u32 %v544_v53, %v435_v52 }
  0x10   :  { %v437_v57 = vld [vmem:[%s837_s0 + $0x38] sm:$0xf0]  ;;  %v551_v58 = vld [vmem:[%s837_s0 + $0x74] sm:$0xf]  ;;  %v468_v61 = vor.u32 %v552_v55, %v467_v54  ;;  %v753_v0 = vld [vmem:[%s836_s2] ss:$0 sm:$0xff] }
  0x11   :  { %v469_v59 = vld [vmem:[%s837_s0 + $0x78] sm:$0xf0]  ;;  %v440_v62 = vor.u32 %v543_v56, %v437_v57 }
  0x12   :  { %246 = vmatpush.bf16.msra.mxu0 %v556_v8  ;;  %573 = vmatpush.bf16.msra.mxu2 %v556_v8  ;;  %v472_v63 = vor.u32 %v551_v58, %v469_v59 }
  0x13   :  { %295 = vmatpush.bf16.msra.mxu1 %v564_v9  ;;  %581 = vmatpush.bf16.msra.mxu3 %v564_v9 }
  0x16   :  { %247 = vmatpush.bf16.msra.mxu0 %v555_v10  ;;  %574 = vmatpush.bf16.msra.mxu2 %v555_v10 }
  0x17   :  { %296 = vmatpush.bf16.msra.mxu1 %v563_v11  ;;  %582 = vmatpush.bf16.msra.mxu3 %v563_v11 }
  0x1a   :  { %248 = vmatpush.bf16.msra.mxu0 %v554_v12  ;;  %575 = vmatpush.bf16.msra.mxu2 %v554_v12 }
  0x1b   :  { %297 = vmatpush.bf16.msra.mxu1 %v562_v13  ;;  %583 = vmatpush.bf16.msra.mxu3 %v562_v13 }
  0x1e   :  { %249 = vmatpush.bf16.msra.mxu0 %v553_v14  ;;  %576 = vmatpush.bf16.msra.mxu2 %v553_v14 }
  0x1f   :  { %298 = vmatpush.bf16.msra.mxu1 %v561_v15  ;;  %584 = vmatpush.bf16.msra.mxu3 %v561_v15 }
  0x21   :  { %250 = vmatmul.bf16.vlgmr.msra.gmra.mxu0 %v412_v24  ;;  %270 = vmatmul.bf16.vlgmr.msra.gmra.mxu2 %v444_v25 }
  0x22   :  { %299 = vmatmul.bf16.vlgmr.msra.gmra.mxu1 %v416_v26  ;;  %319 = vmatmul.bf16.vlgmr.msra.gmra.mxu3 %v448_v27 }
  0x31   :  { %255 = vmatmul.bf16.gmra.mxu0 %v420_v36  ;;  %275 = vmatmul.bf16.gmra.mxu2 %v452_v37 }
  0x32   :  { %304 = vmatmul.bf16.gmra.mxu1 %v424_v38  ;;  %324 = vmatmul.bf16.gmra.mxu3 %v456_v39 }
  0x41   :  { %260 = vmatmul.bf16.gmra.mxu0 %v428_v48  ;;  %280 = vmatmul.bf16.gmra.mxu2 %v460_v49 }
  0x42   :  { %309 = vmatmul.bf16.gmra.mxu1 %v432_v50  ;;  %329 = vmatmul.bf16.gmra.mxu3 %v464_v51 }
  0x51   :  { %265 = vmatmul.bf16.gmra.mxu0 %v436_v60  ;;  %285 = vmatmul.bf16.gmra.mxu2 %v468_v61 }
  0x52   :  { %314 = vmatmul.bf16.gmra.mxu1 %v440_v62  ;;  %334 = vmatmul.bf16.gmra.mxu3 %v472_v63 }
  0x9e   :  { %v251_v1 = vpop.f32.mrf.mxu0 }
  0x9f   :  { %v252_v2 = vadd.f32 %v753_v0, %v251_v1  ;;  %v300_v3 = vpop.f32.mrf.mxu1 }
  0xa1   :  { %v301_v4 = vadd.f32 %v300_v3, %v252_v2 }
  0xa3   :  { %v340_v5 = vmul.f32 0.1, %v301_v4 }
  0xa4   :  { %v271_v6 = vpop.f32.mrf.mxu2 }
  0xa5   :  { %v356_v7 = vmax.f32 %v301_v4, %v340_v5  ;;  %v272_v8 = vadd.f32 %v753_v0, %v271_v6  ;;  %v320_v9 = vpop.f32.mrf.mxu3 }
  0xa6   :  { %v253_v10 = vpop.f32.mrf.mxu0 }
  0xa7   :  { %v372_v11 = vpack.c.bf16 %v356_v7, %v356_v7  ;;  %v321_v12 = vadd.f32 %v320_v9, %v272_v8  ;;  %v254_v13 = vadd.f32 %v753_v0, %v253_v10  ;;  %v302_v14 = vpop.f32.mrf.mxu1 }
  0xa9   :  { %389 = vst.msk [vmem:[%s838_s3] sm:$0xf] %vm388_vm0, %v372_v11  ;;  %v348_v15 = vmul.f32 0.1, %v321_v12  ;;  %v303_v16 = vadd.f32 %v302_v14, %v254_v13 }
  0xab   :  { %v364_v17 = vmax.f32 %v321_v12, %v348_v15  ;;  %v341_v18 = vmul.f32 0.1, %v303_v16 }
  0xac   :  { %v273_v19 = vpop.f32.mrf.mxu2 }
  0xad   :  { %v380_v20 = vpack.c.bf16 %v364_v17, %v364_v17  ;;  %v357_v21 = vmax.f32 %v303_v16, %v341_v18  ;;  %v274_v22 = vadd.f32 %v753_v0, %v273_v19  ;;  %v322_v23 = vpop.f32.mrf.mxu3 }
  0xae   :  { %v256_v24 = vpop.f32.mrf.mxu0 }
  0xaf   :  { %397 = vst.msk [vmem:[%s838_s3 + $0x20] sm:$0xf] %vm388_vm0, %v380_v20  ;;  %v373_v25 = vpack.c.bf16 %v357_v21, %v357_v21  ;;  %v323_v26 = vadd.f32 %v322_v23, %v274_v22  ;;  %v257_v27 = vadd.f32 %v753_v0, %v256_v24  ;;  %v305_v28 = vpop.f32.mrf.mxu1 }
  0xb1   :  { %390 = vst.msk [vmem:[%s838_s3 + $0x4] sm:$0xf] %vm388_vm0, %v373_v25  ;;  %v349_v29 = vmul.f32 0.1, %v323_v26  ;;  %v306_v30 = vadd.f32 %v305_v28, %v257_v27 }
  0xb3   :  { %v365_v31 = vmax.f32 %v323_v26, %v349_v29  ;;  %v342_v32 = vmul.f32 0.1, %v306_v30 }
  0xb4   :  { %v276_v33 = vpop.f32.mrf.mxu2 }
  0xb5   :  { %v381_v34 = vpack.c.bf16 %v365_v31, %v365_v31  ;;  %v358_v35 = vmax.f32 %v306_v30, %v342_v32  ;;  %v277_v36 = vadd.f32 %v753_v0, %v276_v33  ;;  %v325_v37 = vpop.f32.mrf.mxu3 }
  0xb6   :  { %v258_v38 = vpop.f32.mrf.mxu0 }
  0xb7   :  { %398 = vst.msk [vmem:[%s838_s3 + $0x24] sm:$0xf] %vm388_vm0, %v381_v34  ;;  %v374_v39 = vpack.c.bf16 %v358_v35, %v358_v35  ;;  %v326_v40 = vadd.f32 %v325_v37, %v277_v36  ;;  %v259_v41 = vadd.f32 %v753_v0, %v258_v38  ;;  %v307_v42 = vpop.f32.mrf.mxu1 }
  0xb9   :  { %391 = vst.msk [vmem:[%s838_s3 + $0x8] sm:$0xf] %vm388_vm0, %v374_v39  ;;  %v350_v43 = vmul.f32 0.1, %v326_v40  ;;  %v308_v44 = vadd.f32 %v307_v42, %v259_v41 }
  0xbb   :  { %v366_v45 = vmax.f32 %v326_v40, %v350_v43  ;;  %v343_v46 = vmul.f32 0.1, %v308_v44 }
  0xbc   :  { %v278_v47 = vpop.f32.mrf.mxu2 }
  0xbd   :  { %v382_v48 = vpack.c.bf16 %v366_v45, %v366_v45  ;;  %v359_v49 = vmax.f32 %v308_v44, %v343_v46  ;;  %v279_v50 = vadd.f32 %v753_v0, %v278_v47  ;;  %v327_v51 = vpop.f32.mrf.mxu3 }
  0xbe   :  { %v261_v52 = vpop.f32.mrf.mxu0 }
  0xbf   :  { %399 = vst.msk [vmem:[%s838_s3 + $0x28] sm:$0xf] %vm388_vm0, %v382_v48  ;;  %v375_v53 = vpack.c.bf16 %v359_v49, %v359_v49  ;;  %v328_v54 = vadd.f32 %v327_v51, %v279_v50  ;;  %v262_v55 = vadd.f32 %v753_v0, %v261_v52  ;;  %v310_v56 = vpop.f32.mrf.mxu1 }
  0xc1   :  { %392 = vst.msk [vmem:[%s838_s3 + $0xc] sm:$0xf] %vm388_vm0, %v375_v53  ;;  %v351_v57 = vmul.f32 0.1, %v328_v54  ;;  %v311_v58 = vadd.f32 %v310_v56, %v262_v55 }
  0xc3   :  { %v367_v59 = vmax.f32 %v328_v54, %v351_v57  ;;  %v344_v60 = vmul.f32 0.1, %v311_v58 }
  0xc4   :  { %v281_v61 = vpop.f32.mrf.mxu2 }
  0xc5   :  { %v383_v62 = vpack.c.bf16 %v367_v59, %v367_v59  ;;  %v360_v63 = vmax.f32 %v311_v58, %v344_v60  ;;  %v282_v1 = vadd.f32 %v753_v0, %v281_v61  ;;  %v330_v2 = vpop.f32.mrf.mxu3 }
  0xc6   :  { %v263_v3 = vpop.f32.mrf.mxu0 }
  0xc7   :  { %400 = vst.msk [vmem:[%s838_s3 + $0x2c] sm:$0xf] %vm388_vm0, %v383_v62  ;;  %v376_v4 = vpack.c.bf16 %v360_v63, %v360_v63  ;;  %v331_v5 = vadd.f32 %v330_v2, %v282_v1  ;;  %v264_v6 = vadd.f32 %v753_v0, %v263_v3  ;;  %v312_v7 = vpop.f32.mrf.mxu1 }
  0xc9   :  { %393 = vst.msk [vmem:[%s838_s3 + $0x10] sm:$0xf] %vm388_vm0, %v376_v4  ;;  %v352_v8 = vmul.f32 0.1, %v331_v5  ;;  %v313_v9 = vadd.f32 %v312_v7, %v264_v6 }
  0xcb   :  { %v368_v10 = vmax.f32 %v331_v5, %v352_v8  ;;  %v345_v11 = vmul.f32 0.1, %v313_v9 }
  0xcc   :  { %v283_v12 = vpop.f32.mrf.mxu2 }
  0xcd   :  { %v384_v13 = vpack.c.bf16 %v368_v10, %v368_v10  ;;  %v361_v14 = vmax.f32 %v313_v9, %v345_v11  ;;  %v284_v15 = vadd.f32 %v753_v0, %v283_v12  ;;  %v332_v16 = vpop.f32.mrf.mxu3 }
  0xce   :  { %v266_v17 = vpop.f32.mrf.mxu0 }
  0xcf   :  { %401 = vst.msk [vmem:[%s838_s3 + $0x30] sm:$0xf] %vm388_vm0, %v384_v13  ;;  %v377_v18 = vpack.c.bf16 %v361_v14, %v361_v14  ;;  %v333_v19 = vadd.f32 %v332_v16, %v284_v15  ;;  %v267_v20 = vadd.f32 %v753_v0, %v266_v17  ;;  %v315_v21 = vpop.f32.mrf.mxu1 }
  0xd1   :  { %394 = vst.msk [vmem:[%s838_s3 + $0x14] sm:$0xf] %vm388_vm0, %v377_v18  ;;  %v353_v22 = vmul.f32 0.1, %v333_v19  ;;  %v316_v23 = vadd.f32 %v315_v21, %v267_v20 }
  0xd3   :  { %v369_v24 = vmax.f32 %v333_v19, %v353_v22  ;;  %v346_v25 = vmul.f32 0.1, %v316_v23 }
  0xd4   :  { %v286_v26 = vpop.f32.mrf.mxu2 }
  0xd5   :  { %v385_v27 = vpack.c.bf16 %v369_v24, %v369_v24  ;;  %v362_v28 = vmax.f32 %v316_v23, %v346_v25  ;;  %v287_v29 = vadd.f32 %v753_v0, %v286_v26  ;;  %v335_v30 = vpop.f32.mrf.mxu3 }
  0xd6   :  { %v268_v31 = vpop.f32.mrf.mxu0 }
  0xd7   :  { %402 = vst.msk [vmem:[%s838_s3 + $0x34] sm:$0xf] %vm388_vm0, %v385_v27  ;;  %v378_v32 = vpack.c.bf16 %v362_v28, %v362_v28  ;;  %v336_v33 = vadd.f32 %v335_v30, %v287_v29  ;;  %v269_v34 = vadd.f32 %v753_v0, %v268_v31  ;;  %v317_v35 = vpop.f32.mrf.mxu1 }
  0xd9   :  { %395 = vst.msk [vmem:[%s838_s3 + $0x18] sm:$0xf] %vm388_vm0, %v378_v32  ;;  %v354_v36 = vmul.f32 0.1, %v336_v33  ;;  %v318_v37 = vadd.f32 %v317_v35, %v269_v34 }
  0xdb   :  { %v370_v38 = vmax.f32 %v336_v33, %v354_v36  ;;  %v347_v39 = vmul.f32 0.1, %v318_v37 }
  0xdc   :  { %v288_v40 = vpop.f32.mrf.mxu2 }
  0xdd   :  { %v386_v41 = vpack.c.bf16 %v370_v38, %v370_v38  ;;  %v363_v42 = vmax.f32 %v318_v37, %v347_v39  ;;  %v289_v43 = vadd.f32 %v753_v0, %v288_v40  ;;  %v337_v44 = vpop.f32.mrf.mxu3 }
  0xdf   :  { %403 = vst.msk [vmem:[%s838_s3 + $0x38] sm:$0xf] %vm388_vm0, %v386_v41  ;;  %v379_v45 = vpack.c.bf16 %v363_v42, %v363_v42  ;;  %v338_v46 = vadd.f32 %v337_v44, %v289_v43 }
  0xe1   :  { %396 = vst.msk [vmem:[%s838_s3 + $0x1c] sm:$0xf] %vm388_vm0, %v379_v45  ;;  %v355_v47 = vmul.f32 0.1, %v338_v46 }
  0xe3   :  { %v371_v48 = vmax.f32 %v338_v46, %v355_v47 }
  0xe5   :  { %v387_v49 = vpack.c.bf16 %v371_v48, %v371_v48 }
  0xe7   :  { %404 = vst.msk [vmem:[%s838_s3 + $0x3c] sm:$0xf] %vm388_vm0, %v387_v49 }

// kernel: resnet_forward.38
= control target key start
LH: loop header
LB: loop body
LE: loop exit
PB: predicated region body
PF: predicated region fallthrough
CT: control target
= control target key end

     0   :  { %s841_s1 = inlined_call_operand.vmem [shape: bf16[256,128], index: 1, kind: input, shape index: {}]   ;;  %s842_s2 = inlined_call_operand.vmem [shape: f32[1,128], index: 2, kind: input, shape index: {}]   ;;  %s843_s0 = inlined_call_operand.vmem [shape: bf16[128,256], index: 0, kind: input, shape index: {}]   ;;  %s844_s3 = inlined_call_operand.vmem [shape: bf16[128,128], index: 3, kind: output, shape index: {}]  }
   0x1   :  { %v559_v0 = vld [vmem:[%s841_s1 + $0x38] sm:$0xff]  ;;  %v558_v2 = vld [vmem:[%s841_s1 + $0x30] sm:$0xff]  ;;  %v557_v4 = vld [vmem:[%s841_s1 + $0x28] sm:$0xff] }
   0x2   :  { %v567_v1 = vld [vmem:[%s841_s1 + $0x78] sm:$0xff]  ;;  %242 = vmatpush.bf16.msra.mxu0 %v559_v0  ;;  %615 = vmatpush.bf16.msra.mxu2 %v559_v0  ;;  %v566_v3 = vld [vmem:[%s841_s1 + $0x70] sm:$0xff]  ;;  %v565_v5 = vld [vmem:[%s841_s1 + $0x68] sm:$0xff] }
   0x3   :  { %291 = vmatpush.bf16.msra.mxu1 %v567_v1  ;;  %623 = vmatpush.bf16.msra.mxu3 %v567_v1  ;;  %v556_v6 = vld [vmem:[%s841_s1 + $0x20] sm:$0xff]  ;;  %v555_v8 = vld [vmem:[%s841_s1 + $0x18] sm:$0xff]  ;;  %v554_v10 = vld [vmem:[%s841_s1 + $0x10] sm:$0xff] }
   0x4   :  { %v564_v7 = vld [vmem:[%s841_s1 + $0x60] sm:$0xff]  ;;  %v563_v9 = vld [vmem:[%s841_s1 + $0x58] sm:$0xff]  ;;  %v562_v11 = vld [vmem:[%s841_s1 + $0x50] sm:$0xff] }
   0x5   :  { %v553_v12 = vld [vmem:[%s841_s1 + $0x8] sm:$0xff]  ;;  %v552_v14 = vld [vmem:[%s841_s1] sm:$0xff]  ;;  %v418_v28 = vld [vmem:[%s843_s0 + $0x10] sm:$0xf] }
   0x6   :  { %243 = vmatpush.bf16.msra.mxu0 %v558_v2  ;;  %616 = vmatpush.bf16.msra.mxu2 %v558_v2  ;;  %v561_v13 = vld [vmem:[%s841_s1 + $0x48] sm:$0xff]  ;;  %v560_v15 = vld [vmem:[%s841_s1 + $0x40] sm:$0xff]  ;;  %v539_v29 = vld [vmem:[%s843_s0 + $0x14] sm:$0xf0] }
   0x7   :  { %292 = vmatpush.bf16.msra.mxu1 %v566_v3  ;;  %624 = vmatpush.bf16.msra.mxu3 %v566_v3  ;;  %v410_v16 = vld [vmem:[%s843_s0] sm:$0xf]  ;;  %v537_v17 = vld [vmem:[%s843_s0 + $0x4] sm:$0xf0]  ;;  %v536_v20 = vld [vmem:[%s843_s0 + $0x4] sm:$0xf]  ;;  %v419_v36 = vor.u32 %v539_v29, %v418_v28 }
   0x8   :  { %v442_v18 = vld [vmem:[%s843_s0 + $0x40] sm:$0xf]  ;;  %v545_v19 = vld [vmem:[%s843_s0 + $0x44] sm:$0xf0]  ;;  %v412_v21 = vld [vmem:[%s843_s0 + $0x8] sm:$0xf0]  ;;  %v411_v24 = vor.u32 %v537_v17, %v410_v16 }
   0x9   :  { %v544_v22 = vld [vmem:[%s843_s0 + $0x44] sm:$0xf]  ;;  %v444_v23 = vld [vmem:[%s843_s0 + $0x48] sm:$0xf0]  ;;  %v443_v25 = vor.u32 %v545_v19, %v442_v18  ;;  %v415_v26 = vor.u32 %v536_v20, %v412_v21  ;;  %v450_v30 = vld [vmem:[%s843_s0 + $0x50] sm:$0xf] }
   0xa   :  { %244 = vmatpush.bf16.msra.mxu0 %v557_v4  ;;  %617 = vmatpush.bf16.msra.mxu2 %v557_v4  ;;  %v447_v27 = vor.u32 %v544_v22, %v444_v23  ;;  %v547_v31 = vld [vmem:[%s843_s0 + $0x54] sm:$0xf0]  ;;  %v538_v32 = vld [vmem:[%s843_s0 + $0x14] sm:$0xf]  ;;  %v420_v33 = vld [vmem:[%s843_s0 + $0x18] sm:$0xf0] }
   0xb   :  { %293 = vmatpush.bf16.msra.mxu1 %v565_v5  ;;  %625 = vmatpush.bf16.msra.mxu3 %v565_v5  ;;  %v546_v34 = vld [vmem:[%s843_s0 + $0x54] sm:$0xf]  ;;  %v452_v35 = vld [vmem:[%s843_s0 + $0x58] sm:$0xf0]  ;;  %v451_v37 = vor.u32 %v547_v31, %v450_v30  ;;  %v423_v38 = vor.u32 %v538_v32, %v420_v33  ;;  %v426_v40 = vld [vmem:[%s843_s0 + $0x20] sm:$0xf] }
   0xc   :  { %v455_v39 = vor.u32 %v546_v34, %v452_v35  ;;  %v541_v41 = vld [vmem:[%s843_s0 + $0x24] sm:$0xf0]  ;;  %v458_v42 = vld [vmem:[%s843_s0 + $0x60] sm:$0xf]  ;;  %v540_v44 = vld [vmem:[%s843_s0 + $0x24] sm:$0xf] }
   0xd   :  { %v549_v43 = vld [vmem:[%s843_s0 + $0x64] sm:$0xf0]  ;;  %v428_v45 = vld [vmem:[%s843_s0 + $0x28] sm:$0xf0]  ;;  %v548_v46 = vld [vmem:[%s843_s0 + $0x64] sm:$0xf]  ;;  %v427_v48 = vor.u32 %v541_v41, %v426_v40 }
   0xe   :  { %245 = vmatpush.bf16.msra.mxu0 %v556_v6  ;;  %618 = vmatpush.bf16.msra.mxu2 %v556_v6  ;;  %v460_v47 = vld [vmem:[%s843_s0 + $0x68] sm:$0xf0]  ;;  %v459_v49 = vor.u32 %v549_v43, %v458_v42  ;;  %v431_v50 = vor.u32 %v540_v44, %v428_v45  ;;  %v434_v52 = vld [vmem:[%s843_s0 + $0x30] sm:$0xf]  ;;  %v543_v53 = vld [vmem:[%s843_s0 + $0x34] sm:$0xf0] }
   0xf   :  { %294 = vmatpush.bf16.msra.mxu1 %v564_v7  ;;  %626 = vmatpush.bf16.msra.mxu3 %v564_v7  ;;  %v463_v51 = vor.u32 %v548_v46, %v460_v47  ;;  %v466_v54 = vld [vmem:[%s843_s0 + $0x70] sm:$0xf]  ;;  %v551_v55 = vld [vmem:[%s843_s0 + $0x74] sm:$0xf0]  ;;  %v542_v56 = vld [vmem:[%s843_s0 + $0x34] sm:$0xf]  ;;  %v435_v60 = vor.u32 %v543_v53, %v434_v52 }
  0x10   :  { %v436_v57 = vld [vmem:[%s843_s0 + $0x38] sm:$0xf0]  ;;  %v550_v58 = vld [vmem:[%s843_s0 + $0x74] sm:$0xf]  ;;  %v467_v61 = vor.u32 %v551_v55, %v466_v54  ;;  %v799_v0 = vld [vmem:[%s842_s2] ss:$0 sm:$0xff] }
  0x11   :  { %v468_v59 = vld [vmem:[%s843_s0 + $0x78] sm:$0xf0]  ;;  %v439_v62 = vor.u32 %v542_v56, %v436_v57 }
  0x12   :  { %246 = vmatpush.bf16.msra.mxu0 %v555_v8  ;;  %619 = vmatpush.bf16.msra.mxu2 %v555_v8  ;;  %v471_v63 = vor.u32 %v550_v58, %v468_v59 }
  0x13   :  { %295 = vmatpush.bf16.msra.mxu1 %v563_v9  ;;  %627 = vmatpush.bf16.msra.mxu3 %v563_v9 }
  0x16   :  { %247 = vmatpush.bf16.msra.mxu0 %v554_v10  ;;  %620 = vmatpush.bf16.msra.mxu2 %v554_v10 }
  0x17   :  { %296 = vmatpush.bf16.msra.mxu1 %v562_v11  ;;  %628 = vmatpush.bf16.msra.mxu3 %v562_v11 }
  0x1a   :  { %248 = vmatpush.bf16.msra.mxu0 %v553_v12  ;;  %621 = vmatpush.bf16.msra.mxu2 %v553_v12 }
  0x1b   :  { %297 = vmatpush.bf16.msra.mxu1 %v561_v13  ;;  %629 = vmatpush.bf16.msra.mxu3 %v561_v13 }
  0x1e   :  { %249 = vmatpush.bf16.msra.mxu0 %v552_v14  ;;  %622 = vmatpush.bf16.msra.mxu2 %v552_v14 }
  0x1f   :  { %298 = vmatpush.bf16.msra.mxu1 %v560_v15  ;;  %630 = vmatpush.bf16.msra.mxu3 %v560_v15 }
  0x21   :  { %250 = vmatmul.bf16.vlgmr.msra.gmra.mxu0 %v411_v24  ;;  %270 = vmatmul.bf16.vlgmr.msra.gmra.mxu2 %v443_v25 }
  0x22   :  { %299 = vmatmul.bf16.vlgmr.msra.gmra.mxu1 %v415_v26  ;;  %319 = vmatmul.bf16.vlgmr.msra.gmra.mxu3 %v447_v27 }
  0x31   :  { %255 = vmatmul.bf16.gmra.mxu0 %v419_v36  ;;  %275 = vmatmul.bf16.gmra.mxu2 %v451_v37 }
  0x32   :  { %304 = vmatmul.bf16.gmra.mxu1 %v423_v38  ;;  %324 = vmatmul.bf16.gmra.mxu3 %v455_v39 }
  0x41   :  { %260 = vmatmul.bf16.gmra.mxu0 %v427_v48  ;;  %280 = vmatmul.bf16.gmra.mxu2 %v459_v49 }
  0x42   :  { %309 = vmatmul.bf16.gmra.mxu1 %v431_v50  ;;  %329 = vmatmul.bf16.gmra.mxu3 %v463_v51 }
  0x51   :  { %265 = vmatmul.bf16.gmra.mxu0 %v435_v60  ;;  %285 = vmatmul.bf16.gmra.mxu2 %v467_v61 }
  0x52   :  { %314 = vmatmul.bf16.gmra.mxu1 %v439_v62  ;;  %334 = vmatmul.bf16.gmra.mxu3 %v471_v63 }
  0x9e   :  { %v251_v1 = vpop.f32.mrf.mxu0 }
  0x9f   :  { %v300_v2 = vpop.f32.mrf.mxu1  ;;  %v252_v3 = vadd.f32 %v799_v0, %v251_v1 }
  0xa1   :  { %v301_v5 = vadd.f32 %v300_v2, %v252_v3 }
  0xa3   :  { %v340_v11 = vmul.f32 0.1, %v301_v5 }
  0xa4   :  { %v271_v4 = vpop.f32.mrf.mxu2 }
  0xa5   :  { %v320_v6 = vpop.f32.mrf.mxu3  ;;  %v272_v8 = vadd.f32 %v799_v0, %v271_v4  ;;  %v356_v16 = vmax.f32 %v301_v5, %v340_v11 }
  0xa6   :  { %v253_v7 = vpop.f32.mrf.mxu0 }
  0xa7   :  { %v254_v9 = vadd.f32 %v799_v0, %v253_v7  ;;  %v302_v10 = vpop.f32.mrf.mxu1  ;;  %v321_v13 = vadd.f32 %v320_v6, %v272_v8 }
  0xa9   :  { %v303_v12 = vadd.f32 %v302_v10, %v254_v9  ;;  %v348_v21 = vmul.f32 0.1, %v321_v13 }
  0xab   :  { %v341_v14 = vmul.f32 0.1, %v303_v12  ;;  %v364_v27 = vmax.f32 %v321_v13, %v348_v21 }
  0xac   :  { %v273_v15 = vpop.f32.mrf.mxu2 }
  0xad   :  { %v357_v17 = vmax.f32 %v303_v12, %v341_v14  ;;  %v274_v18 = vadd.f32 %v799_v0, %v273_v15  ;;  %v322_v19 = vpop.f32.mrf.mxu3 }
  0xae   :  { %v256_v20 = vpop.f32.mrf.mxu0 }
  0xaf   :  { %v571_v22 = vpack.c.bf16 %v357_v17, %v356_v16  ;;  %v323_v23 = vadd.f32 %v322_v19, %v274_v18  ;;  %v305_v24 = vpop.f32.mrf.mxu1  ;;  %v257_v26 = vadd.f32 %v799_v0, %v256_v20 }
  0xb1   :  { %572 = vst [vmem:[%s844_s3] sm:$0xff] %v571_v22   ;;  %v349_v25 = vmul.f32 0.1, %v323_v23  ;;  %v306_v31 = vadd.f32 %v305_v24, %v257_v26 }
  0xb3   :  { %v365_v28 = vmax.f32 %v323_v23, %v349_v25  ;;  %v342_v37 = vmul.f32 0.1, %v306_v31 }
  0xb4   :  { %v276_v29 = vpop.f32.mrf.mxu2 }
  0xb5   :  { %v591_v30 = vpack.c.bf16 %v365_v28, %v364_v27  ;;  %v325_v32 = vpop.f32.mrf.mxu3  ;;  %v277_v34 = vadd.f32 %v799_v0, %v276_v29  ;;  %v358_v42 = vmax.f32 %v306_v31, %v342_v37 }
  0xb6   :  { %v258_v33 = vpop.f32.mrf.mxu0 }
  0xb7   :  { %611 = vst [vmem:[%s844_s3 + $0x20] sm:$0xff] %v591_v30   ;;  %v259_v35 = vadd.f32 %v799_v0, %v258_v33  ;;  %v307_v36 = vpop.f32.mrf.mxu1  ;;  %v326_v39 = vadd.f32 %v325_v32, %v277_v34 }
  0xb9   :  { %v308_v38 = vadd.f32 %v307_v36, %v259_v35  ;;  %v350_v47 = vmul.f32 0.1, %v326_v39 }
  0xbb   :  { %v343_v40 = vmul.f32 0.1, %v308_v38  ;;  %v366_v53 = vmax.f32 %v326_v39, %v350_v47 }
  0xbc   :  { %v278_v41 = vpop.f32.mrf.mxu2 }
  0xbd   :  { %v359_v43 = vmax.f32 %v308_v38, %v343_v40  ;;  %v279_v44 = vadd.f32 %v799_v0, %v278_v41  ;;  %v327_v45 = vpop.f32.mrf.mxu3 }
  0xbe   :  { %v261_v46 = vpop.f32.mrf.mxu0 }
  0xbf   :  { %v576_v48 = vpack.c.bf16 %v359_v43, %v358_v42  ;;  %v328_v49 = vadd.f32 %v327_v45, %v279_v44  ;;  %v310_v50 = vpop.f32.mrf.mxu1  ;;  %v262_v52 = vadd.f32 %v799_v0, %v261_v46 }
  0xc1   :  { %608 = vst [vmem:[%s844_s3 + $0x8] sm:$0xff] %v576_v48   ;;  %v351_v51 = vmul.f32 0.1, %v328_v49  ;;  %v311_v57 = vadd.f32 %v310_v50, %v262_v52 }
  0xc3   :  { %v367_v54 = vmax.f32 %v328_v49, %v351_v51  ;;  %v344_v63 = vmul.f32 0.1, %v311_v57 }
  0xc4   :  { %v281_v55 = vpop.f32.mrf.mxu2 }
  0xc5   :  { %v596_v56 = vpack.c.bf16 %v367_v54, %v366_v53  ;;  %v330_v58 = vpop.f32.mrf.mxu3  ;;  %v282_v60 = vadd.f32 %v799_v0, %v281_v55  ;;  %v360_v5 = vmax.f32 %v311_v57, %v344_v63 }
  0xc6   :  { %v263_v59 = vpop.f32.mrf.mxu0 }
  0xc7   :  { %612 = vst [vmem:[%s844_s3 + $0x28] sm:$0xff] %v596_v56   ;;  %v264_v61 = vadd.f32 %v799_v0, %v263_v59  ;;  %v312_v62 = vpop.f32.mrf.mxu1  ;;  %v331_v2 = vadd.f32 %v330_v58, %v282_v60 }
  0xc9   :  { %v313_v1 = vadd.f32 %v312_v62, %v264_v61  ;;  %v352_v10 = vmul.f32 0.1, %v331_v2 }
  0xcb   :  { %v345_v3 = vmul.f32 0.1, %v313_v1  ;;  %v368_v16 = vmax.f32 %v331_v2, %v352_v10 }
  0xcc   :  { %v283_v4 = vpop.f32.mrf.mxu2 }
  0xcd   :  { %v361_v6 = vmax.f32 %v313_v1, %v345_v3  ;;  %v284_v7 = vadd.f32 %v799_v0, %v283_v4  ;;  %v332_v8 = vpop.f32.mrf.mxu3 }
  0xce   :  { %v266_v9 = vpop.f32.mrf.mxu0 }
  0xcf   :  { %v581_v11 = vpack.c.bf16 %v361_v6, %v360_v5  ;;  %v333_v12 = vadd.f32 %v332_v8, %v284_v7  ;;  %v315_v13 = vpop.f32.mrf.mxu1  ;;  %v267_v15 = vadd.f32 %v799_v0, %v266_v9 }
  0xd1   :  { %609 = vst [vmem:[%s844_s3 + $0x10] sm:$0xff] %v581_v11   ;;  %v353_v14 = vmul.f32 0.1, %v333_v12  ;;  %v316_v20 = vadd.f32 %v315_v13, %v267_v15 }
  0xd3   :  { %v369_v17 = vmax.f32 %v333_v12, %v353_v14  ;;  %v346_v26 = vmul.f32 0.1, %v316_v20 }
  0xd4   :  { %v286_v18 = vpop.f32.mrf.mxu2 }
  0xd5   :  { %v601_v19 = vpack.c.bf16 %v369_v17, %v368_v16  ;;  %v335_v21 = vpop.f32.mrf.mxu3  ;;  %v287_v23 = vadd.f32 %v799_v0, %v286_v18  ;;  %v362_v31 = vmax.f32 %v316_v20, %v346_v26 }
  0xd6   :  { %v268_v22 = vpop.f32.mrf.mxu0 }
  0xd7   :  { %613 = vst [vmem:[%s844_s3 + $0x30] sm:$0xff] %v601_v19   ;;  %v269_v24 = vadd.f32 %v799_v0, %v268_v22  ;;  %v317_v25 = vpop.f32.mrf.mxu1  ;;  %v336_v28 = vadd.f32 %v335_v21, %v287_v23 }
  0xd9   :  { %v318_v27 = vadd.f32 %v317_v25, %v269_v24  ;;  %v354_v35 = vmul.f32 0.1, %v336_v28 }
  0xdb   :  { %v347_v29 = vmul.f32 0.1, %v318_v27  ;;  %v370_v39 = vmax.f32 %v336_v28, %v354_v35 }
  0xdc   :  { %v288_v30 = vpop.f32.mrf.mxu2 }
  0xdd   :  { %v363_v32 = vmax.f32 %v318_v27, %v347_v29  ;;  %v289_v33 = vadd.f32 %v799_v0, %v288_v30  ;;  %v337_v34 = vpop.f32.mrf.mxu3 }
  0xdf   :  { %v586_v36 = vpack.c.bf16 %v363_v32, %v362_v31  ;;  %v338_v37 = vadd.f32 %v337_v34, %v289_v33 }
  0xe1   :  { %610 = vst [vmem:[%s844_s3 + $0x18] sm:$0xff] %v586_v36   ;;  %v355_v38 = vmul.f32 0.1, %v338_v37 }
  0xe3   :  { %v371_v40 = vmax.f32 %v338_v37, %v355_v38 }
  0xe5   :  { %v606_v41 = vpack.c.bf16 %v371_v40, %v370_v39 }
  0xe7   :  { %614 = vst [vmem:[%s844_s3 + $0x38] sm:$0xff] %v606_v41  }

// kernel: resnet_forward.39
= control target key start
LH: loop header
LB: loop body
LE: loop exit
PB: predicated region body
PF: predicated region fallthrough
CT: control target
= control target key end

     0   :  { %s4353_s1 = inlined_call_operand.vmem [shape: bf16[3456,128], index: 1, kind: input, shape index: {}]   ;;  %s4354_s0 = inlined_call_operand.vmem [shape: bf16[16,3456], index: 0, kind: input, shape index: {}]   ;;  %s4355_s2 = inlined_call_operand.vmem [shape: f32[1,128], index: 2, kind: input, shape index: {}]   ;;  %s4356_s3 = inlined_call_operand.vmem [shape: bf16[16,128], index: 3, kind: output, shape index: {}]  }
   0x1   :  { %v3302_v0 = vld [vmem:[%s4353_s1 + $0x38] sm:$0xff]  ;;  %v3301_v4 = vld [vmem:[%s4353_s1 + $0x30] sm:$0xff]  ;;  %v3300_v8 = vld [vmem:[%s4353_s1 + $0x28] sm:$0xff] }
   0x2   :  { %v3310_v1 = vld [vmem:[%s4353_s1 + $0x78] sm:$0xff]  ;;  %1910 = vmatpush.bf16.msra.mxu0 %v3302_v0  ;;  %v3309_v5 = vld [vmem:[%s4353_s1 + $0x70] sm:$0xff]  ;;  %v3308_v9 = vld [vmem:[%s4353_s1 + $0x68] sm:$0xff] }
   0x3   :  { %v3318_v2 = vld [vmem:[%s4353_s1 + $0xb8] sm:$0xff]  ;;  %1924 = vmatpush.bf16.msra.mxu1 %v3310_v1  ;;  %v3317_v6 = vld [vmem:[%s4353_s1 + $0xb0] sm:$0xff]  ;;  %v3316_v10 = vld [vmem:[%s4353_s1 + $0xa8] sm:$0xff] }
   0x4   :  { %v3326_v3 = vld [vmem:[%s4353_s1 + $0xf8] sm:$0xff]  ;;  %1938 = vmatpush.bf16.msra.mxu2 %v3318_v2  ;;  %v3325_v7 = vld [vmem:[%s4353_s1 + $0xf0] sm:$0xff]  ;;  %v3324_v11 = vld [vmem:[%s4353_s1 + $0xe8] sm:$0xff] }
   0x5   :  { %1952 = vmatpush.bf16.msra.mxu3 %v3326_v3  ;;  %v3299_v12 = vld [vmem:[%s4353_s1 + $0x20] sm:$0xff]  ;;  %v3298_v16 = vld [vmem:[%s4353_s1 + $0x18] sm:$0xff]  ;;  %v3297_v20 = vld [vmem:[%s4353_s1 + $0x10] sm:$0xff] }
   0x6   :  { %1911 = vmatpush.bf16.msra.mxu0 %v3301_v4  ;;  %v3307_v13 = vld [vmem:[%s4353_s1 + $0x60] sm:$0xff]  ;;  %v3306_v17 = vld [vmem:[%s4353_s1 + $0x58] sm:$0xff]  ;;  %v3305_v21 = vld [vmem:[%s4353_s1 + $0x50] sm:$0xff] }
   0x7   :  { %1925 = vmatpush.bf16.msra.mxu1 %v3309_v5  ;;  %v3315_v14 = vld [vmem:[%s4353_s1 + $0xa0] sm:$0xff]  ;;  %v3314_v18 = vld [vmem:[%s4353_s1 + $0x98] sm:$0xff]  ;;  %v3313_v22 = vld [vmem:[%s4353_s1 + $0x90] sm:$0xff] }
   0x8   :  { %1939 = vmatpush.bf16.msra.mxu2 %v3317_v6  ;;  %v3323_v15 = vld [vmem:[%s4353_s1 + $0xe0] sm:$0xff]  ;;  %v3322_v19 = vld [vmem:[%s4353_s1 + $0xd8] sm:$0xff]  ;;  %v3321_v23 = vld [vmem:[%s4353_s1 + $0xd0] sm:$0xff] }
   0x9   :  { %1953 = vmatpush.bf16.msra.mxu3 %v3325_v7  ;;  %v3296_v24 = vld [vmem:[%s4353_s1 + $0x8] sm:$0xff]  ;;  %v3295_v28 = vld [vmem:[%s4353_s1] sm:$0xff]  ;;  %v3334_v31 = vld [vmem:[%s4353_s1 + $0x138] sm:$0xff] }
   0xa   :  { %1912 = vmatpush.bf16.msra.mxu0 %v3300_v8  ;;  %v3304_v25 = vld [vmem:[%s4353_s1 + $0x48] sm:$0xff]  ;;  %v3303_v29 = vld [vmem:[%s4353_s1 + $0x40] sm:$0xff]  ;;  %v3342_v34 = vld [vmem:[%s4353_s1 + $0x178] sm:$0xff] }
   0xb   :  { %1926 = vmatpush.bf16.msra.mxu1 %v3308_v9  ;;  %v3312_v26 = vld [vmem:[%s4353_s1 + $0x88] sm:$0xff]  ;;  %v3311_v30 = vld [vmem:[%s4353_s1 + $0x80] sm:$0xff]  ;;  %v3282_v36 = vld [vmem:[%s4354_s0 + $0x70] sm:$0xf0] }
   0xc   :  { %1940 = vmatpush.bf16.msra.mxu2 %v3316_v10  ;;  %v3320_v27 = vld [vmem:[%s4353_s1 + $0xc8] sm:$0xff]  ;;  %v2298_v32 = vld [vmem:[%s4354_s0] sm:$0xf]  ;;  %v3350_v37 = vld [vmem:[%s4353_s1 + $0x1b8] sm:$0xff] }
   0xd   :  { %1954 = vmatpush.bf16.msra.mxu3 %v3324_v11  ;;  %v3281_v33 = vld [vmem:[%s4354_s0 + $0x68] sm:$0xf0]  ;;  %v2306_v35 = vld [vmem:[%s4354_s0 + $0x8] sm:$0xf]  ;;  %v3268_v38 = vld [vmem:[%s4354_s0 + $0x4] sm:$0xf] }
   0xe   :  { %1913 = vmatpush.bf16.msra.mxu0 %v3299_v12  ;;  %v2300_v39 = vld [vmem:[%s4354_s0 + $0x6c] sm:$0xf0]  ;;  %v3319_v40 = vld [vmem:[%s4353_s1 + $0xc0] sm:$0xff]  ;;  %v2299_v41 = vor.u32 %v3281_v33, %v2298_v32  ;;  %v3358_v42 = vld [vmem:[%s4353_s1 + $0x1f8] sm:$0xff]  ;;  %v2307_v43 = vor.u32 %v3282_v36, %v2306_v35 }
   0xf   :  { %1927 = vmatpush.bf16.msra.mxu1 %v3307_v13  ;;  %v3269_v44 = vld [vmem:[%s4354_s0 + $0xc] sm:$0xf]  ;;  %v2308_v45 = vld [vmem:[%s4354_s0 + $0x74] sm:$0xf0]  ;;  %v3333_v46 = vld [vmem:[%s4353_s1 + $0x130] sm:$0xff]  ;;  %v2303_v47 = vor.u32 %v3268_v38, %v2300_v39 }
  0x10   :  { %1941 = vmatpush.bf16.msra.mxu2 %v3315_v14  ;;  %v3341_v48 = vld [vmem:[%s4353_s1 + $0x170] sm:$0xff]  ;;  %v2311_v50 = vor.u32 %v3269_v44, %v2308_v45  ;;  %v3332_v52 = vld [vmem:[%s4353_s1 + $0x128] sm:$0xff]  ;;  %v3331_v56 = vld [vmem:[%s4353_s1 + $0x120] sm:$0xff] }
  0x11   :  { %1955 = vmatpush.bf16.msra.mxu3 %v3323_v15  ;;  %v3349_v49 = vld [vmem:[%s4353_s1 + $0x1b0] sm:$0xff]  ;;  %v3340_v53 = vld [vmem:[%s4353_s1 + $0x168] sm:$0xff]  ;;  %v3339_v57 = vld [vmem:[%s4353_s1 + $0x160] sm:$0xff] }
  0x12   :  { %1914 = vmatpush.bf16.msra.mxu0 %v3298_v16  ;;  %v3357_v51 = vld [vmem:[%s4353_s1 + $0x1f0] sm:$0xff]  ;;  %v3348_v54 = vld [vmem:[%s4353_s1 + $0x1a8] sm:$0xff]  ;;  %v3347_v58 = vld [vmem:[%s4353_s1 + $0x1a0] sm:$0xff] }
  0x13   :  { %1928 = vmatpush.bf16.msra.mxu1 %v3306_v17  ;;  %v3356_v55 = vld [vmem:[%s4353_s1 + $0x1e8] sm:$0xff]  ;;  %v3355_v59 = vld [vmem:[%s4353_s1 + $0x1e0] sm:$0xff]  ;;  %v3330_v60 = vld [vmem:[%s4353_s1 + $0x118] sm:$0xff] }
  0x14   :  { %1942 = vmatpush.bf16.msra.mxu2 %v3314_v18  ;;  %v3338_v61 = vld [vmem:[%s4353_s1 + $0x158] sm:$0xff]  ;;  %v3329_v0 = vld [vmem:[%s4353_s1 + $0x110] sm:$0xff]  ;;  %v3328_v4 = vld [vmem:[%s4353_s1 + $0x108] sm:$0xff] }
  0x15   :  { %1956 = vmatpush.bf16.msra.mxu3 %v3322_v19  ;;  %v3346_v62 = vld [vmem:[%s4353_s1 + $0x198] sm:$0xff]  ;;  %v3337_v1 = vld [vmem:[%s4353_s1 + $0x150] sm:$0xff]  ;;  %v3336_v5 = vld [vmem:[%s4353_s1 + $0x148] sm:$0xff] }
  0x16   :  { %1915 = vmatpush.bf16.msra.mxu0 %v3297_v20  ;;  %v3354_v63 = vld [vmem:[%s4353_s1 + $0x1d8] sm:$0xff]  ;;  %v3345_v2 = vld [vmem:[%s4353_s1 + $0x190] sm:$0xff]  ;;  %v3344_v6 = vld [vmem:[%s4353_s1 + $0x188] sm:$0xff] }
  0x17   :  { %1929 = vmatpush.bf16.msra.mxu1 %v3305_v21  ;;  %v3353_v3 = vld [vmem:[%s4353_s1 + $0x1d0] sm:$0xff]  ;;  %v3352_v7 = vld [vmem:[%s4353_s1 + $0x1c8] sm:$0xff]  ;;  %v3327_v8 = vld [vmem:[%s4353_s1 + $0x100] sm:$0xff] }
  0x18   :  { %1943 = vmatpush.bf16.msra.mxu2 %v3313_v22  ;;  %v3335_v9 = vld [vmem:[%s4353_s1 + $0x140] sm:$0xff]  ;;  %v3366_v11 = vld [vmem:[%s4353_s1 + $0x238] sm:$0xff]  ;;  %v2314_v13 = vld [vmem:[%s4354_s0 + $0x10] sm:$0xf] }
  0x19   :  { %1957 = vmatpush.bf16.msra.mxu3 %v3321_v23  ;;  %v3343_v10 = vld [vmem:[%s4353_s1 + $0x180] sm:$0xff]  ;;  %v3374_v12 = vld [vmem:[%s4353_s1 + $0x278] sm:$0xff]  ;;  %v3270_v18 = vld [vmem:[%s4354_s0 + $0x14] sm:$0xf] }
  0x1a   :  { %1916 = vmatpush.bf16.msra.mxu0 %v3296_v24  ;;  %v3283_v14 = vld [vmem:[%s4354_s0 + $0x78] sm:$0xf0]  ;;  %v2322_v15 = vld [vmem:[%s4354_s0 + $0x18] sm:$0xf]  ;;  %v3284_v16 = vld [vmem:[%s4354_s0 + $0x80] sm:$0xf0] }
  0x1b   :  { %1930 = vmatpush.bf16.msra.mxu1 %v3304_v25  ;;  %v3382_v17 = vld [vmem:[%s4353_s1 + $0x2b8] sm:$0xff]  ;;  %v2316_v19 = vld [vmem:[%s4354_s0 + $0x7c] sm:$0xf0]  ;;  %v2324_v22 = vld [vmem:[%s4354_s0 + $0x84] sm:$0xf0]  ;;  %v2315_v23 = vor.u32 %v3283_v14, %v2314_v13  ;;  %v2323_v24 = vor.u32 %v3284_v16, %v2322_v15 }
  0x1c   :  { %1944 = vmatpush.bf16.msra.mxu2 %v3312_v26  ;;  %v3351_v20 = vld [vmem:[%s4353_s1 + $0x1c0] sm:$0xff]  ;;  %v3271_v21 = vld [vmem:[%s4354_s0 + $0x1c] sm:$0xf]  ;;  %v2319_v26 = vor.u32 %v3270_v18, %v2316_v19  ;;  %v3364_v32 = vld [vmem:[%s4353_s1 + $0x228] sm:$0xff] }
  0x1d   :  { %1958 = vmatpush.bf16.msra.mxu3 %v3320_v27  ;;  %v3390_v25 = vld [vmem:[%s4353_s1 + $0x2f8] sm:$0xff]  ;;  %v2327_v27 = vor.u32 %v3271_v21, %v2324_v22  ;;  %v3372_v33 = vld [vmem:[%s4353_s1 + $0x268] sm:$0xff]  ;;  %v3363_v36 = vld [vmem:[%s4353_s1 + $0x220] sm:$0xff] }
  0x1e   :  { %1917 = vmatpush.bf16.msra.mxu0 %v3295_v28  ;;  %v3365_v28 = vld [vmem:[%s4353_s1 + $0x230] sm:$0xff]  ;;  %v3388_v35 = vld [vmem:[%s4353_s1 + $0x2e8] sm:$0xff]  ;;  %v3379_v38 = vld [vmem:[%s4353_s1 + $0x2a0] sm:$0xff] }
  0x1f   :  { %1931 = vmatpush.bf16.msra.mxu1 %v3303_v29  ;;  %v3373_v29 = vld [vmem:[%s4353_s1 + $0x270] sm:$0xff]  ;;  %v3387_v39 = vld [vmem:[%s4353_s1 + $0x2e0] sm:$0xff]  ;;  %v3404_v13 = vld [vmem:[%s4353_s1 + $0x368] sm:$0xff] }
  0x20   :  { %1945 = vmatpush.bf16.msra.mxu2 %v3311_v30  ;;  %v3381_v30 = vld [vmem:[%s4353_s1 + $0x2b0] sm:$0xff]  ;;  %v3412_v14 = vld [vmem:[%s4353_s1 + $0x3a8] sm:$0xff]  ;;  %v3395_v16 = vld [vmem:[%s4353_s1 + $0x320] sm:$0xff] }
  0x21   :  { %1959 = vmatpush.bf16.msra.mxu3 %v3319_v40  ;;  %1918 = vmatmul.bf16.vlgmr.msra.gmra.mxu0 %v2299_v41  ;;  %v3362_v40 = vld [vmem:[%s4353_s1 + $0x218] sm:$0xff]  ;;  %v3361_v44 = vld [vmem:[%s4353_s1 + $0x210] sm:$0xff]  ;;  %v3420_v15 = vld [vmem:[%s4353_s1 + $0x3e8] sm:$0xff] }
  0x22   :  { %1966 = vmatpush.bf16.msrb.mxu0 %v3334_v31  ;;  %1932 = vmatmul.bf16.vlgmr.msra.gmra.mxu1 %v2303_v47  ;;  %v3389_v31 = vld [vmem:[%s4353_s1 + $0x2f0] sm:$0xff]  ;;  %v3370_v41 = vld [vmem:[%s4353_s1 + $0x258] sm:$0xff]  ;;  %v3411_v18 = vld [vmem:[%s4353_s1 + $0x3a0] sm:$0xff] }
  0x23   :  { %1980 = vmatpush.bf16.msrb.mxu1 %v3342_v34  ;;  %1946 = vmatmul.bf16.vlgmr.msra.gmra.mxu2 %v2307_v43  ;;  %v3380_v34 = vld [vmem:[%s4353_s1 + $0x2a8] sm:$0xff]  ;;  %v3386_v43 = vld [vmem:[%s4353_s1 + $0x2d8] sm:$0xff]  ;;  %v3369_v45 = vld [vmem:[%s4353_s1 + $0x250] sm:$0xff] }
  0x24   :  { %1994 = vmatpush.bf16.msrb.mxu2 %v3350_v37  ;;  %1960 = vmatmul.bf16.vlgmr.msra.gmra.mxu3 %v2311_v50  ;;  %v3371_v37 = vld [vmem:[%s4353_s1 + $0x260] sm:$0xff]  ;;  %v3385_v47 = vld [vmem:[%s4353_s1 + $0x2d0] sm:$0xff]  ;;  %v3376_v50 = vld [vmem:[%s4353_s1 + $0x288] sm:$0xff] }
  0x25   :  { %2008 = vmatpush.bf16.msrb.mxu3 %v3358_v42  ;;  %v3378_v42 = vld [vmem:[%s4353_s1 + $0x298] sm:$0xff]  ;;  %v3419_v19 = vld [vmem:[%s4353_s1 + $0x3e0] sm:$0xff] }
  0x26   :  { %1967 = vmatpush.bf16.msrb.mxu0 %v3333_v46  ;;  %v3377_v46 = vld [vmem:[%s4353_s1 + $0x290] sm:$0xff]  ;;  %v3402_v21 = vld [vmem:[%s4353_s1 + $0x358] sm:$0xff] }
  0x27   :  { %1981 = vmatpush.bf16.msrb.mxu1 %v3341_v48  ;;  %v3360_v48 = vld [vmem:[%s4353_s1 + $0x208] sm:$0xff]  ;;  %v3410_v22 = vld [vmem:[%s4353_s1 + $0x398] sm:$0xff] }
  0x28   :  { %1995 = vmatpush.bf16.msrb.mxu2 %v3349_v49  ;;  %v3368_v49 = vld [vmem:[%s4353_s1 + $0x248] sm:$0xff] }
  0x29   :  { %2009 = vmatpush.bf16.msrb.mxu3 %v3357_v51  ;;  %v3384_v51 = vld [vmem:[%s4353_s1 + $0x2c8] sm:$0xff] }
  0x2a   :  { %1968 = vmatpush.bf16.msrb.mxu0 %v3332_v52  ;;  %v3359_v52 = vld [vmem:[%s4353_s1 + $0x200] sm:$0xff] }
  0x2b   :  { %1982 = vmatpush.bf16.msrb.mxu1 %v3340_v53  ;;  %v3367_v53 = vld [vmem:[%s4353_s1 + $0x240] sm:$0xff] }
  0x2c   :  { %1996 = vmatpush.bf16.msrb.mxu2 %v3348_v54  ;;  %v3375_v54 = vld [vmem:[%s4353_s1 + $0x280] sm:$0xff] }
  0x2d   :  { %2010 = vmatpush.bf16.msrb.mxu3 %v3356_v55  ;;  %v3398_v55 = vld [vmem:[%s4353_s1 + $0x338] sm:$0xff] }
  0x2e   :  { %1969 = vmatpush.bf16.msrb.mxu0 %v3331_v56  ;;  %v3406_v56 = vld [vmem:[%s4353_s1 + $0x378] sm:$0xff] }
  0x2f   :  { %1983 = vmatpush.bf16.msrb.mxu1 %v3339_v57  ;;  %v2330_v57 = vld [vmem:[%s4354_s0 + $0x20] sm:$0xf] }
  0x30   :  { %1997 = vmatpush.bf16.msrb.mxu2 %v3347_v58  ;;  %v3285_v58 = vld [vmem:[%s4354_s0 + $0x88] sm:$0xf0] }
  0x31   :  { %2011 = vmatpush.bf16.msrb.mxu3 %v3355_v59  ;;  %v2338_v59 = vld [vmem:[%s4354_s0 + $0x28] sm:$0xf] }
  0x32   :  { %1970 = vmatpush.bf16.msrb.mxu0 %v3330_v60  ;;  %v3286_v60 = vld [vmem:[%s4354_s0 + $0x90] sm:$0xf0] }
  0x33   :  { %1984 = vmatpush.bf16.msrb.mxu1 %v3338_v61  ;;  %v3414_v61 = vld [vmem:[%s4353_s1 + $0x3b8] sm:$0xff] }
  0x34   :  { %1998 = vmatpush.bf16.msrb.mxu2 %v3346_v62  ;;  %v3272_v62 = vld [vmem:[%s4354_s0 + $0x24] sm:$0xf] }
  0x35   :  { %2012 = vmatpush.bf16.msrb.mxu3 %v3354_v63  ;;  %v2332_v63 = vld [vmem:[%s4354_s0 + $0x8c] sm:$0xf0] }
  0x36   :  { %1971 = vmatpush.bf16.msrb.mxu0 %v3329_v0  ;;  %v3383_v0 = vld [vmem:[%s4353_s1 + $0x2c0] sm:$0xff] }
  0x37   :  { %1985 = vmatpush.bf16.msrb.mxu1 %v3337_v1  ;;  %v3273_v1 = vld [vmem:[%s4354_s0 + $0x2c] sm:$0xf] }
  0x38   :  { %1999 = vmatpush.bf16.msrb.mxu2 %v3345_v2  ;;  %v2340_v2 = vld [vmem:[%s4354_s0 + $0x94] sm:$0xf0] }
  0x39   :  { %2013 = vmatpush.bf16.msrb.mxu3 %v3353_v3  ;;  %v2331_v3 = vor.u32 %v3285_v58, %v2330_v57  ;;  %v3436_v57 = vld [vmem:[%s4353_s1 + $0x468] sm:$0xff] }
  0x3a   :  { %1972 = vmatpush.bf16.msrb.mxu0 %v3328_v4  ;;  %v2339_v4 = vor.u32 %v3286_v60, %v2338_v59  ;;  %v3444_v58 = vld [vmem:[%s4353_s1 + $0x4a8] sm:$0xff]  ;;  %v3427_v60 = vld [vmem:[%s4353_s1 + $0x420] sm:$0xff] }
  0x3b   :  { %1986 = vmatpush.bf16.msrb.mxu1 %v3336_v5  ;;  %v3422_v5 = vld [vmem:[%s4353_s1 + $0x3f8] sm:$0xff]  ;;  %v3452_v59 = vld [vmem:[%s4353_s1 + $0x4e8] sm:$0xff] }
  0x3c   :  { %2000 = vmatpush.bf16.msrb.mxu2 %v3344_v6  ;;  %v2335_v6 = vor.u32 %v3272_v62, %v2332_v63  ;;  %v3443_v62 = vld [vmem:[%s4353_s1 + $0x4a0] sm:$0xff] }
  0x3d   :  { %2014 = vmatpush.bf16.msrb.mxu3 %v3352_v7  ;;  %v2343_v7 = vor.u32 %v3273_v1, %v2340_v2  ;;  %v3451_v63 = vld [vmem:[%s4353_s1 + $0x4e0] sm:$0xff]  ;;  %v3434_v1 = vld [vmem:[%s4353_s1 + $0x458] sm:$0xff] }
  0x3e   :  { %1973 = vmatpush.bf16.msrb.mxu0 %v3327_v8  ;;  %v3397_v8 = vld [vmem:[%s4353_s1 + $0x330] sm:$0xff]  ;;  %v3442_v2 = vld [vmem:[%s4353_s1 + $0x498] sm:$0xff] }
  0x3f   :  { %1987 = vmatpush.bf16.msrb.mxu1 %v3335_v9  ;;  %v3405_v9 = vld [vmem:[%s4353_s1 + $0x370] sm:$0xff] }
  0x40   :  { %2001 = vmatpush.bf16.msrb.mxu2 %v3343_v10  ;;  %v3413_v10 = vld [vmem:[%s4353_s1 + $0x3b0] sm:$0xff] }
  0x41   :  { %2015 = vmatpush.bf16.msrb.mxu3 %v3351_v20  ;;  %1974 = vmatmul.bf16.vlgmr.msrb.gmra.mxu0 %v2315_v23  ;;  %v3394_v20 = vld [vmem:[%s4353_s1 + $0x318] sm:$0xff] }
  0x42   :  { %2022 = vmatpush.bf16.msra.mxu0 %v3366_v11  ;;  %1988 = vmatmul.bf16.vlgmr.msrb.gmra.mxu1 %v2319_v26  ;;  %v3421_v11 = vld [vmem:[%s4353_s1 + $0x3f0] sm:$0xff]  ;;  %v3418_v23 = vld [vmem:[%s4353_s1 + $0x3d8] sm:$0xff] }
  0x43   :  { %2036 = vmatpush.bf16.msra.mxu1 %v3374_v12  ;;  %2002 = vmatmul.bf16.vlgmr.msrb.gmra.mxu2 %v2323_v24  ;;  %v3396_v12 = vld [vmem:[%s4353_s1 + $0x328] sm:$0xff]  ;;  %v3393_v24 = vld [vmem:[%s4353_s1 + $0x310] sm:$0xff] }
  0x44   :  { %2050 = vmatpush.bf16.msra.mxu2 %v3382_v17  ;;  %2016 = vmatmul.bf16.vlgmr.msrb.gmra.mxu3 %v2327_v27  ;;  %v3403_v17 = vld [vmem:[%s4353_s1 + $0x360] sm:$0xff]  ;;  %v3409_v26 = vld [vmem:[%s4353_s1 + $0x390] sm:$0xff] }
  0x45   :  { %2064 = vmatpush.bf16.msra.mxu3 %v3390_v25  ;;  %v3401_v25 = vld [vmem:[%s4353_s1 + $0x350] sm:$0xff] }
  0x46   :  { %2023 = vmatpush.bf16.msra.mxu0 %v3365_v28  ;;  %v3417_v27 = vld [vmem:[%s4353_s1 + $0x3d0] sm:$0xff]  ;;  %v3392_v28 = vld [vmem:[%s4353_s1 + $0x308] sm:$0xff] }
  0x47   :  { %2037 = vmatpush.bf16.msra.mxu1 %v3373_v29  ;;  %v3400_v29 = vld [vmem:[%s4353_s1 + $0x348] sm:$0xff] }
  0x48   :  { %2051 = vmatpush.bf16.msra.mxu2 %v3381_v30  ;;  %v3408_v30 = vld [vmem:[%s4353_s1 + $0x388] sm:$0xff] }
  0x49   :  { %2065 = vmatpush.bf16.msra.mxu3 %v3389_v31  ;;  %v3416_v31 = vld [vmem:[%s4353_s1 + $0x3c8] sm:$0xff] }
  0x4a   :  { %2024 = vmatpush.bf16.msra.mxu0 %v3364_v32  ;;  %v3391_v32 = vld [vmem:[%s4353_s1 + $0x300] sm:$0xff] }
  0x4b   :  { %2038 = vmatpush.bf16.msra.mxu1 %v3372_v33  ;;  %v3399_v33 = vld [vmem:[%s4353_s1 + $0x340] sm:$0xff] }
  0x4c   :  { %2052 = vmatpush.bf16.msra.mxu2 %v3380_v34  ;;  %v3407_v34 = vld [vmem:[%s4353_s1 + $0x380] sm:$0xff] }
  0x4d   :  { %2066 = vmatpush.bf16.msra.mxu3 %v3388_v35  ;;  %v3430_v35 = vld [vmem:[%s4353_s1 + $0x438] sm:$0xff] }
  0x4e   :  { %2025 = vmatpush.bf16.msra.mxu0 %v3363_v36  ;;  %v3438_v36 = vld [vmem:[%s4353_s1 + $0x478] sm:$0xff] }
  0x4f   :  { %2039 = vmatpush.bf16.msra.mxu1 %v3371_v37  ;;  %v2346_v37 = vld [vmem:[%s4354_s0 + $0x30] sm:$0xf] }
  0x50   :  { %2053 = vmatpush.bf16.msra.mxu2 %v3379_v38  ;;  %v3287_v38 = vld [vmem:[%s4354_s0 + $0x98] sm:$0xf0] }
  0x51   :  { %2067 = vmatpush.bf16.msra.mxu3 %v3387_v39  ;;  %v2354_v39 = vld [vmem:[%s4354_s0 + $0x38] sm:$0xf] }
  0x52   :  { %2026 = vmatpush.bf16.msra.mxu0 %v3362_v40  ;;  %v3288_v40 = vld [vmem:[%s4354_s0 + $0xa0] sm:$0xf0] }
  0x53   :  { %2040 = vmatpush.bf16.msra.mxu1 %v3370_v41  ;;  %v3446_v41 = vld [vmem:[%s4353_s1 + $0x4b8] sm:$0xff] }
  0x54   :  { %2054 = vmatpush.bf16.msra.mxu2 %v3378_v42  ;;  %v3274_v42 = vld [vmem:[%s4354_s0 + $0x34] sm:$0xf] }
  0x55   :  { %2068 = vmatpush.bf16.msra.mxu3 %v3386_v43  ;;  %v2348_v43 = vld [vmem:[%s4354_s0 + $0x9c] sm:$0xf0] }
  0x56   :  { %2027 = vmatpush.bf16.msra.mxu0 %v3361_v44  ;;  %v3415_v44 = vld [vmem:[%s4353_s1 + $0x3c0] sm:$0xff] }
  0x57   :  { %2041 = vmatpush.bf16.msra.mxu1 %v3369_v45  ;;  %v3275_v45 = vld [vmem:[%s4354_s0 + $0x3c] sm:$0xf] }
  0x58   :  { %2055 = vmatpush.bf16.msra.mxu2 %v3377_v46  ;;  %v2356_v46 = vld [vmem:[%s4354_s0 + $0xa4] sm:$0xf0] }
  0x59   :  { %2069 = vmatpush.bf16.msra.mxu3 %v3385_v47  ;;  %v2347_v47 = vor.u32 %v3287_v38, %v2346_v37  ;;  %v3468_v37 = vld [vmem:[%s4353_s1 + $0x568] sm:$0xff] }
  0x5a   :  { %2028 = vmatpush.bf16.msra.mxu0 %v3360_v48  ;;  %v2355_v48 = vor.u32 %v3288_v40, %v2354_v39  ;;  %v3476_v38 = vld [vmem:[%s4353_s1 + $0x5a8] sm:$0xff]  ;;  %v3459_v40 = vld [vmem:[%s4353_s1 + $0x520] sm:$0xff] }
  0x5b   :  { %2042 = vmatpush.bf16.msra.mxu1 %v3368_v49  ;;  %v3454_v49 = vld [vmem:[%s4353_s1 + $0x4f8] sm:$0xff]  ;;  %v3484_v39 = vld [vmem:[%s4353_s1 + $0x5e8] sm:$0xff] }
  0x5c   :  { %2056 = vmatpush.bf16.msra.mxu2 %v3376_v50  ;;  %v2351_v50 = vor.u32 %v3274_v42, %v2348_v43  ;;  %v3475_v42 = vld [vmem:[%s4353_s1 + $0x5a0] sm:$0xff] }
  0x5d   :  { %2070 = vmatpush.bf16.msra.mxu3 %v3384_v51  ;;  %v2359_v51 = vor.u32 %v3275_v45, %v2356_v46  ;;  %v3483_v43 = vld [vmem:[%s4353_s1 + $0x5e0] sm:$0xff]  ;;  %v3466_v45 = vld [vmem:[%s4353_s1 + $0x558] sm:$0xff] }
  0x5e   :  { %2029 = vmatpush.bf16.msra.mxu0 %v3359_v52  ;;  %v3429_v52 = vld [vmem:[%s4353_s1 + $0x430] sm:$0xff]  ;;  %v3474_v46 = vld [vmem:[%s4353_s1 + $0x598] sm:$0xff] }
  0x5f   :  { %2043 = vmatpush.bf16.msra.mxu1 %v3367_v53  ;;  %v3437_v53 = vld [vmem:[%s4353_s1 + $0x470] sm:$0xff] }
  0x60   :  { %2057 = vmatpush.bf16.msra.mxu2 %v3375_v54  ;;  %v3445_v54 = vld [vmem:[%s4353_s1 + $0x4b0] sm:$0xff] }
  0x61   :  { %2071 = vmatpush.bf16.msra.mxu3 %v3383_v0  ;;  %2030 = vmatmul.bf16.vlgmr.msra.gmra.mxu0 %v2331_v3  ;;  %v3426_v0 = vld [vmem:[%s4353_s1 + $0x418] sm:$0xff] }
  0x62   :  { %2078 = vmatpush.bf16.msrb.mxu0 %v3398_v55  ;;  %2044 = vmatmul.bf16.vlgmr.msra.gmra.mxu1 %v2335_v6  ;;  %v3453_v55 = vld [vmem:[%s4353_s1 + $0x4f0] sm:$0xff]  ;;  %v3450_v3 = vld [vmem:[%s4353_s1 + $0x4d8] sm:$0xff] }
  0x63   :  { %2092 = vmatpush.bf16.msrb.mxu1 %v3406_v56  ;;  %2058 = vmatmul.bf16.vlgmr.msra.gmra.mxu2 %v2339_v4  ;;  %v3428_v56 = vld [vmem:[%s4353_s1 + $0x428] sm:$0xff]  ;;  %v3425_v4 = vld [vmem:[%s4353_s1 + $0x410] sm:$0xff] }
  0x64   :  { %2106 = vmatpush.bf16.msrb.mxu2 %v3414_v61  ;;  %2072 = vmatmul.bf16.vlgmr.msra.gmra.mxu3 %v2343_v7  ;;  %v3435_v61 = vld [vmem:[%s4353_s1 + $0x460] sm:$0xff]  ;;  %v3441_v6 = vld [vmem:[%s4353_s1 + $0x490] sm:$0xff] }
  0x65   :  { %2120 = vmatpush.bf16.msrb.mxu3 %v3422_v5  ;;  %v3433_v5 = vld [vmem:[%s4353_s1 + $0x450] sm:$0xff] }
  0x66   :  { %2079 = vmatpush.bf16.msrb.mxu0 %v3397_v8  ;;  %v3449_v7 = vld [vmem:[%s4353_s1 + $0x4d0] sm:$0xff]  ;;  %v3424_v8 = vld [vmem:[%s4353_s1 + $0x408] sm:$0xff] }
  0x67   :  { %2093 = vmatpush.bf16.msrb.mxu1 %v3405_v9  ;;  %v3432_v9 = vld [vmem:[%s4353_s1 + $0x448] sm:$0xff] }
  0x68   :  { %2107 = vmatpush.bf16.msrb.mxu2 %v3413_v10  ;;  %v3440_v10 = vld [vmem:[%s4353_s1 + $0x488] sm:$0xff] }
  0x69   :  { %2121 = vmatpush.bf16.msrb.mxu3 %v3421_v11  ;;  %v3448_v11 = vld [vmem:[%s4353_s1 + $0x4c8] sm:$0xff] }
  0x6a   :  { %2080 = vmatpush.bf16.msrb.mxu0 %v3396_v12  ;;  %v3423_v12 = vld [vmem:[%s4353_s1 + $0x400] sm:$0xff] }
  0x6b   :  { %2094 = vmatpush.bf16.msrb.mxu1 %v3404_v13  ;;  %v3431_v13 = vld [vmem:[%s4353_s1 + $0x440] sm:$0xff] }
  0x6c   :  { %2108 = vmatpush.bf16.msrb.mxu2 %v3412_v14  ;;  %v3439_v14 = vld [vmem:[%s4353_s1 + $0x480] sm:$0xff] }
  0x6d   :  { %2122 = vmatpush.bf16.msrb.mxu3 %v3420_v15  ;;  %v3462_v15 = vld [vmem:[%s4353_s1 + $0x538] sm:$0xff] }
  0x6e   :  { %2081 = vmatpush.bf16.msrb.mxu0 %v3395_v16  ;;  %v3470_v16 = vld [vmem:[%s4353_s1 + $0x578] sm:$0xff] }
  0x6f   :  { %2095 = vmatpush.bf16.msrb.mxu1 %v3403_v17  ;;  %v2362_v17 = vld [vmem:[%s4354_s0 + $0x40] sm:$0xf] }
  0x70   :  { %2109 = vmatpush.bf16.msrb.mxu2 %v3411_v18  ;;  %v3289_v18 = vld [vmem:[%s4354_s0 + $0xa8] sm:$0xf0] }
  0x71   :  { %2123 = vmatpush.bf16.msrb.mxu3 %v3419_v19  ;;  %v2370_v19 = vld [vmem:[%s4354_s0 + $0x48] sm:$0xf] }
  0x72   :  { %2082 = vmatpush.bf16.msrb.mxu0 %v3394_v20  ;;  %v3290_v20 = vld [vmem:[%s4354_s0 + $0xb0] sm:$0xf0] }
  0x73   :  { %2096 = vmatpush.bf16.msrb.mxu1 %v3402_v21  ;;  %v3478_v21 = vld [vmem:[%s4353_s1 + $0x5b8] sm:$0xff] }
  0x74   :  { %2110 = vmatpush.bf16.msrb.mxu2 %v3410_v22  ;;  %v3276_v22 = vld [vmem:[%s4354_s0 + $0x44] sm:$0xf] }
  0x75   :  { %2124 = vmatpush.bf16.msrb.mxu3 %v3418_v23  ;;  %v2364_v23 = vld [vmem:[%s4354_s0 + $0xac] sm:$0xf0] }
  0x76   :  { %2083 = vmatpush.bf16.msrb.mxu0 %v3393_v24  ;;  %v3447_v24 = vld [vmem:[%s4353_s1 + $0x4c0] sm:$0xff] }
  0x77   :  { %2097 = vmatpush.bf16.msrb.mxu1 %v3401_v25  ;;  %v3277_v25 = vld [vmem:[%s4354_s0 + $0x4c] sm:$0xf] }
  0x78   :  { %2111 = vmatpush.bf16.msrb.mxu2 %v3409_v26  ;;  %v2372_v26 = vld [vmem:[%s4354_s0 + $0xb4] sm:$0xf0] }
  0x79   :  { %2125 = vmatpush.bf16.msrb.mxu3 %v3417_v27  ;;  %v2363_v27 = vor.u32 %v3289_v18, %v2362_v17  ;;  %v3491_v17 = vld [vmem:[%s4353_s1 + $0x620] sm:$0xff] }
  0x7a   :  { %2084 = vmatpush.bf16.msrb.mxu0 %v3392_v28  ;;  %v2371_v28 = vor.u32 %v3290_v20, %v2370_v19  ;;  %v3499_v18 = vld [vmem:[%s4353_s1 + $0x660] sm:$0xff]  ;;  %v3490_v20 = vld [vmem:[%s4353_s1 + $0x618] sm:$0xff] }
  0x7b   :  { %2098 = vmatpush.bf16.msrb.mxu1 %v3400_v29  ;;  %v3486_v29 = vld [vmem:[%s4353_s1 + $0x5f8] sm:$0xff]  ;;  %v3507_v19 = vld [vmem:[%s4353_s1 + $0x6a0] sm:$0xff] }
  0x7c   :  { %2112 = vmatpush.bf16.msrb.mxu2 %v3408_v30  ;;  %v2367_v30 = vor.u32 %v3276_v22, %v2364_v23  ;;  %v3506_v22 = vld [vmem:[%s4353_s1 + $0x698] sm:$0xff]  ;;  %v3489_v23 = vld [vmem:[%s4353_s1 + $0x610] sm:$0xff] }
  0x7d   :  { %2126 = vmatpush.bf16.msrb.mxu3 %v3416_v31  ;;  %v2375_v31 = vor.u32 %v3277_v25, %v2372_v26  ;;  %v3505_v25 = vld [vmem:[%s4353_s1 + $0x690] sm:$0xff]  ;;  %v3488_v26 = vld [vmem:[%s4353_s1 + $0x608] sm:$0xff] }
  0x7e   :  { %2085 = vmatpush.bf16.msrb.mxu0 %v3391_v32  ;;  %v3461_v32 = vld [vmem:[%s4353_s1 + $0x530] sm:$0xff] }
  0x7f   :  { %2099 = vmatpush.bf16.msrb.mxu1 %v3399_v33  ;;  %v3469_v33 = vld [vmem:[%s4353_s1 + $0x570] sm:$0xff] }
  0x80   :  { %2113 = vmatpush.bf16.msrb.mxu2 %v3407_v34  ;;  %v3477_v34 = vld [vmem:[%s4353_s1 + $0x5b0] sm:$0xff] }
  0x81   :  { %2127 = vmatpush.bf16.msrb.mxu3 %v3415_v44  ;;  %2086 = vmatmul.bf16.vlgmr.msrb.gmra.mxu0 %v2347_v47  ;;  %v3458_v44 = vld [vmem:[%s4353_s1 + $0x518] sm:$0xff] }
  0x82   :  { %2134 = vmatpush.bf16.msra.mxu0 %v3430_v35  ;;  %2100 = vmatmul.bf16.vlgmr.msrb.gmra.mxu1 %v2351_v50  ;;  %v3485_v35 = vld [vmem:[%s4353_s1 + $0x5f0] sm:$0xff]  ;;  %v3482_v47 = vld [vmem:[%s4353_s1 + $0x5d8] sm:$0xff] }
  0x83   :  { %2148 = vmatpush.bf16.msra.mxu1 %v3438_v36  ;;  %2114 = vmatmul.bf16.vlgmr.msrb.gmra.mxu2 %v2355_v48  ;;  %v3460_v36 = vld [vmem:[%s4353_s1 + $0x528] sm:$0xff]  ;;  %v3457_v48 = vld [vmem:[%s4353_s1 + $0x510] sm:$0xff] }
  0x84   :  { %2162 = vmatpush.bf16.msra.mxu2 %v3446_v41  ;;  %2128 = vmatmul.bf16.vlgmr.msrb.gmra.mxu3 %v2359_v51  ;;  %v3467_v41 = vld [vmem:[%s4353_s1 + $0x560] sm:$0xff]  ;;  %v3473_v50 = vld [vmem:[%s4353_s1 + $0x590] sm:$0xff] }
  0x85   :  { %2176 = vmatpush.bf16.msra.mxu3 %v3454_v49  ;;  %v3465_v49 = vld [vmem:[%s4353_s1 + $0x550] sm:$0xff] }
  0x86   :  { %2135 = vmatpush.bf16.msra.mxu0 %v3429_v52  ;;  %v3481_v51 = vld [vmem:[%s4353_s1 + $0x5d0] sm:$0xff]  ;;  %v3456_v52 = vld [vmem:[%s4353_s1 + $0x508] sm:$0xff] }
  0x87   :  { %2149 = vmatpush.bf16.msra.mxu1 %v3437_v53  ;;  %v3464_v53 = vld [vmem:[%s4353_s1 + $0x548] sm:$0xff] }
  0x88   :  { %2163 = vmatpush.bf16.msra.mxu2 %v3445_v54  ;;  %v3472_v54 = vld [vmem:[%s4353_s1 + $0x588] sm:$0xff] }
  0x89   :  { %2177 = vmatpush.bf16.msra.mxu3 %v3453_v55  ;;  %v3480_v55 = vld [vmem:[%s4353_s1 + $0x5c8] sm:$0xff] }
  0x8a   :  { %2136 = vmatpush.bf16.msra.mxu0 %v3428_v56  ;;  %v3455_v56 = vld [vmem:[%s4353_s1 + $0x500] sm:$0xff] }
  0x8b   :  { %2150 = vmatpush.bf16.msra.mxu1 %v3436_v57  ;;  %v3463_v57 = vld [vmem:[%s4353_s1 + $0x540] sm:$0xff] }
  0x8c   :  { %2164 = vmatpush.bf16.msra.mxu2 %v3444_v58  ;;  %v3471_v58 = vld [vmem:[%s4353_s1 + $0x580] sm:$0xff] }
  0x8d   :  { %2178 = vmatpush.bf16.msra.mxu3 %v3452_v59  ;;  %v3494_v59 = vld [vmem:[%s4353_s1 + $0x638] sm:$0xff] }
  0x8e   :  { %2137 = vmatpush.bf16.msra.mxu0 %v3427_v60  ;;  %v3502_v60 = vld [vmem:[%s4353_s1 + $0x678] sm:$0xff] }
  0x8f   :  { %2151 = vmatpush.bf16.msra.mxu1 %v3435_v61  ;;  %v2378_v61 = vld [vmem:[%s4354_s0 + $0x50] sm:$0xf] }
  0x90   :  { %2165 = vmatpush.bf16.msra.mxu2 %v3443_v62  ;;  %v3291_v62 = vld [vmem:[%s4354_s0 + $0xb8] sm:$0xf0] }
  0x91   :  { %2179 = vmatpush.bf16.msra.mxu3 %v3451_v63  ;;  %v2386_v63 = vld [vmem:[%s4354_s0 + $0x58] sm:$0xf] }
  0x92   :  { %2138 = vmatpush.bf16.msra.mxu0 %v3426_v0  ;;  %v3292_v0 = vld [vmem:[%s4354_s0 + $0xc0] sm:$0xf0] }
  0x93   :  { %2152 = vmatpush.bf16.msra.mxu1 %v3434_v1  ;;  %v3510_v1 = vld [vmem:[%s4353_s1 + $0x6b8] sm:$0xff] }
  0x94   :  { %2166 = vmatpush.bf16.msra.mxu2 %v3442_v2  ;;  %v3278_v2 = vld [vmem:[%s4354_s0 + $0x54] sm:$0xf] }
  0x95   :  { %2180 = vmatpush.bf16.msra.mxu3 %v3450_v3  ;;  %v2380_v3 = vld [vmem:[%s4354_s0 + $0xbc] sm:$0xf0] }
  0x96   :  { %2139 = vmatpush.bf16.msra.mxu0 %v3425_v4  ;;  %v3479_v4 = vld [vmem:[%s4353_s1 + $0x5c0] sm:$0xff] }
  0x97   :  { %2153 = vmatpush.bf16.msra.mxu1 %v3433_v5  ;;  %v3279_v5 = vld [vmem:[%s4354_s0 + $0x5c] sm:$0xf] }
  0x98   :  { %2167 = vmatpush.bf16.msra.mxu2 %v3441_v6  ;;  %v2388_v6 = vld [vmem:[%s4354_s0 + $0xc4] sm:$0xf0] }
  0x99   :  { %2181 = vmatpush.bf16.msra.mxu3 %v3449_v7  ;;  %v2379_v7 = vor.u32 %v3291_v62, %v2378_v61 }
  0x9a   :  { %2140 = vmatpush.bf16.msra.mxu0 %v3424_v8  ;;  %v2387_v8 = vor.u32 %v3292_v0, %v2386_v63 }
  0x9b   :  { %2154 = vmatpush.bf16.msra.mxu1 %v3432_v9  ;;  %v2383_v9 = vor.u32 %v3278_v2, %v2380_v3 }
  0x9c   :  { %2168 = vmatpush.bf16.msra.mxu2 %v3440_v10  ;;  %v2391_v10 = vor.u32 %v3279_v5, %v2388_v6 }
  0x9d   :  { %2182 = vmatpush.bf16.msra.mxu3 %v3448_v11  ;;  %v3493_v11 = vld [vmem:[%s4353_s1 + $0x630] sm:$0xff] }
  0x9e   :  { %2141 = vmatpush.bf16.msra.mxu0 %v3423_v12  ;;  %v3501_v12 = vld [vmem:[%s4353_s1 + $0x670] sm:$0xff] }
  0x9f   :  { %2155 = vmatpush.bf16.msra.mxu1 %v3431_v13  ;;  %v3509_v13 = vld [vmem:[%s4353_s1 + $0x6b0] sm:$0xff] }
  0xa0   :  { %2169 = vmatpush.bf16.msra.mxu2 %v3439_v14  ;;  %v3492_v14 = vld [vmem:[%s4353_s1 + $0x628] sm:$0xff] }
  0xa1   :  { %2183 = vmatpush.bf16.msra.mxu3 %v3447_v24  ;;  %2142 = vmatmul.bf16.vlgmr.msra.gmra.mxu0 %v2363_v27  ;;  %v3497_v24 = vld [vmem:[%s4353_s1 + $0x650] sm:$0xff]  ;;  %v3496_v27 = vld [vmem:[%s4353_s1 + $0x648] sm:$0xff] }
  0xa2   :  { %2190 = vmatpush.bf16.msrb.mxu0 %v3462_v15  ;;  %2156 = vmatmul.bf16.vlgmr.msra.gmra.mxu1 %v2367_v30  ;;  %v3500_v15 = vld [vmem:[%s4353_s1 + $0x668] sm:$0xff]  ;;  %v3495_v30 = vld [vmem:[%s4353_s1 + $0x640] sm:$0xff] }
  0xa3   :  { %2204 = vmatpush.bf16.msrb.mxu1 %v3470_v16  ;;  %2170 = vmatmul.bf16.vlgmr.msra.gmra.mxu2 %v2371_v28  ;;  %v3508_v16 = vld [vmem:[%s4353_s1 + $0x6a8] sm:$0xff] }
  0xa4   :  { %2218 = vmatpush.bf16.msrb.mxu2 %v3478_v21  ;;  %2184 = vmatmul.bf16.vlgmr.msra.gmra.mxu3 %v2375_v31  ;;  %v3498_v21 = vld [vmem:[%s4353_s1 + $0x658] sm:$0xff]  ;;  %v3504_v28 = vld [vmem:[%s4353_s1 + $0x688] sm:$0xff]  ;;  %v3503_v31 = vld [vmem:[%s4353_s1 + $0x680] sm:$0xff] }
  0xa5   :  { %2232 = vmatpush.bf16.msrb.mxu3 %v3486_v29  ;;  %v3487_v29 = vld [vmem:[%s4353_s1 + $0x600] sm:$0xff] }
  0xa6   :  { %2191 = vmatpush.bf16.msrb.mxu0 %v3461_v32  ;;  %v2394_v32 = vld [vmem:[%s4354_s0 + $0x60] sm:$0xf] }
  0xa7   :  { %2205 = vmatpush.bf16.msrb.mxu1 %v3469_v33  ;;  %v3293_v33 = vld [vmem:[%s4354_s0 + $0xc8] sm:$0xf0] }
  0xa8   :  { %2219 = vmatpush.bf16.msrb.mxu2 %v3477_v34  ;;  %v3280_v34 = vld [vmem:[%s4354_s0 + $0x64] sm:$0xf] }
  0xa9   :  { %2233 = vmatpush.bf16.msrb.mxu3 %v3485_v35  ;;  %v2396_v35 = vld [vmem:[%s4354_s0 + $0xcc] sm:$0xf0] }
  0xaa   :  { %2192 = vmatpush.bf16.msrb.mxu0 %v3460_v36  ;;  %v2402_v36 = vld [vmem:[%s4354_s0 + $0x68] sm:$0xf] }
  0xab   :  { %2206 = vmatpush.bf16.msrb.mxu1 %v3468_v37  ;;  %v3294_v37 = vld [vmem:[%s4354_s0 + $0xd0] sm:$0xf0] }
  0xac   :  { %2220 = vmatpush.bf16.msrb.mxu2 %v3476_v38  ;;  %v2395_v38 = vor.u32 %v3293_v33, %v2394_v32 }
  0xad   :  { %2234 = vmatpush.bf16.msrb.mxu3 %v3484_v39  ;;  %v2399_v39 = vor.u32 %v3280_v34, %v2396_v35 }
  0xae   :  { %2193 = vmatpush.bf16.msrb.mxu0 %v3459_v40  ;;  %v2403_v40 = vor.u32 %v3294_v37, %v2402_v36 }
  0xaf   :  { %2207 = vmatpush.bf16.msrb.mxu1 %v3467_v41  ;;  %v1919_v41 = vpop.f32.mrf.mxu0 }
  0xb0   :  { %2221 = vmatpush.bf16.msrb.mxu2 %v3475_v42  ;;  %v1933_v42 = vpop.f32.mrf.mxu1 }
  0xb1   :  { %2235 = vmatpush.bf16.msrb.mxu3 %v3483_v43  ;;  %v1947_v43 = vpop.f32.mrf.mxu2 }
  0xb2   :  { %2194 = vmatpush.bf16.msrb.mxu0 %v3458_v44 }
  0xb3   :  { %2208 = vmatpush.bf16.msrb.mxu1 %v3466_v45  ;;  %v1961_v45 = vpop.f32.mrf.mxu3 }
  0xb4   :  { %2222 = vmatpush.bf16.msrb.mxu2 %v3474_v46 }
  0xb5   :  { %2236 = vmatpush.bf16.msrb.mxu3 %v3482_v47 }
  0xb6   :  { %2195 = vmatpush.bf16.msrb.mxu0 %v3457_v48 }
  0xb7   :  { %2209 = vmatpush.bf16.msrb.mxu1 %v3465_v49  ;;  %v1921_v44 = vpop.f32.mrf.mxu0 }
  0xb8   :  { %2223 = vmatpush.bf16.msrb.mxu2 %v3473_v50  ;;  %v1935_v46 = vpop.f32.mrf.mxu1 }
  0xb9   :  { %2237 = vmatpush.bf16.msrb.mxu3 %v3481_v51  ;;  %v1949_v47 = vpop.f32.mrf.mxu2 }
  0xba   :  { %2196 = vmatpush.bf16.msrb.mxu0 %v3456_v52 }
  0xbb   :  { %2210 = vmatpush.bf16.msrb.mxu1 %v3464_v53  ;;  %v1963_v49 = vpop.f32.mrf.mxu3 }
  0xbc   :  { %2224 = vmatpush.bf16.msrb.mxu2 %v3472_v54 }
  0xbd   :  { %2238 = vmatpush.bf16.msrb.mxu3 %v3480_v55 }
  0xbe   :  { %2197 = vmatpush.bf16.msrb.mxu0 %v3455_v56  ;;  %v3516_v56 = vld [vmem:[%s4355_s2] ss:$0 sm:$0xff] }
  0xbf   :  { %2211 = vmatpush.bf16.msrb.mxu1 %v3463_v57  ;;  %v1975_v48 = vpop.f32.mrf.mxu0  ;;  %v1922_v61 = vadd.f32 %v3516_v56, %v1921_v44 }
  0xc0   :  { %2225 = vmatpush.bf16.msrb.mxu2 %v3471_v58  ;;  %v1989_v50 = vpop.f32.mrf.mxu1 }
  0xc1   :  { %2239 = vmatpush.bf16.msrb.mxu3 %v3479_v4  ;;  %2198 = vmatmul.bf16.vlgmr.msrb.gmra.mxu0 %v2379_v7  ;;  %v1936_v0 = vadd.f32 %v1935_v46, %v1922_v61 }
  0xc2   :  { %2246 = vmatpush.bf16.msra.mxu0 %v3494_v59  ;;  %2212 = vmatmul.bf16.vlgmr.msrb.gmra.mxu1 %v2383_v9  ;;  %v1920_v59 = vadd.f32 %v3516_v56, %v1919_v41 }
  0xc3   :  { %2260 = vmatpush.bf16.msra.mxu1 %v3502_v60  ;;  %2226 = vmatmul.bf16.vlgmr.msrb.gmra.mxu2 %v2387_v8  ;;  %v1950_v5 = vadd.f32 %v1949_v47, %v1936_v0 }
  0xc4   :  { %2274 = vmatpush.bf16.msra.mxu2 %v3510_v1  ;;  %2240 = vmatmul.bf16.vlgmr.msrb.gmra.mxu3 %v2391_v10  ;;  %v1934_v63 = vadd.f32 %v1933_v42, %v1920_v59 }
  0xc5   :  { %v1964_v8 = vadd.f32 %v1963_v49, %v1950_v5 }
  0xc6   :  { %2247 = vmatpush.bf16.msra.mxu0 %v3493_v11  ;;  %v2003_v51 = vpop.f32.mrf.mxu2  ;;  %v1948_v2 = vadd.f32 %v1947_v43, %v1934_v63 }
  0xc7   :  { %2261 = vmatpush.bf16.msra.mxu1 %v3501_v12  ;;  %v1977_v52 = vpop.f32.mrf.mxu0  ;;  %v2017_v53 = vpop.f32.mrf.mxu3 }
  0xc8   :  { %2275 = vmatpush.bf16.msra.mxu2 %v3509_v13  ;;  %v1991_v54 = vpop.f32.mrf.mxu1  ;;  %v1962_v6 = vadd.f32 %v1961_v45, %v1948_v2  ;;  %v1978_v12 = vadd.f32 %v1977_v52, %v1964_v8 }
  0xca   :  { %2248 = vmatpush.bf16.msra.mxu0 %v3492_v14  ;;  %v1976_v10 = vadd.f32 %v1975_v48, %v1962_v6 }
  0xcb   :  { %2262 = vmatpush.bf16.msra.mxu1 %v3500_v15 }
  0xcc   :  { %2276 = vmatpush.bf16.msra.mxu2 %v3508_v16  ;;  %v1990_v14 = vadd.f32 %v1989_v50, %v1976_v10  ;;  %v1992_v16 = vadd.f32 %v1991_v54, %v1978_v12 }
  0xce   :  { %2249 = vmatpush.bf16.msra.mxu0 %v3491_v17  ;;  %v2005_v55 = vpop.f32.mrf.mxu2  ;;  %v2004_v17 = vadd.f32 %v2003_v51, %v1990_v14 }
  0xcf   :  { %2263 = vmatpush.bf16.msra.mxu1 %v3499_v18  ;;  %v2019_v60 = vpop.f32.mrf.mxu3  ;;  %v2006_v18 = vadd.f32 %v2005_v55, %v1992_v16 }
  0xd0   :  { %2277 = vmatpush.bf16.msra.mxu2 %v3507_v19 }
  0xd2   :  { %2250 = vmatpush.bf16.msra.mxu0 %v3490_v20 }
  0xd3   :  { %2264 = vmatpush.bf16.msra.mxu1 %v3498_v21 }
  0xd4   :  { %2278 = vmatpush.bf16.msra.mxu2 %v3506_v22  ;;  %v2018_v22 = vadd.f32 %v2017_v53, %v2004_v17 }
  0xd6   :  { %2251 = vmatpush.bf16.msra.mxu0 %v3489_v23  ;;  %v2020_v23 = vadd.f32 %v2019_v60, %v2006_v18 }
  0xd7   :  { %2265 = vmatpush.bf16.msra.mxu1 %v3497_v24 }
  0xd8   :  { %2279 = vmatpush.bf16.msra.mxu2 %v3505_v25 }
  0xda   :  { %2252 = vmatpush.bf16.msra.mxu0 %v3488_v26 }
  0xdb   :  { %2266 = vmatpush.bf16.msra.mxu1 %v3496_v27 }
  0xdc   :  { %2280 = vmatpush.bf16.msra.mxu2 %v3504_v28 }
  0xde   :  { %2253 = vmatpush.bf16.msra.mxu0 %v3487_v29  ;;  %v2031_v57 = vpop.f32.mrf.mxu0 }
  0xdf   :  { %2267 = vmatpush.bf16.msra.mxu1 %v3495_v30  ;;  %v2045_v58 = vpop.f32.mrf.mxu1  ;;  %v2032_v24 = vadd.f32 %v2031_v57, %v2018_v22 }
  0xe0   :  { %2281 = vmatpush.bf16.msra.mxu2 %v3503_v31 }
  0xe1   :  { %2254 = vmatmul.bf16.vlgmr.msra.gmra.mxu0 %v2395_v38  ;;  %v2046_v28 = vadd.f32 %v2045_v58, %v2032_v24 }
  0xe2   :  { %2268 = vmatmul.bf16.vlgmr.msra.gmra.mxu1 %v2399_v39 }
  0xe3   :  { %2282 = vmatmul.bf16.vlgmr.msra.gmra.mxu2 %v2403_v40 }
  0xe6   :  { %v2059_v62 = vpop.f32.mrf.mxu2  ;;  %v2033_v1 = vpop.f32.mrf.mxu0 }
  0xe7   :  { %v2073_v3 = vpop.f32.mrf.mxu3  ;;  %v2047_v4 = vpop.f32.mrf.mxu1  ;;  %v2034_v25 = vadd.f32 %v2033_v1, %v2020_v23  ;;  %v2060_v31 = vadd.f32 %v2059_v62, %v2046_v28 }
  0xe9   :  { %v2048_v29 = vadd.f32 %v2047_v4, %v2034_v25  ;;  %v2074_v35 = vadd.f32 %v2073_v3, %v2060_v31 }
  0xee   :  { %v2061_v7 = vpop.f32.mrf.mxu2 }
  0xef   :  { %v2075_v13 = vpop.f32.mrf.mxu3  ;;  %v2062_v32 = vadd.f32 %v2061_v7, %v2048_v29 }
  0xf1   :  { %v2076_v36 = vadd.f32 %v2075_v13, %v2062_v32 }
  0xfe   :  { %v2087_v9 = vpop.f32.mrf.mxu0 }
  0xff   :  { %v2101_v11 = vpop.f32.mrf.mxu1  ;;  %v2088_v37 = vadd.f32 %v2087_v9, %v2074_v35 }
 0x101   :  { %v2102_v42 = vadd.f32 %v2101_v11, %v2088_v37 }
 0x106   :  { %v2115_v15 = vpop.f32.mrf.mxu2  ;;  %v2089_v19 = vpop.f32.mrf.mxu0 }
 0x107   :  { %v2129_v20 = vpop.f32.mrf.mxu3  ;;  %v2103_v21 = vpop.f32.mrf.mxu1  ;;  %v2090_v38 = vadd.f32 %v2089_v19, %v2076_v36  ;;  %v2116_v44 = vadd.f32 %v2115_v15, %v2102_v42 }
 0x109   :  { %v2104_v43 = vadd.f32 %v2103_v21, %v2090_v38  ;;  %v2130_v48 = vadd.f32 %v2129_v20, %v2116_v44 }
 0x10e   :  { %v2117_v26 = vpop.f32.mrf.mxu2 }
 0x10f   :  { %v2131_v33 = vpop.f32.mrf.mxu3  ;;  %v2118_v45 = vadd.f32 %v2117_v26, %v2104_v43 }
 0x111   :  { %v2132_v49 = vadd.f32 %v2131_v33, %v2118_v45 }
 0x11e   :  { %v2143_v27 = vpop.f32.mrf.mxu0 }
 0x11f   :  { %v2157_v30 = vpop.f32.mrf.mxu1  ;;  %v2144_v51 = vadd.f32 %v2143_v27, %v2130_v48 }
 0x121   :  { %v2158_v55 = vadd.f32 %v2157_v30, %v2144_v51 }
 0x126   :  { %v2171_v34 = vpop.f32.mrf.mxu2  ;;  %v2145_v39 = vpop.f32.mrf.mxu0 }
 0x127   :  { %v2185_v40 = vpop.f32.mrf.mxu3  ;;  %v2159_v41 = vpop.f32.mrf.mxu1  ;;  %v2146_v52 = vadd.f32 %v2145_v39, %v2132_v49  ;;  %v2172_v57 = vadd.f32 %v2171_v34, %v2158_v55 }
 0x129   :  { %v2160_v56 = vadd.f32 %v2159_v41, %v2146_v52  ;;  %v2186_v62 = vadd.f32 %v2185_v40, %v2172_v57 }
 0x12e   :  { %v2173_v46 = vpop.f32.mrf.mxu2 }
 0x12f   :  { %v2187_v53 = vpop.f32.mrf.mxu3  ;;  %v2174_v58 = vadd.f32 %v2173_v46, %v2160_v56 }
 0x131   :  { %v2188_v63 = vadd.f32 %v2187_v53, %v2174_v58 }
 0x13e   :  { %v2199_v47 = vpop.f32.mrf.mxu0 }
 0x13f   :  { %v2213_v50 = vpop.f32.mrf.mxu1  ;;  %v2200_v0 = vadd.f32 %v2199_v47, %v2186_v62 }
 0x141   :  { %v2214_v4 = vadd.f32 %v2213_v50, %v2200_v0 }
 0x146   :  { %v2227_v54 = vpop.f32.mrf.mxu2  ;;  %v2201_v59 = vpop.f32.mrf.mxu0 }
 0x147   :  { %v2241_v60 = vpop.f32.mrf.mxu3  ;;  %v2215_v61 = vpop.f32.mrf.mxu1  ;;  %v2202_v1 = vadd.f32 %v2201_v59, %v2188_v63  ;;  %v2228_v7 = vadd.f32 %v2227_v54, %v2214_v4 }
 0x149   :  { %v2216_v5 = vadd.f32 %v2215_v61, %v2202_v1  ;;  %v2242_v11 = vadd.f32 %v2241_v60, %v2228_v7 }
 0x14e   :  { %v2229_v2 = vpop.f32.mrf.mxu2 }
 0x14f   :  { %v2230_v8 = vadd.f32 %v2229_v2, %v2216_v5  ;;  %v2243_v9 = vpop.f32.mrf.mxu3 }
 0x151   :  { %v2244_v12 = vadd.f32 %v2243_v9, %v2230_v8 }
 0x15e   :  { %v2255_v3 = vpop.f32.mrf.mxu0 }
 0x15f   :  { %v2269_v6 = vpop.f32.mrf.mxu1  ;;  %v2256_v14 = vadd.f32 %v2255_v3, %v2242_v11 }
 0x161   :  { %v2270_v17 = vadd.f32 %v2269_v6, %v2256_v14 }
 0x166   :  { %v2283_v10 = vpop.f32.mrf.mxu2  ;;  %v2257_v13 = vpop.f32.mrf.mxu0 }
 0x167   :  { %v2258_v15 = vadd.f32 %v2257_v13, %v2244_v12  ;;  %v2271_v16 = vpop.f32.mrf.mxu1  ;;  %v2284_v20 = vadd.f32 %v2283_v10, %v2270_v17 }
 0x169   :  { %v2272_v18 = vadd.f32 %v2271_v16, %v2258_v15 }
 0x16e   :  { %v2285_v19 = vpop.f32.mrf.mxu2 }
 0x16f   :  { %v2286_v21 = vadd.f32 %v2285_v19, %v2272_v18 }
 0x171   :  { %v3514_v22 = vpack.c.bf16 %v2286_v21, %v2284_v20 }
 0x173   :  { %3515 = vst [vmem:[%s4356_s3] sm:$0xff] %v3514_v22  }

// kernel: resnet_forward.37
= control target key start
LH: loop header
LB: loop body
LE: loop exit
PB: predicated region body
PF: predicated region fallthrough
CT: control target
= control target key end

     0   :  { %s1317_s1 = inlined_call_operand.vmem [shape: bf16[256,512], index: 1, kind: input, shape index: {}]   ;;  %s1318_s0 = inlined_call_operand.vmem [shape: bf16[16,256], index: 0, kind: input, shape index: {}]   ;;  %s1319_s2 = inlined_call_operand.vmem [shape: f32[1,512], index: 2, kind: input, shape index: {}]   ;;  %s1320_s3 = inlined_call_operand.vmem [shape: bf16[16,512], index: 3, kind: output, shape index: {}]  }
   0x1   :  { %v666_v0 = vld [vmem:[%s1317_s1 + $0xe0] sm:$0xf]  ;;  %v840_v1 = vld [vmem:[%s1317_s1 + $0xec] sm:$0xf0]  ;;  %v838_v5 = vld [vmem:[%s1317_s1 + $0xe4] sm:$0xf] }
   0x2   :  { %v794_v2 = vld [vmem:[%s1317_s1 + $0x1e0] sm:$0xf]  ;;  %v667_v3 = vor.u32 %v840_v1, %v666_v0  ;;  %v872_v4 = vld [vmem:[%s1317_s1 + $0x1ec] sm:$0xf0]  ;;  %v668_v6 = vld [vmem:[%s1317_s1 + $0xf0] sm:$0xf0] }
   0x3   :  { %v795_v7 = vor.u32 %v872_v4, %v794_v2  ;;  %v671_v8 = vor.u32 %v838_v5, %v668_v6  ;;  %v870_v9 = vld [vmem:[%s1317_s1 + $0x1e4] sm:$0xf]  ;;  %v796_v10 = vld [vmem:[%s1317_s1 + $0x1f0] sm:$0xf0]  ;;  %v650_v11 = vld [vmem:[%s1317_s1 + $0xc0] sm:$0xf] }
   0x4   :  { %420 = vmatpush.bf16.msra.mxu0 %v667_v3  ;;  %v799_v12 = vor.u32 %v870_v9, %v796_v10  ;;  %v836_v13 = vld [vmem:[%s1317_s1 + $0xcc] sm:$0xf0]  ;;  %v778_v14 = vld [vmem:[%s1317_s1 + $0x1c0] sm:$0xf]  ;;  %v834_v18 = vld [vmem:[%s1317_s1 + $0xc4] sm:$0xf] }
   0x5   :  { %v868_v15 = vld [vmem:[%s1317_s1 + $0x1cc] sm:$0xf0]  ;;  %434 = vmatpush.bf16.msra.mxu1 %v795_v7  ;;  %448 = vmatpush.bf16.msra.mxu2 %v671_v8  ;;  %v651_v16 = vor.u32 %v836_v13, %v650_v11  ;;  %v652_v19 = vld [vmem:[%s1317_s1 + $0xd0] sm:$0xf0]  ;;  %v866_v20 = vld [vmem:[%s1317_s1 + $0x1c4] sm:$0xf] }
   0x6   :  { %v779_v17 = vor.u32 %v868_v15, %v778_v14  ;;  %462 = vmatpush.bf16.msra.mxu3 %v799_v12  ;;  %v655_v21 = vor.u32 %v834_v18, %v652_v19  ;;  %v780_v22 = vld [vmem:[%s1317_s1 + $0x1d0] sm:$0xf0]  ;;  %v634_v23 = vld [vmem:[%s1317_s1 + $0xa0] sm:$0xf]  ;;  %v832_v24 = vld [vmem:[%s1317_s1 + $0xac] sm:$0xf0] }
   0x7   :  { %v783_v25 = vor.u32 %v866_v20, %v780_v22  ;;  %v762_v26 = vld [vmem:[%s1317_s1 + $0x1a0] sm:$0xf]  ;;  %v864_v27 = vld [vmem:[%s1317_s1 + $0x1ac] sm:$0xf0]  ;;  %v830_v28 = vld [vmem:[%s1317_s1 + $0xa4] sm:$0xf]  ;;  %v635_v29 = vor.u32 %v832_v24, %v634_v23 }
   0x8   :  { %421 = vmatpush.bf16.msra.mxu0 %v651_v16  ;;  %v636_v30 = vld [vmem:[%s1317_s1 + $0xb0] sm:$0xf0]  ;;  %v862_v31 = vld [vmem:[%s1317_s1 + $0x1a4] sm:$0xf]  ;;  %v763_v33 = vor.u32 %v864_v27, %v762_v26  ;;  %v618_v35 = vld [vmem:[%s1317_s1 + $0x80] sm:$0xf] }
   0x9   :  { %v764_v32 = vld [vmem:[%s1317_s1 + $0x1b0] sm:$0xf0]  ;;  %435 = vmatpush.bf16.msra.mxu1 %v779_v17  ;;  %449 = vmatpush.bf16.msra.mxu2 %v655_v21  ;;  %v639_v34 = vor.u32 %v830_v28, %v636_v30  ;;  %v828_v36 = vld [vmem:[%s1317_s1 + $0x8c] sm:$0xf0]  ;;  %v746_v37 = vld [vmem:[%s1317_s1 + $0x180] sm:$0xf] }
   0xa   :  { %463 = vmatpush.bf16.msra.mxu3 %v783_v25  ;;  %v767_v38 = vor.u32 %v862_v31, %v764_v32  ;;  %v860_v39 = vld [vmem:[%s1317_s1 + $0x18c] sm:$0xf0]  ;;  %v826_v40 = vld [vmem:[%s1317_s1 + $0x84] sm:$0xf]  ;;  %v620_v41 = vld [vmem:[%s1317_s1 + $0x90] sm:$0xf0]  ;;  %v619_v44 = vor.u32 %v828_v36, %v618_v35 }
   0xb   :  { %v858_v42 = vld [vmem:[%s1317_s1 + $0x184] sm:$0xf]  ;;  %v748_v43 = vld [vmem:[%s1317_s1 + $0x190] sm:$0xf0]  ;;  %v747_v45 = vor.u32 %v860_v39, %v746_v37  ;;  %v623_v46 = vor.u32 %v826_v40, %v620_v41  ;;  %v602_v47 = vld [vmem:[%s1317_s1 + $0x60] sm:$0xf] }
   0xc   :  { %422 = vmatpush.bf16.msra.mxu0 %v635_v29  ;;  %v824_v48 = vld [vmem:[%s1317_s1 + $0x6c] sm:$0xf0]  ;;  %v730_v49 = vld [vmem:[%s1317_s1 + $0x160] sm:$0xf]  ;;  %v751_v50 = vor.u32 %v858_v42, %v748_v43  ;;  %v822_v52 = vld [vmem:[%s1317_s1 + $0x64] sm:$0xf] }
   0xd   :  { %436 = vmatpush.bf16.msra.mxu1 %v763_v33  ;;  %450 = vmatpush.bf16.msra.mxu2 %v639_v34  ;;  %v856_v51 = vld [vmem:[%s1317_s1 + $0x16c] sm:$0xf0]  ;;  %v604_v53 = vld [vmem:[%s1317_s1 + $0x70] sm:$0xf0]  ;;  %v854_v54 = vld [vmem:[%s1317_s1 + $0x164] sm:$0xf]  ;;  %v603_v56 = vor.u32 %v824_v48, %v602_v47 }
   0xe   :  { %464 = vmatpush.bf16.msra.mxu3 %v767_v38  ;;  %v732_v55 = vld [vmem:[%s1317_s1 + $0x170] sm:$0xf0]  ;;  %v731_v57 = vor.u32 %v856_v51, %v730_v49  ;;  %v607_v58 = vor.u32 %v822_v52, %v604_v53  ;;  %v586_v59 = vld [vmem:[%s1317_s1 + $0x40] sm:$0xf]  ;;  %v820_v60 = vld [vmem:[%s1317_s1 + $0x4c] sm:$0xf0] }
   0xf   :  { %v714_v61 = vld [vmem:[%s1317_s1 + $0x140] sm:$0xf]  ;;  %v735_v62 = vor.u32 %v854_v54, %v732_v55  ;;  %v852_v63 = vld [vmem:[%s1317_s1 + $0x14c] sm:$0xf0]  ;;  %v818_v0 = vld [vmem:[%s1317_s1 + $0x44] sm:$0xf]  ;;  %v587_v4 = vor.u32 %v820_v60, %v586_v59 }
  0x10   :  { %423 = vmatpush.bf16.msra.mxu0 %v619_v44  ;;  %v588_v1 = vld [vmem:[%s1317_s1 + $0x50] sm:$0xf0]  ;;  %v850_v2 = vld [vmem:[%s1317_s1 + $0x144] sm:$0xf]  ;;  %v715_v5 = vor.u32 %v852_v63, %v714_v61  ;;  %v570_v7 = vld [vmem:[%s1317_s1 + $0x20] sm:$0xf] }
  0x11   :  { %437 = vmatpush.bf16.msra.mxu1 %v747_v45  ;;  %451 = vmatpush.bf16.msra.mxu2 %v623_v46  ;;  %v716_v3 = vld [vmem:[%s1317_s1 + $0x150] sm:$0xf0]  ;;  %v591_v6 = vor.u32 %v818_v0, %v588_v1  ;;  %v816_v8 = vld [vmem:[%s1317_s1 + $0x2c] sm:$0xf0]  ;;  %v698_v9 = vld [vmem:[%s1317_s1 + $0x120] sm:$0xf] }
  0x12   :  { %465 = vmatpush.bf16.msra.mxu3 %v751_v50  ;;  %v719_v10 = vor.u32 %v850_v2, %v716_v3  ;;  %v848_v11 = vld [vmem:[%s1317_s1 + $0x12c] sm:$0xf0]  ;;  %v814_v12 = vld [vmem:[%s1317_s1 + $0x24] sm:$0xf]  ;;  %v572_v13 = vld [vmem:[%s1317_s1 + $0x30] sm:$0xf0]  ;;  %v571_v16 = vor.u32 %v816_v8, %v570_v7 }
  0x13   :  { %v846_v14 = vld [vmem:[%s1317_s1 + $0x124] sm:$0xf]  ;;  %v700_v15 = vld [vmem:[%s1317_s1 + $0x130] sm:$0xf0]  ;;  %v554_v17 = vld [vmem:[%s1317_s1] sm:$0xf]  ;;  %v699_v20 = vor.u32 %v848_v11, %v698_v9  ;;  %v575_v21 = vor.u32 %v814_v12, %v572_v13 }
  0x14   :  { %424 = vmatpush.bf16.msra.mxu0 %v603_v56  ;;  %v812_v18 = vld [vmem:[%s1317_s1 + $0xc] sm:$0xf0]  ;;  %v682_v19 = vld [vmem:[%s1317_s1 + $0x100] sm:$0xf]  ;;  %v810_v23 = vld [vmem:[%s1317_s1 + $0x4] sm:$0xf]  ;;  %v703_v25 = vor.u32 %v846_v14, %v700_v15 }
  0x15   :  { %438 = vmatpush.bf16.msra.mxu1 %v731_v57  ;;  %452 = vmatpush.bf16.msra.mxu2 %v607_v58  ;;  %v844_v22 = vld [vmem:[%s1317_s1 + $0x10c] sm:$0xf0]  ;;  %v556_v24 = vld [vmem:[%s1317_s1 + $0x10] sm:$0xf0]  ;;  %v842_v26 = vld [vmem:[%s1317_s1 + $0x104] sm:$0xf]  ;;  %v555_v32 = vor.u32 %v812_v18, %v554_v17 }
  0x16   :  { %466 = vmatpush.bf16.msra.mxu3 %v735_v62  ;;  %v684_v27 = vld [vmem:[%s1317_s1 + $0x110] sm:$0xf0]  ;;  %v674_v28 = vld [vmem:[%s1317_s1 + $0xe8] sm:$0xf]  ;;  %v841_v29 = vld [vmem:[%s1317_s1 + $0xf4] sm:$0xf0]  ;;  %v683_v36 = vor.u32 %v844_v22, %v682_v19  ;;  %v559_v37 = vor.u32 %v810_v23, %v556_v24 }
  0x17   :  { %v802_v30 = vld [vmem:[%s1317_s1 + $0x1e8] sm:$0xf]  ;;  %v873_v31 = vld [vmem:[%s1317_s1 + $0x1f4] sm:$0xf0]  ;;  %v839_v33 = vld [vmem:[%s1317_s1 + $0xec] sm:$0xf]  ;;  %v687_v41 = vor.u32 %v842_v26, %v684_v27  ;;  %v675_v42 = vor.u32 %v841_v29, %v674_v28 }
  0x18   :  { %425 = vmatpush.bf16.msra.mxu0 %v587_v4  ;;  %v676_v34 = vld [vmem:[%s1317_s1 + $0xf8] sm:$0xf0]  ;;  %v871_v35 = vld [vmem:[%s1317_s1 + $0x1ec] sm:$0xf]  ;;  %v546_v39 = vld [vmem:[%s1318_s0] sm:$0xf]  ;;  %v803_v45 = vor.u32 %v873_v31, %v802_v30 }
  0x19   :  { %439 = vmatpush.bf16.msra.mxu1 %v715_v5  ;;  %453 = vmatpush.bf16.msra.mxu2 %v591_v6  ;;  %v804_v38 = vld [vmem:[%s1317_s1 + $0x1f8] sm:$0xf0]  ;;  %v809_v40 = vld [vmem:[%s1318_s0 + $0x4] sm:$0xf0]  ;;  %v837_v44 = vld [vmem:[%s1317_s1 + $0xd4] sm:$0xf0]  ;;  %v679_v46 = vor.u32 %v839_v33, %v676_v34 }
  0x1a   :  { %467 = vmatpush.bf16.msra.mxu3 %v719_v10  ;;  %v658_v43 = vld [vmem:[%s1317_s1 + $0xc8] sm:$0xf]  ;;  %v808_v48 = vld [vmem:[%s1318_s0 + $0x4] sm:$0xf]  ;;  %v548_v49 = vld [vmem:[%s1318_s0 + $0x8] sm:$0xf0]  ;;  %v807_v50 = vor.u32 %v871_v35, %v804_v38  ;;  %v1140_v54 = vor.u32 %v809_v40, %v546_v39 }
  0x1b   :  { %v786_v47 = vld [vmem:[%s1317_s1 + $0x1c8] sm:$0xf]  ;;  %v869_v51 = vld [vmem:[%s1317_s1 + $0x1d4] sm:$0xf0]  ;;  %v835_v52 = vld [vmem:[%s1317_s1 + $0xcc] sm:$0xf]  ;;  %v1148_v57 = vor.u32 %v808_v48, %v548_v49  ;;  %v659_v58 = vor.u32 %v837_v44, %v658_v43 }
  0x1c   :  { %426 = vmatpush.bf16.msra.mxu0 %v571_v16  ;;  %v660_v53 = vld [vmem:[%s1317_s1 + $0xd8] sm:$0xf0]  ;;  %v867_v55 = vld [vmem:[%s1317_s1 + $0x1cc] sm:$0xf]  ;;  %v787_v59 = vor.u32 %v869_v51, %v786_v47  ;;  %v642_v61 = vld [vmem:[%s1317_s1 + $0xa8] sm:$0xf] }
  0x1d   :  { %440 = vmatpush.bf16.msra.mxu1 %v699_v20  ;;  %454 = vmatpush.bf16.msra.mxu2 %v575_v21  ;;  %v788_v56 = vld [vmem:[%s1317_s1 + $0x1d8] sm:$0xf0]  ;;  %v663_v60 = vor.u32 %v835_v52, %v660_v53  ;;  %v833_v62 = vld [vmem:[%s1317_s1 + $0xb4] sm:$0xf0]  ;;  %v770_v63 = vld [vmem:[%s1317_s1 + $0x1a8] sm:$0xf] }
  0x1e   :  { %468 = vmatpush.bf16.msra.mxu3 %v703_v25  ;;  %v791_v0 = vor.u32 %v867_v55, %v788_v56  ;;  %v865_v1 = vld [vmem:[%s1317_s1 + $0x1b4] sm:$0xf0]  ;;  %v831_v2 = vld [vmem:[%s1317_s1 + $0xac] sm:$0xf]  ;;  %v644_v3 = vld [vmem:[%s1317_s1 + $0xb8] sm:$0xf0]  ;;  %v643_v6 = vor.u32 %v833_v62, %v642_v61 }
  0x1f   :  { %v863_v4 = vld [vmem:[%s1317_s1 + $0x1ac] sm:$0xf]  ;;  %v772_v5 = vld [vmem:[%s1317_s1 + $0x1b8] sm:$0xf0]  ;;  %v771_v7 = vor.u32 %v865_v1, %v770_v63  ;;  %v647_v8 = vor.u32 %v831_v2, %v644_v3  ;;  %v626_v9 = vld [vmem:[%s1317_s1 + $0x88] sm:$0xf] }
  0x20   :  { %427 = vmatpush.bf16.msra.mxu0 %v555_v32  ;;  %v829_v10 = vld [vmem:[%s1317_s1 + $0x94] sm:$0xf0]  ;;  %v754_v11 = vld [vmem:[%s1317_s1 + $0x188] sm:$0xf]  ;;  %v775_v12 = vor.u32 %v863_v4, %v772_v5  ;;  %v827_v14 = vld [vmem:[%s1317_s1 + $0x8c] sm:$0xf] }
  0x21   :  { %441 = vmatpush.bf16.msra.mxu1 %v683_v36  ;;  %455 = vmatpush.bf16.msra.mxu2 %v559_v37  ;;  %v861_v13 = vld [vmem:[%s1317_s1 + $0x194] sm:$0xf0]  ;;  %v628_v15 = vld [vmem:[%s1317_s1 + $0x98] sm:$0xf0]  ;;  %v859_v16 = vld [vmem:[%s1317_s1 + $0x18c] sm:$0xf]  ;;  %v627_v18 = vor.u32 %v829_v10, %v626_v9 }
  0x22   :  { %469 = vmatpush.bf16.msra.mxu3 %v687_v41  ;;  %v756_v17 = vld [vmem:[%s1317_s1 + $0x198] sm:$0xf0]  ;;  %v755_v19 = vor.u32 %v861_v13, %v754_v11  ;;  %v631_v20 = vor.u32 %v827_v14, %v628_v15  ;;  %v610_v21 = vld [vmem:[%s1317_s1 + $0x68] sm:$0xf]  ;;  %v825_v22 = vld [vmem:[%s1317_s1 + $0x74] sm:$0xf0] }
  0x23   :  { %428 = vmatmul.bf16.vlgmr.msra.gmra.mxu0 %v1140_v54  ;;  %v738_v23 = vld [vmem:[%s1317_s1 + $0x168] sm:$0xf]  ;;  %v759_v24 = vor.u32 %v859_v16, %v756_v17  ;;  %v857_v25 = vld [vmem:[%s1317_s1 + $0x174] sm:$0xf0]  ;;  %v823_v26 = vld [vmem:[%s1317_s1 + $0x6c] sm:$0xf]  ;;  %v611_v30 = vor.u32 %v825_v22, %v610_v21 }
  0x24   :  { %476 = vmatpush.bf16.msrb.mxu0 %v675_v42  ;;  %456 = vmatmul.bf16.vlgmr.msra.gmra.mxu2 %v1140_v54  ;;  %v612_v27 = vld [vmem:[%s1317_s1 + $0x78] sm:$0xf0]  ;;  %v855_v28 = vld [vmem:[%s1317_s1 + $0x16c] sm:$0xf]  ;;  %v739_v31 = vor.u32 %v857_v25, %v738_v23  ;;  %v594_v33 = vld [vmem:[%s1317_s1 + $0x48] sm:$0xf] }
  0x25   :  { %490 = vmatpush.bf16.msrb.mxu1 %v803_v45  ;;  %504 = vmatpush.bf16.msrb.mxu2 %v679_v46  ;;  %v740_v29 = vld [vmem:[%s1317_s1 + $0x178] sm:$0xf0]  ;;  %v615_v32 = vor.u32 %v823_v26, %v612_v27  ;;  %v821_v34 = vld [vmem:[%s1317_s1 + $0x54] sm:$0xf0]  ;;  %v722_v35 = vld [vmem:[%s1317_s1 + $0x148] sm:$0xf] }
  0x26   :  { %518 = vmatpush.bf16.msrb.mxu3 %v807_v50  ;;  %442 = vmatmul.bf16.vlgmr.msra.gmra.mxu1 %v1148_v57  ;;  %v743_v36 = vor.u32 %v855_v28, %v740_v29  ;;  %v853_v37 = vld [vmem:[%s1317_s1 + $0x154] sm:$0xf0]  ;;  %v819_v38 = vld [vmem:[%s1317_s1 + $0x4c] sm:$0xf]  ;;  %v596_v39 = vld [vmem:[%s1317_s1 + $0x58] sm:$0xf0]  ;;  %v595_v42 = vor.u32 %v821_v34, %v594_v33 }
  0x27   :  { %470 = vmatmul.bf16.vlgmr.msra.gmra.mxu3 %v1148_v57  ;;  %v851_v40 = vld [vmem:[%s1317_s1 + $0x14c] sm:$0xf]  ;;  %v724_v41 = vld [vmem:[%s1317_s1 + $0x158] sm:$0xf0]  ;;  %v723_v43 = vor.u32 %v853_v37, %v722_v35  ;;  %v599_v44 = vor.u32 %v819_v38, %v596_v39  ;;  %v578_v45 = vld [vmem:[%s1317_s1 + $0x28] sm:$0xf] }
  0x28   :  { %477 = vmatpush.bf16.msrb.mxu0 %v659_v58  ;;  %v817_v46 = vld [vmem:[%s1317_s1 + $0x34] sm:$0xf0]  ;;  %v706_v47 = vld [vmem:[%s1317_s1 + $0x128] sm:$0xf]  ;;  %v727_v48 = vor.u32 %v851_v40, %v724_v41  ;;  %v815_v50 = vld [vmem:[%s1317_s1 + $0x2c] sm:$0xf] }
  0x29   :  { %491 = vmatpush.bf16.msrb.mxu1 %v787_v59  ;;  %505 = vmatpush.bf16.msrb.mxu2 %v663_v60  ;;  %v849_v49 = vld [vmem:[%s1317_s1 + $0x134] sm:$0xf0]  ;;  %v580_v51 = vld [vmem:[%s1317_s1 + $0x38] sm:$0xf0]  ;;  %v847_v52 = vld [vmem:[%s1317_s1 + $0x12c] sm:$0xf]  ;;  %v579_v55 = vor.u32 %v817_v46, %v578_v45 }
  0x2a   :  { %519 = vmatpush.bf16.msrb.mxu3 %v791_v0  ;;  %v708_v53 = vld [vmem:[%s1317_s1 + $0x138] sm:$0xf0]  ;;  %v707_v56 = vor.u32 %v849_v49, %v706_v47  ;;  %v583_v58 = vor.u32 %v815_v50, %v580_v51  ;;  %v562_v59 = vld [vmem:[%s1317_s1 + $0x8] sm:$0xf]  ;;  %v813_v60 = vld [vmem:[%s1317_s1 + $0x14] sm:$0xf0] }
  0x2b   :  { %v690_v61 = vld [vmem:[%s1317_s1 + $0x108] sm:$0xf]  ;;  %v711_v62 = vor.u32 %v847_v52, %v708_v53  ;;  %v845_v63 = vld [vmem:[%s1317_s1 + $0x114] sm:$0xf0]  ;;  %v811_v0 = vld [vmem:[%s1317_s1 + $0xc] sm:$0xf]  ;;  %v563_v4 = vor.u32 %v813_v60, %v562_v59 }
  0x2c   :  { %478 = vmatpush.bf16.msrb.mxu0 %v643_v6  ;;  %v564_v1 = vld [vmem:[%s1317_s1 + $0x18] sm:$0xf0]  ;;  %v843_v2 = vld [vmem:[%s1317_s1 + $0x10c] sm:$0xf]  ;;  %v691_v5 = vor.u32 %v845_v63, %v690_v61 }
  0x2d   :  { %492 = vmatpush.bf16.msrb.mxu1 %v771_v7  ;;  %506 = vmatpush.bf16.msrb.mxu2 %v647_v8  ;;  %v692_v3 = vld [vmem:[%s1317_s1 + $0x118] sm:$0xf0]  ;;  %v567_v6 = vor.u32 %v811_v0, %v564_v1  ;;  %v80_v8 = vld [vmem:[%s1319_s2] sm:$0xf] }
  0x2e   :  { %520 = vmatpush.bf16.msrb.mxu3 %v775_v12  ;;  %v695_v7 = vor.u32 %v843_v2, %v692_v3  ;;  %v82_v9 = vperm.slane %v80_v8, 0  ;;  %v83_v13 = vperm.slane %v80_v8, 1  ;;  %v84_v27 = vperm.slane %v80_v8, 2 }
  0x30   :  { %479 = vmatpush.bf16.msrb.mxu0 %v627_v18 }
  0x31   :  { %493 = vmatpush.bf16.msrb.mxu1 %v755_v19  ;;  %507 = vmatpush.bf16.msrb.mxu2 %v631_v20 }
  0x32   :  { %521 = vmatpush.bf16.msrb.mxu3 %v759_v24 }
  0x34   :  { %480 = vmatpush.bf16.msrb.mxu0 %v611_v30  ;;  %v85_v30 = vperm.slane %v80_v8, 3 }
  0x35   :  { %494 = vmatpush.bf16.msrb.mxu1 %v739_v31  ;;  %508 = vmatpush.bf16.msrb.mxu2 %v615_v32 }
  0x36   :  { %522 = vmatpush.bf16.msrb.mxu3 %v743_v36 }
  0x38   :  { %481 = vmatpush.bf16.msrb.mxu0 %v595_v42 }
  0x39   :  { %495 = vmatpush.bf16.msrb.mxu1 %v723_v43  ;;  %509 = vmatpush.bf16.msrb.mxu2 %v599_v44 }
  0x3a   :  { %523 = vmatpush.bf16.msrb.mxu3 %v727_v48 }
  0x3c   :  { %482 = vmatpush.bf16.msrb.mxu0 %v579_v55 }
  0x3d   :  { %496 = vmatpush.bf16.msrb.mxu1 %v707_v56  ;;  %510 = vmatpush.bf16.msrb.mxu2 %v583_v58 }
  0x3e   :  { %524 = vmatpush.bf16.msrb.mxu3 %v711_v62 }
  0x40   :  { %483 = vmatpush.bf16.msrb.mxu0 %v563_v4 }
  0x41   :  { %497 = vmatpush.bf16.msrb.mxu1 %v691_v5  ;;  %511 = vmatpush.bf16.msrb.mxu2 %v567_v6 }
  0x42   :  { %525 = vmatpush.bf16.msrb.mxu3 %v695_v7 }
  0x43   :  { %484 = vmatmul.bf16.vlgmr.msrb.gmra.mxu0 %v1140_v54 }
  0x44   :  { %498 = vmatmul.bf16.vlgmr.msrb.gmra.mxu1 %v1148_v57  ;;  %512 = vmatmul.bf16.vlgmr.msrb.gmra.mxu2 %v1140_v54 }
  0x45   :  { %526 = vmatmul.bf16.vlgmr.msrb.gmra.mxu3 %v1148_v57 }
  0xa0   :  { %v429_v10 = vpop.f32.mrf.mxu0 }
  0xa1   :  { %v430_v12 = vadd.f32 %v429_v10, %v82_v9 }
  0xa3   :  { %v443_v11 = vpop.f32.mrf.mxu1 }
  0xa4   :  { %v444_v16 = vadd.f32 %v443_v11, %v430_v12 }
  0xa7   :  { %v457_v14 = vpop.f32.mrf.mxu2 }
  0xa8   :  { %v458_v15 = vadd.f32 %v457_v14, %v83_v13  ;;  %v431_v19 = vpop.f32.mrf.mxu0 }
  0xa9   :  { %v432_v21 = vadd.f32 %v431_v19, %v82_v9 }
  0xaa   :  { %v471_v17 = vpop.f32.mrf.mxu3 }
  0xab   :  { %v472_v18 = vadd.f32 %v471_v17, %v458_v15  ;;  %v445_v54 = vpop.f32.mrf.mxu1 }
  0xac   :  { %v446_v23 = vadd.f32 %v445_v54, %v432_v21 }
  0xad   :  { %v532_v20 = vpack.c.bf16 %v472_v18, %v444_v16 }
  0xaf   :  { %536 = vst [vmem:[%s1320_s3] sm:$0xff] %v532_v20  ;;  %v459_v57 = vpop.f32.mrf.mxu2 }
  0xb0   :  { %v460_v22 = vadd.f32 %v459_v57, %v83_v13 }
  0xb2   :  { %v473_v24 = vpop.f32.mrf.mxu3 }
  0xb3   :  { %v474_v25 = vadd.f32 %v473_v24, %v460_v22 }
  0xb5   :  { %v534_v26 = vpack.c.bf16 %v474_v25, %v446_v23 }
  0xb7   :  { %538 = vst [vmem:[%s1320_s3 + $0x10] sm:$0xff] %v534_v26 }
  0xc0   :  { %v485_v28 = vpop.f32.mrf.mxu0 }
  0xc1   :  { %v486_v29 = vadd.f32 %v485_v28, %v84_v27  ;;  %v499_v31 = vpop.f32.mrf.mxu1 }
  0xc3   :  { %v500_v33 = vadd.f32 %v499_v31, %v486_v29 }
  0xc7   :  { %v513_v32 = vpop.f32.mrf.mxu2 }
  0xc8   :  { %v514_v34 = vadd.f32 %v513_v32, %v85_v30  ;;  %v527_v35 = vpop.f32.mrf.mxu3  ;;  %v487_v37 = vpop.f32.mrf.mxu0 }
  0xc9   :  { %v488_v39 = vadd.f32 %v487_v37, %v84_v27  ;;  %v501_v42 = vpop.f32.mrf.mxu1 }
  0xca   :  { %v528_v36 = vadd.f32 %v527_v35, %v514_v34 }
  0xcb   :  { %v502_v44 = vadd.f32 %v501_v42, %v488_v39 }
  0xcc   :  { %v533_v38 = vpack.c.bf16 %v528_v36, %v500_v33 }
  0xce   :  { %537 = vst [vmem:[%s1320_s3 + $0x8] sm:$0xff] %v533_v38 }
  0xcf   :  { %v515_v40 = vpop.f32.mrf.mxu2 }
  0xd0   :  { %v516_v41 = vadd.f32 %v515_v40, %v85_v30  ;;  %v529_v43 = vpop.f32.mrf.mxu3 }
  0xd2   :  { %v530_v45 = vadd.f32 %v529_v43, %v516_v41 }
  0xd4   :  { %v535_v46 = vpack.c.bf16 %v530_v45, %v502_v44 }
  0xd6   :  { %539 = vst [vmem:[%s1320_s3 + $0x18] sm:$0xff] %v535_v46 }

// kernel: resnet_forward.40
= control target key start
LH: loop header
LB: loop body
LE: loop exit
PB: predicated region body
PF: predicated region fallthrough
CT: control target
= control target key end

     0   :  { %s743_s1 = inlined_call_operand.vmem [shape: bf16[128,512], index: 1, kind: input, shape index: {}]   ;;  %s744_s0 = inlined_call_operand.vmem [shape: bf16[16,128], index: 0, kind: input, shape index: {}]   ;;  %s745_s2 = inlined_call_operand.vmem [shape: f32[1,512], index: 2, kind: input, shape index: {}]   ;;  %s746_s3 = inlined_call_operand.vmem [shape: bf16[16,512], index: 3, kind: input, shape index: {}]   ;;  %s747_s4 = inlined_call_operand.vmem [shape: bf16[16,512], index: 4, kind: output, shape index: {}]  }
   0x1   :  { %v449_v0 = vld [vmem:[%s743_s1 + $0xe0] sm:$0xf]  ;;  %v494_v1 = vld [vmem:[%s743_s1 + $0xec] sm:$0xf0]  ;;  %v492_v2 = vld [vmem:[%s743_s1 + $0xe4] sm:$0xf] }
   0x2   :  { %v450_v3 = vor.u32 %v494_v1, %v449_v0  ;;  %v451_v4 = vld [vmem:[%s743_s1 + $0xf0] sm:$0xf0]  ;;  %v457_v5 = vld [vmem:[%s743_s1 + $0xe8] sm:$0xf]  ;;  %v495_v6 = vld [vmem:[%s743_s1 + $0xf4] sm:$0xf0] }
   0x3   :  { %v454_v7 = vor.u32 %v492_v2, %v451_v4  ;;  %v458_v8 = vor.u32 %v495_v6, %v457_v5  ;;  %v493_v9 = vld [vmem:[%s743_s1 + $0xec] sm:$0xf]  ;;  %v459_v10 = vld [vmem:[%s743_s1 + $0xf8] sm:$0xf0]  ;;  %v433_v11 = vld [vmem:[%s743_s1 + $0xc0] sm:$0xf] }
   0x4   :  { %227 = vmatpush.bf16.msra.mxu0 %v450_v3  ;;  %v462_v12 = vor.u32 %v493_v9, %v459_v10  ;;  %v490_v13 = vld [vmem:[%s743_s1 + $0xcc] sm:$0xf0]  ;;  %v488_v14 = vld [vmem:[%s743_s1 + $0xc4] sm:$0xf]  ;;  %v435_v15 = vld [vmem:[%s743_s1 + $0xd0] sm:$0xf0] }
   0x5   :  { %241 = vmatpush.bf16.msra.mxu1 %v454_v7  ;;  %255 = vmatpush.bf16.msra.mxu2 %v458_v8  ;;  %v434_v16 = vor.u32 %v490_v13, %v433_v11  ;;  %v438_v17 = vor.u32 %v488_v14, %v435_v15  ;;  %v441_v18 = vld [vmem:[%s743_s1 + $0xc8] sm:$0xf]  ;;  %v491_v19 = vld [vmem:[%s743_s1 + $0xd4] sm:$0xf0]  ;;  %v489_v20 = vld [vmem:[%s743_s1 + $0xcc] sm:$0xf] }
   0x6   :  { %269 = vmatpush.bf16.msra.mxu3 %v462_v12  ;;  %v442_v21 = vor.u32 %v491_v19, %v441_v18  ;;  %v443_v22 = vld [vmem:[%s743_s1 + $0xd8] sm:$0xf0]  ;;  %v417_v23 = vld [vmem:[%s743_s1 + $0xa0] sm:$0xf]  ;;  %v486_v24 = vld [vmem:[%s743_s1 + $0xac] sm:$0xf0] }
   0x7   :  { %v446_v25 = vor.u32 %v489_v20, %v443_v22  ;;  %v484_v26 = vld [vmem:[%s743_s1 + $0xa4] sm:$0xf]  ;;  %v419_v27 = vld [vmem:[%s743_s1 + $0xb0] sm:$0xf0]  ;;  %v425_v28 = vld [vmem:[%s743_s1 + $0xa8] sm:$0xf]  ;;  %v418_v29 = vor.u32 %v486_v24, %v417_v23 }
   0x8   :  { %228 = vmatpush.bf16.msra.mxu0 %v434_v16  ;;  %v487_v30 = vld [vmem:[%s743_s1 + $0xb4] sm:$0xf0]  ;;  %v485_v31 = vld [vmem:[%s743_s1 + $0xac] sm:$0xf]  ;;  %v427_v32 = vld [vmem:[%s743_s1 + $0xb8] sm:$0xf0]  ;;  %v422_v33 = vor.u32 %v484_v26, %v419_v27 }
   0x9   :  { %242 = vmatpush.bf16.msra.mxu1 %v438_v17  ;;  %256 = vmatpush.bf16.msra.mxu2 %v442_v21  ;;  %v426_v34 = vor.u32 %v487_v30, %v425_v28  ;;  %v401_v35 = vld [vmem:[%s743_s1 + $0x80] sm:$0xf]  ;;  %v482_v36 = vld [vmem:[%s743_s1 + $0x8c] sm:$0xf0]  ;;  %v480_v37 = vld [vmem:[%s743_s1 + $0x84] sm:$0xf]  ;;  %v430_v38 = vor.u32 %v485_v31, %v427_v32 }
   0xa   :  { %270 = vmatpush.bf16.msra.mxu3 %v446_v25  ;;  %v403_v39 = vld [vmem:[%s743_s1 + $0x90] sm:$0xf0]  ;;  %v409_v40 = vld [vmem:[%s743_s1 + $0x88] sm:$0xf]  ;;  %v483_v41 = vld [vmem:[%s743_s1 + $0x94] sm:$0xf0]  ;;  %v402_v44 = vor.u32 %v482_v36, %v401_v35 }
   0xb   :  { %v481_v42 = vld [vmem:[%s743_s1 + $0x8c] sm:$0xf]  ;;  %v411_v43 = vld [vmem:[%s743_s1 + $0x98] sm:$0xf0]  ;;  %v406_v45 = vor.u32 %v480_v37, %v403_v39  ;;  %v410_v46 = vor.u32 %v483_v41, %v409_v40  ;;  %v385_v47 = vld [vmem:[%s743_s1 + $0x60] sm:$0xf] }
   0xc   :  { %229 = vmatpush.bf16.msra.mxu0 %v418_v29  ;;  %v478_v48 = vld [vmem:[%s743_s1 + $0x6c] sm:$0xf0]  ;;  %v476_v49 = vld [vmem:[%s743_s1 + $0x64] sm:$0xf]  ;;  %v414_v50 = vor.u32 %v481_v42, %v411_v43  ;;  %v387_v51 = vld [vmem:[%s743_s1 + $0x70] sm:$0xf0] }
   0xd   :  { %243 = vmatpush.bf16.msra.mxu1 %v422_v33  ;;  %257 = vmatpush.bf16.msra.mxu2 %v426_v34  ;;  %v393_v52 = vld [vmem:[%s743_s1 + $0x68] sm:$0xf]  ;;  %v479_v53 = vld [vmem:[%s743_s1 + $0x74] sm:$0xf0]  ;;  %v477_v54 = vld [vmem:[%s743_s1 + $0x6c] sm:$0xf]  ;;  %v386_v56 = vor.u32 %v478_v48, %v385_v47  ;;  %v390_v57 = vor.u32 %v476_v49, %v387_v51 }
   0xe   :  { %271 = vmatpush.bf16.msra.mxu3 %v430_v38  ;;  %v395_v55 = vld [vmem:[%s743_s1 + $0x78] sm:$0xf0]  ;;  %v394_v58 = vor.u32 %v479_v53, %v393_v52  ;;  %v369_v59 = vld [vmem:[%s743_s1 + $0x40] sm:$0xf]  ;;  %v474_v60 = vld [vmem:[%s743_s1 + $0x4c] sm:$0xf0] }
   0xf   :  { %v472_v61 = vld [vmem:[%s743_s1 + $0x44] sm:$0xf]  ;;  %v398_v62 = vor.u32 %v477_v54, %v395_v55  ;;  %v371_v63 = vld [vmem:[%s743_s1 + $0x50] sm:$0xf0]  ;;  %v377_v0 = vld [vmem:[%s743_s1 + $0x48] sm:$0xf]  ;;  %v370_v4 = vor.u32 %v474_v60, %v369_v59 }
  0x10   :  { %230 = vmatpush.bf16.msra.mxu0 %v402_v44  ;;  %v475_v1 = vld [vmem:[%s743_s1 + $0x54] sm:$0xf0]  ;;  %v473_v2 = vld [vmem:[%s743_s1 + $0x4c] sm:$0xf]  ;;  %v379_v3 = vld [vmem:[%s743_s1 + $0x58] sm:$0xf0]  ;;  %v374_v5 = vor.u32 %v472_v61, %v371_v63 }
  0x11   :  { %244 = vmatpush.bf16.msra.mxu1 %v406_v45  ;;  %258 = vmatpush.bf16.msra.mxu2 %v410_v46  ;;  %v378_v6 = vor.u32 %v475_v1, %v377_v0  ;;  %v353_v7 = vld [vmem:[%s743_s1 + $0x20] sm:$0xf]  ;;  %v470_v8 = vld [vmem:[%s743_s1 + $0x2c] sm:$0xf0]  ;;  %v468_v9 = vld [vmem:[%s743_s1 + $0x24] sm:$0xf]  ;;  %v382_v10 = vor.u32 %v473_v2, %v379_v3 }
  0x12   :  { %272 = vmatpush.bf16.msra.mxu3 %v414_v50  ;;  %v355_v11 = vld [vmem:[%s743_s1 + $0x30] sm:$0xf0]  ;;  %v361_v12 = vld [vmem:[%s743_s1 + $0x28] sm:$0xf]  ;;  %v471_v13 = vld [vmem:[%s743_s1 + $0x34] sm:$0xf0]  ;;  %v354_v16 = vor.u32 %v470_v8, %v353_v7 }
  0x13   :  { %v469_v14 = vld [vmem:[%s743_s1 + $0x2c] sm:$0xf]  ;;  %v363_v15 = vld [vmem:[%s743_s1 + $0x38] sm:$0xf0]  ;;  %v358_v17 = vor.u32 %v468_v9, %v355_v11  ;;  %v362_v18 = vor.u32 %v471_v13, %v361_v12  ;;  %v337_v19 = vld [vmem:[%s743_s1] sm:$0xf] }
  0x14   :  { %231 = vmatpush.bf16.msra.mxu0 %v386_v56  ;;  %v466_v20 = vld [vmem:[%s743_s1 + $0xc] sm:$0xf0]  ;;  %v464_v21 = vld [vmem:[%s743_s1 + $0x4] sm:$0xf]  ;;  %v366_v22 = vor.u32 %v469_v14, %v363_v15  ;;  %v339_v23 = vld [vmem:[%s743_s1 + $0x10] sm:$0xf0] }
  0x15   :  { %245 = vmatpush.bf16.msra.mxu1 %v390_v57  ;;  %259 = vmatpush.bf16.msra.mxu2 %v394_v58  ;;  %v345_v24 = vld [vmem:[%s743_s1 + $0x8] sm:$0xf]  ;;  %v467_v25 = vld [vmem:[%s743_s1 + $0x14] sm:$0xf0]  ;;  %v465_v26 = vld [vmem:[%s743_s1 + $0xc] sm:$0xf]  ;;  %v338_v28 = vor.u32 %v466_v20, %v337_v19  ;;  %v342_v29 = vor.u32 %v464_v21, %v339_v23 }
  0x16   :  { %273 = vmatpush.bf16.msra.mxu3 %v398_v62  ;;  %v347_v27 = vld [vmem:[%s743_s1 + $0x18] sm:$0xf0]  ;;  %v346_v30 = vor.u32 %v467_v25, %v345_v24  ;;  %v463_v32 = vld [vmem:[%s744_s0] sm:$0xff]  ;;  %v284_v44 = vld [vmem:[%s746_s3 + $0x8] sm:$0xff] }
  0x17   :  { %v350_v31 = vor.u32 %v465_v26, %v347_v27  ;;  %v51_v33 = vld [vmem:[%s745_s2] sm:$0xf]  ;;  %v285_v47 = vld [vmem:[%s746_s3 + $0x10] sm:$0xff]  ;;  %v289_v51 = vunpack.c.l.bf16 %v284_v44  ;;  %v290_v54 = vunpack.c.h.bf16 %v284_v44 }
  0x18   :  { %232 = vmatpush.bf16.msra.mxu0 %v370_v4  ;;  %v283_v34 = vld [vmem:[%s746_s3] sm:$0xff]  ;;  %v53_v35 = vperm.slane %v51_v33, 0  ;;  %v54_v36 = vperm.slane %v51_v33, 1  ;;  %v55_v46 = vperm.slane %v51_v33, 2  ;;  %v56_v49 = vperm.slane %v51_v33, 3 }
  0x19   :  { %246 = vmatpush.bf16.msra.mxu1 %v374_v5  ;;  %260 = vmatpush.bf16.msra.mxu2 %v378_v6  ;;  %v287_v37 = vunpack.c.l.bf16 %v283_v34  ;;  %v288_v39 = vunpack.c.h.bf16 %v283_v34  ;;  %v291_v55 = vunpack.c.l.bf16 %v285_v47  ;;  %v292_v60 = vunpack.c.h.bf16 %v285_v47  ;;  %v286_v5 = vld [vmem:[%s746_s3 + $0x18] sm:$0xff] }
  0x1a   :  { %274 = vmatpush.bf16.msra.mxu3 %v382_v10  ;;  %v293_v12 = vunpack.c.l.bf16 %v286_v5 }
  0x1c   :  { %233 = vmatpush.bf16.msra.mxu0 %v354_v16  ;;  %v294_v16 = vunpack.c.h.bf16 %v286_v5 }
  0x1d   :  { %247 = vmatpush.bf16.msra.mxu1 %v358_v17  ;;  %261 = vmatpush.bf16.msra.mxu2 %v362_v18 }
  0x1e   :  { %275 = vmatpush.bf16.msra.mxu3 %v366_v22 }
  0x20   :  { %234 = vmatpush.bf16.msra.mxu0 %v338_v28 }
  0x21   :  { %248 = vmatpush.bf16.msra.mxu1 %v342_v29  ;;  %262 = vmatpush.bf16.msra.mxu2 %v346_v30 }
  0x22   :  { %276 = vmatpush.bf16.msra.mxu3 %v350_v31 }
  0x23   :  { %235 = vmatmul.bf16.vlgmr.msra.gmra.mxu0 %v463_v32 }
  0x24   :  { %249 = vmatmul.bf16.vlgmr.msra.gmra.mxu1 %v463_v32  ;;  %263 = vmatmul.bf16.vlgmr.msra.gmra.mxu2 %v463_v32 }
  0x25   :  { %277 = vmatmul.bf16.vlgmr.msra.gmra.mxu3 %v463_v32 }
  0xa0   :  { %v236_v38 = vpop.f32.mrf.mxu0 }
  0xa1   :  { %v237_v40 = vadd.f32 %v236_v38, %v53_v35  ;;  %v250_v41 = vpop.f32.mrf.mxu1 }
  0xa2   :  { %v251_v42 = vadd.f32 %v250_v41, %v54_v36 }
  0xa3   :  { %v295_v43 = vadd.f32 %v287_v37, %v237_v40 }
  0xa4   :  { %v296_v45 = vadd.f32 %v288_v39, %v251_v42 }
  0xa5   :  { %v303_v48 = vmul.f32 0.1, %v295_v43 }
  0xa6   :  { %v304_v50 = vmul.f32 0.1, %v296_v45 }
  0xa7   :  { %v311_v52 = vmax.f32 %v295_v43, %v303_v48  ;;  %v264_v53 = vpop.f32.mrf.mxu2 }
  0xa8   :  { %v312_v56 = vmax.f32 %v296_v45, %v304_v50  ;;  %v265_v57 = vadd.f32 %v264_v53, %v55_v46  ;;  %v278_v58 = vpop.f32.mrf.mxu3  ;;  %v238_v59 = vpop.f32.mrf.mxu0 }
  0xa9   :  { %v279_v61 = vadd.f32 %v278_v58, %v56_v49  ;;  %v239_v62 = vadd.f32 %v238_v59, %v53_v35  ;;  %v252_v63 = vpop.f32.mrf.mxu1 }
  0xaa   :  { %v319_v0 = vpack.c.bf16 %v312_v56, %v311_v52  ;;  %v297_v1 = vadd.f32 %v289_v51, %v265_v57  ;;  %v253_v2 = vadd.f32 %v252_v63, %v54_v36 }
  0xab   :  { %v298_v3 = vadd.f32 %v290_v54, %v279_v61  ;;  %v299_v4 = vadd.f32 %v291_v55, %v239_v62 }
  0xac   :  { %323 = vst [vmem:[%s747_s4] sm:$0xff] %v319_v0  ;;  %v305_v6 = vmul.f32 0.1, %v297_v1  ;;  %v300_v7 = vadd.f32 %v292_v60, %v253_v2 }
  0xad   :  { %v306_v8 = vmul.f32 0.1, %v298_v3  ;;  %v307_v9 = vmul.f32 0.1, %v299_v4 }
  0xae   :  { %v313_v10 = vmax.f32 %v297_v1, %v305_v6  ;;  %v308_v11 = vmul.f32 0.1, %v300_v7 }
  0xaf   :  { %v314_v13 = vmax.f32 %v298_v3, %v306_v8  ;;  %v315_v14 = vmax.f32 %v299_v4, %v307_v9  ;;  %v266_v15 = vpop.f32.mrf.mxu2 }
  0xb0   :  { %v316_v17 = vmax.f32 %v300_v7, %v308_v11  ;;  %v267_v18 = vadd.f32 %v266_v15, %v55_v46  ;;  %v280_v19 = vpop.f32.mrf.mxu3 }
  0xb1   :  { %v320_v20 = vpack.c.bf16 %v314_v13, %v313_v10  ;;  %v281_v21 = vadd.f32 %v280_v19, %v56_v49 }
  0xb2   :  { %v321_v22 = vpack.c.bf16 %v316_v17, %v315_v14  ;;  %v301_v23 = vadd.f32 %v293_v12, %v267_v18 }
  0xb3   :  { %324 = vst [vmem:[%s747_s4 + $0x8] sm:$0xff] %v320_v20  ;;  %v302_v24 = vadd.f32 %v294_v16, %v281_v21 }
  0xb4   :  { %325 = vst [vmem:[%s747_s4 + $0x10] sm:$0xff] %v321_v22  ;;  %v309_v25 = vmul.f32 0.1, %v301_v23 }
  0xb5   :  { %v310_v26 = vmul.f32 0.1, %v302_v24 }
  0xb6   :  { %v317_v27 = vmax.f32 %v301_v23, %v309_v25 }
  0xb7   :  { %v318_v28 = vmax.f32 %v302_v24, %v310_v26 }
  0xb9   :  { %v322_v29 = vpack.c.bf16 %v318_v28, %v317_v27 }
  0xbb   :  { %326 = vst [vmem:[%s747_s4 + $0x18] sm:$0xff] %v322_v29 }

// kernel: resnet_forward.41
= control target key start
LH: loop header
LB: loop body
LE: loop exit
PB: predicated region body
PF: predicated region fallthrough
CT: control target
= control target key end

     0   :  { %s698_s1 = inlined_call_operand.vmem [shape: bf16[512,128], index: 1, kind: input, shape index: {}]   ;;  %s699_s2 = inlined_call_operand.vmem [shape: f32[1,128], index: 2, kind: input, shape index: {}]   ;;  %s700_s0 = inlined_call_operand.vmem [shape: bf16[16,512], index: 0, kind: input, shape index: {}]   ;;  %s701_s3 = inlined_call_operand.vmem [shape: bf16[16,128], index: 3, kind: output, shape index: {}]  }
   0x1   :  { %v521_v0 = vld [vmem:[%s698_s1 + $0x38] sm:$0xff]  ;;  %v520_v4 = vld [vmem:[%s698_s1 + $0x30] sm:$0xff]  ;;  %v519_v8 = vld [vmem:[%s698_s1 + $0x28] sm:$0xff] }
   0x2   :  { %v529_v1 = vld [vmem:[%s698_s1 + $0x78] sm:$0xff]  ;;  %298 = vmatpush.bf16.msra.mxu0 %v521_v0  ;;  %v528_v5 = vld [vmem:[%s698_s1 + $0x70] sm:$0xff]  ;;  %v527_v9 = vld [vmem:[%s698_s1 + $0x68] sm:$0xff] }
   0x3   :  { %v537_v2 = vld [vmem:[%s698_s1 + $0xb8] sm:$0xff]  ;;  %312 = vmatpush.bf16.msra.mxu1 %v529_v1  ;;  %v536_v6 = vld [vmem:[%s698_s1 + $0xb0] sm:$0xff]  ;;  %v535_v10 = vld [vmem:[%s698_s1 + $0xa8] sm:$0xff] }
   0x4   :  { %v545_v3 = vld [vmem:[%s698_s1 + $0xf8] sm:$0xff]  ;;  %326 = vmatpush.bf16.msra.mxu2 %v537_v2  ;;  %v544_v7 = vld [vmem:[%s698_s1 + $0xf0] sm:$0xff]  ;;  %v543_v11 = vld [vmem:[%s698_s1 + $0xe8] sm:$0xff] }
   0x5   :  { %340 = vmatpush.bf16.msra.mxu3 %v545_v3  ;;  %v518_v12 = vld [vmem:[%s698_s1 + $0x20] sm:$0xff]  ;;  %v517_v16 = vld [vmem:[%s698_s1 + $0x18] sm:$0xff]  ;;  %v516_v20 = vld [vmem:[%s698_s1 + $0x10] sm:$0xff] }
   0x6   :  { %299 = vmatpush.bf16.msra.mxu0 %v520_v4  ;;  %v526_v13 = vld [vmem:[%s698_s1 + $0x60] sm:$0xff]  ;;  %v525_v17 = vld [vmem:[%s698_s1 + $0x58] sm:$0xff]  ;;  %v524_v21 = vld [vmem:[%s698_s1 + $0x50] sm:$0xff] }
   0x7   :  { %313 = vmatpush.bf16.msra.mxu1 %v528_v5  ;;  %v534_v14 = vld [vmem:[%s698_s1 + $0xa0] sm:$0xff]  ;;  %v533_v18 = vld [vmem:[%s698_s1 + $0x98] sm:$0xff]  ;;  %v532_v22 = vld [vmem:[%s698_s1 + $0x90] sm:$0xff] }
   0x8   :  { %327 = vmatpush.bf16.msra.mxu2 %v536_v6  ;;  %v542_v15 = vld [vmem:[%s698_s1 + $0xe0] sm:$0xff]  ;;  %v541_v19 = vld [vmem:[%s698_s1 + $0xd8] sm:$0xff]  ;;  %v540_v23 = vld [vmem:[%s698_s1 + $0xd0] sm:$0xff] }
   0x9   :  { %341 = vmatpush.bf16.msra.mxu3 %v544_v7  ;;  %v515_v24 = vld [vmem:[%s698_s1 + $0x8] sm:$0xff]  ;;  %v514_v28 = vld [vmem:[%s698_s1] sm:$0xff]  ;;  %v512_v33 = vld [vmem:[%s700_s0 + $0xc] sm:$0xf0] }
   0xa   :  { %300 = vmatpush.bf16.msra.mxu0 %v519_v8  ;;  %v523_v25 = vld [vmem:[%s698_s1 + $0x48] sm:$0xff]  ;;  %v522_v29 = vld [vmem:[%s698_s1 + $0x40] sm:$0xff]  ;;  %v370_v35 = vld [vmem:[%s700_s0 + $0x10] sm:$0xf0] }
   0xb   :  { %314 = vmatpush.bf16.msra.mxu1 %v527_v9  ;;  %v531_v26 = vld [vmem:[%s698_s1 + $0x88] sm:$0xff]  ;;  %v530_v30 = vld [vmem:[%s698_s1 + $0x80] sm:$0xff]  ;;  %v513_v37 = vld [vmem:[%s700_s0 + $0x14] sm:$0xf0] }
   0xc   :  { %328 = vmatpush.bf16.msra.mxu2 %v535_v10  ;;  %v539_v27 = vld [vmem:[%s698_s1 + $0xc8] sm:$0xff]  ;;  %v538_v31 = vld [vmem:[%s698_s1 + $0xc0] sm:$0xff]  ;;  %v378_v39 = vld [vmem:[%s700_s0 + $0x18] sm:$0xf0] }
   0xd   :  { %342 = vmatpush.bf16.msra.mxu3 %v543_v11  ;;  %v368_v32 = vld [vmem:[%s700_s0] sm:$0xf]  ;;  %v510_v34 = vld [vmem:[%s700_s0 + $0x4] sm:$0xf]  ;;  %v376_v36 = vld [vmem:[%s700_s0 + $0x8] sm:$0xf] }
   0xe   :  { %301 = vmatpush.bf16.msra.mxu0 %v518_v12  ;;  %v511_v38 = vld [vmem:[%s700_s0 + $0xc] sm:$0xf]  ;;  %v369_v40 = vor.u32 %v512_v33, %v368_v32  ;;  %v373_v41 = vor.u32 %v510_v34, %v370_v35  ;;  %v377_v42 = vor.u32 %v513_v37, %v376_v36  ;;  %v551_v44 = vld [vmem:[%s699_s2] ss:$0 sm:$0xff] }
   0xf   :  { %315 = vmatpush.bf16.msra.mxu1 %v526_v13  ;;  %v381_v43 = vor.u32 %v511_v38, %v378_v39 }
  0x10   :  { %329 = vmatpush.bf16.msra.mxu2 %v534_v14 }
  0x11   :  { %343 = vmatpush.bf16.msra.mxu3 %v542_v15 }
  0x12   :  { %302 = vmatpush.bf16.msra.mxu0 %v517_v16 }
  0x13   :  { %316 = vmatpush.bf16.msra.mxu1 %v525_v17 }
  0x14   :  { %330 = vmatpush.bf16.msra.mxu2 %v533_v18 }
  0x15   :  { %344 = vmatpush.bf16.msra.mxu3 %v541_v19 }
  0x16   :  { %303 = vmatpush.bf16.msra.mxu0 %v516_v20 }
  0x17   :  { %317 = vmatpush.bf16.msra.mxu1 %v524_v21 }
  0x18   :  { %331 = vmatpush.bf16.msra.mxu2 %v532_v22 }
  0x19   :  { %345 = vmatpush.bf16.msra.mxu3 %v540_v23 }
  0x1a   :  { %304 = vmatpush.bf16.msra.mxu0 %v515_v24 }
  0x1b   :  { %318 = vmatpush.bf16.msra.mxu1 %v523_v25 }
  0x1c   :  { %332 = vmatpush.bf16.msra.mxu2 %v531_v26 }
  0x1d   :  { %346 = vmatpush.bf16.msra.mxu3 %v539_v27 }
  0x1e   :  { %305 = vmatpush.bf16.msra.mxu0 %v514_v28 }
  0x1f   :  { %319 = vmatpush.bf16.msra.mxu1 %v522_v29 }
  0x20   :  { %333 = vmatpush.bf16.msra.mxu2 %v530_v30 }
  0x21   :  { %347 = vmatpush.bf16.msra.mxu3 %v538_v31  ;;  %306 = vmatmul.bf16.vlgmr.msra.gmra.mxu0 %v369_v40 }
  0x22   :  { %320 = vmatmul.bf16.vlgmr.msra.gmra.mxu1 %v373_v41 }
  0x23   :  { %334 = vmatmul.bf16.vlgmr.msra.gmra.mxu2 %v377_v42 }
  0x24   :  { %348 = vmatmul.bf16.vlgmr.msra.gmra.mxu3 %v381_v43 }
  0x9e   :  { %v307_v45 = vpop.f32.mrf.mxu0 }
  0x9f   :  { %v308_v46 = vadd.f32 %v551_v44, %v307_v45  ;;  %v321_v47 = vpop.f32.mrf.mxu1 }
  0xa1   :  { %v322_v48 = vadd.f32 %v321_v47, %v308_v46 }
  0xa6   :  { %v335_v49 = vpop.f32.mrf.mxu2  ;;  %v309_v51 = vpop.f32.mrf.mxu0 }
  0xa7   :  { %v349_v50 = vpop.f32.mrf.mxu3  ;;  %v336_v52 = vadd.f32 %v335_v49, %v322_v48  ;;  %v310_v53 = vadd.f32 %v551_v44, %v309_v51  ;;  %v323_v54 = vpop.f32.mrf.mxu1 }
  0xa9   :  { %v350_v55 = vadd.f32 %v349_v50, %v336_v52  ;;  %v324_v56 = vadd.f32 %v323_v54, %v310_v53 }
  0xab   :  { %v354_v60 = vmul.f32 0.1, %v350_v55 }
  0xad   :  { %v356_v63 = vmax.f32 %v350_v55, %v354_v60 }
  0xae   :  { %v337_v57 = vpop.f32.mrf.mxu2 }
  0xaf   :  { %v338_v58 = vadd.f32 %v337_v57, %v324_v56  ;;  %v351_v59 = vpop.f32.mrf.mxu3 }
  0xb1   :  { %v352_v61 = vadd.f32 %v351_v59, %v338_v58 }
  0xb3   :  { %v355_v62 = vmul.f32 0.1, %v352_v61 }
  0xb5   :  { %v357_v0 = vmax.f32 %v352_v61, %v355_v62 }
  0xb7   :  { %v549_v1 = vpack.c.bf16 %v357_v0, %v356_v63 }
  0xb9   :  { %550 = vst [vmem:[%s701_s3] sm:$0xff] %v549_v1  }

</bundles_post_ra>
